<compile_context>
chip_gen: v7x
topology: tpu7x:2x2x1
jax: 0.10.0
libtpu: 0.0.40
codegen_flags: <defaults>
</compile_context>

<pallas_src>
import jax
import jax.numpy as jnp
import numpy as np
from jax.experimental import pallas as pl
from jax.experimental.pallas import tpu as pltpu

# ---------------- configuration (small, synthetic) ---------------------------
POINT_DIM = 3            # input channels of the point cloud
BACKBONE_HIDDEN = 32     # H: synthetic backbone per-point hidden width
GLOBAL_FEAT = 64         # F: backbone.global_feature_dim
HEAD_HIDDEN = 32         # l_hidden = [32] for every MLP head
OUT_DIMS = (("position", 3), ("orientation", 4), ("size", 3), ("shape", 2))
TOTAL_OUT = sum(od for _, od in OUT_DIMS)                      # 12
N_POINTS = 128           # points per cloud (lane width)
OUT_PAD = 128            # lane-dense padded output / packed-param width
assert N_POINTS == OUT_PAD == 128

_H, _F = BACKBONE_HIDDEN, GLOBAL_FEAT

# packed-parameter row offsets (all multiples of 8 -> aligned sublane slices)
R_W1 = 0                            # 3*H rows: per-channel layer-1 weight (lane-broadcast)
R_B1 = R_W1 + POINT_DIM * _H        # H rows  : layer-1 bias (lane-broadcast)
R_W2 = R_B1 + _H                    # F rows  : layer-2 weight (F,H) in lanes [0:H]
R_B2 = R_W2 + _F                    # F rows  : layer-2 bias (lane-broadcast)
R_HW1 = R_B2 + _F                   # F rows  : packed head layer-1 weight (F,128)
R_HB1 = R_HW1 + _F                  # 8 rows  : packed head layer-1 bias (row 0)
R_HW2 = R_HB1 + 8                   # 128 rows: block-diag head layer-2 weight (cols 0..11)
R_HB2 = R_HW2 + len(OUT_DIMS) * HEAD_HIDDEN   # 8 rows: packed head layer-2 bias (row 0)
R_TOTAL = R_HB2 + 8                 # 464


# ---------------- deterministic parameter init (PyTorch-Linear style) --------
def _linear_init(key, fan_in, fan_out):
    kw, kb = jax.random.split(key)
    bound = 1.0 / np.sqrt(fan_in)
    w = jax.random.uniform(kw, (fan_in, fan_out), jnp.float32, -bound, bound)
    b = jax.random.uniform(kb, (1, fan_out), jnp.float32, -bound, bound)
    return w, b


def init_params(key):
    keys = jax.random.split(key, 2 + 2 * len(OUT_DIMS))
    bw1, bb1 = _linear_init(keys[0], POINT_DIM, BACKBONE_HIDDEN)
    bw2, bb2 = _linear_init(keys[1], BACKBONE_HIDDEN, GLOBAL_FEAT)
    heads = {}
    for i, (name, od) in enumerate(OUT_DIMS):
        w1, b1 = _linear_init(keys[2 + 2 * i], GLOBAL_FEAT, HEAD_HIDDEN)
        w2, b2 = _linear_init(keys[3 + 2 * i], HEAD_HIDDEN, od)
        heads[name] = (w1, b1, w2, b2)
    return (bw1, bb1, bw2, bb2), heads


# ---------------- host-side packing (done once) -------------------------------
def pack_params(backbone_params, head_params):
    """Pack every weight/bias into one (R_TOTAL, 128) f32 slab (pre-broadcast)."""
    bw1, bb1, bw2, bb2 = backbone_params
    P = jnp.zeros((R_TOTAL, OUT_PAD), jnp.float32)

    # backbone layer 1: per-channel weight column lane-broadcast to (H, 128)
    for c in range(POINT_DIM):
        P = P.at[R_W1 + c * _H: R_W1 + (c + 1) * _H, :].set(
            jnp.broadcast_to(bw1[c][:, None], (_H, OUT_PAD)))
    P = P.at[R_B1:R_B1 + _H, :].set(jnp.broadcast_to(bb1[0][:, None], (_H, OUT_PAD)))

    # backbone layer 2: channels-first weight (F, H) and lane-broadcast bias
    P = P.at[R_W2:R_W2 + _F, :_H].set(bw2.T)
    P = P.at[R_B2:R_B2 + _F, :].set(jnp.broadcast_to(bb2[0][:, None], (_F, OUT_PAD)))

    # fused heads: packed first layer + block-diagonal, zero-padded second layer
    w1_all = jnp.concatenate([head_params[n][0] for n, _ in OUT_DIMS], axis=1)  # (F, 128)
    b1_all = jnp.concatenate([head_params[n][1] for n, _ in OUT_DIMS], axis=1)  # (1, 128)
    P = P.at[R_HW1:R_HW1 + _F, :].set(w1_all)
    P = P.at[R_HB1, :].set(b1_all[0])
    row, col = 0, 0
    for name, od in OUT_DIMS:
        w2h, b2h = head_params[name][2], head_params[name][3]
        P = P.at[R_HW2 + row:R_HW2 + row + HEAD_HIDDEN, col:col + od].set(w2h)
        P = P.at[R_HB2, col:col + od].set(b2h[0])
        row += HEAD_HIDDEN
        col += od
    return P


# ---------------- the Pallas kernel (one batch TILE per grid step) ------------
def _sqnet_kernel(pts_ref,            # (Bt, 3, N)   channels-first point cloud
                  prm_ref,            # (R_TOTAL, 128) packed constants
                  out_ref,            # (Bt, 128)    lane-dense padded output
                  h1_ref,             # scratch (H, Bt*N) lane-flat layer-1 acts
                  gt_ref):            # scratch (F, Bt)   pooled global feature^T
    f32 = jnp.float32
    Bt = pts_ref.shape[0]
    N = pts_ref.shape[2]

    def leaky(t):                     # LeakyReLU(0.2)
        return jnp.where(t >= 0, t, 0.2 * t)

    # hoisted layer-1 constants (pre-broadcast to (H, N) host-side)
    w1x = prm_ref[R_W1:R_W1 + _H, :]
    w1y = prm_ref[R_W1 + _H:R_W1 + 2 * _H, :]
    w1z = prm_ref[R_W1 + 2 * _H:R_W1 + 3 * _H, :]
    b1 = prm_ref[R_B1:R_B1 + _H, :]

    # ---- backbone layer 1 (3 -> H): per-batch VPU FMAs scattered into a
    #      lane-flat (H, Bt*N) scratch (static slices, static unroll) --------
    for b in range(Bt):
        pb = pts_ref[b]                                     # (3, N)
        hb = (pb[0:1, :] * w1x + pb[1:2, :] * w1y
              + pb[2:3, :] * w1z + b1)                      # (H, N)
        h1_ref[:, b * N:(b + 1) * N] = leaky(hb)

    # ---- backbone layer 2 (H -> F): ONE (F,H) @ (H, Bt*N) MXU matmul -------
    w2 = prm_ref[R_W2:R_W2 + _F, :_H]                       # (F, H)
    b2 = prm_ref[R_B2:R_B2 + _F, 0:1]                       # (F, 1)
    h2 = jnp.dot(w2, h1_ref[...], preferred_element_type=f32) + b2
    h2 = leaky(h2)                                          # (F, Bt*N)

    # ---- global max-pool over each batch's 128-lane point group ------------
    for b in range(Bt):
        gt_ref[:, b:b + 1] = jnp.max(h2[:, b * N:(b + 1) * N],
                                     axis=1, keepdims=True)
    g = gt_ref[...].T                                       # (Bt, F)

    # ---- fused heads: 2 matmuls for all 4 MLP heads -------------------------
    hw1 = prm_ref[R_HW1:R_HW1 + _F, :]                      # (F, 128)
    hb1 = prm_ref[R_HB1:R_HB1 + 1, :]                       # (1, 128)
    hw2 = prm_ref[R_HW2:R_HW2 + len(OUT_DIMS) * HEAD_HIDDEN, :]   # (128, 128)
    hb2 = prm_ref[R_HB2:R_HB2 + 1, :]                       # (1, 128)
    z = leaky(jnp.dot(g, hw1, preferred_element_type=f32) + hb1)   # (Bt, 128)
    raw = jnp.dot(z, hw2, preferred_element_type=f32) + hb2        # (Bt, 128), lanes>=12 are 0

    # ---- per-lane post-processing:  pos | L2-normalized ori | .5σ+.03 | 1.5σ+.2
    col = jax.lax.broadcasted_iota(jnp.int32, raw.shape, 1)
    is_ori = (col >= 3) & (col < 7)
    sumsq = jnp.sum(jnp.where(is_ori, raw * raw, 0.0), axis=1, keepdims=True)
    # rsqrt(max(sumsq, 1e-24)) == 1 / max(||x||, 1e-12)  (F.normalize eps)
    inv_norm = jax.lax.rsqrt(jnp.maximum(sumsq, 1e-24))
    lin = jnp.where(is_ori, raw * inv_norm, raw)            # pos + normalized ori
    sig = jax.nn.sigmoid(raw)
    scale = jnp.where(col >= 10, 1.5, 0.5)
    shift = jnp.where(col >= 10, 0.2, 0.03)
    out_ref[...] = jnp.where((col >= 7) & (col < TOTAL_OUT),
                             scale * sig + shift, lin)      # padding lanes stay 0


# ---------------- wrapper ------------------------------------------------------
def superquadric_forward(x_ncw, packed_params, *, batch_tile=32):
    """x_ncw: (B, 3, N) float32 point cloud (native PyTorch NCW layout)."""
    B, C, N = x_ncw.shape
    assert C == POINT_DIM and N == N_POINTS
    Bt = min(batch_tile, B)
    # ragged batches are not handled (would need padding + slicing of junk rows)
    assert B % Bt == 0, "batch must be a multiple of the batch tile"
    R = packed_params.shape[0]

    out = pl.pallas_call(
        _sqnet_kernel,
        grid=(B // Bt,),
        in_specs=[pl.BlockSpec((Bt, C, N), lambda b: (b, 0, 0)),
                  pl.BlockSpec((R, OUT_PAD), lambda b: (0, 0))],
        out_specs=pl.BlockSpec((Bt, OUT_PAD), lambda b: (b, 0)),
        out_shape=jax.ShapeDtypeStruct((B, OUT_PAD), jnp.float32),
        scratch_shapes=[pltpu.VMEM((BACKBONE_HIDDEN, Bt * N), jnp.float32),
                        pltpu.VMEM((GLOBAL_FEAT, Bt), jnp.float32)],
        # ~2.5 MiB of VMEM in use; well under every generation's default scoped
        # limit (16 MiB on v5e), so vmem_limit_bytes is left unset.  Raise it if
        # batch_tile is pushed to >=128.
        compiler_params=pltpu.CompilerParams(
            dimension_semantics=("parallel",)),
    )(x_ncw, packed_params)
    return out[:, :TOTAL_OUT]            # drop the lane padding (layout plumbing)


# ---------------- pure-JAX reference for correctness check --------------------
def reference_forward(x_ncw, backbone_params, head_params):
    pts = jnp.transpose(x_ncw, (0, 2, 1))                     # (B, N, 3)
    bw1, bb1, bw2, bb2 = backbone_params
    leaky = lambda t: jnp.where(t >= 0, t, 0.2 * t)
    h = leaky(pts @ bw1 + bb1)
    h = leaky(h @ bw2 + bb2)
    g = jnp.max(h, axis=1)                                    # (B, F)

    def head(p):
        w1, b1, w2, b2 = p
        z = leaky(g @ w1 + b1)
        return z @ w2 + b2

    pos = head(head_params["position"])
    ori = head(head_params["orientation"])
    ori = ori / jnp.maximum(jnp.linalg.norm(ori, axis=1, keepdims=True), 1e-12)
    siz = 0.5 * jax.nn.sigmoid(head(head_params["size"])) + 0.03
    shp = 1.5 * jax.nn.sigmoid(head(head_params["shape"])) + 0.2
    return jnp.concatenate([pos, ori, siz, shp], axis=1)


if __name__ == "__main__":
    key = jax.random.PRNGKey(0)
    kp, kx = jax.random.split(key)
    backbone_params, head_params = init_params(kp)
    packed = pack_params(backbone_params, head_params)

    B, N = 64, N_POINTS                                       # 2 batch tiles of 32
    x = jax.random.normal(kx, (B, POINT_DIM, N), jnp.float32)  # (B, 3, N)

    out = superquadric_forward(x, packed, batch_tile=32)
    out = jax.block_until_ready(out)

    ref = reference_forward(x, backbone_params, head_params)
    assert out.shape == (B, TOTAL_OUT)
    np.testing.assert_allclose(np.asarray(out), np.asarray(ref),
                               rtol=1e-3, atol=1e-3)
    print("KERNEL_OK")
</pallas_src>

<mosaic_0001>
module attributes {stable_mosaic.version = 11 : i64} {
  func.func @_sqnet_kernel(%arg0: i32, %arg1: memref<32x3x128xf32, #tpu.memory_space<vmem>>, %arg2: memref<464x128xf32, #tpu.memory_space<vmem>>, %arg3: memref<32x128xf32, #tpu.memory_space<vmem>>, %arg4: memref<32x4096xf32, #tpu.memory_space<vmem>>, %arg5: memref<64x32xf32, #tpu.memory_space<vmem>>) attributes {dimension_semantics = [#tpu.dimension_semantics<parallel>], iteration_bounds = array<i64: 2>, scalar_prefetch = 0 : i64, scratch_operands = 2 : i64, tpu.core_type = #tpu.core_type<tc>, window_params = [{transform_indices = @transform_0, window_bounds = array<i64: 32, 3, 128>}, {pipeline_mode = #tpu.pipeline_mode<synchronous>, transform_indices = @transform_1, window_bounds = array<i64: 464, 128>}, {transform_indices = @transform_2, window_bounds = array<i64: 32, 128>}]} {
    %c0 = arith.constant 0 : index
    %c0_0 = arith.constant 0 : index
    %0 = vector.load %arg2[%c0, %c0_0] : memref<464x128xf32, #tpu.memory_space<vmem>>, vector<32x128xf32>
    %c32 = arith.constant 32 : index
    %c0_1 = arith.constant 0 : index
    %1 = vector.load %arg2[%c32, %c0_1] : memref<464x128xf32, #tpu.memory_space<vmem>>, vector<32x128xf32>
    %c64 = arith.constant 64 : index
    %c0_2 = arith.constant 0 : index
    %2 = vector.load %arg2[%c64, %c0_2] : memref<464x128xf32, #tpu.memory_space<vmem>>, vector<32x128xf32>
    %c96 = arith.constant 96 : index
    %c0_3 = arith.constant 0 : index
    %3 = vector.load %arg2[%c96, %c0_3] : memref<464x128xf32, #tpu.memory_space<vmem>>, vector<32x128xf32>
    %c0_4 = arith.constant 0 : index
    %c0_5 = arith.constant 0 : index
    %c0_6 = arith.constant 0 : index
    %4 = vector.load %arg1[%c0_4, %c0_5, %c0_6] : memref<32x3x128xf32, #tpu.memory_space<vmem>>, vector<1x3x128xf32>
    %5 = vector.shape_cast %4 : vector<1x3x128xf32> to vector<3x128xf32>
    %6 = vector.extract_strided_slice %5 {offsets = [0, 0], sizes = [1, 128], strides = [1, 1]} : vector<3x128xf32> to vector<1x128xf32>
    %7 = vector.broadcast %6 : vector<1x128xf32> to vector<32x128xf32>
    %8 = arith.mulf %7, %0 : vector<32x128xf32>
    %9 = vector.extract_strided_slice %5 {offsets = [1, 0], sizes = [1, 128], strides = [1, 1]} : vector<3x128xf32> to vector<1x128xf32>
    %10 = vector.broadcast %9 : vector<1x128xf32> to vector<32x128xf32>
    %11 = arith.mulf %10, %1 : vector<32x128xf32>
    %12 = arith.addf %8, %11 : vector<32x128xf32>
    %13 = vector.extract_strided_slice %5 {offsets = [2, 0], sizes = [1, 128], strides = [1, 1]} : vector<3x128xf32> to vector<1x128xf32>
    %14 = vector.broadcast %13 : vector<1x128xf32> to vector<32x128xf32>
    %15 = arith.mulf %14, %2 : vector<32x128xf32>
    %16 = arith.addf %12, %15 : vector<32x128xf32>
    %17 = arith.addf %16, %3 : vector<32x128xf32>
    %cst = arith.constant 0.000000e+00 : f32
    %18 = vector.broadcast %cst : f32 to vector<32x128xf32>
    %19 = arith.cmpf oge, %17, %18 : vector<32x128xf32>
    %cst_7 = arith.constant 2.000000e-01 : f32
    %20 = vector.broadcast %cst_7 : f32 to vector<32x128xf32>
    %21 = arith.mulf %20, %17 : vector<32x128xf32>
    %22 = arith.select %19, %17, %21 : vector<32x128xi1>, vector<32x128xf32>
    %c0_8 = arith.constant 0 : index
    %c0_9 = arith.constant 0 : index
    %23 = vector.load %arg4[%c0_8, %c0_9] : memref<32x4096xf32, #tpu.memory_space<vmem>>, vector<32x128xf32>
    tpu.vector_store %arg4[%c0_8, %c0_9], %22 {strides = array<i32>} : memref<32x4096xf32, #tpu.memory_space<vmem>>, vector<32x128xf32>,
    %c1 = arith.constant 1 : index
    %c0_10 = arith.constant 0 : index
    %c0_11 = arith.constant 0 : index
    %24 = vector.load %arg1[%c1, %c0_10, %c0_11] : memref<32x3x128xf32, #tpu.memory_space<vmem>>, vector<1x3x128xf32>
    %25 = vector.shape_cast %24 : vector<1x3x128xf32> to vector<3x128xf32>
    %26 = vector.extract_strided_slice %25 {offsets = [0, 0], sizes = [1, 128], strides = [1, 1]} : vector<3x128xf32> to vector<1x128xf32>
    %27 = vector.broadcast %26 : vector<1x128xf32> to vector<32x128xf32>
    %28 = arith.mulf %27, %0 : vector<32x128xf32>
    %29 = vector.extract_strided_slice %25 {offsets = [1, 0], sizes = [1, 128], strides = [1, 1]} : vector<3x128xf32> to vector<1x128xf32>
    %30 = vector.broadcast %29 : vector<1x128xf32> to vector<32x128xf32>
    %31 = arith.mulf %30, %1 : vector<32x128xf32>
    %32 = arith.addf %28, %31 : vector<32x128xf32>
    %33 = vector.extract_strided_slice %25 {offsets = [2, 0], sizes = [1, 128], strides = [1, 1]} : vector<3x128xf32> to vector<1x128xf32>
    %34 = vector.broadcast %33 : vector<1x128xf32> to vector<32x128xf32>
    %35 = arith.mulf %34, %2 : vector<32x128xf32>
    %36 = arith.addf %32, %35 : vector<32x128xf32>
    %37 = arith.addf %36, %3 : vector<32x128xf32>
    %cst_12 = arith.constant 0.000000e+00 : f32
    %38 = vector.broadcast %cst_12 : f32 to vector<32x128xf32>
    %39 = arith.cmpf oge, %37, %38 : vector<32x128xf32>
    %cst_13 = arith.constant 2.000000e-01 : f32
    %40 = vector.broadcast %cst_13 : f32 to vector<32x128xf32>
    %41 = arith.mulf %40, %37 : vector<32x128xf32>
    %42 = arith.select %39, %37, %41 : vector<32x128xi1>, vector<32x128xf32>
    %c0_14 = arith.constant 0 : index
    %c128 = arith.constant 128 : index
    %43 = vector.load %arg4[%c0_14, %c128] : memref<32x4096xf32, #tpu.memory_space<vmem>>, vector<32x128xf32>
    tpu.vector_store %arg4[%c0_14, %c128], %42 {strides = array<i32>} : memref<32x4096xf32, #tpu.memory_space<vmem>>, vector<32x128xf32>,
    %c2 = arith.constant 2 : index
    %c0_15 = arith.constant 0 : index
    %c0_16 = arith.constant 0 : index
    %44 = vector.load %arg1[%c2, %c0_15, %c0_16] : memref<32x3x128xf32, #tpu.memory_space<vmem>>, vector<1x3x128xf32>
    %45 = vector.shape_cast %44 : vector<1x3x128xf32> to vector<3x128xf32>
    %46 = vector.extract_strided_slice %45 {offsets = [0, 0], sizes = [1, 128], strides = [1, 1]} : vector<3x128xf32> to vector<1x128xf32>
    %47 = vector.broadcast %46 : vector<1x128xf32> to vector<32x128xf32>
    %48 = arith.mulf %47, %0 : vector<32x128xf32>
    %49 = vector.extract_strided_slice %45 {offsets = [1, 0], sizes = [1, 128], strides = [1, 1]} : vector<3x128xf32> to vector<1x128xf32>
    %50 = vector.broadcast %49 : vector<1x128xf32> to vector<32x128xf32>
    %51 = arith.mulf %50, %1 : vector<32x128xf32>
    %52 = arith.addf %48, %51 : vector<32x128xf32>
    %53 = vector.extract_strided_slice %45 {offsets = [2, 0], sizes = [1, 128], strides = [1, 1]} : vector<3x128xf32> to vector<1x128xf32>
    %54 = vector.broadcast %53 : vector<1x128xf32> to vector<32x128xf32>
    %55 = arith.mulf %54, %2 : vector<32x128xf32>
    %56 = arith.addf %52, %55 : vector<32x128xf32>
    %57 = arith.addf %56, %3 : vector<32x128xf32>
    %cst_17 = arith.constant 0.000000e+00 : f32
    %58 = vector.broadcast %cst_17 : f32 to vector<32x128xf32>
    %59 = arith.cmpf oge, %57, %58 : vector<32x128xf32>
    %cst_18 = arith.constant 2.000000e-01 : f32
    %60 = vector.broadcast %cst_18 : f32 to vector<32x128xf32>
    %61 = arith.mulf %60, %57 : vector<32x128xf32>
    %62 = arith.select %59, %57, %61 : vector<32x128xi1>, vector<32x128xf32>
    %c0_19 = arith.constant 0 : index
    %c256 = arith.constant 256 : index
    %63 = vector.load %arg4[%c0_19, %c256] : memref<32x4096xf32, #tpu.memory_space<vmem>>, vector<32x128xf32>
    tpu.vector_store %arg4[%c0_19, %c256], %62 {strides = array<i32>} : memref<32x4096xf32, #tpu.memory_space<vmem>>, vector<32x128xf32>,
    %c3 = arith.constant 3 : index
    %c0_20 = arith.constant 0 : index
    %c0_21 = arith.constant 0 : index
    %64 = vector.load %arg1[%c3, %c0_20, %c0_21] : memref<32x3x128xf32, #tpu.memory_space<vmem>>, vector<1x3x128xf32>
    %65 = vector.shape_cast %64 : vector<1x3x128xf32> to vector<3x128xf32>
    %66 = vector.extract_strided_slice %65 {offsets = [0, 0], sizes = [1, 128], strides = [1, 1]} : vector<3x128xf32> to vector<1x128xf32>
    %67 = vector.broadcast %66 : vector<1x128xf32> to vector<32x128xf32>
    %68 = arith.mulf %67, %0 : vector<32x128xf32>
    %69 = vector.extract_strided_slice %65 {offsets = [1, 0], sizes = [1, 128], strides = [1, 1]} : vector<3x128xf32> to vector<1x128xf32>
    %70 = vector.broadcast %69 : vector<1x128xf32> to vector<32x128xf32>
    %71 = arith.mulf %70, %1 : vector<32x128xf32>
    %72 = arith.addf %68, %71 : vector<32x128xf32>
    %73 = vector.extract_strided_slice %65 {offsets = [2, 0], sizes = [1, 128], strides = [1, 1]} : vector<3x128xf32> to vector<1x128xf32>
    %74 = vector.broadcast %73 : vector<1x128xf32> to vector<32x128xf32>
    %75 = arith.mulf %74, %2 : vector<32x128xf32>
    %76 = arith.addf %72, %75 : vector<32x128xf32>
    %77 = arith.addf %76, %3 : vector<32x128xf32>
    %cst_22 = arith.constant 0.000000e+00 : f32
    %78 = vector.broadcast %cst_22 : f32 to vector<32x128xf32>
    %79 = arith.cmpf oge, %77, %78 : vector<32x128xf32>
    %cst_23 = arith.constant 2.000000e-01 : f32
    %80 = vector.broadcast %cst_23 : f32 to vector<32x128xf32>
    %81 = arith.mulf %80, %77 : vector<32x128xf32>
    %82 = arith.select %79, %77, %81 : vector<32x128xi1>, vector<32x128xf32>
    %c0_24 = arith.constant 0 : index
    %c384 = arith.constant 384 : index
    %83 = vector.load %arg4[%c0_24, %c384] : memref<32x4096xf32, #tpu.memory_space<vmem>>, vector<32x128xf32>
    tpu.vector_store %arg4[%c0_24, %c384], %82 {strides = array<i32>} : memref<32x4096xf32, #tpu.memory_space<vmem>>, vector<32x128xf32>,
    %c4 = arith.constant 4 : index
    %c0_25 = arith.constant 0 : index
    %c0_26 = arith.constant 0 : index
    %84 = vector.load %arg1[%c4, %c0_25, %c0_26] : memref<32x3x128xf32, #tpu.memory_space<vmem>>, vector<1x3x128xf32>
    %85 = vector.shape_cast %84 : vector<1x3x128xf32> to vector<3x128xf32>
    %86 = vector.extract_strided_slice %85 {offsets = [0, 0], sizes = [1, 128], strides = [1, 1]} : vector<3x128xf32> to vector<1x128xf32>
    %87 = vector.broadcast %86 : vector<1x128xf32> to vector<32x128xf32>
    %88 = arith.mulf %87, %0 : vector<32x128xf32>
    %89 = vector.extract_strided_slice %85 {offsets = [1, 0], sizes = [1, 128], strides = [1, 1]} : vector<3x128xf32> to vector<1x128xf32>
    %90 = vector.broadcast %89 : vector<1x128xf32> to vector<32x128xf32>
    %91 = arith.mulf %90, %1 : vector<32x128xf32>
    %92 = arith.addf %88, %91 : vector<32x128xf32>
    %93 = vector.extract_strided_slice %85 {offsets = [2, 0], sizes = [1, 128], strides = [1, 1]} : vector<3x128xf32> to vector<1x128xf32>
    %94 = vector.broadcast %93 : vector<1x128xf32> to vector<32x128xf32>
    %95 = arith.mulf %94, %2 : vector<32x128xf32>
    %96 = arith.addf %92, %95 : vector<32x128xf32>
    %97 = arith.addf %96, %3 : vector<32x128xf32>
    %cst_27 = arith.constant 0.000000e+00 : f32
    %98 = vector.broadcast %cst_27 : f32 to vector<32x128xf32>
    %99 = arith.cmpf oge, %97, %98 : vector<32x128xf32>
    %cst_28 = arith.constant 2.000000e-01 : f32
    %100 = vector.broadcast %cst_28 : f32 to vector<32x128xf32>
    %101 = arith.mulf %100, %97 : vector<32x128xf32>
    %102 = arith.select %99, %97, %101 : vector<32x128xi1>, vector<32x128xf32>
    %c0_29 = arith.constant 0 : index
    %c512 = arith.constant 512 : index
    %103 = vector.load %arg4[%c0_29, %c512] : memref<32x4096xf32, #tpu.memory_space<vmem>>, vector<32x128xf32>
    tpu.vector_store %arg4[%c0_29, %c512], %102 {strides = array<i32>} : memref<32x4096xf32, #tpu.memory_space<vmem>>, vector<32x128xf32>,
    %c5 = arith.constant 5 : index
    %c0_30 = arith.constant 0 : index
    %c0_31 = arith.constant 0 : index
    %104 = vector.load %arg1[%c5, %c0_30, %c0_31] : memref<32x3x128xf32, #tpu.memory_space<vmem>>, vector<1x3x128xf32>
    %105 = vector.shape_cast %104 : vector<1x3x128xf32> to vector<3x128xf32>
    %106 = vector.extract_strided_slice %105 {offsets = [0, 0], sizes = [1, 128], strides = [1, 1]} : vector<3x128xf32> to vector<1x128xf32>
    %107 = vector.broadcast %106 : vector<1x128xf32> to vector<32x128xf32>
    %108 = arith.mulf %107, %0 : vector<32x128xf32>
    %109 = vector.extract_strided_slice %105 {offsets = [1, 0], sizes = [1, 128], strides = [1, 1]} : vector<3x128xf32> to vector<1x128xf32>
    %110 = vector.broadcast %109 : vector<1x128xf32> to vector<32x128xf32>
    %111 = arith.mulf %110, %1 : vector<32x128xf32>
    %112 = arith.addf %108, %111 : vector<32x128xf32>
    %113 = vector.extract_strided_slice %105 {offsets = [2, 0], sizes = [1, 128], strides = [1, 1]} : vector<3x128xf32> to vector<1x128xf32>
    %114 = vector.broadcast %113 : vector<1x128xf32> to vector<32x128xf32>
    %115 = arith.mulf %114, %2 : vector<32x128xf32>
    %116 = arith.addf %112, %115 : vector<32x128xf32>
    %117 = arith.addf %116, %3 : vector<32x128xf32>
    %cst_32 = arith.constant 0.000000e+00 : f32
    %118 = vector.broadcast %cst_32 : f32 to vector<32x128xf32>
    %119 = arith.cmpf oge, %117, %118 : vector<32x128xf32>
    %cst_33 = arith.constant 2.000000e-01 : f32
    %120 = vector.broadcast %cst_33 : f32 to vector<32x128xf32>
    %121 = arith.mulf %120, %117 : vector<32x128xf32>
    %122 = arith.select %119, %117, %121 : vector<32x128xi1>, vector<32x128xf32>
    %c0_34 = arith.constant 0 : index
    %c640 = arith.constant 640 : index
    %123 = vector.load %arg4[%c0_34, %c640] : memref<32x4096xf32, #tpu.memory_space<vmem>>, vector<32x128xf32>
    tpu.vector_store %arg4[%c0_34, %c640], %122 {strides = array<i32>} : memref<32x4096xf32, #tpu.memory_space<vmem>>, vector<32x128xf32>,
    %c6 = arith.constant 6 : index
    %c0_35 = arith.constant 0 : index
    %c0_36 = arith.constant 0 : index
    %124 = vector.load %arg1[%c6, %c0_35, %c0_36] : memref<32x3x128xf32, #tpu.memory_space<vmem>>, vector<1x3x128xf32>
    %125 = vector.shape_cast %124 : vector<1x3x128xf32> to vector<3x128xf32>
    %126 = vector.extract_strided_slice %125 {offsets = [0, 0], sizes = [1, 128], strides = [1, 1]} : vector<3x128xf32> to vector<1x128xf32>
    %127 = vector.broadcast %126 : vector<1x128xf32> to vector<32x128xf32>
    %128 = arith.mulf %127, %0 : vector<32x128xf32>
    %129 = vector.extract_strided_slice %125 {offsets = [1, 0], sizes = [1, 128], strides = [1, 1]} : vector<3x128xf32> to vector<1x128xf32>
    %130 = vector.broadcast %129 : vector<1x128xf32> to vector<32x128xf32>
    %131 = arith.mulf %130, %1 : vector<32x128xf32>
    %132 = arith.addf %128, %131 : vector<32x128xf32>
    %133 = vector.extract_strided_slice %125 {offsets = [2, 0], sizes = [1, 128], strides = [1, 1]} : vector<3x128xf32> to vector<1x128xf32>
    %134 = vector.broadcast %133 : vector<1x128xf32> to vector<32x128xf32>
    %135 = arith.mulf %134, %2 : vector<32x128xf32>
    %136 = arith.addf %132, %135 : vector<32x128xf32>
    %137 = arith.addf %136, %3 : vector<32x128xf32>
    %cst_37 = arith.constant 0.000000e+00 : f32
    %138 = vector.broadcast %cst_37 : f32 to vector<32x128xf32>
    %139 = arith.cmpf oge, %137, %138 : vector<32x128xf32>
    %cst_38 = arith.constant 2.000000e-01 : f32
    %140 = vector.broadcast %cst_38 : f32 to vector<32x128xf32>
    %141 = arith.mulf %140, %137 : vector<32x128xf32>
    %142 = arith.select %139, %137, %141 : vector<32x128xi1>, vector<32x128xf32>
    %c0_39 = arith.constant 0 : index
    %c768 = arith.constant 768 : index
    %143 = vector.load %arg4[%c0_39, %c768] : memref<32x4096xf32, #tpu.memory_space<vmem>>, vector<32x128xf32>
    tpu.vector_store %arg4[%c0_39, %c768], %142 {strides = array<i32>} : memref<32x4096xf32, #tpu.memory_space<vmem>>, vector<32x128xf32>,
    %c7 = arith.constant 7 : index
    %c0_40 = arith.constant 0 : index
    %c0_41 = arith.constant 0 : index
    %144 = vector.load %arg1[%c7, %c0_40, %c0_41] : memref<32x3x128xf32, #tpu.memory_space<vmem>>, vector<1x3x128xf32>
    %145 = vector.shape_cast %144 : vector<1x3x128xf32> to vector<3x128xf32>
    %146 = vector.extract_strided_slice %145 {offsets = [0, 0], sizes = [1, 128], strides = [1, 1]} : vector<3x128xf32> to vector<1x128xf32>
    %147 = vector.broadcast %146 : vector<1x128xf32> to vector<32x128xf32>
    %148 = arith.mulf %147, %0 : vector<32x128xf32>
    %149 = vector.extract_strided_slice %145 {offsets = [1, 0], sizes = [1, 128], strides = [1, 1]} : vector<3x128xf32> to vector<1x128xf32>
    %150 = vector.broadcast %149 : vector<1x128xf32> to vector<32x128xf32>
    %151 = arith.mulf %150, %1 : vector<32x128xf32>
    %152 = arith.addf %148, %151 : vector<32x128xf32>
    %153 = vector.extract_strided_slice %145 {offsets = [2, 0], sizes = [1, 128], strides = [1, 1]} : vector<3x128xf32> to vector<1x128xf32>
    %154 = vector.broadcast %153 : vector<1x128xf32> to vector<32x128xf32>
    %155 = arith.mulf %154, %2 : vector<32x128xf32>
    %156 = arith.addf %152, %155 : vector<32x128xf32>
    %157 = arith.addf %156, %3 : vector<32x128xf32>
    %cst_42 = arith.constant 0.000000e+00 : f32
    %158 = vector.broadcast %cst_42 : f32 to vector<32x128xf32>
    %159 = arith.cmpf oge, %157, %158 : vector<32x128xf32>
    %cst_43 = arith.constant 2.000000e-01 : f32
    %160 = vector.broadcast %cst_43 : f32 to vector<32x128xf32>
    %161 = arith.mulf %160, %157 : vector<32x128xf32>
    %162 = arith.select %159, %157, %161 : vector<32x128xi1>, vector<32x128xf32>
    %c0_44 = arith.constant 0 : index
    %c896 = arith.constant 896 : index
    %163 = vector.load %arg4[%c0_44, %c896] : memref<32x4096xf32, #tpu.memory_space<vmem>>, vector<32x128xf32>
    tpu.vector_store %arg4[%c0_44, %c896], %162 {strides = array<i32>} : memref<32x4096xf32, #tpu.memory_space<vmem>>, vector<32x128xf32>,
    %c8 = arith.constant 8 : index
    %c0_45 = arith.constant 0 : index
    %c0_46 = arith.constant 0 : index
    %164 = vector.load %arg1[%c8, %c0_45, %c0_46] : memref<32x3x128xf32, #tpu.memory_space<vmem>>, vector<1x3x128xf32>
    %165 = vector.shape_cast %164 : vector<1x3x128xf32> to vector<3x128xf32>
    %166 = vector.extract_strided_slice %165 {offsets = [0, 0], sizes = [1, 128], strides = [1, 1]} : vector<3x128xf32> to vector<1x128xf32>
    %167 = vector.broadcast %166 : vector<1x128xf32> to vector<32x128xf32>
    %168 = arith.mulf %167, %0 : vector<32x128xf32>
    %169 = vector.extract_strided_slice %165 {offsets = [1, 0], sizes = [1, 128], strides = [1, 1]} : vector<3x128xf32> to vector<1x128xf32>
    %170 = vector.broadcast %169 : vector<1x128xf32> to vector<32x128xf32>
    %171 = arith.mulf %170, %1 : vector<32x128xf32>
    %172 = arith.addf %168, %171 : vector<32x128xf32>
    %173 = vector.extract_strided_slice %165 {offsets = [2, 0], sizes = [1, 128], strides = [1, 1]} : vector<3x128xf32> to vector<1x128xf32>
    %174 = vector.broadcast %173 : vector<1x128xf32> to vector<32x128xf32>
    %175 = arith.mulf %174, %2 : vector<32x128xf32>
    %176 = arith.addf %172, %175 : vector<32x128xf32>
    %177 = arith.addf %176, %3 : vector<32x128xf32>
    %cst_47 = arith.constant 0.000000e+00 : f32
    %178 = vector.broadcast %cst_47 : f32 to vector<32x128xf32>
    %179 = arith.cmpf oge, %177, %178 : vector<32x128xf32>
    %cst_48 = arith.constant 2.000000e-01 : f32
    %180 = vector.broadcast %cst_48 : f32 to vector<32x128xf32>
    %181 = arith.mulf %180, %177 : vector<32x128xf32>
    %182 = arith.select %179, %177, %181 : vector<32x128xi1>, vector<32x128xf32>
    %c0_49 = arith.constant 0 : index
    %c1024 = arith.constant 1024 : index
    %183 = vector.load %arg4[%c0_49, %c1024] : memref<32x4096xf32, #tpu.memory_space<vmem>>, vector<32x128xf32>
    tpu.vector_store %arg4[%c0_49, %c1024], %182 {strides = array<i32>} : memref<32x4096xf32, #tpu.memory_space<vmem>>, vector<32x128xf32>,
    %c9 = arith.constant 9 : index
    %c0_50 = arith.constant 0 : index
    %c0_51 = arith.constant 0 : index
    %184 = vector.load %arg1[%c9, %c0_50, %c0_51] : memref<32x3x128xf32, #tpu.memory_space<vmem>>, vector<1x3x128xf32>
    %185 = vector.shape_cast %184 : vector<1x3x128xf32> to vector<3x128xf32>
    %186 = vector.extract_strided_slice %185 {offsets = [0, 0], sizes = [1, 128], strides = [1, 1]} : vector<3x128xf32> to vector<1x128xf32>
    %187 = vector.broadcast %186 : vector<1x128xf32> to vector<32x128xf32>
    %188 = arith.mulf %187, %0 : vector<32x128xf32>
    %189 = vector.extract_strided_slice %185 {offsets = [1, 0], sizes = [1, 128], strides = [1, 1]} : vector<3x128xf32> to vector<1x128xf32>
    %190 = vector.broadcast %189 : vector<1x128xf32> to vector<32x128xf32>
    %191 = arith.mulf %190, %1 : vector<32x128xf32>
    %192 = arith.addf %188, %191 : vector<32x128xf32>
    %193 = vector.extract_strided_slice %185 {offsets = [2, 0], sizes = [1, 128], strides = [1, 1]} : vector<3x128xf32> to vector<1x128xf32>
    %194 = vector.broadcast %193 : vector<1x128xf32> to vector<32x128xf32>
    %195 = arith.mulf %194, %2 : vector<32x128xf32>
    %196 = arith.addf %192, %195 : vector<32x128xf32>
    %197 = arith.addf %196, %3 : vector<32x128xf32>
    %cst_52 = arith.constant 0.000000e+00 : f32
    %198 = vector.broadcast %cst_52 : f32 to vector<32x128xf32>
    %199 = arith.cmpf oge, %197, %198 : vector<32x128xf32>
    %cst_53 = arith.constant 2.000000e-01 : f32
    %200 = vector.broadcast %cst_53 : f32 to vector<32x128xf32>
    %201 = arith.mulf %200, %197 : vector<32x128xf32>
    %202 = arith.select %199, %197, %201 : vector<32x128xi1>, vector<32x128xf32>
    %c0_54 = arith.constant 0 : index
    %c1152 = arith.constant 1152 : index
    %203 = vector.load %arg4[%c0_54, %c1152] : memref<32x4096xf32, #tpu.memory_space<vmem>>, vector<32x128xf32>
    tpu.vector_store %arg4[%c0_54, %c1152], %202 {strides = array<i32>} : memref<32x4096xf32, #tpu.memory_space<vmem>>, vector<32x128xf32>,
    %c10 = arith.constant 10 : index
    %c0_55 = arith.constant 0 : index
    %c0_56 = arith.constant 0 : index
    %204 = vector.load %arg1[%c10, %c0_55, %c0_56] : memref<32x3x128xf32, #tpu.memory_space<vmem>>, vector<1x3x128xf32>
    %205 = vector.shape_cast %204 : vector<1x3x128xf32> to vector<3x128xf32>
    %206 = vector.extract_strided_slice %205 {offsets = [0, 0], sizes = [1, 128], strides = [1, 1]} : vector<3x128xf32> to vector<1x128xf32>
    %207 = vector.broadcast %206 : vector<1x128xf32> to vector<32x128xf32>
    %208 = arith.mulf %207, %0 : vector<32x128xf32>
    %209 = vector.extract_strided_slice %205 {offsets = [1, 0], sizes = [1, 128], strides = [1, 1]} : vector<3x128xf32> to vector<1x128xf32>
    %210 = vector.broadcast %209 : vector<1x128xf32> to vector<32x128xf32>
    %211 = arith.mulf %210, %1 : vector<32x128xf32>
    %212 = arith.addf %208, %211 : vector<32x128xf32>
    %213 = vector.extract_strided_slice %205 {offsets = [2, 0], sizes = [1, 128], strides = [1, 1]} : vector<3x128xf32> to vector<1x128xf32>
    %214 = vector.broadcast %213 : vector<1x128xf32> to vector<32x128xf32>
    %215 = arith.mulf %214, %2 : vector<32x128xf32>
    %216 = arith.addf %212, %215 : vector<32x128xf32>
    %217 = arith.addf %216, %3 : vector<32x128xf32>
    %cst_57 = arith.constant 0.000000e+00 : f32
    %218 = vector.broadcast %cst_57 : f32 to vector<32x128xf32>
    %219 = arith.cmpf oge, %217, %218 : vector<32x128xf32>
    %cst_58 = arith.constant 2.000000e-01 : f32
    %220 = vector.broadcast %cst_58 : f32 to vector<32x128xf32>
    %221 = arith.mulf %220, %217 : vector<32x128xf32>
    %222 = arith.select %219, %217, %221 : vector<32x128xi1>, vector<32x128xf32>
    %c0_59 = arith.constant 0 : index
    %c1280 = arith.constant 1280 : index
    %223 = vector.load %arg4[%c0_59, %c1280] : memref<32x4096xf32, #tpu.memory_space<vmem>>, vector<32x128xf32>
    tpu.vector_store %arg4[%c0_59, %c1280], %222 {strides = array<i32>} : memref<32x4096xf32, #tpu.memory_space<vmem>>, vector<32x128xf32>,
    %c11 = arith.constant 11 : index
    %c0_60 = arith.constant 0 : index
    %c0_61 = arith.constant 0 : index
    %224 = vector.load %arg1[%c11, %c0_60, %c0_61] : memref<32x3x128xf32, #tpu.memory_space<vmem>>, vector<1x3x128xf32>
    %225 = vector.shape_cast %224 : vector<1x3x128xf32> to vector<3x128xf32>
    %226 = vector.extract_strided_slice %225 {offsets = [0, 0], sizes = [1, 128], strides = [1, 1]} : vector<3x128xf32> to vector<1x128xf32>
    %227 = vector.broadcast %226 : vector<1x128xf32> to vector<32x128xf32>
    %228 = arith.mulf %227, %0 : vector<32x128xf32>
    %229 = vector.extract_strided_slice %225 {offsets = [1, 0], sizes = [1, 128], strides = [1, 1]} : vector<3x128xf32> to vector<1x128xf32>
    %230 = vector.broadcast %229 : vector<1x128xf32> to vector<32x128xf32>
    %231 = arith.mulf %230, %1 : vector<32x128xf32>
    %232 = arith.addf %228, %231 : vector<32x128xf32>
    %233 = vector.extract_strided_slice %225 {offsets = [2, 0], sizes = [1, 128], strides = [1, 1]} : vector<3x128xf32> to vector<1x128xf32>
    %234 = vector.broadcast %233 : vector<1x128xf32> to vector<32x128xf32>
    %235 = arith.mulf %234, %2 : vector<32x128xf32>
    %236 = arith.addf %232, %235 : vector<32x128xf32>
    %237 = arith.addf %236, %3 : vector<32x128xf32>
    %cst_62 = arith.constant 0.000000e+00 : f32
    %238 = vector.broadcast %cst_62 : f32 to vector<32x128xf32>
    %239 = arith.cmpf oge, %237, %238 : vector<32x128xf32>
    %cst_63 = arith.constant 2.000000e-01 : f32
    %240 = vector.broadcast %cst_63 : f32 to vector<32x128xf32>
    %241 = arith.mulf %240, %237 : vector<32x128xf32>
    %242 = arith.select %239, %237, %241 : vector<32x128xi1>, vector<32x128xf32>
    %c0_64 = arith.constant 0 : index
    %c1408 = arith.constant 1408 : index
    %243 = vector.load %arg4[%c0_64, %c1408] : memref<32x4096xf32, #tpu.memory_space<vmem>>, vector<32x128xf32>
    tpu.vector_store %arg4[%c0_64, %c1408], %242 {strides = array<i32>} : memref<32x4096xf32, #tpu.memory_space<vmem>>, vector<32x128xf32>,
    %c12 = arith.constant 12 : index
    %c0_65 = arith.constant 0 : index
    %c0_66 = arith.constant 0 : index
    %244 = vector.load %arg1[%c12, %c0_65, %c0_66] : memref<32x3x128xf32, #tpu.memory_space<vmem>>, vector<1x3x128xf32>
    %245 = vector.shape_cast %244 : vector<1x3x128xf32> to vector<3x128xf32>
    %246 = vector.extract_strided_slice %245 {offsets = [0, 0], sizes = [1, 128], strides = [1, 1]} : vector<3x128xf32> to vector<1x128xf32>
    %247 = vector.broadcast %246 : vector<1x128xf32> to vector<32x128xf32>
    %248 = arith.mulf %247, %0 : vector<32x128xf32>
    %249 = vector.extract_strided_slice %245 {offsets = [1, 0], sizes = [1, 128], strides = [1, 1]} : vector<3x128xf32> to vector<1x128xf32>
    %250 = vector.broadcast %249 : vector<1x128xf32> to vector<32x128xf32>
    %251 = arith.mulf %250, %1 : vector<32x128xf32>
    %252 = arith.addf %248, %251 : vector<32x128xf32>
    %253 = vector.extract_strided_slice %245 {offsets = [2, 0], sizes = [1, 128], strides = [1, 1]} : vector<3x128xf32> to vector<1x128xf32>
    %254 = vector.broadcast %253 : vector<1x128xf32> to vector<32x128xf32>
    %255 = arith.mulf %254, %2 : vector<32x128xf32>
    %256 = arith.addf %252, %255 : vector<32x128xf32>
    %257 = arith.addf %256, %3 : vector<32x128xf32>
    %cst_67 = arith.constant 0.000000e+00 : f32
    %258 = vector.broadcast %cst_67 : f32 to vector<32x128xf32>
    %259 = arith.cmpf oge, %257, %258 : vector<32x128xf32>
    %cst_68 = arith.constant 2.000000e-01 : f32
    %260 = vector.broadcast %cst_68 : f32 to vector<32x128xf32>
    %261 = arith.mulf %260, %257 : vector<32x128xf32>
    %262 = arith.select %259, %257, %261 : vector<32x128xi1>, vector<32x128xf32>
    %c0_69 = arith.constant 0 : index
    %c1536 = arith.constant 1536 : index
    %263 = vector.load %arg4[%c0_69, %c1536] : memref<32x4096xf32, #tpu.memory_space<vmem>>, vector<32x128xf32>
    tpu.vector_store %arg4[%c0_69, %c1536], %262 {strides = array<i32>} : memref<32x4096xf32, #tpu.memory_space<vmem>>, vector<32x128xf32>,
    %c13 = arith.constant 13 : index
    %c0_70 = arith.constant 0 : index
    %c0_71 = arith.constant 0 : index
    %264 = vector.load %arg1[%c13, %c0_70, %c0_71] : memref<32x3x128xf32, #tpu.memory_space<vmem>>, vector<1x3x128xf32>
    %265 = vector.shape_cast %264 : vector<1x3x128xf32> to vector<3x128xf32>
    %266 = vector.extract_strided_slice %265 {offsets = [0, 0], sizes = [1, 128], strides = [1, 1]} : vector<3x128xf32> to vector<1x128xf32>
    %267 = vector.broadcast %266 : vector<1x128xf32> to vector<32x128xf32>
    %268 = arith.mulf %267, %0 : vector<32x128xf32>
    %269 = vector.extract_strided_slice %265 {offsets = [1, 0], sizes = [1, 128], strides = [1, 1]} : vector<3x128xf32> to vector<1x128xf32>
    %270 = vector.broadcast %269 : vector<1x128xf32> to vector<32x128xf32>
    %271 = arith.mulf %270, %1 : vector<32x128xf32>
    %272 = arith.addf %268, %271 : vector<32x128xf32>
    %273 = vector.extract_strided_slice %265 {offsets = [2, 0], sizes = [1, 128], strides = [1, 1]} : vector<3x128xf32> to vector<1x128xf32>
    %274 = vector.broadcast %273 : vector<1x128xf32> to vector<32x128xf32>
    %275 = arith.mulf %274, %2 : vector<32x128xf32>
    %276 = arith.addf %272, %275 : vector<32x128xf32>
    %277 = arith.addf %276, %3 : vector<32x128xf32>
    %cst_72 = arith.constant 0.000000e+00 : f32
    %278 = vector.broadcast %cst_72 : f32 to vector<32x128xf32>
    %279 = arith.cmpf oge, %277, %278 : vector<32x128xf32>
    %cst_73 = arith.constant 2.000000e-01 : f32
    %280 = vector.broadcast %cst_73 : f32 to vector<32x128xf32>
    %281 = arith.mulf %280, %277 : vector<32x128xf32>
    %282 = arith.select %279, %277, %281 : vector<32x128xi1>, vector<32x128xf32>
    %c0_74 = arith.constant 0 : index
    %c1664 = arith.constant 1664 : index
    %283 = vector.load %arg4[%c0_74, %c1664] : memref<32x4096xf32, #tpu.memory_space<vmem>>, vector<32x128xf32>
    tpu.vector_store %arg4[%c0_74, %c1664], %282 {strides = array<i32>} : memref<32x4096xf32, #tpu.memory_space<vmem>>, vector<32x128xf32>,
    %c14 = arith.constant 14 : index
    %c0_75 = arith.constant 0 : index
    %c0_76 = arith.constant 0 : index
    %284 = vector.load %arg1[%c14, %c0_75, %c0_76] : memref<32x3x128xf32, #tpu.memory_space<vmem>>, vector<1x3x128xf32>
    %285 = vector.shape_cast %284 : vector<1x3x128xf32> to vector<3x128xf32>
    %286 = vector.extract_strided_slice %285 {offsets = [0, 0], sizes = [1, 128], strides = [1, 1]} : vector<3x128xf32> to vector<1x128xf32>
    %287 = vector.broadcast %286 : vector<1x128xf32> to vector<32x128xf32>
    %288 = arith.mulf %287, %0 : vector<32x128xf32>
    %289 = vector.extract_strided_slice %285 {offsets = [1, 0], sizes = [1, 128], strides = [1, 1]} : vector<3x128xf32> to vector<1x128xf32>
    %290 = vector.broadcast %289 : vector<1x128xf32> to vector<32x128xf32>
    %291 = arith.mulf %290, %1 : vector<32x128xf32>
    %292 = arith.addf %288, %291 : vector<32x128xf32>
    %293 = vector.extract_strided_slice %285 {offsets = [2, 0], sizes = [1, 128], strides = [1, 1]} : vector<3x128xf32> to vector<1x128xf32>
    %294 = vector.broadcast %293 : vector<1x128xf32> to vector<32x128xf32>
    %295 = arith.mulf %294, %2 : vector<32x128xf32>
    %296 = arith.addf %292, %295 : vector<32x128xf32>
    %297 = arith.addf %296, %3 : vector<32x128xf32>
    %cst_77 = arith.constant 0.000000e+00 : f32
    %298 = vector.broadcast %cst_77 : f32 to vector<32x128xf32>
    %299 = arith.cmpf oge, %297, %298 : vector<32x128xf32>
    %cst_78 = arith.constant 2.000000e-01 : f32
    %300 = vector.broadcast %cst_78 : f32 to vector<32x128xf32>
    %301 = arith.mulf %300, %297 : vector<32x128xf32>
    %302 = arith.select %299, %297, %301 : vector<32x128xi1>, vector<32x128xf32>
    %c0_79 = arith.constant 0 : index
    %c1792 = arith.constant 1792 : index
    %303 = vector.load %arg4[%c0_79, %c1792] : memref<32x4096xf32, #tpu.memory_space<vmem>>, vector<32x128xf32>
    tpu.vector_store %arg4[%c0_79, %c1792], %302 {strides = array<i32>} : memref<32x4096xf32, #tpu.memory_space<vmem>>, vector<32x128xf32>,
    %c15 = arith.constant 15 : index
    %c0_80 = arith.constant 0 : index
    %c0_81 = arith.constant 0 : index
    %304 = vector.load %arg1[%c15, %c0_80, %c0_81] : memref<32x3x128xf32, #tpu.memory_space<vmem>>, vector<1x3x128xf32>
    %305 = vector.shape_cast %304 : vector<1x3x128xf32> to vector<3x128xf32>
    %306 = vector.extract_strided_slice %305 {offsets = [0, 0], sizes = [1, 128], strides = [1, 1]} : vector<3x128xf32> to vector<1x128xf32>
    %307 = vector.broadcast %306 : vector<1x128xf32> to vector<32x128xf32>
    %308 = arith.mulf %307, %0 : vector<32x128xf32>
    %309 = vector.extract_strided_slice %305 {offsets = [1, 0], sizes = [1, 128], strides = [1, 1]} : vector<3x128xf32> to vector<1x128xf32>
    %310 = vector.broadcast %309 : vector<1x128xf32> to vector<32x128xf32>
    %311 = arith.mulf %310, %1 : vector<32x128xf32>
    %312 = arith.addf %308, %311 : vector<32x128xf32>
    %313 = vector.extract_strided_slice %305 {offsets = [2, 0], sizes = [1, 128], strides = [1, 1]} : vector<3x128xf32> to vector<1x128xf32>
    %314 = vector.broadcast %313 : vector<1x128xf32> to vector<32x128xf32>
    %315 = arith.mulf %314, %2 : vector<32x128xf32>
    %316 = arith.addf %312, %315 : vector<32x128xf32>
    %317 = arith.addf %316, %3 : vector<32x128xf32>
    %cst_82 = arith.constant 0.000000e+00 : f32
    %318 = vector.broadcast %cst_82 : f32 to vector<32x128xf32>
    %319 = arith.cmpf oge, %317, %318 : vector<32x128xf32>
    %cst_83 = arith.constant 2.000000e-01 : f32
    %320 = vector.broadcast %cst_83 : f32 to vector<32x128xf32>
    %321 = arith.mulf %320, %317 : vector<32x128xf32>
    %322 = arith.select %319, %317, %321 : vector<32x128xi1>, vector<32x128xf32>
    %c0_84 = arith.constant 0 : index
    %c1920 = arith.constant 1920 : index
    %323 = vector.load %arg4[%c0_84, %c1920] : memref<32x4096xf32, #tpu.memory_space<vmem>>, vector<32x128xf32>
    tpu.vector_store %arg4[%c0_84, %c1920], %322 {strides = array<i32>} : memref<32x4096xf32, #tpu.memory_space<vmem>>, vector<32x128xf32>,
    %c16 = arith.constant 16 : index
    %c0_85 = arith.constant 0 : index
    %c0_86 = arith.constant 0 : index
    %324 = vector.load %arg1[%c16, %c0_85, %c0_86] : memref<32x3x128xf32, #tpu.memory_space<vmem>>, vector<1x3x128xf32>
    %325 = vector.shape_cast %324 : vector<1x3x128xf32> to vector<3x128xf32>
    %326 = vector.extract_strided_slice %325 {offsets = [0, 0], sizes = [1, 128], strides = [1, 1]} : vector<3x128xf32> to vector<1x128xf32>
    %327 = vector.broadcast %326 : vector<1x128xf32> to vector<32x128xf32>
    %328 = arith.mulf %327, %0 : vector<32x128xf32>
    %329 = vector.extract_strided_slice %325 {offsets = [1, 0], sizes = [1, 128], strides = [1, 1]} : vector<3x128xf32> to vector<1x128xf32>
    %330 = vector.broadcast %329 : vector<1x128xf32> to vector<32x128xf32>
    %331 = arith.mulf %330, %1 : vector<32x128xf32>
    %332 = arith.addf %328, %331 : vector<32x128xf32>
    %333 = vector.extract_strided_slice %325 {offsets = [2, 0], sizes = [1, 128], strides = [1, 1]} : vector<3x128xf32> to vector<1x128xf32>
    %334 = vector.broadcast %333 : vector<1x128xf32> to vector<32x128xf32>
    %335 = arith.mulf %334, %2 : vector<32x128xf32>
    %336 = arith.addf %332, %335 : vector<32x128xf32>
    %337 = arith.addf %336, %3 : vector<32x128xf32>
    %cst_87 = arith.constant 0.000000e+00 : f32
    %338 = vector.broadcast %cst_87 : f32 to vector<32x128xf32>
    %339 = arith.cmpf oge, %337, %338 : vector<32x128xf32>
    %cst_88 = arith.constant 2.000000e-01 : f32
    %340 = vector.broadcast %cst_88 : f32 to vector<32x128xf32>
    %341 = arith.mulf %340, %337 : vector<32x128xf32>
    %342 = arith.select %339, %337, %341 : vector<32x128xi1>, vector<32x128xf32>
    %c0_89 = arith.constant 0 : index
    %c2048 = arith.constant 2048 : index
    %343 = vector.load %arg4[%c0_89, %c2048] : memref<32x4096xf32, #tpu.memory_space<vmem>>, vector<32x128xf32>
    tpu.vector_store %arg4[%c0_89, %c2048], %342 {strides = array<i32>} : memref<32x4096xf32, #tpu.memory_space<vmem>>, vector<32x128xf32>,
    %c17 = arith.constant 17 : index
    %c0_90 = arith.constant 0 : index
    %c0_91 = arith.constant 0 : index
    %344 = vector.load %arg1[%c17, %c0_90, %c0_91] : memref<32x3x128xf32, #tpu.memory_space<vmem>>, vector<1x3x128xf32>
    %345 = vector.shape_cast %344 : vector<1x3x128xf32> to vector<3x128xf32>
    %346 = vector.extract_strided_slice %345 {offsets = [0, 0], sizes = [1, 128], strides = [1, 1]} : vector<3x128xf32> to vector<1x128xf32>
    %347 = vector.broadcast %346 : vector<1x128xf32> to vector<32x128xf32>
    %348 = arith.mulf %347, %0 : vector<32x128xf32>
    %349 = vector.extract_strided_slice %345 {offsets = [1, 0], sizes = [1, 128], strides = [1, 1]} : vector<3x128xf32> to vector<1x128xf32>
    %350 = vector.broadcast %349 : vector<1x128xf32> to vector<32x128xf32>
    %351 = arith.mulf %350, %1 : vector<32x128xf32>
    %352 = arith.addf %348, %351 : vector<32x128xf32>
    %353 = vector.extract_strided_slice %345 {offsets = [2, 0], sizes = [1, 128], strides = [1, 1]} : vector<3x128xf32> to vector<1x128xf32>
    %354 = vector.broadcast %353 : vector<1x128xf32> to vector<32x128xf32>
    %355 = arith.mulf %354, %2 : vector<32x128xf32>
    %356 = arith.addf %352, %355 : vector<32x128xf32>
    %357 = arith.addf %356, %3 : vector<32x128xf32>
    %cst_92 = arith.constant 0.000000e+00 : f32
    %358 = vector.broadcast %cst_92 : f32 to vector<32x128xf32>
    %359 = arith.cmpf oge, %357, %358 : vector<32x128xf32>
    %cst_93 = arith.constant 2.000000e-01 : f32
    %360 = vector.broadcast %cst_93 : f32 to vector<32x128xf32>
    %361 = arith.mulf %360, %357 : vector<32x128xf32>
    %362 = arith.select %359, %357, %361 : vector<32x128xi1>, vector<32x128xf32>
    %c0_94 = arith.constant 0 : index
    %c2176 = arith.constant 2176 : index
    %363 = vector.load %arg4[%c0_94, %c2176] : memref<32x4096xf32, #tpu.memory_space<vmem>>, vector<32x128xf32>
    tpu.vector_store %arg4[%c0_94, %c2176], %362 {strides = array<i32>} : memref<32x4096xf32, #tpu.memory_space<vmem>>, vector<32x128xf32>,
    %c18 = arith.constant 18 : index
    %c0_95 = arith.constant 0 : index
    %c0_96 = arith.constant 0 : index
    %364 = vector.load %arg1[%c18, %c0_95, %c0_96] : memref<32x3x128xf32, #tpu.memory_space<vmem>>, vector<1x3x128xf32>
    %365 = vector.shape_cast %364 : vector<1x3x128xf32> to vector<3x128xf32>
    %366 = vector.extract_strided_slice %365 {offsets = [0, 0], sizes = [1, 128], strides = [1, 1]} : vector<3x128xf32> to vector<1x128xf32>
    %367 = vector.broadcast %366 : vector<1x128xf32> to vector<32x128xf32>
    %368 = arith.mulf %367, %0 : vector<32x128xf32>
    %369 = vector.extract_strided_slice %365 {offsets = [1, 0], sizes = [1, 128], strides = [1, 1]} : vector<3x128xf32> to vector<1x128xf32>
    %370 = vector.broadcast %369 : vector<1x128xf32> to vector<32x128xf32>
    %371 = arith.mulf %370, %1 : vector<32x128xf32>
    %372 = arith.addf %368, %371 : vector<32x128xf32>
    %373 = vector.extract_strided_slice %365 {offsets = [2, 0], sizes = [1, 128], strides = [1, 1]} : vector<3x128xf32> to vector<1x128xf32>
    %374 = vector.broadcast %373 : vector<1x128xf32> to vector<32x128xf32>
    %375 = arith.mulf %374, %2 : vector<32x128xf32>
    %376 = arith.addf %372, %375 : vector<32x128xf32>
    %377 = arith.addf %376, %3 : vector<32x128xf32>
    %cst_97 = arith.constant 0.000000e+00 : f32
    %378 = vector.broadcast %cst_97 : f32 to vector<32x128xf32>
    %379 = arith.cmpf oge, %377, %378 : vector<32x128xf32>
    %cst_98 = arith.constant 2.000000e-01 : f32
    %380 = vector.broadcast %cst_98 : f32 to vector<32x128xf32>
    %381 = arith.mulf %380, %377 : vector<32x128xf32>
    %382 = arith.select %379, %377, %381 : vector<32x128xi1>, vector<32x128xf32>
    %c0_99 = arith.constant 0 : index
    %c2304 = arith.constant 2304 : index
    %383 = vector.load %arg4[%c0_99, %c2304] : memref<32x4096xf32, #tpu.memory_space<vmem>>, vector<32x128xf32>
    tpu.vector_store %arg4[%c0_99, %c2304], %382 {strides = array<i32>} : memref<32x4096xf32, #tpu.memory_space<vmem>>, vector<32x128xf32>,
    %c19 = arith.constant 19 : index
    %c0_100 = arith.constant 0 : index
    %c0_101 = arith.constant 0 : index
    %384 = vector.load %arg1[%c19, %c0_100, %c0_101] : memref<32x3x128xf32, #tpu.memory_space<vmem>>, vector<1x3x128xf32>
    %385 = vector.shape_cast %384 : vector<1x3x128xf32> to vector<3x128xf32>
    %386 = vector.extract_strided_slice %385 {offsets = [0, 0], sizes = [1, 128], strides = [1, 1]} : vector<3x128xf32> to vector<1x128xf32>
    %387 = vector.broadcast %386 : vector<1x128xf32> to vector<32x128xf32>
    %388 = arith.mulf %387, %0 : vector<32x128xf32>
    %389 = vector.extract_strided_slice %385 {offsets = [1, 0], sizes = [1, 128], strides = [1, 1]} : vector<3x128xf32> to vector<1x128xf32>
    %390 = vector.broadcast %389 : vector<1x128xf32> to vector<32x128xf32>
    %391 = arith.mulf %390, %1 : vector<32x128xf32>
    %392 = arith.addf %388, %391 : vector<32x128xf32>
    %393 = vector.extract_strided_slice %385 {offsets = [2, 0], sizes = [1, 128], strides = [1, 1]} : vector<3x128xf32> to vector<1x128xf32>
    %394 = vector.broadcast %393 : vector<1x128xf32> to vector<32x128xf32>
    %395 = arith.mulf %394, %2 : vector<32x128xf32>
    %396 = arith.addf %392, %395 : vector<32x128xf32>
    %397 = arith.addf %396, %3 : vector<32x128xf32>
    %cst_102 = arith.constant 0.000000e+00 : f32
    %398 = vector.broadcast %cst_102 : f32 to vector<32x128xf32>
    %399 = arith.cmpf oge, %397, %398 : vector<32x128xf32>
    %cst_103 = arith.constant 2.000000e-01 : f32
    %400 = vector.broadcast %cst_103 : f32 to vector<32x128xf32>
    %401 = arith.mulf %400, %397 : vector<32x128xf32>
    %402 = arith.select %399, %397, %401 : vector<32x128xi1>, vector<32x128xf32>
    %c0_104 = arith.constant 0 : index
    %c2432 = arith.constant 2432 : index
    %403 = vector.load %arg4[%c0_104, %c2432] : memref<32x4096xf32, #tpu.memory_space<vmem>>, vector<32x128xf32>
    tpu.vector_store %arg4[%c0_104, %c2432], %402 {strides = array<i32>} : memref<32x4096xf32, #tpu.memory_space<vmem>>, vector<32x128xf32>,
    %c20 = arith.constant 20 : index
    %c0_105 = arith.constant 0 : index
    %c0_106 = arith.constant 0 : index
    %404 = vector.load %arg1[%c20, %c0_105, %c0_106] : memref<32x3x128xf32, #tpu.memory_space<vmem>>, vector<1x3x128xf32>
    %405 = vector.shape_cast %404 : vector<1x3x128xf32> to vector<3x128xf32>
    %406 = vector.extract_strided_slice %405 {offsets = [0, 0], sizes = [1, 128], strides = [1, 1]} : vector<3x128xf32> to vector<1x128xf32>
    %407 = vector.broadcast %406 : vector<1x128xf32> to vector<32x128xf32>
    %408 = arith.mulf %407, %0 : vector<32x128xf32>
    %409 = vector.extract_strided_slice %405 {offsets = [1, 0], sizes = [1, 128], strides = [1, 1]} : vector<3x128xf32> to vector<1x128xf32>
    %410 = vector.broadcast %409 : vector<1x128xf32> to vector<32x128xf32>
    %411 = arith.mulf %410, %1 : vector<32x128xf32>
    %412 = arith.addf %408, %411 : vector<32x128xf32>
    %413 = vector.extract_strided_slice %405 {offsets = [2, 0], sizes = [1, 128], strides = [1, 1]} : vector<3x128xf32> to vector<1x128xf32>
    %414 = vector.broadcast %413 : vector<1x128xf32> to vector<32x128xf32>
    %415 = arith.mulf %414, %2 : vector<32x128xf32>
    %416 = arith.addf %412, %415 : vector<32x128xf32>
    %417 = arith.addf %416, %3 : vector<32x128xf32>
    %cst_107 = arith.constant 0.000000e+00 : f32
    %418 = vector.broadcast %cst_107 : f32 to vector<32x128xf32>
    %419 = arith.cmpf oge, %417, %418 : vector<32x128xf32>
    %cst_108 = arith.constant 2.000000e-01 : f32
    %420 = vector.broadcast %cst_108 : f32 to vector<32x128xf32>
    %421 = arith.mulf %420, %417 : vector<32x128xf32>
    %422 = arith.select %419, %417, %421 : vector<32x128xi1>, vector<32x128xf32>
    %c0_109 = arith.constant 0 : index
    %c2560 = arith.constant 2560 : index
    %423 = vector.load %arg4[%c0_109, %c2560] : memref<32x4096xf32, #tpu.memory_space<vmem>>, vector<32x128xf32>
    tpu.vector_store %arg4[%c0_109, %c2560], %422 {strides = array<i32>} : memref<32x4096xf32, #tpu.memory_space<vmem>>, vector<32x128xf32>,
    %c21 = arith.constant 21 : index
    %c0_110 = arith.constant 0 : index
    %c0_111 = arith.constant 0 : index
    %424 = vector.load %arg1[%c21, %c0_110, %c0_111] : memref<32x3x128xf32, #tpu.memory_space<vmem>>, vector<1x3x128xf32>
    %425 = vector.shape_cast %424 : vector<1x3x128xf32> to vector<3x128xf32>
    %426 = vector.extract_strided_slice %425 {offsets = [0, 0], sizes = [1, 128], strides = [1, 1]} : vector<3x128xf32> to vector<1x128xf32>
    %427 = vector.broadcast %426 : vector<1x128xf32> to vector<32x128xf32>
    %428 = arith.mulf %427, %0 : vector<32x128xf32>
    %429 = vector.extract_strided_slice %425 {offsets = [1, 0], sizes = [1, 128], strides = [1, 1]} : vector<3x128xf32> to vector<1x128xf32>
    %430 = vector.broadcast %429 : vector<1x128xf32> to vector<32x128xf32>
    %431 = arith.mulf %430, %1 : vector<32x128xf32>
    %432 = arith.addf %428, %431 : vector<32x128xf32>
    %433 = vector.extract_strided_slice %425 {offsets = [2, 0], sizes = [1, 128], strides = [1, 1]} : vector<3x128xf32> to vector<1x128xf32>
    %434 = vector.broadcast %433 : vector<1x128xf32> to vector<32x128xf32>
    %435 = arith.mulf %434, %2 : vector<32x128xf32>
    %436 = arith.addf %432, %435 : vector<32x128xf32>
    %437 = arith.addf %436, %3 : vector<32x128xf32>
    %cst_112 = arith.constant 0.000000e+00 : f32
    %438 = vector.broadcast %cst_112 : f32 to vector<32x128xf32>
    %439 = arith.cmpf oge, %437, %438 : vector<32x128xf32>
    %cst_113 = arith.constant 2.000000e-01 : f32
    %440 = vector.broadcast %cst_113 : f32 to vector<32x128xf32>
    %441 = arith.mulf %440, %437 : vector<32x128xf32>
    %442 = arith.select %439, %437, %441 : vector<32x128xi1>, vector<32x128xf32>
    %c0_114 = arith.constant 0 : index
    %c2688 = arith.constant 2688 : index
    %443 = vector.load %arg4[%c0_114, %c2688] : memref<32x4096xf32, #tpu.memory_space<vmem>>, vector<32x128xf32>
    tpu.vector_store %arg4[%c0_114, %c2688], %442 {strides = array<i32>} : memref<32x4096xf32, #tpu.memory_space<vmem>>, vector<32x128xf32>,
    %c22 = arith.constant 22 : index
    %c0_115 = arith.constant 0 : index
    %c0_116 = arith.constant 0 : index
    %444 = vector.load %arg1[%c22, %c0_115, %c0_116] : memref<32x3x128xf32, #tpu.memory_space<vmem>>, vector<1x3x128xf32>
    %445 = vector.shape_cast %444 : vector<1x3x128xf32> to vector<3x128xf32>
    %446 = vector.extract_strided_slice %445 {offsets = [0, 0], sizes = [1, 128], strides = [1, 1]} : vector<3x128xf32> to vector<1x128xf32>
    %447 = vector.broadcast %446 : vector<1x128xf32> to vector<32x128xf32>
    %448 = arith.mulf %447, %0 : vector<32x128xf32>
    %449 = vector.extract_strided_slice %445 {offsets = [1, 0], sizes = [1, 128], strides = [1, 1]} : vector<3x128xf32> to vector<1x128xf32>
    %450 = vector.broadcast %449 : vector<1x128xf32> to vector<32x128xf32>
    %451 = arith.mulf %450, %1 : vector<32x128xf32>
    %452 = arith.addf %448, %451 : vector<32x128xf32>
    %453 = vector.extract_strided_slice %445 {offsets = [2, 0], sizes = [1, 128], strides = [1, 1]} : vector<3x128xf32> to vector<1x128xf32>
    %454 = vector.broadcast %453 : vector<1x128xf32> to vector<32x128xf32>
    %455 = arith.mulf %454, %2 : vector<32x128xf32>
    %456 = arith.addf %452, %455 : vector<32x128xf32>
    %457 = arith.addf %456, %3 : vector<32x128xf32>
    %cst_117 = arith.constant 0.000000e+00 : f32
    %458 = vector.broadcast %cst_117 : f32 to vector<32x128xf32>
    %459 = arith.cmpf oge, %457, %458 : vector<32x128xf32>
    %cst_118 = arith.constant 2.000000e-01 : f32
    %460 = vector.broadcast %cst_118 : f32 to vector<32x128xf32>
    %461 = arith.mulf %460, %457 : vector<32x128xf32>
    %462 = arith.select %459, %457, %461 : vector<32x128xi1>, vector<32x128xf32>
    %c0_119 = arith.constant 0 : index
    %c2816 = arith.constant 2816 : index
    %463 = vector.load %arg4[%c0_119, %c2816] : memref<32x4096xf32, #tpu.memory_space<vmem>>, vector<32x128xf32>
    tpu.vector_store %arg4[%c0_119, %c2816], %462 {strides = array<i32>} : memref<32x4096xf32, #tpu.memory_space<vmem>>, vector<32x128xf32>,
    %c23 = arith.constant 23 : index
    %c0_120 = arith.constant 0 : index
    %c0_121 = arith.constant 0 : index
    %464 = vector.load %arg1[%c23, %c0_120, %c0_121] : memref<32x3x128xf32, #tpu.memory_space<vmem>>, vector<1x3x128xf32>
    %465 = vector.shape_cast %464 : vector<1x3x128xf32> to vector<3x128xf32>
    %466 = vector.extract_strided_slice %465 {offsets = [0, 0], sizes = [1, 128], strides = [1, 1]} : vector<3x128xf32> to vector<1x128xf32>
    %467 = vector.broadcast %466 : vector<1x128xf32> to vector<32x128xf32>
    %468 = arith.mulf %467, %0 : vector<32x128xf32>
    %469 = vector.extract_strided_slice %465 {offsets = [1, 0], sizes = [1, 128], strides = [1, 1]} : vector<3x128xf32> to vector<1x128xf32>
    %470 = vector.broadcast %469 : vector<1x128xf32> to vector<32x128xf32>
    %471 = arith.mulf %470, %1 : vector<32x128xf32>
    %472 = arith.addf %468, %471 : vector<32x128xf32>
    %473 = vector.extract_strided_slice %465 {offsets = [2, 0], sizes = [1, 128], strides = [1, 1]} : vector<3x128xf32> to vector<1x128xf32>
    %474 = vector.broadcast %473 : vector<1x128xf32> to vector<32x128xf32>
    %475 = arith.mulf %474, %2 : vector<32x128xf32>
    %476 = arith.addf %472, %475 : vector<32x128xf32>
    %477 = arith.addf %476, %3 : vector<32x128xf32>
    %cst_122 = arith.constant 0.000000e+00 : f32
    %478 = vector.broadcast %cst_122 : f32 to vector<32x128xf32>
    %479 = arith.cmpf oge, %477, %478 : vector<32x128xf32>
    %cst_123 = arith.constant 2.000000e-01 : f32
    %480 = vector.broadcast %cst_123 : f32 to vector<32x128xf32>
    %481 = arith.mulf %480, %477 : vector<32x128xf32>
    %482 = arith.select %479, %477, %481 : vector<32x128xi1>, vector<32x128xf32>
    %c0_124 = arith.constant 0 : index
    %c2944 = arith.constant 2944 : index
    %483 = vector.load %arg4[%c0_124, %c2944] : memref<32x4096xf32, #tpu.memory_space<vmem>>, vector<32x128xf32>
    tpu.vector_store %arg4[%c0_124, %c2944], %482 {strides = array<i32>} : memref<32x4096xf32, #tpu.memory_space<vmem>>, vector<32x128xf32>,
    %c24 = arith.constant 24 : index
    %c0_125 = arith.constant 0 : index
    %c0_126 = arith.constant 0 : index
    %484 = vector.load %arg1[%c24, %c0_125, %c0_126] : memref<32x3x128xf32, #tpu.memory_space<vmem>>, vector<1x3x128xf32>
    %485 = vector.shape_cast %484 : vector<1x3x128xf32> to vector<3x128xf32>
    %486 = vector.extract_strided_slice %485 {offsets = [0, 0], sizes = [1, 128], strides = [1, 1]} : vector<3x128xf32> to vector<1x128xf32>
    %487 = vector.broadcast %486 : vector<1x128xf32> to vector<32x128xf32>
    %488 = arith.mulf %487, %0 : vector<32x128xf32>
    %489 = vector.extract_strided_slice %485 {offsets = [1, 0], sizes = [1, 128], strides = [1, 1]} : vector<3x128xf32> to vector<1x128xf32>
    %490 = vector.broadcast %489 : vector<1x128xf32> to vector<32x128xf32>
    %491 = arith.mulf %490, %1 : vector<32x128xf32>
    %492 = arith.addf %488, %491 : vector<32x128xf32>
    %493 = vector.extract_strided_slice %485 {offsets = [2, 0], sizes = [1, 128], strides = [1, 1]} : vector<3x128xf32> to vector<1x128xf32>
    %494 = vector.broadcast %493 : vector<1x128xf32> to vector<32x128xf32>
    %495 = arith.mulf %494, %2 : vector<32x128xf32>
    %496 = arith.addf %492, %495 : vector<32x128xf32>
    %497 = arith.addf %496, %3 : vector<32x128xf32>
    %cst_127 = arith.constant 0.000000e+00 : f32
    %498 = vector.broadcast %cst_127 : f32 to vector<32x128xf32>
    %499 = arith.cmpf oge, %497, %498 : vector<32x128xf32>
    %cst_128 = arith.constant 2.000000e-01 : f32
    %500 = vector.broadcast %cst_128 : f32 to vector<32x128xf32>
    %501 = arith.mulf %500, %497 : vector<32x128xf32>
    %502 = arith.select %499, %497, %501 : vector<32x128xi1>, vector<32x128xf32>
    %c0_129 = arith.constant 0 : index
    %c3072 = arith.constant 3072 : index
    %503 = vector.load %arg4[%c0_129, %c3072] : memref<32x4096xf32, #tpu.memory_space<vmem>>, vector<32x128xf32>
    tpu.vector_store %arg4[%c0_129, %c3072], %502 {strides = array<i32>} : memref<32x4096xf32, #tpu.memory_space<vmem>>, vector<32x128xf32>,
    %c25 = arith.constant 25 : index
    %c0_130 = arith.constant 0 : index
    %c0_131 = arith.constant 0 : index
    %504 = vector.load %arg1[%c25, %c0_130, %c0_131] : memref<32x3x128xf32, #tpu.memory_space<vmem>>, vector<1x3x128xf32>
    %505 = vector.shape_cast %504 : vector<1x3x128xf32> to vector<3x128xf32>
    %506 = vector.extract_strided_slice %505 {offsets = [0, 0], sizes = [1, 128], strides = [1, 1]} : vector<3x128xf32> to vector<1x128xf32>
    %507 = vector.broadcast %506 : vector<1x128xf32> to vector<32x128xf32>
    %508 = arith.mulf %507, %0 : vector<32x128xf32>
    %509 = vector.extract_strided_slice %505 {offsets = [1, 0], sizes = [1, 128], strides = [1, 1]} : vector<3x128xf32> to vector<1x128xf32>
    %510 = vector.broadcast %509 : vector<1x128xf32> to vector<32x128xf32>
    %511 = arith.mulf %510, %1 : vector<32x128xf32>
    %512 = arith.addf %508, %511 : vector<32x128xf32>
    %513 = vector.extract_strided_slice %505 {offsets = [2, 0], sizes = [1, 128], strides = [1, 1]} : vector<3x128xf32> to vector<1x128xf32>
    %514 = vector.broadcast %513 : vector<1x128xf32> to vector<32x128xf32>
    %515 = arith.mulf %514, %2 : vector<32x128xf32>
    %516 = arith.addf %512, %515 : vector<32x128xf32>
    %517 = arith.addf %516, %3 : vector<32x128xf32>
    %cst_132 = arith.constant 0.000000e+00 : f32
    %518 = vector.broadcast %cst_132 : f32 to vector<32x128xf32>
    %519 = arith.cmpf oge, %517, %518 : vector<32x128xf32>
    %cst_133 = arith.constant 2.000000e-01 : f32
    %520 = vector.broadcast %cst_133 : f32 to vector<32x128xf32>
    %521 = arith.mulf %520, %517 : vector<32x128xf32>
    %522 = arith.select %519, %517, %521 : vector<32x128xi1>, vector<32x128xf32>
    %c0_134 = arith.constant 0 : index
    %c3200 = arith.constant 3200 : index
    %523 = vector.load %arg4[%c0_134, %c3200] : memref<32x4096xf32, #tpu.memory_space<vmem>>, vector<32x128xf32>
    tpu.vector_store %arg4[%c0_134, %c3200], %522 {strides = array<i32>} : memref<32x4096xf32, #tpu.memory_space<vmem>>, vector<32x128xf32>,
    %c26 = arith.constant 26 : index
    %c0_135 = arith.constant 0 : index
    %c0_136 = arith.constant 0 : index
    %524 = vector.load %arg1[%c26, %c0_135, %c0_136] : memref<32x3x128xf32, #tpu.memory_space<vmem>>, vector<1x3x128xf32>
    %525 = vector.shape_cast %524 : vector<1x3x128xf32> to vector<3x128xf32>
    %526 = vector.extract_strided_slice %525 {offsets = [0, 0], sizes = [1, 128], strides = [1, 1]} : vector<3x128xf32> to vector<1x128xf32>
    %527 = vector.broadcast %526 : vector<1x128xf32> to vector<32x128xf32>
    %528 = arith.mulf %527, %0 : vector<32x128xf32>
    %529 = vector.extract_strided_slice %525 {offsets = [1, 0], sizes = [1, 128], strides = [1, 1]} : vector<3x128xf32> to vector<1x128xf32>
    %530 = vector.broadcast %529 : vector<1x128xf32> to vector<32x128xf32>
    %531 = arith.mulf %530, %1 : vector<32x128xf32>
    %532 = arith.addf %528, %531 : vector<32x128xf32>
    %533 = vector.extract_strided_slice %525 {offsets = [2, 0], sizes = [1, 128], strides = [1, 1]} : vector<3x128xf32> to vector<1x128xf32>
    %534 = vector.broadcast %533 : vector<1x128xf32> to vector<32x128xf32>
    %535 = arith.mulf %534, %2 : vector<32x128xf32>
    %536 = arith.addf %532, %535 : vector<32x128xf32>
    %537 = arith.addf %536, %3 : vector<32x128xf32>
    %cst_137 = arith.constant 0.000000e+00 : f32
    %538 = vector.broadcast %cst_137 : f32 to vector<32x128xf32>
    %539 = arith.cmpf oge, %537, %538 : vector<32x128xf32>
    %cst_138 = arith.constant 2.000000e-01 : f32
    %540 = vector.broadcast %cst_138 : f32 to vector<32x128xf32>
    %541 = arith.mulf %540, %537 : vector<32x128xf32>
    %542 = arith.select %539, %537, %541 : vector<32x128xi1>, vector<32x128xf32>
    %c0_139 = arith.constant 0 : index
    %c3328 = arith.constant 3328 : index
    %543 = vector.load %arg4[%c0_139, %c3328] : memref<32x4096xf32, #tpu.memory_space<vmem>>, vector<32x128xf32>
    tpu.vector_store %arg4[%c0_139, %c3328], %542 {strides = array<i32>} : memref<32x4096xf32, #tpu.memory_space<vmem>>, vector<32x128xf32>,
    %c27 = arith.constant 27 : index
    %c0_140 = arith.constant 0 : index
    %c0_141 = arith.constant 0 : index
    %544 = vector.load %arg1[%c27, %c0_140, %c0_141] : memref<32x3x128xf32, #tpu.memory_space<vmem>>, vector<1x3x128xf32>
    %545 = vector.shape_cast %544 : vector<1x3x128xf32> to vector<3x128xf32>
    %546 = vector.extract_strided_slice %545 {offsets = [0, 0], sizes = [1, 128], strides = [1, 1]} : vector<3x128xf32> to vector<1x128xf32>
    %547 = vector.broadcast %546 : vector<1x128xf32> to vector<32x128xf32>
    %548 = arith.mulf %547, %0 : vector<32x128xf32>
    %549 = vector.extract_strided_slice %545 {offsets = [1, 0], sizes = [1, 128], strides = [1, 1]} : vector<3x128xf32> to vector<1x128xf32>
    %550 = vector.broadcast %549 : vector<1x128xf32> to vector<32x128xf32>
    %551 = arith.mulf %550, %1 : vector<32x128xf32>
    %552 = arith.addf %548, %551 : vector<32x128xf32>
    %553 = vector.extract_strided_slice %545 {offsets = [2, 0], sizes = [1, 128], strides = [1, 1]} : vector<3x128xf32> to vector<1x128xf32>
    %554 = vector.broadcast %553 : vector<1x128xf32> to vector<32x128xf32>
    %555 = arith.mulf %554, %2 : vector<32x128xf32>
    %556 = arith.addf %552, %555 : vector<32x128xf32>
    %557 = arith.addf %556, %3 : vector<32x128xf32>
    %cst_142 = arith.constant 0.000000e+00 : f32
    %558 = vector.broadcast %cst_142 : f32 to vector<32x128xf32>
    %559 = arith.cmpf oge, %557, %558 : vector<32x128xf32>
    %cst_143 = arith.constant 2.000000e-01 : f32
    %560 = vector.broadcast %cst_143 : f32 to vector<32x128xf32>
    %561 = arith.mulf %560, %557 : vector<32x128xf32>
    %562 = arith.select %559, %557, %561 : vector<32x128xi1>, vector<32x128xf32>
    %c0_144 = arith.constant 0 : index
    %c3456 = arith.constant 3456 : index
    %563 = vector.load %arg4[%c0_144, %c3456] : memref<32x4096xf32, #tpu.memory_space<vmem>>, vector<32x128xf32>
    tpu.vector_store %arg4[%c0_144, %c3456], %562 {strides = array<i32>} : memref<32x4096xf32, #tpu.memory_space<vmem>>, vector<32x128xf32>,
    %c28 = arith.constant 28 : index
    %c0_145 = arith.constant 0 : index
    %c0_146 = arith.constant 0 : index
    %564 = vector.load %arg1[%c28, %c0_145, %c0_146] : memref<32x3x128xf32, #tpu.memory_space<vmem>>, vector<1x3x128xf32>
    %565 = vector.shape_cast %564 : vector<1x3x128xf32> to vector<3x128xf32>
    %566 = vector.extract_strided_slice %565 {offsets = [0, 0], sizes = [1, 128], strides = [1, 1]} : vector<3x128xf32> to vector<1x128xf32>
    %567 = vector.broadcast %566 : vector<1x128xf32> to vector<32x128xf32>
    %568 = arith.mulf %567, %0 : vector<32x128xf32>
    %569 = vector.extract_strided_slice %565 {offsets = [1, 0], sizes = [1, 128], strides = [1, 1]} : vector<3x128xf32> to vector<1x128xf32>
    %570 = vector.broadcast %569 : vector<1x128xf32> to vector<32x128xf32>
    %571 = arith.mulf %570, %1 : vector<32x128xf32>
    %572 = arith.addf %568, %571 : vector<32x128xf32>
    %573 = vector.extract_strided_slice %565 {offsets = [2, 0], sizes = [1, 128], strides = [1, 1]} : vector<3x128xf32> to vector<1x128xf32>
    %574 = vector.broadcast %573 : vector<1x128xf32> to vector<32x128xf32>
    %575 = arith.mulf %574, %2 : vector<32x128xf32>
    %576 = arith.addf %572, %575 : vector<32x128xf32>
    %577 = arith.addf %576, %3 : vector<32x128xf32>
    %cst_147 = arith.constant 0.000000e+00 : f32
    %578 = vector.broadcast %cst_147 : f32 to vector<32x128xf32>
    %579 = arith.cmpf oge, %577, %578 : vector<32x128xf32>
    %cst_148 = arith.constant 2.000000e-01 : f32
    %580 = vector.broadcast %cst_148 : f32 to vector<32x128xf32>
    %581 = arith.mulf %580, %577 : vector<32x128xf32>
    %582 = arith.select %579, %577, %581 : vector<32x128xi1>, vector<32x128xf32>
    %c0_149 = arith.constant 0 : index
    %c3584 = arith.constant 3584 : index
    %583 = vector.load %arg4[%c0_149, %c3584] : memref<32x4096xf32, #tpu.memory_space<vmem>>, vector<32x128xf32>
    tpu.vector_store %arg4[%c0_149, %c3584], %582 {strides = array<i32>} : memref<32x4096xf32, #tpu.memory_space<vmem>>, vector<32x128xf32>,
    %c29 = arith.constant 29 : index
    %c0_150 = arith.constant 0 : index
    %c0_151 = arith.constant 0 : index
    %584 = vector.load %arg1[%c29, %c0_150, %c0_151] : memref<32x3x128xf32, #tpu.memory_space<vmem>>, vector<1x3x128xf32>
    %585 = vector.shape_cast %584 : vector<1x3x128xf32> to vector<3x128xf32>
    %586 = vector.extract_strided_slice %585 {offsets = [0, 0], sizes = [1, 128], strides = [1, 1]} : vector<3x128xf32> to vector<1x128xf32>
    %587 = vector.broadcast %586 : vector<1x128xf32> to vector<32x128xf32>
    %588 = arith.mulf %587, %0 : vector<32x128xf32>
    %589 = vector.extract_strided_slice %585 {offsets = [1, 0], sizes = [1, 128], strides = [1, 1]} : vector<3x128xf32> to vector<1x128xf32>
    %590 = vector.broadcast %589 : vector<1x128xf32> to vector<32x128xf32>
    %591 = arith.mulf %590, %1 : vector<32x128xf32>
    %592 = arith.addf %588, %591 : vector<32x128xf32>
    %593 = vector.extract_strided_slice %585 {offsets = [2, 0], sizes = [1, 128], strides = [1, 1]} : vector<3x128xf32> to vector<1x128xf32>
    %594 = vector.broadcast %593 : vector<1x128xf32> to vector<32x128xf32>
    %595 = arith.mulf %594, %2 : vector<32x128xf32>
    %596 = arith.addf %592, %595 : vector<32x128xf32>
    %597 = arith.addf %596, %3 : vector<32x128xf32>
    %cst_152 = arith.constant 0.000000e+00 : f32
    %598 = vector.broadcast %cst_152 : f32 to vector<32x128xf32>
    %599 = arith.cmpf oge, %597, %598 : vector<32x128xf32>
    %cst_153 = arith.constant 2.000000e-01 : f32
    %600 = vector.broadcast %cst_153 : f32 to vector<32x128xf32>
    %601 = arith.mulf %600, %597 : vector<32x128xf32>
    %602 = arith.select %599, %597, %601 : vector<32x128xi1>, vector<32x128xf32>
    %c0_154 = arith.constant 0 : index
    %c3712 = arith.constant 3712 : index
    %603 = vector.load %arg4[%c0_154, %c3712] : memref<32x4096xf32, #tpu.memory_space<vmem>>, vector<32x128xf32>
    tpu.vector_store %arg4[%c0_154, %c3712], %602 {strides = array<i32>} : memref<32x4096xf32, #tpu.memory_space<vmem>>, vector<32x128xf32>,
    %c30 = arith.constant 30 : index
    %c0_155 = arith.constant 0 : index
    %c0_156 = arith.constant 0 : index
    %604 = vector.load %arg1[%c30, %c0_155, %c0_156] : memref<32x3x128xf32, #tpu.memory_space<vmem>>, vector<1x3x128xf32>
    %605 = vector.shape_cast %604 : vector<1x3x128xf32> to vector<3x128xf32>
    %606 = vector.extract_strided_slice %605 {offsets = [0, 0], sizes = [1, 128], strides = [1, 1]} : vector<3x128xf32> to vector<1x128xf32>
    %607 = vector.broadcast %606 : vector<1x128xf32> to vector<32x128xf32>
    %608 = arith.mulf %607, %0 : vector<32x128xf32>
    %609 = vector.extract_strided_slice %605 {offsets = [1, 0], sizes = [1, 128], strides = [1, 1]} : vector<3x128xf32> to vector<1x128xf32>
    %610 = vector.broadcast %609 : vector<1x128xf32> to vector<32x128xf32>
    %611 = arith.mulf %610, %1 : vector<32x128xf32>
    %612 = arith.addf %608, %611 : vector<32x128xf32>
    %613 = vector.extract_strided_slice %605 {offsets = [2, 0], sizes = [1, 128], strides = [1, 1]} : vector<3x128xf32> to vector<1x128xf32>
    %614 = vector.broadcast %613 : vector<1x128xf32> to vector<32x128xf32>
    %615 = arith.mulf %614, %2 : vector<32x128xf32>
    %616 = arith.addf %612, %615 : vector<32x128xf32>
    %617 = arith.addf %616, %3 : vector<32x128xf32>
    %cst_157 = arith.constant 0.000000e+00 : f32
    %618 = vector.broadcast %cst_157 : f32 to vector<32x128xf32>
    %619 = arith.cmpf oge, %617, %618 : vector<32x128xf32>
    %cst_158 = arith.constant 2.000000e-01 : f32
    %620 = vector.broadcast %cst_158 : f32 to vector<32x128xf32>
    %621 = arith.mulf %620, %617 : vector<32x128xf32>
    %622 = arith.select %619, %617, %621 : vector<32x128xi1>, vector<32x128xf32>
    %c0_159 = arith.constant 0 : index
    %c3840 = arith.constant 3840 : index
    %623 = vector.load %arg4[%c0_159, %c3840] : memref<32x4096xf32, #tpu.memory_space<vmem>>, vector<32x128xf32>
    tpu.vector_store %arg4[%c0_159, %c3840], %622 {strides = array<i32>} : memref<32x4096xf32, #tpu.memory_space<vmem>>, vector<32x128xf32>,
    %c31 = arith.constant 31 : index
    %c0_160 = arith.constant 0 : index
    %c0_161 = arith.constant 0 : index
    %624 = vector.load %arg1[%c31, %c0_160, %c0_161] : memref<32x3x128xf32, #tpu.memory_space<vmem>>, vector<1x3x128xf32>
    %625 = vector.shape_cast %624 : vector<1x3x128xf32> to vector<3x128xf32>
    %626 = vector.extract_strided_slice %625 {offsets = [0, 0], sizes = [1, 128], strides = [1, 1]} : vector<3x128xf32> to vector<1x128xf32>
    %627 = vector.broadcast %626 : vector<1x128xf32> to vector<32x128xf32>
    %628 = arith.mulf %627, %0 : vector<32x128xf32>
    %629 = vector.extract_strided_slice %625 {offsets = [1, 0], sizes = [1, 128], strides = [1, 1]} : vector<3x128xf32> to vector<1x128xf32>
    %630 = vector.broadcast %629 : vector<1x128xf32> to vector<32x128xf32>
    %631 = arith.mulf %630, %1 : vector<32x128xf32>
    %632 = arith.addf %628, %631 : vector<32x128xf32>
    %633 = vector.extract_strided_slice %625 {offsets = [2, 0], sizes = [1, 128], strides = [1, 1]} : vector<3x128xf32> to vector<1x128xf32>
    %634 = vector.broadcast %633 : vector<1x128xf32> to vector<32x128xf32>
    %635 = arith.mulf %634, %2 : vector<32x128xf32>
    %636 = arith.addf %632, %635 : vector<32x128xf32>
    %637 = arith.addf %636, %3 : vector<32x128xf32>
    %cst_162 = arith.constant 0.000000e+00 : f32
    %638 = vector.broadcast %cst_162 : f32 to vector<32x128xf32>
    %639 = arith.cmpf oge, %637, %638 : vector<32x128xf32>
    %cst_163 = arith.constant 2.000000e-01 : f32
    %640 = vector.broadcast %cst_163 : f32 to vector<32x128xf32>
    %641 = arith.mulf %640, %637 : vector<32x128xf32>
    %642 = arith.select %639, %637, %641 : vector<32x128xi1>, vector<32x128xf32>
    %c0_164 = arith.constant 0 : index
    %c3968 = arith.constant 3968 : index
    %643 = vector.load %arg4[%c0_164, %c3968] : memref<32x4096xf32, #tpu.memory_space<vmem>>, vector<32x128xf32>
    tpu.vector_store %arg4[%c0_164, %c3968], %642 {strides = array<i32>} : memref<32x4096xf32, #tpu.memory_space<vmem>>, vector<32x128xf32>,
    %c128_165 = arith.constant 128 : index
    %c0_166 = arith.constant 0 : index
    %644 = vector.load %arg2[%c128_165, %c0_166] : memref<464x128xf32, #tpu.memory_space<vmem>>, vector<64x32xf32>
    %c192 = arith.constant 192 : index
    %c0_167 = arith.constant 0 : index
    %645 = vector.load %arg2[%c192, %c0_167] : memref<464x128xf32, #tpu.memory_space<vmem>>, vector<64x1xf32>
    %c0_168 = arith.constant 0 : index
    %c0_169 = arith.constant 0 : index
    %646 = vector.load %arg4[%c0_168, %c0_169] : memref<32x4096xf32, #tpu.memory_space<vmem>>, vector<32x4096xf32>
    %cst_170 = arith.constant dense<0.000000e+00> : vector<64x4096xf32>
    %647 = tpu.matmul %644, %646, %cst_170 {dimension_numbers = #tpu.dot_dimension_numbers<[1], [0], [0], [1], [0, 0, 1, 1], [], []>} : vector<64x32xf32>, vector<32x4096xf32>, vector<64x4096xf32> -> vector<64x4096xf32>
    %648 = vector.broadcast %645 : vector<64x1xf32> to vector<64x4096xf32>
    %649 = arith.addf %647, %648 : vector<64x4096xf32>
    %cst_171 = arith.constant 0.000000e+00 : f32
    %650 = vector.broadcast %cst_171 : f32 to vector<64x4096xf32>
    %651 = arith.cmpf oge, %649, %650 : vector<64x4096xf32>
    %cst_172 = arith.constant 2.000000e-01 : f32
    %652 = vector.broadcast %cst_172 : f32 to vector<64x4096xf32>
    %653 = arith.mulf %652, %649 : vector<64x4096xf32>
    %654 = arith.select %651, %649, %653 : vector<64x4096xi1>, vector<64x4096xf32>
    %655 = vector.extract_strided_slice %654 {offsets = [0, 0], sizes = [64, 128], strides = [1, 1]} : vector<64x4096xf32> to vector<64x128xf32>
    %cst_173 = arith.constant dense<0xFF800000> : vector<64xf32>
    %656 = vector.multi_reduction <maximumf>, %655, %cst_173 [1] : vector<64x128xf32> to vector<64xf32>
    %657 = vector.shape_cast %656 : vector<64xf32> to vector<64x1xf32>
    %c0_174 = arith.constant 0 : index
    %c0_175 = arith.constant 0 : index
    %658 = vector.load %arg5[%c0_174, %c0_175] : memref<64x32xf32, #tpu.memory_space<vmem>>, vector<64x1xf32>
    tpu.vector_store %arg5[%c0_174, %c0_175], %657 {strides = array<i32>} : memref<64x32xf32, #tpu.memory_space<vmem>>, vector<64x1xf32>,
    %659 = vector.extract_strided_slice %654 {offsets = [0, 128], sizes = [64, 128], strides = [1, 1]} : vector<64x4096xf32> to vector<64x128xf32>
    %cst_176 = arith.constant dense<0xFF800000> : vector<64xf32>
    %660 = vector.multi_reduction <maximumf>, %659, %cst_176 [1] : vector<64x128xf32> to vector<64xf32>
    %661 = vector.shape_cast %660 : vector<64xf32> to vector<64x1xf32>
    %c0_177 = arith.constant 0 : index
    %c1_178 = arith.constant 1 : index
    %662 = vector.load %arg5[%c0_177, %c1_178] : memref<64x32xf32, #tpu.memory_space<vmem>>, vector<64x1xf32>
    tpu.vector_store %arg5[%c0_177, %c1_178], %661 {strides = array<i32>} : memref<64x32xf32, #tpu.memory_space<vmem>>, vector<64x1xf32>,
    %663 = vector.extract_strided_slice %654 {offsets = [0, 256], sizes = [64, 128], strides = [1, 1]} : vector<64x4096xf32> to vector<64x128xf32>
    %cst_179 = arith.constant dense<0xFF800000> : vector<64xf32>
    %664 = vector.multi_reduction <maximumf>, %663, %cst_179 [1] : vector<64x128xf32> to vector<64xf32>
    %665 = vector.shape_cast %664 : vector<64xf32> to vector<64x1xf32>
    %c0_180 = arith.constant 0 : index
    %c2_181 = arith.constant 2 : index
    %666 = vector.load %arg5[%c0_180, %c2_181] : memref<64x32xf32, #tpu.memory_space<vmem>>, vector<64x1xf32>
    tpu.vector_store %arg5[%c0_180, %c2_181], %665 {strides = array<i32>} : memref<64x32xf32, #tpu.memory_space<vmem>>, vector<64x1xf32>,
    %667 = vector.extract_strided_slice %654 {offsets = [0, 384], sizes = [64, 128], strides = [1, 1]} : vector<64x4096xf32> to vector<64x128xf32>
    %cst_182 = arith.constant dense<0xFF800000> : vector<64xf32>
    %668 = vector.multi_reduction <maximumf>, %667, %cst_182 [1] : vector<64x128xf32> to vector<64xf32>
    %669 = vector.shape_cast %668 : vector<64xf32> to vector<64x1xf32>
    %c0_183 = arith.constant 0 : index
    %c3_184 = arith.constant 3 : index
    %670 = vector.load %arg5[%c0_183, %c3_184] : memref<64x32xf32, #tpu.memory_space<vmem>>, vector<64x1xf32>
    tpu.vector_store %arg5[%c0_183, %c3_184], %669 {strides = array<i32>} : memref<64x32xf32, #tpu.memory_space<vmem>>, vector<64x1xf32>,
    %671 = vector.extract_strided_slice %654 {offsets = [0, 512], sizes = [64, 128], strides = [1, 1]} : vector<64x4096xf32> to vector<64x128xf32>
    %cst_185 = arith.constant dense<0xFF800000> : vector<64xf32>
    %672 = vector.multi_reduction <maximumf>, %671, %cst_185 [1] : vector<64x128xf32> to vector<64xf32>
    %673 = vector.shape_cast %672 : vector<64xf32> to vector<64x1xf32>
    %c0_186 = arith.constant 0 : index
    %c4_187 = arith.constant 4 : index
    %674 = vector.load %arg5[%c0_186, %c4_187] : memref<64x32xf32, #tpu.memory_space<vmem>>, vector<64x1xf32>
    tpu.vector_store %arg5[%c0_186, %c4_187], %673 {strides = array<i32>} : memref<64x32xf32, #tpu.memory_space<vmem>>, vector<64x1xf32>,
    %675 = vector.extract_strided_slice %654 {offsets = [0, 640], sizes = [64, 128], strides = [1, 1]} : vector<64x4096xf32> to vector<64x128xf32>
    %cst_188 = arith.constant dense<0xFF800000> : vector<64xf32>
    %676 = vector.multi_reduction <maximumf>, %675, %cst_188 [1] : vector<64x128xf32> to vector<64xf32>
    %677 = vector.shape_cast %676 : vector<64xf32> to vector<64x1xf32>
    %c0_189 = arith.constant 0 : index
    %c5_190 = arith.constant 5 : index
    %678 = vector.load %arg5[%c0_189, %c5_190] : memref<64x32xf32, #tpu.memory_space<vmem>>, vector<64x1xf32>
    tpu.vector_store %arg5[%c0_189, %c5_190], %677 {strides = array<i32>} : memref<64x32xf32, #tpu.memory_space<vmem>>, vector<64x1xf32>,
    %679 = vector.extract_strided_slice %654 {offsets = [0, 768], sizes = [64, 128], strides = [1, 1]} : vector<64x4096xf32> to vector<64x128xf32>
    %cst_191 = arith.constant dense<0xFF800000> : vector<64xf32>
    %680 = vector.multi_reduction <maximumf>, %679, %cst_191 [1] : vector<64x128xf32> to vector<64xf32>
    %681 = vector.shape_cast %680 : vector<64xf32> to vector<64x1xf32>
    %c0_192 = arith.constant 0 : index
    %c6_193 = arith.constant 6 : index
    %682 = vector.load %arg5[%c0_192, %c6_193] : memref<64x32xf32, #tpu.memory_space<vmem>>, vector<64x1xf32>
    tpu.vector_store %arg5[%c0_192, %c6_193], %681 {strides = array<i32>} : memref<64x32xf32, #tpu.memory_space<vmem>>, vector<64x1xf32>,
    %683 = vector.extract_strided_slice %654 {offsets = [0, 896], sizes = [64, 128], strides = [1, 1]} : vector<64x4096xf32> to vector<64x128xf32>
    %cst_194 = arith.constant dense<0xFF800000> : vector<64xf32>
    %684 = vector.multi_reduction <maximumf>, %683, %cst_194 [1] : vector<64x128xf32> to vector<64xf32>
    %685 = vector.shape_cast %684 : vector<64xf32> to vector<64x1xf32>
    %c0_195 = arith.constant 0 : index
    %c7_196 = arith.constant 7 : index
    %686 = vector.load %arg5[%c0_195, %c7_196] : memref<64x32xf32, #tpu.memory_space<vmem>>, vector<64x1xf32>
    tpu.vector_store %arg5[%c0_195, %c7_196], %685 {strides = array<i32>} : memref<64x32xf32, #tpu.memory_space<vmem>>, vector<64x1xf32>,
    %687 = vector.extract_strided_slice %654 {offsets = [0, 1024], sizes = [64, 128], strides = [1, 1]} : vector<64x4096xf32> to vector<64x128xf32>
    %cst_197 = arith.constant dense<0xFF800000> : vector<64xf32>
    %688 = vector.multi_reduction <maximumf>, %687, %cst_197 [1] : vector<64x128xf32> to vector<64xf32>
    %689 = vector.shape_cast %688 : vector<64xf32> to vector<64x1xf32>
    %c0_198 = arith.constant 0 : index
    %c8_199 = arith.constant 8 : index
    %690 = vector.load %arg5[%c0_198, %c8_199] : memref<64x32xf32, #tpu.memory_space<vmem>>, vector<64x1xf32>
    tpu.vector_store %arg5[%c0_198, %c8_199], %689 {strides = array<i32>} : memref<64x32xf32, #tpu.memory_space<vmem>>, vector<64x1xf32>,
    %691 = vector.extract_strided_slice %654 {offsets = [0, 1152], sizes = [64, 128], strides = [1, 1]} : vector<64x4096xf32> to vector<64x128xf32>
    %cst_200 = arith.constant dense<0xFF800000> : vector<64xf32>
    %692 = vector.multi_reduction <maximumf>, %691, %cst_200 [1] : vector<64x128xf32> to vector<64xf32>
    %693 = vector.shape_cast %692 : vector<64xf32> to vector<64x1xf32>
    %c0_201 = arith.constant 0 : index
    %c9_202 = arith.constant 9 : index
    %694 = vector.load %arg5[%c0_201, %c9_202] : memref<64x32xf32, #tpu.memory_space<vmem>>, vector<64x1xf32>
    tpu.vector_store %arg5[%c0_201, %c9_202], %693 {strides = array<i32>} : memref<64x32xf32, #tpu.memory_space<vmem>>, vector<64x1xf32>,
    %695 = vector.extract_strided_slice %654 {offsets = [0, 1280], sizes = [64, 128], strides = [1, 1]} : vector<64x4096xf32> to vector<64x128xf32>
    %cst_203 = arith.constant dense<0xFF800000> : vector<64xf32>
    %696 = vector.multi_reduction <maximumf>, %695, %cst_203 [1] : vector<64x128xf32> to vector<64xf32>
    %697 = vector.shape_cast %696 : vector<64xf32> to vector<64x1xf32>
    %c0_204 = arith.constant 0 : index
    %c10_205 = arith.constant 10 : index
    %698 = vector.load %arg5[%c0_204, %c10_205] : memref<64x32xf32, #tpu.memory_space<vmem>>, vector<64x1xf32>
    tpu.vector_store %arg5[%c0_204, %c10_205], %697 {strides = array<i32>} : memref<64x32xf32, #tpu.memory_space<vmem>>, vector<64x1xf32>,
    %699 = vector.extract_strided_slice %654 {offsets = [0, 1408], sizes = [64, 128], strides = [1, 1]} : vector<64x4096xf32> to vector<64x128xf32>
    %cst_206 = arith.constant dense<0xFF800000> : vector<64xf32>
    %700 = vector.multi_reduction <maximumf>, %699, %cst_206 [1] : vector<64x128xf32> to vector<64xf32>
    %701 = vector.shape_cast %700 : vector<64xf32> to vector<64x1xf32>
    %c0_207 = arith.constant 0 : index
    %c11_208 = arith.constant 11 : index
    %702 = vector.load %arg5[%c0_207, %c11_208] : memref<64x32xf32, #tpu.memory_space<vmem>>, vector<64x1xf32>
    tpu.vector_store %arg5[%c0_207, %c11_208], %701 {strides = array<i32>} : memref<64x32xf32, #tpu.memory_space<vmem>>, vector<64x1xf32>,
    %703 = vector.extract_strided_slice %654 {offsets = [0, 1536], sizes = [64, 128], strides = [1, 1]} : vector<64x4096xf32> to vector<64x128xf32>
    %cst_209 = arith.constant dense<0xFF800000> : vector<64xf32>
    %704 = vector.multi_reduction <maximumf>, %703, %cst_209 [1] : vector<64x128xf32> to vector<64xf32>
    %705 = vector.shape_cast %704 : vector<64xf32> to vector<64x1xf32>
    %c0_210 = arith.constant 0 : index
    %c12_211 = arith.constant 12 : index
    %706 = vector.load %arg5[%c0_210, %c12_211] : memref<64x32xf32, #tpu.memory_space<vmem>>, vector<64x1xf32>
    tpu.vector_store %arg5[%c0_210, %c12_211], %705 {strides = array<i32>} : memref<64x32xf32, #tpu.memory_space<vmem>>, vector<64x1xf32>,
    %707 = vector.extract_strided_slice %654 {offsets = [0, 1664], sizes = [64, 128], strides = [1, 1]} : vector<64x4096xf32> to vector<64x128xf32>
    %cst_212 = arith.constant dense<0xFF800000> : vector<64xf32>
    %708 = vector.multi_reduction <maximumf>, %707, %cst_212 [1] : vector<64x128xf32> to vector<64xf32>
    %709 = vector.shape_cast %708 : vector<64xf32> to vector<64x1xf32>
    %c0_213 = arith.constant 0 : index
    %c13_214 = arith.constant 13 : index
    %710 = vector.load %arg5[%c0_213, %c13_214] : memref<64x32xf32, #tpu.memory_space<vmem>>, vector<64x1xf32>
    tpu.vector_store %arg5[%c0_213, %c13_214], %709 {strides = array<i32>} : memref<64x32xf32, #tpu.memory_space<vmem>>, vector<64x1xf32>,
    %711 = vector.extract_strided_slice %654 {offsets = [0, 1792], sizes = [64, 128], strides = [1, 1]} : vector<64x4096xf32> to vector<64x128xf32>
    %cst_215 = arith.constant dense<0xFF800000> : vector<64xf32>
    %712 = vector.multi_reduction <maximumf>, %711, %cst_215 [1] : vector<64x128xf32> to vector<64xf32>
    %713 = vector.shape_cast %712 : vector<64xf32> to vector<64x1xf32>
    %c0_216 = arith.constant 0 : index
    %c14_217 = arith.constant 14 : index
    %714 = vector.load %arg5[%c0_216, %c14_217] : memref<64x32xf32, #tpu.memory_space<vmem>>, vector<64x1xf32>
    tpu.vector_store %arg5[%c0_216, %c14_217], %713 {strides = array<i32>} : memref<64x32xf32, #tpu.memory_space<vmem>>, vector<64x1xf32>,
    %715 = vector.extract_strided_slice %654 {offsets = [0, 1920], sizes = [64, 128], strides = [1, 1]} : vector<64x4096xf32> to vector<64x128xf32>
    %cst_218 = arith.constant dense<0xFF800000> : vector<64xf32>
    %716 = vector.multi_reduction <maximumf>, %715, %cst_218 [1] : vector<64x128xf32> to vector<64xf32>
    %717 = vector.shape_cast %716 : vector<64xf32> to vector<64x1xf32>
    %c0_219 = arith.constant 0 : index
    %c15_220 = arith.constant 15 : index
    %718 = vector.load %arg5[%c0_219, %c15_220] : memref<64x32xf32, #tpu.memory_space<vmem>>, vector<64x1xf32>
    tpu.vector_store %arg5[%c0_219, %c15_220], %717 {strides = array<i32>} : memref<64x32xf32, #tpu.memory_space<vmem>>, vector<64x1xf32>,
    %719 = vector.extract_strided_slice %654 {offsets = [0, 2048], sizes = [64, 128], strides = [1, 1]} : vector<64x4096xf32> to vector<64x128xf32>
    %cst_221 = arith.constant dense<0xFF800000> : vector<64xf32>
    %720 = vector.multi_reduction <maximumf>, %719, %cst_221 [1] : vector<64x128xf32> to vector<64xf32>
    %721 = vector.shape_cast %720 : vector<64xf32> to vector<64x1xf32>
    %c0_222 = arith.constant 0 : index
    %c16_223 = arith.constant 16 : index
    %722 = vector.load %arg5[%c0_222, %c16_223] : memref<64x32xf32, #tpu.memory_space<vmem>>, vector<64x1xf32>
    tpu.vector_store %arg5[%c0_222, %c16_223], %721 {strides = array<i32>} : memref<64x32xf32, #tpu.memory_space<vmem>>, vector<64x1xf32>,
    %723 = vector.extract_strided_slice %654 {offsets = [0, 2176], sizes = [64, 128], strides = [1, 1]} : vector<64x4096xf32> to vector<64x128xf32>
    %cst_224 = arith.constant dense<0xFF800000> : vector<64xf32>
    %724 = vector.multi_reduction <maximumf>, %723, %cst_224 [1] : vector<64x128xf32> to vector<64xf32>
    %725 = vector.shape_cast %724 : vector<64xf32> to vector<64x1xf32>
    %c0_225 = arith.constant 0 : index
    %c17_226 = arith.constant 17 : index
    %726 = vector.load %arg5[%c0_225, %c17_226] : memref<64x32xf32, #tpu.memory_space<vmem>>, vector<64x1xf32>
    tpu.vector_store %arg5[%c0_225, %c17_226], %725 {strides = array<i32>} : memref<64x32xf32, #tpu.memory_space<vmem>>, vector<64x1xf32>,
    %727 = vector.extract_strided_slice %654 {offsets = [0, 2304], sizes = [64, 128], strides = [1, 1]} : vector<64x4096xf32> to vector<64x128xf32>
    %cst_227 = arith.constant dense<0xFF800000> : vector<64xf32>
    %728 = vector.multi_reduction <maximumf>, %727, %cst_227 [1] : vector<64x128xf32> to vector<64xf32>
    %729 = vector.shape_cast %728 : vector<64xf32> to vector<64x1xf32>
    %c0_228 = arith.constant 0 : index
    %c18_229 = arith.constant 18 : index
    %730 = vector.load %arg5[%c0_228, %c18_229] : memref<64x32xf32, #tpu.memory_space<vmem>>, vector<64x1xf32>
    tpu.vector_store %arg5[%c0_228, %c18_229], %729 {strides = array<i32>} : memref<64x32xf32, #tpu.memory_space<vmem>>, vector<64x1xf32>,
    %731 = vector.extract_strided_slice %654 {offsets = [0, 2432], sizes = [64, 128], strides = [1, 1]} : vector<64x4096xf32> to vector<64x128xf32>
    %cst_230 = arith.constant dense<0xFF800000> : vector<64xf32>
    %732 = vector.multi_reduction <maximumf>, %731, %cst_230 [1] : vector<64x128xf32> to vector<64xf32>
    %733 = vector.shape_cast %732 : vector<64xf32> to vector<64x1xf32>
    %c0_231 = arith.constant 0 : index
    %c19_232 = arith.constant 19 : index
    %734 = vector.load %arg5[%c0_231, %c19_232] : memref<64x32xf32, #tpu.memory_space<vmem>>, vector<64x1xf32>
    tpu.vector_store %arg5[%c0_231, %c19_232], %733 {strides = array<i32>} : memref<64x32xf32, #tpu.memory_space<vmem>>, vector<64x1xf32>,
    %735 = vector.extract_strided_slice %654 {offsets = [0, 2560], sizes = [64, 128], strides = [1, 1]} : vector<64x4096xf32> to vector<64x128xf32>
    %cst_233 = arith.constant dense<0xFF800000> : vector<64xf32>
    %736 = vector.multi_reduction <maximumf>, %735, %cst_233 [1] : vector<64x128xf32> to vector<64xf32>
    %737 = vector.shape_cast %736 : vector<64xf32> to vector<64x1xf32>
    %c0_234 = arith.constant 0 : index
    %c20_235 = arith.constant 20 : index
    %738 = vector.load %arg5[%c0_234, %c20_235] : memref<64x32xf32, #tpu.memory_space<vmem>>, vector<64x1xf32>
    tpu.vector_store %arg5[%c0_234, %c20_235], %737 {strides = array<i32>} : memref<64x32xf32, #tpu.memory_space<vmem>>, vector<64x1xf32>,
    %739 = vector.extract_strided_slice %654 {offsets = [0, 2688], sizes = [64, 128], strides = [1, 1]} : vector<64x4096xf32> to vector<64x128xf32>
    %cst_236 = arith.constant dense<0xFF800000> : vector<64xf32>
    %740 = vector.multi_reduction <maximumf>, %739, %cst_236 [1] : vector<64x128xf32> to vector<64xf32>
    %741 = vector.shape_cast %740 : vector<64xf32> to vector<64x1xf32>
    %c0_237 = arith.constant 0 : index
    %c21_238 = arith.constant 21 : index
    %742 = vector.load %arg5[%c0_237, %c21_238] : memref<64x32xf32, #tpu.memory_space<vmem>>, vector<64x1xf32>
    tpu.vector_store %arg5[%c0_237, %c21_238], %741 {strides = array<i32>} : memref<64x32xf32, #tpu.memory_space<vmem>>, vector<64x1xf32>,
    %743 = vector.extract_strided_slice %654 {offsets = [0, 2816], sizes = [64, 128], strides = [1, 1]} : vector<64x4096xf32> to vector<64x128xf32>
    %cst_239 = arith.constant dense<0xFF800000> : vector<64xf32>
    %744 = vector.multi_reduction <maximumf>, %743, %cst_239 [1] : vector<64x128xf32> to vector<64xf32>
    %745 = vector.shape_cast %744 : vector<64xf32> to vector<64x1xf32>
    %c0_240 = arith.constant 0 : index
    %c22_241 = arith.constant 22 : index
    %746 = vector.load %arg5[%c0_240, %c22_241] : memref<64x32xf32, #tpu.memory_space<vmem>>, vector<64x1xf32>
    tpu.vector_store %arg5[%c0_240, %c22_241], %745 {strides = array<i32>} : memref<64x32xf32, #tpu.memory_space<vmem>>, vector<64x1xf32>,
    %747 = vector.extract_strided_slice %654 {offsets = [0, 2944], sizes = [64, 128], strides = [1, 1]} : vector<64x4096xf32> to vector<64x128xf32>
    %cst_242 = arith.constant dense<0xFF800000> : vector<64xf32>
    %748 = vector.multi_reduction <maximumf>, %747, %cst_242 [1] : vector<64x128xf32> to vector<64xf32>
    %749 = vector.shape_cast %748 : vector<64xf32> to vector<64x1xf32>
    %c0_243 = arith.constant 0 : index
    %c23_244 = arith.constant 23 : index
    %750 = vector.load %arg5[%c0_243, %c23_244] : memref<64x32xf32, #tpu.memory_space<vmem>>, vector<64x1xf32>
    tpu.vector_store %arg5[%c0_243, %c23_244], %749 {strides = array<i32>} : memref<64x32xf32, #tpu.memory_space<vmem>>, vector<64x1xf32>,
    %751 = vector.extract_strided_slice %654 {offsets = [0, 3072], sizes = [64, 128], strides = [1, 1]} : vector<64x4096xf32> to vector<64x128xf32>
    %cst_245 = arith.constant dense<0xFF800000> : vector<64xf32>
    %752 = vector.multi_reduction <maximumf>, %751, %cst_245 [1] : vector<64x128xf32> to vector<64xf32>
    %753 = vector.shape_cast %752 : vector<64xf32> to vector<64x1xf32>
    %c0_246 = arith.constant 0 : index
    %c24_247 = arith.constant 24 : index
    %754 = vector.load %arg5[%c0_246, %c24_247] : memref<64x32xf32, #tpu.memory_space<vmem>>, vector<64x1xf32>
    tpu.vector_store %arg5[%c0_246, %c24_247], %753 {strides = array<i32>} : memref<64x32xf32, #tpu.memory_space<vmem>>, vector<64x1xf32>,
    %755 = vector.extract_strided_slice %654 {offsets = [0, 3200], sizes = [64, 128], strides = [1, 1]} : vector<64x4096xf32> to vector<64x128xf32>
    %cst_248 = arith.constant dense<0xFF800000> : vector<64xf32>
    %756 = vector.multi_reduction <maximumf>, %755, %cst_248 [1] : vector<64x128xf32> to vector<64xf32>
    %757 = vector.shape_cast %756 : vector<64xf32> to vector<64x1xf32>
    %c0_249 = arith.constant 0 : index
    %c25_250 = arith.constant 25 : index
    %758 = vector.load %arg5[%c0_249, %c25_250] : memref<64x32xf32, #tpu.memory_space<vmem>>, vector<64x1xf32>
    tpu.vector_store %arg5[%c0_249, %c25_250], %757 {strides = array<i32>} : memref<64x32xf32, #tpu.memory_space<vmem>>, vector<64x1xf32>,
    %759 = vector.extract_strided_slice %654 {offsets = [0, 3328], sizes = [64, 128], strides = [1, 1]} : vector<64x4096xf32> to vector<64x128xf32>
    %cst_251 = arith.constant dense<0xFF800000> : vector<64xf32>
    %760 = vector.multi_reduction <maximumf>, %759, %cst_251 [1] : vector<64x128xf32> to vector<64xf32>
    %761 = vector.shape_cast %760 : vector<64xf32> to vector<64x1xf32>
    %c0_252 = arith.constant 0 : index
    %c26_253 = arith.constant 26 : index
    %762 = vector.load %arg5[%c0_252, %c26_253] : memref<64x32xf32, #tpu.memory_space<vmem>>, vector<64x1xf32>
    tpu.vector_store %arg5[%c0_252, %c26_253], %761 {strides = array<i32>} : memref<64x32xf32, #tpu.memory_space<vmem>>, vector<64x1xf32>,
    %763 = vector.extract_strided_slice %654 {offsets = [0, 3456], sizes = [64, 128], strides = [1, 1]} : vector<64x4096xf32> to vector<64x128xf32>
    %cst_254 = arith.constant dense<0xFF800000> : vector<64xf32>
    %764 = vector.multi_reduction <maximumf>, %763, %cst_254 [1] : vector<64x128xf32> to vector<64xf32>
    %765 = vector.shape_cast %764 : vector<64xf32> to vector<64x1xf32>
    %c0_255 = arith.constant 0 : index
    %c27_256 = arith.constant 27 : index
    %766 = vector.load %arg5[%c0_255, %c27_256] : memref<64x32xf32, #tpu.memory_space<vmem>>, vector<64x1xf32>
    tpu.vector_store %arg5[%c0_255, %c27_256], %765 {strides = array<i32>} : memref<64x32xf32, #tpu.memory_space<vmem>>, vector<64x1xf32>,
    %767 = vector.extract_strided_slice %654 {offsets = [0, 3584], sizes = [64, 128], strides = [1, 1]} : vector<64x4096xf32> to vector<64x128xf32>
    %cst_257 = arith.constant dense<0xFF800000> : vector<64xf32>
    %768 = vector.multi_reduction <maximumf>, %767, %cst_257 [1] : vector<64x128xf32> to vector<64xf32>
    %769 = vector.shape_cast %768 : vector<64xf32> to vector<64x1xf32>
    %c0_258 = arith.constant 0 : index
    %c28_259 = arith.constant 28 : index
    %770 = vector.load %arg5[%c0_258, %c28_259] : memref<64x32xf32, #tpu.memory_space<vmem>>, vector<64x1xf32>
    tpu.vector_store %arg5[%c0_258, %c28_259], %769 {strides = array<i32>} : memref<64x32xf32, #tpu.memory_space<vmem>>, vector<64x1xf32>,
    %771 = vector.extract_strided_slice %654 {offsets = [0, 3712], sizes = [64, 128], strides = [1, 1]} : vector<64x4096xf32> to vector<64x128xf32>
    %cst_260 = arith.constant dense<0xFF800000> : vector<64xf32>
    %772 = vector.multi_reduction <maximumf>, %771, %cst_260 [1] : vector<64x128xf32> to vector<64xf32>
    %773 = vector.shape_cast %772 : vector<64xf32> to vector<64x1xf32>
    %c0_261 = arith.constant 0 : index
    %c29_262 = arith.constant 29 : index
    %774 = vector.load %arg5[%c0_261, %c29_262] : memref<64x32xf32, #tpu.memory_space<vmem>>, vector<64x1xf32>
    tpu.vector_store %arg5[%c0_261, %c29_262], %773 {strides = array<i32>} : memref<64x32xf32, #tpu.memory_space<vmem>>, vector<64x1xf32>,
    %775 = vector.extract_strided_slice %654 {offsets = [0, 3840], sizes = [64, 128], strides = [1, 1]} : vector<64x4096xf32> to vector<64x128xf32>
    %cst_263 = arith.constant dense<0xFF800000> : vector<64xf32>
    %776 = vector.multi_reduction <maximumf>, %775, %cst_263 [1] : vector<64x128xf32> to vector<64xf32>
    %777 = vector.shape_cast %776 : vector<64xf32> to vector<64x1xf32>
    %c0_264 = arith.constant 0 : index
    %c30_265 = arith.constant 30 : index
    %778 = vector.load %arg5[%c0_264, %c30_265] : memref<64x32xf32, #tpu.memory_space<vmem>>, vector<64x1xf32>
    tpu.vector_store %arg5[%c0_264, %c30_265], %777 {strides = array<i32>} : memref<64x32xf32, #tpu.memory_space<vmem>>, vector<64x1xf32>,
    %779 = vector.extract_strided_slice %654 {offsets = [0, 3968], sizes = [64, 128], strides = [1, 1]} : vector<64x4096xf32> to vector<64x128xf32>
    %cst_266 = arith.constant dense<0xFF800000> : vector<64xf32>
    %780 = vector.multi_reduction <maximumf>, %779, %cst_266 [1] : vector<64x128xf32> to vector<64xf32>
    %781 = vector.shape_cast %780 : vector<64xf32> to vector<64x1xf32>
    %c0_267 = arith.constant 0 : index
    %c31_268 = arith.constant 31 : index
    %782 = vector.load %arg5[%c0_267, %c31_268] : memref<64x32xf32, #tpu.memory_space<vmem>>, vector<64x1xf32>
    tpu.vector_store %arg5[%c0_267, %c31_268], %781 {strides = array<i32>} : memref<64x32xf32, #tpu.memory_space<vmem>>, vector<64x1xf32>,
    %c0_269 = arith.constant 0 : index
    %c0_270 = arith.constant 0 : index
    %783 = vector.load %arg5[%c0_269, %c0_270] : memref<64x32xf32, #tpu.memory_space<vmem>>, vector<64x32xf32>
    %784 = tpu.transpose %783, [1, 0] : vector<64x32xf32> -> vector<32x64xf32>
    %c256_271 = arith.constant 256 : index
    %c0_272 = arith.constant 0 : index
    %785 = vector.load %arg2[%c256_271, %c0_272] : memref<464x128xf32, #tpu.memory_space<vmem>>, vector<64x128xf32>
    %c320 = arith.constant 320 : index
    %c0_273 = arith.constant 0 : index
    %786 = vector.load %arg2[%c320, %c0_273] : memref<464x128xf32, #tpu.memory_space<vmem>>, vector<1x128xf32>
    %c328 = arith.constant 328 : index
    %c0_274 = arith.constant 0 : index
    %787 = vector.load %arg2[%c328, %c0_274] : memref<464x128xf32, #tpu.memory_space<vmem>>, vector<128x128xf32>
    %c456 = arith.constant 456 : index
    %c0_275 = arith.constant 0 : index
    %788 = vector.load %arg2[%c456, %c0_275] : memref<464x128xf32, #tpu.memory_space<vmem>>, vector<1x128xf32>
    %cst_276 = arith.constant dense<0.000000e+00> : vector<32x128xf32>
    %789 = tpu.matmul %784, %785, %cst_276 {dimension_numbers = #tpu.dot_dimension_numbers<[1], [0], [0], [1], [0, 0, 1, 1], [], []>} : vector<32x64xf32>, vector<64x128xf32>, vector<32x128xf32> -> vector<32x128xf32>
    %790 = vector.broadcast %786 : vector<1x128xf32> to vector<32x128xf32>
    %791 = arith.addf %789, %790 : vector<32x128xf32>
    %cst_277 = arith.constant 0.000000e+00 : f32
    %792 = vector.broadcast %cst_277 : f32 to vector<32x128xf32>
    %793 = arith.cmpf oge, %791, %792 : vector<32x128xf32>
    %cst_278 = arith.constant 2.000000e-01 : f32
    %794 = vector.broadcast %cst_278 : f32 to vector<32x128xf32>
    %795 = arith.mulf %794, %791 : vector<32x128xf32>
    %796 = arith.select %793, %791, %795 : vector<32x128xi1>, vector<32x128xf32>
    %cst_279 = arith.constant dense<0.000000e+00> : vector<32x128xf32>
    %797 = tpu.matmul %796, %787, %cst_279 {dimension_numbers = #tpu.dot_dimension_numbers<[1], [0], [0], [1], [0, 0, 1, 1], [], []>} : vector<32x128xf32>, vector<128x128xf32>, vector<32x128xf32> -> vector<32x128xf32>
    %798 = vector.broadcast %788 : vector<1x128xf32> to vector<32x128xf32>
    %799 = arith.addf %797, %798 : vector<32x128xf32>
    %800 = tpu.iota {dimensions = array<i32: 1>} : vector<32x128xi32>
    %c3_i32 = arith.constant 3 : i32
    %801 = vector.broadcast %c3_i32 : i32 to vector<32x128xi32>
    %802 = arith.cmpi sge, %800, %801 : vector<32x128xi32>
    %c7_i32 = arith.constant 7 : i32
    %803 = vector.broadcast %c7_i32 : i32 to vector<32x128xi32>
    %804 = arith.cmpi slt, %800, %803 : vector<32x128xi32>
    %805 = arith.andi %802, %804 : vector<32x128xi1>
    %806 = arith.mulf %799, %799 : vector<32x128xf32>
    %cst_280 = arith.constant 0.000000e+00 : f32
    %807 = vector.broadcast %cst_280 : f32 to vector<32x128xf32>
    %808 = arith.select %805, %806, %807 : vector<32x128xi1>, vector<32x128xf32>
    %cst_281 = arith.constant dense<0.000000e+00> : vector<32xf32>
    %809 = vector.multi_reduction <add>, %808, %cst_281 [1] : vector<32x128xf32> to vector<32xf32>
    %810 = vector.shape_cast %809 : vector<32xf32> to vector<32x1xf32>
    %cst_282 = arith.constant 1.000000e-24 : f32
    %811 = vector.broadcast %cst_282 : f32 to vector<32x1xf32>
    %812 = arith.maximumf %810, %811 : vector<32x1xf32>
    %813 = math.rsqrt %812 : vector<32x1xf32>
    %814 = vector.broadcast %813 : vector<32x1xf32> to vector<32x128xf32>
    %815 = arith.mulf %799, %814 : vector<32x128xf32>
    %816 = arith.select %805, %815, %799 : vector<32x128xi1>, vector<32x128xf32>
    %817 = arith.negf %799 : vector<32x128xf32>
    %818 = math.exp %817 : vector<32x128xf32>
    %cst_283 = arith.constant 1.000000e+00 : f32
    %819 = vector.broadcast %cst_283 : f32 to vector<32x128xf32>
    %820 = arith.addf %819, %818 : vector<32x128xf32>
    %821 = arith.divf %819, %820 : vector<32x128xf32>
    %c10_i32 = arith.constant 10 : i32
    %822 = vector.broadcast %c10_i32 : i32 to vector<32x128xi32>
    %823 = arith.cmpi sge, %800, %822 : vector<32x128xi32>
    %cst_284 = arith.constant 1.500000e+00 : f32
    %cst_285 = arith.constant 5.000000e-01 : f32
    %824 = vector.broadcast %cst_284 : f32 to vector<32x128xf32>
    %825 = vector.broadcast %cst_285 : f32 to vector<32x128xf32>
    %826 = arith.select %823, %824, %825 : vector<32x128xi1>, vector<32x128xf32>
    %c10_i32_286 = arith.constant 10 : i32
    %827 = vector.broadcast %c10_i32_286 : i32 to vector<32x128xi32>
    %828 = arith.cmpi sge, %800, %827 : vector<32x128xi32>
    %cst_287 = arith.constant 2.000000e-01 : f32
    %cst_288 = arith.constant 3.000000e-02 : f32
    %829 = vector.broadcast %cst_287 : f32 to vector<32x128xf32>
    %830 = vector.broadcast %cst_288 : f32 to vector<32x128xf32>
    %831 = arith.select %828, %829, %830 : vector<32x128xi1>, vector<32x128xf32>
    %c7_i32_289 = arith.constant 7 : i32
    %832 = vector.broadcast %c7_i32_289 : i32 to vector<32x128xi32>
    %833 = arith.cmpi sge, %800, %832 : vector<32x128xi32>
    %c12_i32 = arith.constant 12 : i32
    %834 = vector.broadcast %c12_i32 : i32 to vector<32x128xi32>
    %835 = arith.cmpi slt, %800, %834 : vector<32x128xi32>
    %836 = arith.andi %833, %835 : vector<32x128xi1>
    %837 = arith.mulf %826, %821 : vector<32x128xf32>
    %838 = arith.addf %837, %831 : vector<32x128xf32>
    %839 = arith.select %836, %838, %816 : vector<32x128xi1>, vector<32x128xf32>
    %c0_290 = arith.constant 0 : index
    %c0_291 = arith.constant 0 : index
    %840 = vector.load %arg3[%c0_290, %c0_291] : memref<32x128xf32, #tpu.memory_space<vmem>>, vector<32x128xf32>
    tpu.vector_store %arg3[%c0_290, %c0_291], %839 {strides = array<i32>} : memref<32x128xf32, #tpu.memory_space<vmem>>, vector<32x128xf32>,
    return
  }
  func.func @transform_0(%arg0: i32) -> (i32, i32, i32) {
    %c0_i32 = arith.constant 0 : i32
    %c0_i32_0 = arith.constant 0 : i32
    %c0_i32_1 = arith.constant 0 : i32
    return %arg0, %c0_i32, %c0_i32_0 : i32, i32, i32
  }
  func.func @transform_1(%arg0: i32) -> (i32, i32) {
    %c0_i32 = arith.constant 0 : i32
    %c0_i32_0 = arith.constant 0 : i32
    %c0_i32_1 = arith.constant 0 : i32
    return %c0_i32, %c0_i32_0 : i32, i32
  }
  func.func @transform_2(%arg0: i32) -> (i32, i32) {
    %c0_i32 = arith.constant 0 : i32
    %c0_i32_0 = arith.constant 0 : i32
    return %arg0, %c0_i32 : i32, i32
  }
}

</mosaic_0001>

<bundles_post_ra>
// kernel: tpu_custom_call.1
= control target key start
LH: loop header
LB: loop body
LE: loop exit
PB: predicated region body
PF: predicated region fallthrough
CT: control target
= control target key end

     0   :  { %7 = vsyncpa [#allocation5], 0  ;;  %s9925_s0 = inlined_call_operand.vmem [shape: f32[64,3,128], index: 0, kind: input, shape index: {}]   ;;  %s9926_s1 = inlined_call_operand.hbm [shape: f32[464,128], index: 1, kind: input, shape index: {}]   ;;  %s9927_s2 = inlined_call_operand.hbm [shape: f32[64,128], index: 2, kind: output, shape index: {}]  }
   0x1   :  { %8 = vsyncpa [#allocation6], 0 }
   0x2   :  { %10 = vsyncpa [#allocation6 + $0x1], 0  ;;  %s6641_s9 = smov 0   ;;  %s6643_s10 = smov 0  }
   0x3   :  { %s6645_s11 = smov 0   ;;  %s6647_s12 = smov 0  }
   0x4 LB: > { %s6662_s13 = sadd.s32 4294967295, %s6614_s12   ;;  %s5928_s14 = sadd.s32 4294967294, %s6614_s12   ;;  %s6614_s12 = sphi %s6647_s12, %s10284_s12   ;;  %s6610_s11 = sphi %s6645_s11, %s10283_s11   ;;  %s6606_s10 = sphi %s6643_s10, %s10282_s10   ;;  %s6602_s9 = sphi %s6641_s9, %s10281_s9  }
   0x5   : > { %s6666_s15 = sadd.s32 1, %s6614_s12   ;;  %s70_s16 = sadd.s32 1, %s6610_s11 }
   0x6   : > { %s67_s17 = ssub.s32 %s6614_s12, %s6666_s15  ;;  %p80_p0 = scmp.ne.s32.totalorder %s6610_s11, %s6606_s10 }
   0x7   : > { %p68_p1 = scmp.eq.s32.totalorder %s67_s17, 0  ;;  %p81_p2 = scmp.eq.s32.totalorder %s6662_s13, 1 }
   0x8   : > { %p86_p3 = scmp.ne.s32.totalorder %s6606_s10, %s6602_s9  ;;  %p87_p4 = scmp.eq.s32.totalorder %s5928_s14, 1 }
   0x9   : > { %s6677_s18 = scalar_select %p68_p1, %s6610_s11, %s70_s16  }
   0xa   : > { %p6679_p5 = por %p81_p2, %p80_p0  ;;  %p6683_p6 = por %p87_p4, %p86_p3 }
   0xb   : > { %p5929_p7 = scmp.ge.s32.totalorder %s6614_s12, 1  ;;  %p94_p8 = scmp.lt.s32.totalorder %s6614_s12, 3 }
   0xc   : > { %s9938_s19 = scalar_select %p6679_p5, 1, 0 }
   0xd   : > { %s9939_s20 = scalar_select %p6683_p6, 1, 0 }
   0xe   : > { %p9928_p9 = scmp.eq.s32.totalorder %s6662_s13, 0  ;;  %p6690_p10 = pnand %p5929_p7, %p94_p8 }
   0xf   : > { %s6616_s22 = smov [#allocation4]   ;;  %s6520_s27 = scalar_lea.hbm %s9926_s1, 7424 }
  0x10   : > { %s9940_s21 = scalar_select %p6690_p10, 1, 0 }
  0x11   : > { %s106_s23 = sshll.u32 %s6616_s22, 4  ;;  %p6386_p11 = pneg %p6690_p10  ;;  %s107_s23 = int_to_ptr.vmem [resolvable:$true] %s106_s23 }
  0x12   : > { %p6521_p13 = scmp.ne.s32.totalorder %s9926_s1, %s6520_s27  ;;  %p6527_p3 = scmp.lt.u32.totalorder %s6520_s27, %s9926_s1 }
  0x13   : > { %p6698_p12 = pnand %p9928_p9, %p6386_p11 }
  0x15   : > { %p6522_p0 = pneg %p6698_p12 }
  0x17   : > { %p6523_p1 = pnand %p6522_p0, %p6521_p13 }
  0x19   : > { %p6524_p2 = pneg %p6523_p1 }
  0x1b   : > { %p6529_p4 = pnand %p6527_p3, %p6524_p2 }
  0x1d   : > { %6532 = shalt.err (!%p6529_p4)
}
  0x1e   : > { %s6533_s4 = scalar_lea.vmem %s107_s23, 7424  ;;  %p6541_p9 = scmp.lt.s32.totalorder %s107_s23, %s107_s23 }
  0x1f   : > { %p6534_p7 = scmp.ne.s32.totalorder %s107_s23, %s6533_s4  ;;  %p6542_p6 = scmp.lt.s32.totalorder %s6533_s4, %s6533_s4 }
  0x21   : > { %p6536_p8 = pnand %p6534_p7, %p6522_p0  ;;  %p6543_p5 = por %p6542_p6, %p6541_p9 }
  0x23   : > { %p6537_p11 = pneg %p6536_p8 }
  0x25   : > { %p6544_p10 = pnand %p6543_p5, %p6537_p11 }
  0x27   : > { %6547 = shalt.err (!%p6544_p10)
}
  0x28   : > { %s6617_s5 = smov 128   ;;  %s6618_s6 = smov 8  }
  0x29   : > { %6389 = dma.hbm_to_vmem [thread:$0]  (!%p6698_p12), %s9926_s1, 7424, %s107_s23, [#allocation5], %s6617_s5, %s6617_s5, %s6618_s6  }
  0x2a   : > { %p9942_p13 = scmp.ne.s32.totalorder %s9940_s21, 0 }
  0x2c   : > { %131 = sbr.rel (%p9942_p13) target bundleno = 1791 (0x6ff), region = 28 }
  0x33   : > { %p9943_p1 = scmp.eq.s32.totalorder %s6662_s13, 0 }
  0x35   : > { %6593 = dma.done.wait (%p9943_p1), [#allocation5], 7424   ;;  %p9944_p0 = pmov %p9943_p1 }
  0x36   : > { %s5935_s14 = sshll.u32 %s6662_s13, 5  ;;  %v9931_v0 = vlaneseq  ;;  %v9932_v1 = vmov 0.0   ;;  %v6739_v6 = vld [vmem:[#allocation4] sm:$0xff]  ;;  %v6741_v7 = vld [vmem:[#allocation4 + $0x8] sm:$0xff]  ;;  %vm2087_vm12 = vcmask 261120   ;;  %s150_s23 = sand.u32 1, %s6606_s10  }
  0x37   : > { %6595 = vsyncadd (%p9944_p0), [#allocation5], 4294959872  ;;  %p154_p5 = scmp.lt.s32.totalorder %s5935_s14, 63  ;;  %2176 = vmatprep.mubr.f32.mxu0 %v9932_v1  ;;  %2289 = vmatprep.mubr.f32.mxu1 %v9932_v1  ;;  %v6743_v8 = vld [vmem:[#allocation4 + $0x20] sm:$0xff]  ;;  %v6745_v9 = vld [vmem:[#allocation4 + $0x28] sm:$0xff]  ;;  %s5934_s24 = sshll.u32 %s150_s23, 5 }
  0x38   : > { %v178_v2 = vshrl.u32 %v9931_v0, 7  ;;  %v6747_v10 = vld [vmem:[#allocation4 + $0x40] sm:$0xff]  ;;  %v6750_v12 = vld [vmem:[#allocation4 + $0x48] sm:$0xff]  ;;  %s152_s25 = scalar_lea.vmem [#allocation7], %s5934_s24  ;;  %s6111_s26 = sshll.u32 %s6662_s13, 9 }
  0x39   : > { %s10286_s14 = smov (!%p154_p5, %s5935_s14), 63  ;;  %v6796_v35 = vld [vmem:[#allocation4 + $0x60] sm:$0xff]  ;;  %v6798_v36 = vld [vmem:[#allocation4 + $0x68] sm:$0xff]  ;;  %s5854_s27 = sshll.u32 %s152_s25, 4  ;;  %s9875_s27 = int_to_ptr.vmem [resolvable:$true] %s5854_s27 }
  0x3a   : > { %s5936_s16 = sshll.u32 %s10286_s14, 2  ;;  %v6733_v3 = vsub.s32 0, %v178_v2  ;;  %v6735_v4 = vsub.s32 1, %v178_v2  ;;  %v6737_v5 = vsub.s32 2, %v178_v2  ;;  %s9873_s30 = scalar_lea.hbm %s9927_s2, %s6111_s26 }
  0x3b   : > { %s6731_s22 = scalar_lea.vmem %s9925_s0, %s5936_s16  ;;  %s9884_s13 = scalar_lea.sflag [#allocation6], %s150_s23 }
  0x3c   : > { %v5937_v11 = vld [vmem:[%s6731_s22 + $0x4] sm:$0x7]  ;;  %v5939_v16 = vld [vmem:[%s6731_s22 + $0xc] sm:$0x7]  ;;  %v176_v17 = vld [vmem:[%s6731_s22] sm:$0x7] }
  0x3d   : > { %v6753_v13 = vrot.slane %v5937_v11, %v6733_v3  ;;  %v6756_v14 = vrot.slane %v5937_v11, %v6735_v4  ;;  %v6759_v15 = vrot.slane %v5937_v11, %v6737_v5  ;;  %v6764_v18 = vrot.slane %v5939_v16, %v6733_v3  ;;  %v5938_v34 = vld [vmem:[%s6731_s22 + $0x8] sm:$0x7]  ;;  %s6548_s3 = scalar_lea.vmem %s9875_s27, 512  ;;  %p10279_p9 = scmp.ne.s32.totalorder %s9938_s19, 0 }
  0x3e   : > { %v6767_v19 = vrot.slane %v5939_v16, %v6735_v4  ;;  %v6770_v20 = vrot.slane %v5939_v16, %v6737_v5  ;;  %v6773_v21 = vrot.slane %v176_v17, %v6733_v3  ;;  %v6809_v45 = vrot.slane %v176_v17, %v6735_v4  ;;  %p6549_p6 = scmp.ne.s32.totalorder %s9875_s27, %s6548_s3  ;;  %s6623_s4 = smov [#allocation7]  }
  0x3f   : > { %v235_v22 = vmul.f32 %v6753_v13, %v6739_v6  ;;  %v236_v23 = vmul.f32 %v6753_v13, %v6741_v7  ;;  %v243_v24 = vmul.f32 %v6756_v14, %v6743_v8  ;;  %v244_v25 = vmul.f32 %v6756_v14, %v6745_v9  ;;  %s6552_s5 = sshll.u32 %s6623_s4, 4  ;;  %s6553_s5 = int_to_ptr.vmem [resolvable:$false] %s6552_s5 }
  0x40   : > { %v255_v26 = vmul.f32 %v6759_v15, %v6747_v10  ;;  %v256_v27 = vmul.f32 %v6759_v15, %v6750_v12  ;;  %v343_v28 = vmul.f32 %v6764_v18, %v6739_v6  ;;  %v344_v29 = vmul.f32 %v6764_v18, %v6741_v7  ;;  %p6550_p10 = pnand %p6549_p6, %p10279_p9  ;;  %s6554_s6 = scalar_lea.vmem %s6553_s5, 1024 }
  0x41   : > { %v247_v30 = vadd.f32 %v243_v24, %v235_v22  ;;  %v248_v31 = vadd.f32 %v244_v25, %v236_v23  ;;  %v351_v32 = vmul.f32 %v6767_v19, %v6743_v8  ;;  %v352_v33 = vmul.f32 %v6767_v19, %v6745_v9  ;;  %p6555_p2 = scmp.lt.s32.totalorder %s9875_s27, %s6553_s5  ;;  %p6556_p3 = scmp.lt.s32.totalorder %s6554_s6, %s6548_s3 }
  0x42   : > { %v363_v37 = vmul.f32 %v6770_v20, %v6747_v10  ;;  %v364_v38 = vmul.f32 %v6770_v20, %v6750_v12  ;;  %v181_v39 = vmul.f32 %v6773_v21, %v6739_v6  ;;  %v182_v40 = vmul.f32 %v6773_v21, %v6741_v7  ;;  %p6551_p12 = pneg %p6550_p10 }
  0x43   : > { %v259_v41 = vadd.f32 %v255_v26, %v247_v30  ;;  %v260_v42 = vadd.f32 %v256_v27, %v248_v31  ;;  %v355_v43 = vadd.f32 %v351_v32, %v343_v28  ;;  %v356_v44 = vadd.f32 %v352_v33, %v344_v29  ;;  %p6557_p4 = por %p6556_p3, %p6555_p2 }
  0x44   : > { %v6812_v46 = vrot.slane %v176_v17, %v6737_v5  ;;  %v6815_v47 = vrot.slane %v5938_v34, %v6733_v3  ;;  %v6818_v48 = vrot.slane %v5938_v34, %v6735_v4  ;;  %v189_v53 = vmul.f32 %v6809_v45, %v6743_v8  ;;  %v6836_v17 = vld [vmem:[#allocation4 + $0x10] sm:$0xff] }
  0x45   : > { %v263_v49 = vadd.f32 %v259_v41, %v6796_v35  ;;  %v264_v50 = vadd.f32 %v260_v42, %v6798_v36  ;;  %v367_v51 = vadd.f32 %v363_v37, %v355_v43  ;;  %v368_v52 = vadd.f32 %v364_v38, %v356_v44  ;;  %v6857_v44 = vld [vmem:[#allocation4 + $0x38] sm:$0xff]  ;;  %p6558_p7 = pnand %p6557_p4, %p6551_p12 }
  0x46   : > { %v190_v54 = vmul.f32 %v6809_v45, %v6745_v9  ;;  %v201_v55 = vmul.f32 %v6812_v46, %v6747_v10  ;;  %v202_v56 = vmul.f32 %v6812_v46, %v6750_v12  ;;  %v193_v61 = vadd.f32 %v189_v53, %v181_v39  ;;  %v6849_v39 = vld [vmem:[#allocation4 + $0x18] sm:$0xff] }
  0x47   : > { %vm267_vm0 = vcmp.ge.f32.partialorder %v263_v49, 0.0  ;;  %vm268_vm1 = vcmp.ge.f32.partialorder %v264_v50, 0.0  ;;  %v271_v57 = vmul.f32 0.2, %v263_v49  ;;  %v272_v58 = vmul.f32 0.2, %v264_v50 }
  0x48   : > { %v371_v59 = vadd.f32 %v367_v51, %v6796_v35  ;;  %v372_v60 = vadd.f32 %v368_v52, %v6798_v36  ;;  %v194_v62 = vadd.f32 %v190_v54, %v182_v40  ;;  %v289_v11 = vmul.f32 %v6815_v47, %v6739_v6  ;;  %v6851_v40 = vld [vmem:[#allocation4 + $0x30] sm:$0xff]  ;;  %v6861_v54 = vld [vmem:[#allocation4 + $0x58] sm:$0xff] }
  0x49   : > { %v275_v63 = vsel %vm267_vm0, %v263_v49, %v271_v57  ;;  %v276_v2 = vsel %vm268_vm1, %v264_v50, %v272_v58  ;;  %v290_v16 = vmul.f32 %v6815_v47, %v6741_v7  ;;  %v205_v25 = vadd.f32 %v201_v55, %v193_v61  ;;  %v6859_v49 = vld [vmem:[#allocation4 + $0x50] sm:$0xff] }
  0x4a   : > { %v6204_v22 = vpack.c.bf16 %v276_v2, %v275_v63  ;;  %vm375_vm2 = vcmp.ge.f32.partialorder %v371_v59, 0.0  ;;  %vm376_vm3 = vcmp.ge.f32.partialorder %v372_v60, 0.0  ;;  %v379_v23 = vmul.f32 0.2, %v371_v59 }
  0x4b   : > { %v380_v24 = vmul.f32 0.2, %v372_v60  ;;  %v206_v26 = vadd.f32 %v202_v56, %v194_v62  ;;  %v297_v27 = vmul.f32 %v6818_v48, %v6743_v8  ;;  %v298_v29 = vmul.f32 %v6818_v48, %v6745_v9 }
  0x4c   : > { %6205 = vmatprep.subr.bf16.mxu0 %v6204_v22  ;;  %v383_v28 = vsel %vm375_vm2, %v371_v59, %v379_v23  ;;  %v6843_v30 = vrot.slane %v5938_v34, %v6737_v5  ;;  %v237_v31 = vmul.f32 %v6753_v13, %v6836_v17  ;;  %v209_v33 = vadd.f32 %v205_v25, %v6796_v35 }
  0x4d   : > { %v384_v32 = vsel %vm376_vm3, %v372_v60, %v380_v24  ;;  %v210_v37 = vadd.f32 %v206_v26, %v6798_v36  ;;  %v301_v38 = vadd.f32 %v297_v27, %v289_v11  ;;  %v302_v42 = vadd.f32 %v298_v29, %v290_v16  ;;  %v6873_v11 = vld [vmem:[#allocation4 + $0x70] sm:$0xff] }
  0x4e   : > { %v6212_v41 = vpack.c.bf16 %v384_v32, %v383_v28  ;;  %v309_v43 = vmul.f32 %v6843_v30, %v6747_v10  ;;  %v310_v34 = vmul.f32 %v6843_v30, %v6750_v12  ;;  %vm213_vm4 = vcmp.ge.f32.partialorder %v209_v33, 0.0 }
  0x4f   : > { %vm214_vm5 = vcmp.ge.f32.partialorder %v210_v37, 0.0  ;;  %v217_v50 = vmul.f32 0.2, %v209_v33  ;;  %v218_v51 = vmul.f32 0.2, %v210_v37  ;;  %v238_v55 = vmul.f32 %v6753_v13, %v6849_v39  ;;  %v6875_v13 = vld [vmem:[#allocation4 + $0x78] sm:$0xff] }
  0x50   : > { %6213 = vmatprep.subr.bf16.mxu1 %v6212_v41  ;;  %v313_v52 = vadd.f32 %v309_v43, %v301_v38  ;;  %v314_v53 = vadd.f32 %v310_v34, %v302_v42  ;;  %v245_v56 = vmul.f32 %v6756_v14, %v6851_v40  ;;  %v246_v59 = vmul.f32 %v6756_v14, %v6857_v44 }
  0x51   : > { %v221_v57 = vsel %vm213_vm4, %v209_v33, %v217_v50  ;;  %v222_v58 = vsel %vm214_vm5, %v210_v37, %v218_v51  ;;  %v257_v60 = vmul.f32 %v6759_v15, %v6859_v49  ;;  %v258_v22 = vmul.f32 %v6759_v15, %v6861_v54 }
  0x52   : > { %v6206_v61 = vpack.c.bf16 %v222_v58, %v221_v57  ;;  %v317_v62 = vadd.f32 %v313_v52, %v6796_v35  ;;  %v318_v63 = vadd.f32 %v314_v53, %v6798_v36  ;;  %v249_v2 = vadd.f32 %v245_v56, %v237_v31 }
  0x53   : > { %v250_v16 = vadd.f32 %v246_v59, %v238_v55  ;;  %v345_v14 = vmul.f32 %v6764_v18, %v6836_v17  ;;  %v346_v23 = vmul.f32 %v6764_v18, %v6849_v39  ;;  %v353_v28 = vmul.f32 %v6767_v19, %v6851_v40 }
  0x54   : > { %6207 = vmatpush1.bf16.msra.mxu0 %v6206_v61  ;;  %vm321_vm6 = vcmp.ge.f32.partialorder %v317_v62, 0.0  ;;  %vm322_vm7 = vcmp.ge.f32.partialorder %v318_v63, 0.0  ;;  %v325_v24 = vmul.f32 0.2, %v317_v62  ;;  %v326_v25 = vmul.f32 0.2, %v318_v63 }
  0x55   : > { %v261_v26 = vadd.f32 %v257_v60, %v249_v2  ;;  %v262_v27 = vadd.f32 %v258_v22, %v250_v16  ;;  %v354_v29 = vmul.f32 %v6767_v19, %v6857_v44  ;;  %v365_v32 = vmul.f32 %v6770_v20, %v6859_v49 }
  0x56   : > { %v329_v15 = vsel %vm321_vm6, %v317_v62, %v325_v24  ;;  %v330_v31 = vsel %vm322_vm7, %v318_v63, %v326_v25  ;;  %v366_v18 = vmul.f32 %v6770_v20, %v6861_v54  ;;  %v357_v41 = vadd.f32 %v353_v28, %v345_v14 }
  0x57   : > { %v6214_v33 = vpack.c.bf16 %v330_v31, %v329_v15  ;;  %v265_v37 = vadd.f32 %v261_v26, %v6873_v11  ;;  %v266_v38 = vadd.f32 %v262_v27, %v6875_v13  ;;  %v358_v42 = vadd.f32 %v354_v29, %v346_v23  ;;  %v5941_v26 = vld [vmem:[%s6731_s22 + $0x14] sm:$0x7] }
  0x58   : > { %v183_v43 = vmul.f32 %v6773_v21, %v6836_v17  ;;  %v184_v19 = vmul.f32 %v6773_v21, %v6849_v39  ;;  %v191_v34 = vmul.f32 %v6809_v45, %v6851_v40  ;;  %v369_v51 = vadd.f32 %v365_v32, %v357_v41 }
  0x59   : > { %6215 = vmatpush1.bf16.msra.mxu1 %v6214_v33  ;;  %vm269_vm8 = vcmp.ge.f32.partialorder %v265_v37, 0.0  ;;  %vm270_vm9 = vcmp.ge.f32.partialorder %v266_v38, 0.0  ;;  %v273_v20 = vmul.f32 0.2, %v265_v37  ;;  %v274_v50 = vmul.f32 0.2, %v266_v38 }
  0x5a   : > { %v370_v52 = vadd.f32 %v366_v18, %v358_v42  ;;  %v192_v53 = vmul.f32 %v6809_v45, %v6857_v44  ;;  %v195_v55 = vadd.f32 %v191_v34, %v183_v43  ;;  %v203_v58 = vmul.f32 %v6812_v46, %v6859_v49 }
  0x5b   : > { %v277_v56 = vsel %vm269_vm8, %v265_v37, %v273_v20  ;;  %v278_v57 = vsel %vm270_vm9, %v266_v38, %v274_v50  ;;  %v204_v21 = vmul.f32 %v6812_v46, %v6861_v54  ;;  %v373_v60 = vadd.f32 %v369_v51, %v6873_v11  ;;  %v5943_v20 = vld [vmem:[%s6731_s22 + $0x1c] sm:$0x7] }
  0x5c   : > { %v6208_v59 = vpack.c.bf16 %v278_v57, %v277_v56  ;;  %v374_v61 = vadd.f32 %v370_v52, %v6875_v13  ;;  %v196_v62 = vadd.f32 %v192_v53, %v184_v19  ;;  %v207_v63 = vadd.f32 %v203_v58, %v195_v55 }
  0x5d   : > { %v291_v45 = vmul.f32 %v6815_v47, %v6836_v17  ;;  %v292_v2 = vmul.f32 %v6815_v47, %v6849_v39  ;;  %v299_v16 = vmul.f32 %v6818_v48, %v6851_v40  ;;  %vm377_vm10 = vcmp.ge.f32.partialorder %v373_v60, 0.0 }
  0x5e   : > { %6209 = vmatprep.subr.bf16.mxu0 %v6208_v59  ;;  %vm378_vm11 = vcmp.ge.f32.partialorder %v374_v61, 0.0  ;;  %v381_v46 = vmul.f32 0.2, %v373_v60  ;;  %v382_v22 = vmul.f32 0.2, %v374_v61  ;;  %v208_v14 = vadd.f32 %v204_v21, %v196_v62 }
  0x5f   : > { %v211_v23 = vadd.f32 %v207_v63, %v6873_v11  ;;  %v300_v24 = vmul.f32 %v6818_v48, %v6857_v44  ;;  %v303_v25 = vadd.f32 %v299_v16, %v291_v45  ;;  %v311_v47 = vmul.f32 %v6843_v30, %v6859_v49  ;;  %v6949_v63 = vld [vmem:[#allocation4 + $0x80] sm:$0xff] }
  0x60   : > { %v385_v27 = vsel %vm377_vm10, %v373_v60, %v381_v46  ;;  %v386_v28 = vsel %vm378_vm11, %v374_v61, %v382_v22  ;;  %v312_v29 = vmul.f32 %v6843_v30, %v6861_v54  ;;  %v212_v31 = vadd.f32 %v208_v14, %v6875_v13 }
  0x61   : > { %v6216_v15 = vpack.c.bf16 %v386_v28, %v385_v27  ;;  %vm215_vm13 = vcmp.ge.f32.partialorder %v211_v23, 0.0  ;;  %v219_v32 = vmul.f32 0.2, %v211_v23  ;;  %v304_v18 = vadd.f32 %v300_v24, %v292_v2  ;;  %v5940_v2 = vld [vmem:[%s6731_s22 + $0x10] sm:$0x7] }
  0x62   : > { %v315_v33 = vadd.f32 %v311_v47, %v303_v25  ;;  %v6923_v48 = vrot.slane %v5941_v26, %v6733_v3  ;;  %v6926_v37 = vrot.slane %v5941_v26, %v6735_v4  ;;  %vm216_vm14 = vcmp.ge.f32.partialorder %v212_v31, 0.0 }
  0x63   : > { %6217 = vmatprep.subr.bf16.mxu1 %v6216_v15  ;;  %v220_v38 = vmul.f32 0.2, %v212_v31  ;;  %v223_v41 = vsel %vm215_vm13, %v211_v23, %v219_v32  ;;  %v6929_v30 = vrot.slane %v5941_v26, %v6737_v5  ;;  %v316_v42 = vadd.f32 %v312_v29, %v304_v18  ;;  %v6974_v15 = vld [vmem:[#allocation4 + $0x88] sm:$0xff] }
  0x64   : > { %v319_v43 = vadd.f32 %v315_v33, %v6873_v11  ;;  %v451_v19 = vmul.f32 %v6923_v48, %v6739_v6  ;;  %v452_v34 = vmul.f32 %v6923_v48, %v6741_v7  ;;  %v459_v51 = vmul.f32 %v6926_v37, %v6743_v8 }
  0x65   : > { %v224_v50 = vsel %vm216_vm14, %v212_v31, %v220_v38  ;;  %v460_v52 = vmul.f32 %v6926_v37, %v6745_v9  ;;  %v471_v53 = vmul.f32 %v6929_v30, %v6747_v10  ;;  %v320_v56 = vadd.f32 %v316_v42, %v6875_v13 }
  0x66   : > { %v6210_v55 = vpack.c.bf16 %v224_v50, %v223_v41  ;;  %vm323_vm15 = vcmp.ge.f32.partialorder %v319_v43, 0.0  ;;  %v327_v57 = vmul.f32 0.2, %v319_v43  ;;  %v463_v58 = vadd.f32 %v459_v51, %v451_v19 }
  0x67   : > { %v464_v21 = vadd.f32 %v460_v52, %v452_v34  ;;  %v472_v59 = vmul.f32 %v6929_v30, %v6750_v12  ;;  %v6947_v60 = vrot.slane %v5943_v20, %v6733_v3  ;;  %vm324_vm0 = vcmp.ge.f32.partialorder %v320_v56, 0.0 }
  0x68   : > { %6211 = vmatpush1.bf16.msra.mxu0 %v6210_v55  ;;  %v328_v61 = vmul.f32 0.2, %v320_v56  ;;  %v331_v62 = vsel %vm323_vm15, %v319_v43, %v327_v57  ;;  %v6952_v45 = vrot.slane %v5943_v20, %v6735_v4  ;;  %v475_v16 = vadd.f32 %v471_v53, %v463_v58  ;;  %v6995_v53 = vld [vmem:[#allocation4 + $0x90] sm:$0xff]  ;;  %v5942_v58 = vld [vmem:[%s6731_s22 + $0x18] sm:$0x7] }
  0x69   : > { %v476_v46 = vadd.f32 %v472_v59, %v464_v21  ;;  %v559_v22 = vmul.f32 %v6947_v60, %v6739_v6  ;;  %v560_v14 = vmul.f32 %v6947_v60, %v6741_v7  ;;  %v6964_v26 = vrot.slane %v5943_v20, %v6737_v5 }
  0x6a   : > { %v332_v23 = vsel %vm324_vm0, %v320_v56, %v328_v61  ;;  %v567_v24 = vmul.f32 %v6952_v45, %v6743_v8  ;;  %v568_v25 = vmul.f32 %v6952_v45, %v6745_v9  ;;  %v479_v28 = vadd.f32 %v475_v16, %v6796_v35 }
  0x6b   : > { %v6218_v27 = vpack.c.bf16 %v332_v23, %v331_v62  ;;  %5968 = vmatmul.mubr.msk.f32.vlgmr.msra.gmra.mrb[0].mxu0 %vm2087_vm12, %v6949_v63  ;;  %v480_v47 = vadd.f32 %v476_v46, %v6798_v36  ;;  %v6971_v29 = vrot.slane %v5940_v2, %v6733_v3  ;;  %v579_v18 = vmul.f32 %v6964_v26, %v6747_v10 }
  0x6c   : > { %2182 = vmatprep.mubr.f32.mxu0 %v9932_v1  ;;  %v571_v31 = vadd.f32 %v567_v24, %v559_v22  ;;  %v572_v32 = vadd.f32 %v568_v25, %v560_v14  ;;  %v580_v33 = vmul.f32 %v6964_v26, %v6750_v12  ;;  %vm483_vm1 = vcmp.ge.f32.partialorder %v479_v28, 0.0  ;;  %v1911_v25 = vld [vmem:[#allocation4 + $0xc0] sm:$0xff] }
  0x6d   : > { %6219 = vmatpush1.bf16.msra.mxu1 %v6218_v27  ;;  %vm484_vm2 = vcmp.ge.f32.partialorder %v480_v47, 0.0  ;;  %v487_v38 = vmul.f32 0.2, %v479_v28  ;;  %v488_v41 = vmul.f32 0.2, %v480_v47  ;;  %v397_v19 = vmul.f32 %v6971_v29, %v6739_v6  ;;  %v7020_v27 = vld [vmem:[#allocation4 + $0x98] sm:$0xff] }
  0x6e   : > { %v583_v42 = vadd.f32 %v579_v18, %v571_v31  ;;  %v584_v43 = vadd.f32 %v580_v33, %v572_v32  ;;  %v398_v34 = vmul.f32 %v6971_v29, %v6741_v7  ;;  %v6987_v51 = vrot.slane %v5940_v2, %v6735_v4 }
  0x6f   : > { %5969 = vmatmul.mubr.msk.f32.gmra.mrb[2].mxu0 %vm2087_vm12, %v6974_v15  ;;  %v491_v20 = vsel %vm483_vm1, %v479_v28, %v487_v38  ;;  %v492_v50 = vsel %vm484_vm2, %v480_v47, %v488_v41  ;;  %v6990_v52 = vrot.slane %v5940_v2, %v6737_v5  ;;  %v6620_v46 = vmov 0  }
  0x70   : > { %5976 = vmatmul.mubr.msk.f32.vlgmr.msra.gmra.mrb[0].mxu1 %vm2087_vm12, %v6949_v63  ;;  %2188 = vmatprep.mubr.f32.mxu0 %v9932_v1  ;;  %v6220_v55 = vpack.c.bf16 %v492_v50, %v491_v20  ;;  %v587_v56 = vadd.f32 %v583_v42, %v6796_v35  ;;  %v588_v57 = vadd.f32 %v584_v43, %v6798_v36 }
  0x71   : > { %2295 = vmatprep.mubr.f32.mxu1 %v9932_v1  ;;  %v405_v21 = vmul.f32 %v6987_v51, %v6743_v8  ;;  %v406_v59 = vmul.f32 %v6987_v51, %v6745_v9  ;;  %v417_v61 = vmul.f32 %v6990_v52, %v6747_v10  ;;  %v418_v62 = vmul.f32 %v6990_v52, %v6750_v12 }
  0x72   : > { %6221 = vmatprep.subr.bf16.mxu0 %v6220_v55  ;;  %vm591_vm3 = vcmp.ge.f32.partialorder %v587_v56, 0.0  ;;  %vm592_vm4 = vcmp.ge.f32.partialorder %v588_v57, 0.0  ;;  %v595_v2 = vmul.f32 0.2, %v587_v56  ;;  %v596_v16 = vmul.f32 0.2, %v588_v57  ;;  %6438 = vset.pattern.permute.xlu0 %v6620_v46 }
  0x73   : > { %5970 = vmatmul.mubr.msk.f32.gmra.mrb[4].mxu0 %vm2087_vm12, %v6995_v53  ;;  %v409_v22 = vadd.f32 %v405_v21, %v397_v19  ;;  %v410_v14 = vadd.f32 %v406_v59, %v398_v34  ;;  %v7012_v23 = vrot.slane %v5942_v58, %v6733_v3  ;;  %v7015_v24 = vrot.slane %v5942_v58, %v6735_v4  ;;  %v1912_v55 = vld [vmem:[#allocation4 + $0xc8] sm:$0xff] }
  0x74   : > { %5977 = vmatmul.mubr.msk.f32.gmra.mrb[2].mxu1 %vm2087_vm12, %v6974_v15  ;;  %2194 = vmatprep.mubr.f32.mxu0 %v9932_v1  ;;  %v599_v28 = vsel %vm591_vm3, %v587_v56, %v595_v2  ;;  %v600_v47 = vsel %vm592_vm4, %v588_v57, %v596_v16  ;;  %v7023_v31 = vrot.slane %v5942_v58, %v6737_v5  ;;  %v7045_v56 = vld [vmem:[#allocation4 + $0xa0] sm:$0xff] }
  0x75   : > { %2301 = vmatprep.mubr.f32.mxu1 %v9932_v1  ;;  %v6228_v32 = vpack.c.bf16 %v600_v47, %v599_v28  ;;  %v421_v18 = vadd.f32 %v417_v61, %v409_v22  ;;  %v422_v33 = vadd.f32 %v418_v62, %v410_v14  ;;  %v505_v38 = vmul.f32 %v7012_v23, %v6739_v6  ;;  %v1915_v47 = vld [vmem:[#allocation4 + $0xe0] sm:$0xff] }
  0x76   : > { %v506_v41 = vmul.f32 %v7012_v23, %v6741_v7  ;;  %v513_v42 = vmul.f32 %v7015_v24, %v6743_v8  ;;  %v514_v43 = vmul.f32 %v7015_v24, %v6745_v9  ;;  %v525_v19 = vmul.f32 %v7023_v31, %v6747_v10  ;;  %2049 = vperm.xlu0 %6438, %v1911_v25  }
  0x77   : > { %5971 = vmatmul.mubr.msk.f32.gmra.mrb[6].mxu0 %vm2087_vm12, %v7020_v27  ;;  %6229 = vmatprep.subr.bf16.mxu1 %v6228_v32  ;;  %v425_v34 = vadd.f32 %v421_v18, %v6796_v35  ;;  %v426_v20 = vadd.f32 %v422_v33, %v6798_v36  ;;  %v526_v50 = vmul.f32 %v7023_v31, %v6750_v12 }
  0x78   : > { %5978 = vmatmul.mubr.msk.f32.gmra.mrb[4].mxu1 %vm2087_vm12, %v6995_v53  ;;  %2200 = vmatprep.mubr.f32.mxu0 %v9932_v1  ;;  %v517_v57 = vadd.f32 %v513_v42, %v505_v38  ;;  %v518_v58 = vadd.f32 %v514_v43, %v506_v41  ;;  %v453_v21 = vmul.f32 %v6923_v48, %v6836_v17 }
  0x79   : > { %2307 = vmatprep.mubr.f32.mxu1 %v9932_v1  ;;  %vm429_vm5 = vcmp.ge.f32.partialorder %v425_v34, 0.0  ;;  %vm430_vm6 = vcmp.ge.f32.partialorder %v426_v20, 0.0  ;;  %v433_v59 = vmul.f32 0.2, %v425_v34  ;;  %v434_v61 = vmul.f32 0.2, %v426_v20  ;;  %6439 = vset.pattern.permute.xlu1 %v6620_v46 }
  0x7a   : > { %v529_v62 = vadd.f32 %v525_v19, %v517_v57  ;;  %v530_v2 = vadd.f32 %v526_v50, %v518_v58  ;;  %v454_v16 = vmul.f32 %v6923_v48, %v6849_v39  ;;  %v461_v22 = vmul.f32 %v6926_v37, %v6851_v40  ;;  %2054 = vperm.xlu0 %6438, %v1912_v55   ;;  %v7063_v48 = vld [vmem:[#allocation4 + $0xa8] sm:$0xff]  ;;  %v1917_v55 = vld [vmem:[#allocation4 + $0xf0] sm:$0xff] }
  0x7b   : > { %5972 = vmatmul.mubr.msk.f32.gmra.mrb[8].mxu0 %vm2087_vm12, %v7045_v56  ;;  %v437_v14 = vsel %vm429_vm5, %v425_v34, %v433_v59  ;;  %v438_v25 = vsel %vm430_vm6, %v426_v20, %v434_v61  ;;  %v462_v28 = vmul.f32 %v6926_v37, %v6857_v44  ;;  %v473_v46 = vmul.f32 %v6929_v30, %v6859_v49  ;;  %v7081_v57 = vld [vmem:[#allocation4 + $0xb0] sm:$0xff] }
  0x7c   : > { %5979 = vmatmul.mubr.msk.f32.gmra.mrb[6].mxu1 %vm2087_vm12, %v7020_v27  ;;  %2206 = vmatprep.mubr.f32.mxu0 %v9932_v1  ;;  %v6222_v32 = vpack.c.bf16 %v438_v25, %v437_v14  ;;  %v533_v18 = vadd.f32 %v529_v62, %v6796_v35  ;;  %v534_v33 = vadd.f32 %v530_v2, %v6798_v36 }
  0x7d   : > { %2313 = vmatprep.mubr.f32.mxu1 %v9932_v1  ;;  %v465_v38 = vadd.f32 %v461_v22, %v453_v21  ;;  %v466_v37 = vadd.f32 %v462_v28, %v454_v16  ;;  %v474_v41 = vmul.f32 %v6929_v30, %v6861_v54  ;;  %v561_v42 = vmul.f32 %v6947_v60, %v6836_v17 }
  0x7e   : > { %6223 = vmatpush1.bf16.msra.mxu0 %v6222_v32  ;;  %vm537_vm7 = vcmp.ge.f32.partialorder %v533_v18, 0.0  ;;  %vm538_vm8 = vcmp.ge.f32.partialorder %v534_v33, 0.0  ;;  %v541_v43 = vmul.f32 0.2, %v533_v18  ;;  %v542_v19 = vmul.f32 0.2, %v534_v33  ;;  %2069 = vperm.xlu0 %6438, %v1915_v47  }
  0x7f   : > { %5973 = vmatmul.mubr.msk.f32.gmra.mrb[10].mxu0 %vm2087_vm12, %v7063_v48  ;;  %v477_v34 = vadd.f32 %v473_v46, %v465_v38  ;;  %v478_v20 = vadd.f32 %v474_v41, %v466_v37  ;;  %v562_v50 = vmul.f32 %v6947_v60, %v6849_v39  ;;  %v569_v30 = vmul.f32 %v6952_v45, %v6851_v40  ;;  %v7099_v47 = vld [vmem:[#allocation4 + $0xb8] sm:$0xff] }
  0x80   : > { %5980 = vmatmul.mubr.msk.f32.gmra.mrb[8].mxu1 %vm2087_vm12, %v7045_v56  ;;  %2212 = vmatprep.mubr.f32.mxu0 %v9932_v1  ;;  %v545_v58 = vsel %vm537_vm7, %v533_v18, %v541_v43  ;;  %v546_v21 = vsel %vm538_vm8, %v534_v33, %v542_v19  ;;  %v570_v59 = vmul.f32 %v6952_v45, %v6857_v44  ;;  %v1913_v45 = vld [vmem:[#allocation4 + $0xd0] sm:$0xff] }
  0x81   : > { %2319 = vmatprep.mubr.f32.mxu1 %v9932_v1  ;;  %v6230_v61 = vpack.c.bf16 %v546_v21, %v545_v58  ;;  %v481_v60 = vadd.f32 %v477_v34, %v6873_v11  ;;  %v482_v62 = vadd.f32 %v478_v20, %v6875_v13  ;;  %v573_v2 = vadd.f32 %v569_v30, %v561_v42  ;;  %v1914_v30 = vld [vmem:[#allocation4 + $0xd8] sm:$0xff] }
  0x82   : > { %v574_v16 = vadd.f32 %v570_v59, %v562_v50  ;;  %v581_v22 = vmul.f32 %v6964_v26, %v6859_v49  ;;  %v582_v14 = vmul.f32 %v6964_v26, %v6861_v54  ;;  %v399_v25 = vmul.f32 %v6971_v29, %v6836_v17  ;;  %2079 = vperm.xlu0 %6438, %v1917_v55  }
  0x83   : > { %5974 = vmatmul.mubr.msk.f32.gmra.mrb[12].mxu0 %vm2087_vm12, %v7081_v57  ;;  %6231 = vmatpush1.bf16.msra.mxu1 %v6230_v61  ;;  %vm485_vm9 = vcmp.ge.f32.partialorder %v481_v60, 0.0  ;;  %vm486_vm10 = vcmp.ge.f32.partialorder %v482_v62, 0.0  ;;  %v489_v28 = vmul.f32 0.2, %v481_v60  ;;  %v490_v46 = vmul.f32 0.2, %v482_v62 }
  0x84   : > { %5981 = vmatmul.mubr.msk.f32.gmra.mrb[10].mxu1 %vm2087_vm12, %v7063_v48  ;;  %2218 = vmatprep.mubr.f32.mxu0 %v9932_v1  ;;  %v585_v26 = vadd.f32 %v581_v22, %v573_v2  ;;  %v586_v32 = vadd.f32 %v582_v14, %v574_v16  ;;  %v400_v18 = vmul.f32 %v6971_v29, %v6849_v39 }
  0x85   : > { %2325 = vmatprep.mubr.f32.mxu1 %v9932_v1  ;;  %v493_v33 = vsel %vm485_vm9, %v481_v60, %v489_v28  ;;  %v494_v38 = vsel %vm486_vm10, %v482_v62, %v490_v46  ;;  %v407_v37 = vmul.f32 %v6987_v51, %v6851_v40  ;;  %v408_v41 = vmul.f32 %v6987_v51, %v6857_v44  ;;  %v5945_v60 = vld [vmem:[%s6731_s22 + $0x24] sm:$0x7] }
  0x86   : > { %v6224_v42 = vpack.c.bf16 %v494_v38, %v493_v33  ;;  %v589_v43 = vadd.f32 %v585_v26, %v6873_v11  ;;  %v590_v19 = vadd.f32 %v586_v32, %v6875_v13  ;;  %v419_v34 = vmul.f32 %v6990_v52, %v6859_v49  ;;  %2059 = vperm.xlu1 %6439, %v1913_v45   ;;  %v1916_v32 = vld [vmem:[#allocation4 + $0xe8] sm:$0xff] }
  0x87   : > { %5975 = vmatmul.mubr.msk.f32.gmra.mrb[14].mxu0 %vm2087_vm12, %v7099_v47  ;;  %v411_v29 = vadd.f32 %v407_v37, %v399_v25  ;;  %v412_v20 = vadd.f32 %v408_v41, %v400_v18  ;;  %v420_v50 = vmul.f32 %v6990_v52, %v6861_v54  ;;  %v507_v51 = vmul.f32 %v7012_v23, %v6836_v17 }
  0x88   : > { %5982 = vmatmul.mubr.msk.f32.gmra.mrb[12].mxu1 %vm2087_vm12, %v7081_v57  ;;  %6225 = vmatprep.subr.bf16.mxu0 %v6224_v42  ;;  %vm593_vm11 = vcmp.ge.f32.partialorder %v589_v43, 0.0  ;;  %vm594_vm13 = vcmp.ge.f32.partialorder %v590_v19, 0.0  ;;  %v597_v55 = vmul.f32 0.2, %v589_v43  ;;  %v598_v58 = vmul.f32 0.2, %v590_v19 }
  0x89   : > { %2331 = vmatprep.mubr.f32.mxu1 %v9932_v1  ;;  %v423_v21 = vadd.f32 %v419_v34, %v411_v29  ;;  %v424_v59 = vadd.f32 %v420_v50, %v412_v20  ;;  %v508_v61 = vmul.f32 %v7012_v23, %v6849_v39  ;;  %v515_v52 = vmul.f32 %v7015_v24, %v6851_v40  ;;  %v5947_v42 = vld [vmem:[%s6731_s22 + $0x2c] sm:$0x7] }
  0x8a   : > { %v601_v62 = vsel %vm593_vm11, %v589_v43, %v597_v55  ;;  %v602_v2 = vsel %vm594_vm13, %v590_v19, %v598_v58  ;;  %v516_v16 = vmul.f32 %v7015_v24, %v6857_v44  ;;  %v527_v22 = vmul.f32 %v7023_v31, %v6859_v49  ;;  %2402 = vmatprep.mubr.f32.mxu0 %v9932_v1  ;;  %v1918_v55 = vld [vmem:[#allocation4 + $0xf8] sm:$0xff] }
  0x8b   : > { %v6232_v14 = vpack.c.bf16 %v602_v2, %v601_v62  ;;  %v427_v25 = vadd.f32 %v423_v21, %v6873_v11  ;;  %v428_v45 = vadd.f32 %v424_v59, %v6875_v13  ;;  %v519_v23 = vadd.f32 %v515_v52, %v507_v51  ;;  %2064 = vperm.xlu1 %6439, %v1914_v30  }
  0x8c   : > { %5983 = vmatmul.mubr.msk.f32.gmra.mrb[14].mxu1 %vm2087_vm12, %v7099_v47  ;;  %v520_v28 = vadd.f32 %v516_v16, %v508_v61  ;;  %v528_v24 = vmul.f32 %v7023_v31, %v6861_v54  ;;  %v7138_v46 = vrot.slane %v5945_v60, %v6733_v3  ;;  %v7141_v26 = vrot.slane %v5945_v60, %v6735_v4 }
  0x8d   : > { %6233 = vmatprep.subr.bf16.mxu1 %v6232_v14  ;;  %vm431_vm14 = vcmp.ge.f32.partialorder %v427_v25, 0.0  ;;  %vm432_vm15 = vcmp.ge.f32.partialorder %v428_v45, 0.0  ;;  %v435_v18 = vmul.f32 0.2, %v427_v25  ;;  %v436_v33 = vmul.f32 0.2, %v428_v45  ;;  %2515 = vmatprep.mubr.f32.mxu1 %v9932_v1 }
  0x8e   : > { %v531_v38 = vadd.f32 %v527_v22, %v519_v23  ;;  %v532_v37 = vadd.f32 %v528_v24, %v520_v28  ;;  %v667_v41 = vmul.f32 %v7138_v46, %v6739_v6  ;;  %v668_v31 = vmul.f32 %v7138_v46, %v6741_v7  ;;  %v5944_v14 = vld [vmem:[%s6731_s22 + $0x20] sm:$0x7] }
  0x8f   : > { %v439_v43 = vsel %vm431_vm14, %v427_v25, %v435_v18  ;;  %v440_v19 = vsel %vm432_vm15, %v428_v45, %v436_v33  ;;  %v675_v34 = vmul.f32 %v7141_v26, %v6743_v8  ;;  %v676_v29 = vmul.f32 %v7141_v26, %v6745_v9  ;;  %2074 = vperm.xlu1 %6439, %v1916_v32  }
  0x90   : > { %v6226_v20 = vpack.c.bf16 %v440_v19, %v439_v43  ;;  %v535_v50 = vadd.f32 %v531_v38, %v6873_v11  ;;  %v536_v51 = vadd.f32 %v532_v37, %v6875_v13  ;;  %v7156_v30 = vrot.slane %v5945_v60, %v6737_v5 }
  0x91   : > { %v679_v58 = vadd.f32 %v675_v34, %v667_v41  ;;  %v680_v21 = vadd.f32 %v676_v29, %v668_v31  ;;  %v7159_v59 = vrot.slane %v5947_v42, %v6733_v3  ;;  %v7162_v61 = vrot.slane %v5947_v42, %v6735_v4 }
  0x92   : > { %6227 = vmatpush1.bf16.msra.mxu0 %v6226_v20  ;;  %vm539_vm0 = vcmp.ge.f32.partialorder %v535_v50, 0.0  ;;  %vm540_vm1 = vcmp.ge.f32.partialorder %v536_v51, 0.0  ;;  %v543_v52 = vmul.f32 0.2, %v535_v50  ;;  %v544_v62 = vmul.f32 0.2, %v536_v51 }
  0x93   : > { %v687_v2 = vmul.f32 %v7156_v30, %v6747_v10  ;;  %v688_v60 = vmul.f32 %v7156_v30, %v6750_v12  ;;  %v775_v16 = vmul.f32 %v7159_v59, %v6739_v6  ;;  %v776_v22 = vmul.f32 %v7159_v59, %v6741_v7  ;;  %2084 = vperm.xlu1 %6439, %v1918_v55   ;;  %v5946_v55 = vld [vmem:[%s6731_s22 + $0x28] sm:$0x7] }
  0x94   : > { %v547_v25 = vsel %vm539_vm0, %v535_v50, %v543_v52  ;;  %v548_v45 = vsel %vm540_vm1, %v536_v51, %v544_v62  ;;  %v783_v23 = vmul.f32 %v7162_v61, %v6743_v8  ;;  %v784_v28 = vmul.f32 %v7162_v61, %v6745_v9 }
  0x95   : > { %v6234_v24 = vpack.c.bf16 %v548_v45, %v547_v25  ;;  %5984 = vmatmul.mubr.msk.f32.vlgmr.msra.gmra.mrb[16].mxu0 %vm2087_vm12, %v6949_v63  ;;  %v691_v32 = vadd.f32 %v687_v2, %v679_v58  ;;  %v692_v18 = vadd.f32 %v688_v60, %v680_v21  ;;  %v7180_v33 = vrot.slane %v5947_v42, %v6737_v5 }
  0x96   : > { %2408 = vmatprep.mubr.f32.mxu0 %v9932_v1  ;;  %v787_v38 = vadd.f32 %v783_v23, %v775_v16  ;;  %v788_v37 = vadd.f32 %v784_v28, %v776_v22  ;;  %v7184_v41 = vrot.slane %v5944_v14, %v6733_v3  ;;  %v7187_v31 = vrot.slane %v5944_v14, %v6735_v4 }
  0x97   : > { %6235 = vmatpush1.bf16.msra.mxu1 %v6234_v24  ;;  %v695_v43 = vadd.f32 %v691_v32, %v6796_v35  ;;  %v696_v19 = vadd.f32 %v692_v18, %v6798_v36  ;;  %v795_v34 = vmul.f32 %v7180_v33, %v6747_v10  ;;  %v796_v42 = vmul.f32 %v7180_v33, %v6750_v12 }
  0x98   : > { %v613_v29 = vmul.f32 %v7184_v41, %v6739_v6  ;;  %v614_v20 = vmul.f32 %v7184_v41, %v6741_v7  ;;  %v621_v50 = vmul.f32 %v7187_v31, %v6743_v8  ;;  %v622_v51 = vmul.f32 %v7187_v31, %v6745_v9 }
  0x99   : > { %5985 = vmatmul.mubr.msk.f32.gmra.mrb[18].mxu0 %vm2087_vm12, %v6974_v15  ;;  %vm699_vm2 = vcmp.ge.f32.partialorder %v695_v43, 0.0  ;;  %vm700_vm3 = vcmp.ge.f32.partialorder %v696_v19, 0.0  ;;  %v703_v58 = vmul.f32 0.2, %v695_v43  ;;  %v704_v21 = vmul.f32 0.2, %v696_v19 }
  0x9a   : > { %5992 = vmatmul.mubr.msk.f32.vlgmr.msra.gmra.mrb[16].mxu1 %vm2087_vm12, %v6949_v63  ;;  %2414 = vmatprep.mubr.f32.mxu0 %v9932_v1  ;;  %v799_v52 = vadd.f32 %v795_v34, %v787_v38  ;;  %v800_v62 = vadd.f32 %v796_v42, %v788_v37  ;;  %v625_v2 = vadd.f32 %v621_v50, %v613_v29 }
  0x9b   : > { %2521 = vmatprep.mubr.f32.mxu1 %v9932_v1  ;;  %v707_v60 = vsel %vm699_vm2, %v695_v43, %v703_v58  ;;  %v708_v16 = vsel %vm700_vm3, %v696_v19, %v704_v21  ;;  %v626_v22 = vadd.f32 %v622_v51, %v614_v20  ;;  %v7211_v25 = vrot.slane %v5944_v14, %v6737_v5 }
  0x9c   : > { %v6236_v45 = vpack.c.bf16 %v708_v16, %v707_v60  ;;  %v803_v23 = vadd.f32 %v799_v52, %v6796_v35  ;;  %v804_v28 = vadd.f32 %v800_v62, %v6798_v36  ;;  %v7216_v24 = vrot.slane %v5946_v55, %v6733_v3 }
  0x9d   : > { %5986 = vmatmul.mubr.msk.f32.gmra.mrb[20].mxu0 %vm2087_vm12, %v6995_v53  ;;  %v633_v32 = vmul.f32 %v7211_v25, %v6747_v10  ;;  %v634_v18 = vmul.f32 %v7211_v25, %v6750_v12  ;;  %v7225_v14 = vrot.slane %v5946_v55, %v6735_v4  ;;  %v7228_v38 = vrot.slane %v5946_v55, %v6737_v5 }
  0x9e   : > { %5993 = vmatmul.mubr.msk.f32.gmra.mrb[18].mxu1 %vm2087_vm12, %v6974_v15  ;;  %2420 = vmatprep.mubr.f32.mxu0 %v9932_v1  ;;  %vm807_vm4 = vcmp.ge.f32.partialorder %v803_v23, 0.0  ;;  %vm808_vm5 = vcmp.ge.f32.partialorder %v804_v28, 0.0  ;;  %v811_v37 = vmul.f32 0.2, %v803_v23  ;;  %v812_v43 = vmul.f32 0.2, %v804_v28 }
  0x9f   : > { %2527 = vmatprep.mubr.f32.mxu1 %v9932_v1  ;;  %6237 = vmatprep.subr.bf16.mxu0 %v6236_v45  ;;  %v637_v19 = vadd.f32 %v633_v32, %v625_v2  ;;  %v638_v34 = vadd.f32 %v634_v18, %v626_v22  ;;  %v721_v42 = vmul.f32 %v7216_v24, %v6739_v6 }
  0xa0   : > { %v815_v29 = vsel %vm807_vm4, %v803_v23, %v811_v37  ;;  %v816_v20 = vsel %vm808_vm5, %v804_v28, %v812_v43  ;;  %v722_v50 = vmul.f32 %v7216_v24, %v6741_v7  ;;  %v729_v51 = vmul.f32 %v7225_v14, %v6743_v8 }
  0xa1   : > { %5987 = vmatmul.mubr.msk.f32.gmra.mrb[22].mxu0 %vm2087_vm12, %v7020_v27  ;;  %v6244_v55 = vpack.c.bf16 %v816_v20, %v815_v29  ;;  %v641_v58 = vadd.f32 %v637_v19, %v6796_v35  ;;  %v642_v21 = vadd.f32 %v638_v34, %v6798_v36  ;;  %v730_v52 = vmul.f32 %v7225_v14, %v6745_v9 }
  0xa2   : > { %5994 = vmatmul.mubr.msk.f32.gmra.mrb[20].mxu1 %vm2087_vm12, %v6995_v53  ;;  %2426 = vmatprep.mubr.f32.mxu0 %v9932_v1  ;;  %v733_v6 = vadd.f32 %v729_v51, %v721_v42  ;;  %v741_v7 = vmul.f32 %v7228_v38, %v6747_v10  ;;  %v742_v8 = vmul.f32 %v7228_v38, %v6750_v12 }
  0xa3   : > { %2533 = vmatprep.mubr.f32.mxu1 %v9932_v1  ;;  %6245 = vmatprep.subr.bf16.mxu1 %v6244_v55  ;;  %vm645_vm6 = vcmp.ge.f32.partialorder %v641_v58, 0.0  ;;  %vm646_vm7 = vcmp.ge.f32.partialorder %v642_v21, 0.0  ;;  %v649_v62 = vmul.f32 0.2, %v641_v58  ;;  %v650_v2 = vmul.f32 0.2, %v642_v21 }
  0xa4   : > { %v734_v9 = vadd.f32 %v730_v52, %v722_v50  ;;  %v745_v60 = vadd.f32 %v741_v7, %v733_v6  ;;  %v669_v16 = vmul.f32 %v7138_v46, %v6836_v17  ;;  %v670_v22 = vmul.f32 %v7138_v46, %v6849_v39 }
  0xa5   : > { %5988 = vmatmul.mubr.msk.f32.gmra.mrb[24].mxu0 %vm2087_vm12, %v7045_v56  ;;  %v653_v10 = vsel %vm645_vm6, %v641_v58, %v649_v62  ;;  %v654_v12 = vsel %vm646_vm7, %v642_v21, %v650_v2  ;;  %v677_v45 = vmul.f32 %v7141_v26, %v6851_v40  ;;  %v678_v23 = vmul.f32 %v7141_v26, %v6857_v44 }
  0xa6   : > { %5995 = vmatmul.mubr.msk.f32.gmra.mrb[22].mxu1 %vm2087_vm12, %v7020_v27  ;;  %2432 = vmatprep.mubr.f32.mxu0 %v9932_v1  ;;  %v6238_v28 = vpack.c.bf16 %v654_v12, %v653_v10  ;;  %v746_v32 = vadd.f32 %v742_v8, %v734_v9  ;;  %v749_v46 = vadd.f32 %v745_v60, %v6796_v35 }
  0xa7   : > { %2539 = vmatprep.mubr.f32.mxu1 %v9932_v1  ;;  %v681_v18 = vadd.f32 %v677_v45, %v669_v16  ;;  %v682_v37 = vadd.f32 %v678_v23, %v670_v22  ;;  %v689_v43 = vmul.f32 %v7156_v30, %v6859_v49  ;;  %v690_v19 = vmul.f32 %v7156_v30, %v6861_v54 }
  0xa8   : > { %6239 = vmatpush1.bf16.msra.mxu0 %v6238_v28  ;;  %v750_v26 = vadd.f32 %v746_v32, %v6798_v36  ;;  %vm753_vm8 = vcmp.ge.f32.partialorder %v749_v46, 0.0  ;;  %v757_v34 = vmul.f32 0.2, %v749_v46  ;;  %v777_v42 = vmul.f32 %v7159_v59, %v6836_v17 }
  0xa9   : > { %5989 = vmatmul.mubr.msk.f32.gmra.mrb[26].mxu0 %vm2087_vm12, %v7063_v48  ;;  %v693_v35 = vadd.f32 %v689_v43, %v681_v18  ;;  %v694_v29 = vadd.f32 %v690_v19, %v682_v37  ;;  %v778_v20 = vmul.f32 %v7159_v59, %v6849_v39  ;;  %v785_v50 = vmul.f32 %v7162_v61, %v6851_v40  ;;  %v7325_v43 = vld [vmem:[#allocation4 + $0x18] sm:$0xff] }
  0xaa   : > { %5996 = vmatmul.mubr.msk.f32.gmra.mrb[24].mxu1 %vm2087_vm12, %v7045_v56  ;;  %2438 = vmatprep.mubr.f32.mxu0 %v9932_v1  ;;  %vm754_vm9 = vcmp.ge.f32.partialorder %v750_v26, 0.0  ;;  %v758_v36 = vmul.f32 0.2, %v750_v26  ;;  %v761_v30 = vsel %vm753_vm8, %v749_v46, %v757_v34  ;;  %v786_v51 = vmul.f32 %v7162_v61, %v6857_v44  ;;  %v7320_v46 = vld [vmem:[#allocation4 + $0x10] sm:$0xff] }
  0xab   : > { %2545 = vmatprep.mubr.f32.mxu1 %v9932_v1  ;;  %v697_v55 = vadd.f32 %v693_v35, %v6873_v11  ;;  %v698_v59 = vadd.f32 %v694_v29, %v6875_v13  ;;  %v789_v58 = vadd.f32 %v785_v50, %v777_v42  ;;  %v797_v21 = vmul.f32 %v7180_v33, %v6859_v49 }
  0xac   : > { %v762_v52 = vsel %vm754_vm9, %v750_v26, %v758_v36  ;;  %v790_v6 = vadd.f32 %v786_v51, %v778_v20  ;;  %v798_v7 = vmul.f32 %v7180_v33, %v6861_v54  ;;  %v615_v8 = vmul.f32 %v7184_v41, %v6836_v17  ;;  %v7329_v26 = vld [vmem:[#allocation4 + $0x30] sm:$0xff]  ;;  %v7335_v20 = vld [vmem:[#allocation4 + $0x38] sm:$0xff] }
  0xad   : > { %5990 = vmatmul.mubr.msk.f32.gmra.mrb[28].mxu0 %vm2087_vm12, %v7081_v57  ;;  %v6246_v61 = vpack.c.bf16 %v762_v52, %v761_v30  ;;  %vm701_vm10 = vcmp.ge.f32.partialorder %v697_v55, 0.0  ;;  %vm702_vm11 = vcmp.ge.f32.partialorder %v698_v59, 0.0  ;;  %v705_v62 = vmul.f32 0.2, %v697_v55  ;;  %v7345_v51 = vld [vmem:[#allocation4 + $0x58] sm:$0xff]  ;;  %v7354_v52 = vld [vmem:[#allocation4] sm:$0xff] }
  0xae   : > { %5997 = vmatmul.mubr.msk.f32.gmra.mrb[26].mxu1 %vm2087_vm12, %v7063_v48  ;;  %2444 = vmatprep.mubr.f32.mxu0 %v9932_v1  ;;  %v706_v2 = vmul.f32 0.2, %v698_v59  ;;  %v801_v9 = vadd.f32 %v797_v21, %v789_v58  ;;  %v802_v60 = vadd.f32 %v798_v7, %v790_v6  ;;  %v616_v33 = vmul.f32 %v7184_v41, %v6849_v39  ;;  %v7358_v7 = vld [vmem:[#allocation4 + $0x8] sm:$0xff] }
  0xaf   : > { %2551 = vmatprep.mubr.f32.mxu1 %v9932_v1  ;;  %6247 = vmatpush1.bf16.msra.mxu1 %v6246_v61  ;;  %v709_v17 = vsel %vm701_vm10, %v697_v55, %v705_v62  ;;  %v623_v16 = vmul.f32 %v7187_v31, %v6851_v40  ;;  %v624_v22 = vmul.f32 %v7187_v31, %v6857_v44  ;;  %v5951_v55 = vld [vmem:[%s6731_s22 + $0x3c] sm:$0x7] }
  0xb0   : > { %v710_v10 = vsel %vm702_vm11, %v698_v59, %v706_v2  ;;  %v805_v12 = vadd.f32 %v801_v9, %v6873_v11  ;;  %v806_v45 = vadd.f32 %v802_v60, %v6875_v13  ;;  %v635_v23 = vmul.f32 %v7211_v25, %v6859_v49 }
  0xb1   : > { %5991 = vmatmul.mubr.msk.f32.gmra.mrb[30].mxu0 %vm2087_vm12, %v7099_v47  ;;  %v6240_v39 = vpack.c.bf16 %v710_v10, %v709_v17  ;;  %v627_v41 = vadd.f32 %v623_v16, %v615_v8  ;;  %v628_v28 = vadd.f32 %v624_v22, %v616_v33  ;;  %v636_v40 = vmul.f32 %v7211_v25, %v6861_v54  ;;  %v5949_v54 = vld [vmem:[%s6731_s22 + $0x34] sm:$0x7]  ;;  %v7374_v22 = vld [vmem:[#allocation4 + $0x20] sm:$0xff] }
  0xb2   : > { %5998 = vmatmul.mubr.msk.f32.gmra.mrb[28].mxu1 %vm2087_vm12, %v7081_v57  ;;  %vm809_vm13 = vcmp.ge.f32.partialorder %v805_v12, 0.0  ;;  %vm810_vm14 = vcmp.ge.f32.partialorder %v806_v45, 0.0  ;;  %v813_v44 = vmul.f32 0.2, %v805_v12  ;;  %v814_v31 = vmul.f32 0.2, %v806_v45  ;;  %2628 = vmatprep.mubr.f32.mxu0 %v9932_v1 }
  0xb3   : > { %2557 = vmatprep.mubr.f32.mxu1 %v9932_v1  ;;  %6241 = vmatprep.subr.bf16.mxu0 %v6240_v39  ;;  %v639_v49 = vadd.f32 %v635_v23, %v627_v41  ;;  %v640_v32 = vadd.f32 %v636_v40, %v628_v28  ;;  %v723_v18 = vmul.f32 %v7320_v46, %v7216_v24  ;;  %v7368_v33 = vld [vmem:[#allocation4 + $0x70] sm:$0xff]  ;;  %v7382_v23 = vld [vmem:[#allocation4 + $0x40] sm:$0xff]  ;;  %v7386_v41 = vld [vmem:[#allocation4 + $0x48] sm:$0xff] }
  0xb4   : > { %v817_v25 = vsel %vm809_vm13, %v805_v12, %v813_v44  ;;  %v818_v37 = vsel %vm810_vm14, %v806_v45, %v814_v31  ;;  %v724_v19 = vmul.f32 %v7325_v43, %v7216_v24  ;;  %v731_v34 = vmul.f32 %v7329_v26, %v7225_v14  ;;  %v7341_v24 = vld [vmem:[#allocation4 + $0x50] sm:$0xff]  ;;  %v7378_v12 = vld [vmem:[#allocation4 + $0x28] sm:$0xff]  ;;  %v7390_v40 = vld [vmem:[#allocation4 + $0x78] sm:$0xff] }
  0xb5   : > { %v6248_v42 = vpack.c.bf16 %v818_v37, %v817_v25  ;;  %v643_v35 = vadd.f32 %v639_v49, %v6873_v11  ;;  %v644_v29 = vadd.f32 %v640_v32, %v6875_v13  ;;  %v732_v50 = vmul.f32 %v7335_v20, %v7225_v14  ;;  %v5948_v37 = vld [vmem:[%s6731_s22 + $0x30] sm:$0x7] }
  0xb6   : > { %5999 = vmatmul.mubr.msk.f32.gmra.mrb[30].mxu1 %vm2087_vm12, %v7099_v47  ;;  %v735_v36 = vadd.f32 %v731_v34, %v723_v18  ;;  %v743_v30 = vmul.f32 %v7341_v24, %v7228_v38  ;;  %v744_v11 = vmul.f32 %v7345_v51, %v7228_v38  ;;  %v7350_v13 = vrot.slane %v5949_v54, %v6733_v3 }
  0xb7   : > { %6249 = vmatprep.subr.bf16.mxu1 %v6248_v42  ;;  %vm647_vm15 = vcmp.ge.f32.partialorder %v643_v35, 0.0  ;;  %vm648_vm0 = vcmp.ge.f32.partialorder %v644_v29, 0.0  ;;  %v651_v14 = vmul.f32 0.2, %v643_v35  ;;  %v652_v59 = vmul.f32 0.2, %v644_v29  ;;  %2741 = vmatprep.mubr.f32.mxu1 %v9932_v1 }
  0xb8   : > { %v736_v58 = vadd.f32 %v732_v50, %v724_v19  ;;  %v747_v21 = vadd.f32 %v743_v30, %v735_v36  ;;  %v883_v6 = vmul.f32 %v7354_v52, %v7350_v13  ;;  %v884_v38 = vmul.f32 %v7358_v7, %v7350_v13 }
  0xb9   : > { %v655_v8 = vsel %vm647_vm15, %v643_v35, %v651_v14  ;;  %v656_v61 = vsel %vm648_vm0, %v644_v29, %v652_v59  ;;  %v7363_v62 = vrot.slane %v5949_v54, %v6735_v4  ;;  %v7366_v2 = vrot.slane %v5949_v54, %v6737_v5 }
  0xba   : > { %v6242_v9 = vpack.c.bf16 %v656_v61, %v655_v8  ;;  %v748_v60 = vadd.f32 %v744_v11, %v736_v58  ;;  %v751_v17 = vadd.f32 %v7368_v33, %v747_v21  ;;  %v7372_v16 = vrot.slane %v5951_v55, %v6733_v3  ;;  %v7418_v58 = vld [vmem:[#allocation4 + $0x60] sm:$0xff] }
  0xbb   : > { %v891_v10 = vmul.f32 %v7374_v22, %v7363_v62  ;;  %v892_v45 = vmul.f32 %v7378_v12, %v7363_v62  ;;  %v903_v39 = vmul.f32 %v7382_v23, %v7366_v2  ;;  %v904_v28 = vmul.f32 %v7386_v41, %v7366_v2 }
  0xbc   : > { %6243 = vmatpush1.bf16.msra.mxu0 %v6242_v9  ;;  %v752_v44 = vadd.f32 %v7390_v40, %v748_v60  ;;  %vm755_vm1 = vcmp.ge.f32.partialorder %v751_v17, 0.0  ;;  %v759_v31 = vmul.f32 0.2, %v751_v17  ;;  %v991_v49 = vmul.f32 %v7354_v52, %v7372_v16 }
  0xbd   : > { %v895_v32 = vadd.f32 %v891_v10, %v883_v6  ;;  %v896_v18 = vadd.f32 %v892_v45, %v884_v38  ;;  %v992_v54 = vmul.f32 %v7358_v7, %v7372_v16  ;;  %v7398_v25 = vrot.slane %v5951_v55, %v6735_v4  ;;  %v7421_v6 = vld [vmem:[#allocation4 + $0x68] sm:$0xff]  ;;  %v5950_v10 = vld [vmem:[%s6731_s22 + $0x38] sm:$0x7] }
  0xbe   : > { %vm756_vm2 = vcmp.ge.f32.partialorder %v752_v44, 0.0  ;;  %v760_v19 = vmul.f32 0.2, %v752_v44  ;;  %v763_v34 = vsel %vm755_vm1, %v751_v17, %v759_v31  ;;  %v7402_v42 = vrot.slane %v5951_v55, %v6737_v5 }
  0xbf   : > { %6000 = vmatmul.mubr.msk.f32.vlgmr.msra.gmra.mrb[32].mxu0 %vm2087_vm12, %v6949_v63  ;;  %v907_v35 = vadd.f32 %v903_v39, %v895_v32  ;;  %v908_v29 = vadd.f32 %v904_v28, %v896_v18  ;;  %v999_v50 = vmul.f32 %v7374_v22, %v7398_v25  ;;  %v1000_v36 = vmul.f32 %v7378_v12, %v7398_v25 }
  0xc0   : > { %v764_v30 = vsel %vm756_vm2, %v752_v44, %v760_v19  ;;  %2634 = vmatprep.mubr.f32.mxu0 %v9932_v1  ;;  %v1011_v11 = vmul.f32 %v7382_v23, %v7402_v42  ;;  %v1012_v55 = vmul.f32 %v7386_v41, %v7402_v42  ;;  %v7416_v14 = vrot.slane %v5948_v37, %v6733_v3 }
  0xc1   : > { %v6250_v59 = vpack.c.bf16 %v764_v30, %v763_v34  ;;  %v911_v21 = vadd.f32 %v7418_v58, %v907_v35  ;;  %v912_v38 = vadd.f32 %v7421_v6, %v908_v29  ;;  %v1003_v8 = vadd.f32 %v999_v50, %v991_v49 }
  0xc2   : > { %v1004_v61 = vadd.f32 %v1000_v36, %v992_v54  ;;  %v829_v9 = vmul.f32 %v7354_v52, %v7416_v14  ;;  %v830_v60 = vmul.f32 %v7358_v7, %v7416_v14  ;;  %v7429_v17 = vrot.slane %v5948_v37, %v6735_v4 }
  0xc3   : > { %6251 = vmatpush1.bf16.msra.mxu1 %v6250_v59  ;;  %6001 = vmatmul.mubr.msk.f32.gmra.mrb[34].mxu0 %vm2087_vm12, %v6974_v15  ;;  %vm915_vm3 = vcmp.ge.f32.partialorder %v911_v21, 0.0  ;;  %vm916_vm4 = vcmp.ge.f32.partialorder %v912_v38, 0.0  ;;  %v919_v45 = vmul.f32 0.2, %v911_v21  ;;  %v920_v39 = vmul.f32 0.2, %v912_v38 }
  0xc4   : > { %2640 = vmatprep.mubr.f32.mxu0 %v9932_v1  ;;  %v1015_v28 = vadd.f32 %v1011_v11, %v1003_v8  ;;  %v1016_v44 = vadd.f32 %v1012_v55, %v1004_v61  ;;  %v837_v31 = vmul.f32 %v7374_v22, %v7429_v17  ;;  %v838_v49 = vmul.f32 %v7378_v12, %v7429_v17 }
  0xc5   : > { %v923_v32 = vsel %vm915_vm3, %v911_v21, %v919_v45  ;;  %v924_v18 = vsel %vm916_vm4, %v912_v38, %v920_v39  ;;  %v7440_v54 = vrot.slane %v5948_v37, %v6737_v5  ;;  %v7443_v19 = vrot.slane %v5950_v10, %v6733_v3 }
  0xc6   : > { %6008 = vmatmul.mubr.msk.f32.vlgmr.msra.gmra.mrb[32].mxu1 %vm2087_vm12, %v6949_v63  ;;  %v6252_v34 = vpack.c.bf16 %v924_v18, %v923_v32  ;;  %v1019_v35 = vadd.f32 %v7418_v58, %v1015_v28  ;;  %v1020_v29 = vadd.f32 %v7421_v6, %v1016_v44  ;;  %v841_v50 = vadd.f32 %v837_v31, %v829_v9 }
  0xc7   : > { %2747 = vmatprep.mubr.f32.mxu1 %v9932_v1  ;;  %6002 = vmatmul.mubr.msk.f32.gmra.mrb[36].mxu0 %vm2087_vm12, %v6995_v53  ;;  %v842_v36 = vadd.f32 %v838_v49, %v830_v60  ;;  %v849_v37 = vmul.f32 %v7382_v23, %v7440_v54  ;;  %v850_v30 = vmul.f32 %v7386_v41, %v7440_v54 }
  0xc8   : > { %2646 = vmatprep.mubr.f32.mxu0 %v9932_v1  ;;  %6253 = vmatprep.subr.bf16.mxu0 %v6252_v34  ;;  %vm1023_vm5 = vcmp.ge.f32.partialorder %v1019_v35, 0.0  ;;  %vm1024_vm6 = vcmp.ge.f32.partialorder %v1020_v29, 0.0  ;;  %v1027_v63 = vmul.f32 0.2, %v1019_v35  ;;  %v1028_v11 = vmul.f32 0.2, %v1020_v29 }
  0xc9   : > { %v853_v55 = vadd.f32 %v849_v37, %v841_v50  ;;  %v854_v59 = vadd.f32 %v850_v30, %v842_v36  ;;  %v937_v21 = vmul.f32 %v7354_v52, %v7443_v19  ;;  %v938_v38 = vmul.f32 %v7358_v7, %v7443_v19 }
  0xca   : > { %6009 = vmatmul.mubr.msk.f32.gmra.mrb[34].mxu1 %vm2087_vm12, %v6974_v15  ;;  %v1031_v8 = vsel %vm1023_vm5, %v1019_v35, %v1027_v63  ;;  %v1032_v61 = vsel %vm1024_vm6, %v1020_v29, %v1028_v11  ;;  %v7464_v9 = vrot.slane %v5950_v10, %v6735_v4  ;;  %v7467_v60 = vrot.slane %v5950_v10, %v6737_v5 }
  0xcb   : > { %2753 = vmatprep.mubr.f32.mxu1 %v9932_v1  ;;  %6003 = vmatmul.mubr.msk.f32.gmra.mrb[38].mxu0 %vm2087_vm12, %v7020_v27  ;;  %v6260_v45 = vpack.c.bf16 %v1032_v61, %v1031_v8  ;;  %v857_v39 = vadd.f32 %v7418_v58, %v853_v55  ;;  %v858_v28 = vadd.f32 %v7421_v6, %v854_v59 }
  0xcc   : > { %2652 = vmatprep.mubr.f32.mxu0 %v9932_v1  ;;  %v945_v15 = vmul.f32 %v7374_v22, %v7464_v9  ;;  %v946_v44 = vmul.f32 %v7378_v12, %v7464_v9  ;;  %v957_v10 = vmul.f32 %v7382_v23, %v7467_v60  ;;  %v958_v31 = vmul.f32 %v7386_v41, %v7467_v60 }
  0xcd   : > { %6261 = vmatprep.subr.bf16.mxu1 %v6260_v45  ;;  %vm861_vm7 = vcmp.ge.f32.partialorder %v857_v39, 0.0  ;;  %vm862_vm8 = vcmp.ge.f32.partialorder %v858_v28, 0.0  ;;  %v865_v49 = vmul.f32 0.2, %v857_v39  ;;  %v866_v32 = vmul.f32 0.2, %v858_v28 }
  0xce   : > { %6010 = vmatmul.mubr.msk.f32.gmra.mrb[36].mxu1 %vm2087_vm12, %v6995_v53  ;;  %v949_v18 = vadd.f32 %v945_v15, %v937_v21  ;;  %v950_v34 = vadd.f32 %v946_v44, %v938_v38  ;;  %v885_v35 = vmul.f32 %v7320_v46, %v7350_v13  ;;  %v886_v29 = vmul.f32 %v7325_v43, %v7350_v13 }
  0xcf   : > { %2759 = vmatprep.mubr.f32.mxu1 %v9932_v1  ;;  %6004 = vmatmul.mubr.msk.f32.gmra.mrb[40].mxu0 %vm2087_vm12, %v7045_v56  ;;  %v869_v50 = vsel %vm861_vm7, %v857_v39, %v865_v49  ;;  %v870_v36 = vsel %vm862_vm8, %v858_v28, %v866_v32  ;;  %v893_v37 = vmul.f32 %v7329_v26, %v7363_v62 }
  0xd0   : > { %2658 = vmatprep.mubr.f32.mxu0 %v9932_v1  ;;  %v6254_v53 = vpack.c.bf16 %v870_v36, %v869_v50  ;;  %v961_v30 = vadd.f32 %v957_v10, %v949_v18  ;;  %v962_v63 = vadd.f32 %v958_v31, %v950_v34  ;;  %v894_v11 = vmul.f32 %v7335_v20, %v7363_v62 }
  0xd1   : > { %v897_v55 = vadd.f32 %v893_v37, %v885_v35  ;;  %v905_v13 = vmul.f32 %v7341_v24, %v7366_v2  ;;  %v906_v59 = vmul.f32 %v7345_v51, %v7366_v2  ;;  %v993_v21 = vmul.f32 %v7320_v46, %v7372_v16 }
  0xd2   : > { %6011 = vmatmul.mubr.msk.f32.gmra.mrb[38].mxu1 %vm2087_vm12, %v7020_v27  ;;  %6255 = vmatpush1.bf16.msra.mxu0 %v6254_v53  ;;  %v965_v38 = vadd.f32 %v7418_v58, %v961_v30  ;;  %v966_v8 = vadd.f32 %v7421_v6, %v962_v63  ;;  %v898_v61 = vadd.f32 %v894_v11, %v886_v29 }
  0xd3   : > { %2765 = vmatprep.mubr.f32.mxu1 %v9932_v1  ;;  %6005 = vmatmul.mubr.msk.f32.gmra.mrb[42].mxu0 %vm2087_vm12, %v7063_v48  ;;  %v909_v62 = vadd.f32 %v905_v13, %v897_v55  ;;  %v994_v2 = vmul.f32 %v7325_v43, %v7372_v16  ;;  %v1001_v45 = vmul.f32 %v7329_v26, %v7398_v25 }
  0xd4   : > { %2664 = vmatprep.mubr.f32.mxu0 %v9932_v1  ;;  %vm969_vm9 = vcmp.ge.f32.partialorder %v965_v38, 0.0  ;;  %vm970_vm10 = vcmp.ge.f32.partialorder %v966_v8, 0.0  ;;  %v973_v27 = vmul.f32 0.2, %v965_v38  ;;  %v974_v39 = vmul.f32 0.2, %v966_v8 }
  0xd5   : > { %v910_v28 = vadd.f32 %v906_v59, %v898_v61  ;;  %v913_v15 = vadd.f32 %v7368_v33, %v909_v62  ;;  %v1002_v44 = vmul.f32 %v7335_v20, %v7398_v25  ;;  %v1005_v10 = vadd.f32 %v1001_v45, %v993_v21  ;;  %v5953_v62 = vld [vmem:[%s6731_s22 + $0x44] sm:$0x7] }
  0xd6   : > { %6012 = vmatmul.mubr.msk.f32.gmra.mrb[40].mxu1 %vm2087_vm12, %v7045_v56  ;;  %v977_v16 = vsel %vm969_vm9, %v965_v38, %v973_v27  ;;  %v978_v31 = vsel %vm970_vm10, %v966_v8, %v974_v39  ;;  %v1013_v49 = vmul.f32 %v7341_v24, %v7402_v42  ;;  %v1014_v32 = vmul.f32 %v7345_v51, %v7402_v42 }
  0xd7   : > { %2771 = vmatprep.mubr.f32.mxu1 %v9932_v1  ;;  %6006 = vmatmul.mubr.msk.f32.gmra.mrb[44].mxu0 %vm2087_vm12, %v7081_v57  ;;  %v6262_v18 = vpack.c.bf16 %v978_v31, %v977_v16  ;;  %v914_v25 = vadd.f32 %v7390_v40, %v910_v28  ;;  %vm917_vm11 = vcmp.ge.f32.partialorder %v913_v15, 0.0  ;;  %v921_v34 = vmul.f32 0.2, %v913_v15 }
  0xd8   : > { %2670 = vmatprep.mubr.f32.mxu0 %v9932_v1  ;;  %v1006_v56 = vadd.f32 %v1002_v44, %v994_v2  ;;  %v1017_v35 = vadd.f32 %v1013_v49, %v1005_v10  ;;  %v831_v29 = vmul.f32 %v7320_v46, %v7416_v14  ;;  %v832_v42 = vmul.f32 %v7325_v43, %v7416_v14 }
  0xd9   : > { %6263 = vmatpush1.bf16.msra.mxu1 %v6262_v18  ;;  %vm918_vm13 = vcmp.ge.f32.partialorder %v914_v25, 0.0  ;;  %v922_v50 = vmul.f32 0.2, %v914_v25  ;;  %v925_v36 = vsel %vm917_vm11, %v913_v15, %v921_v34  ;;  %v839_v37 = vmul.f32 %v7329_v26, %v7429_v17 }
  0xda   : > { %6013 = vmatmul.mubr.msk.f32.gmra.mrb[42].mxu1 %vm2087_vm12, %v7063_v48  ;;  %v1018_v53 = vadd.f32 %v1014_v32, %v1006_v56  ;;  %v1021_v30 = vadd.f32 %v7368_v33, %v1017_v35  ;;  %v840_v63 = vmul.f32 %v7335_v20, %v7429_v17  ;;  %v851_v14 = vmul.f32 %v7341_v24, %v7440_v54  ;;  %v5955_v32 = vld [vmem:[%s6731_s22 + $0x4c] sm:$0x7] }
  0xdb   : > { %2777 = vmatprep.mubr.f32.mxu1 %v9932_v1  ;;  %6007 = vmatmul.mubr.msk.f32.gmra.mrb[46].mxu0 %vm2087_vm12, %v7099_v47  ;;  %v926_v11 = vsel %vm918_vm13, %v914_v25, %v922_v50  ;;  %v843_v55 = vadd.f32 %v839_v37, %v831_v29  ;;  %v852_v48 = vmul.f32 %v7345_v51, %v7440_v54 }
  0xdc   : > { %v6256_v13 = vpack.c.bf16 %v926_v11, %v925_v36  ;;  %v1022_v59 = vadd.f32 %v7390_v40, %v1018_v53  ;;  %vm1025_vm14 = vcmp.ge.f32.partialorder %v1021_v30, 0.0  ;;  %v1029_v21 = vmul.f32 0.2, %v1021_v30  ;;  %2854 = vmatprep.mubr.f32.mxu0 %v9932_v1 }
  0xdd   : > { %v844_v17 = vadd.f32 %v840_v63, %v832_v42  ;;  %v855_v38 = vadd.f32 %v851_v14, %v843_v55  ;;  %v939_v8 = vmul.f32 %v7320_v46, %v7443_v19  ;;  %v940_v61 = vmul.f32 %v7325_v43, %v7443_v19 }
  0xde   : > { %6014 = vmatmul.mubr.msk.f32.gmra.mrb[44].mxu1 %vm2087_vm12, %v7081_v57  ;;  %6257 = vmatprep.subr.bf16.mxu0 %v6256_v13  ;;  %vm1026_vm15 = vcmp.ge.f32.partialorder %v1022_v59, 0.0  ;;  %v1030_v54 = vmul.f32 0.2, %v1022_v59  ;;  %v1033_v2 = vsel %vm1025_vm14, %v1021_v30, %v1029_v21  ;;  %v947_v45 = vmul.f32 %v7329_v26, %v7464_v9  ;;  %v5952_v21 = vld [vmem:[%s6731_s22 + $0x40] sm:$0x7] }
  0xdf   : > { %2783 = vmatprep.mubr.f32.mxu1 %v9932_v1  ;;  %v856_v27 = vadd.f32 %v852_v48, %v844_v17  ;;  %v859_v39 = vadd.f32 %v7368_v33, %v855_v38  ;;  %v948_v19 = vmul.f32 %v7335_v20, %v7464_v9  ;;  %v959_v28 = vmul.f32 %v7341_v24, %v7467_v60 }
  0xe0   : > { %v1034_v57 = vsel %vm1026_vm15, %v1022_v59, %v1030_v54  ;;  %v951_v15 = vadd.f32 %v947_v45, %v939_v8  ;;  %v960_v44 = vmul.f32 %v7345_v51, %v7467_v60  ;;  %v7567_v10 = vrot.slane %v5953_v62, %v6733_v3 }
  0xe1   : > { %v6264_v16 = vpack.c.bf16 %v1034_v57, %v1033_v2  ;;  %v860_v31 = vadd.f32 %v7390_v40, %v856_v27  ;;  %vm863_vm0 = vcmp.ge.f32.partialorder %v859_v39, 0.0  ;;  %v867_v49 = vmul.f32 0.2, %v859_v39  ;;  %v7615_v57 = vld [vmem:[#allocation4 + $0x80] sm:$0xff] }
  0xe2   : > { %6015 = vmatmul.mubr.msk.f32.gmra.mrb[46].mxu1 %vm2087_vm12, %v7099_v47  ;;  %v952_v9 = vadd.f32 %v948_v19, %v940_v61  ;;  %v963_v18 = vadd.f32 %v959_v28, %v951_v15  ;;  %v1099_v25 = vmul.f32 %v7354_v52, %v7567_v10  ;;  %v1100_v60 = vmul.f32 %v7358_v7, %v7567_v10 }
  0xe3   : > { %6265 = vmatprep.subr.bf16.mxu1 %v6264_v16  ;;  %vm864_vm1 = vcmp.ge.f32.partialorder %v860_v31, 0.0  ;;  %v868_v34 = vmul.f32 0.2, %v860_v31  ;;  %v871_v56 = vsel %vm863_vm0, %v859_v39, %v867_v49  ;;  %2967 = vmatprep.mubr.f32.mxu1 %v9932_v1  ;;  %v7579_v35 = vrot.slane %v5953_v62, %v6735_v4 }
  0xe4   : > { %v964_v29 = vadd.f32 %v960_v44, %v952_v9  ;;  %v967_v47 = vadd.f32 %v7368_v33, %v963_v18  ;;  %v7583_v42 = vrot.slane %v5953_v62, %v6737_v5  ;;  %v7586_v50 = vrot.slane %v5955_v32, %v6733_v3  ;;  %v5954_v18 = vld [vmem:[%s6731_s22 + $0x48] sm:$0x7] }
  0xe5   : > { %v872_v36 = vsel %vm864_vm1, %v860_v31, %v868_v34  ;;  %v1107_v37 = vmul.f32 %v7374_v22, %v7579_v35  ;;  %v1108_v53 = vmul.f32 %v7378_v12, %v7579_v35  ;;  %v7593_v30 = vrot.slane %v5955_v32, %v6735_v4 }
  0xe6   : > { %v6258_v63 = vpack.c.bf16 %v872_v36, %v871_v56  ;;  %v968_v14 = vadd.f32 %v7390_v40, %v964_v29  ;;  %vm971_vm2 = vcmp.ge.f32.partialorder %v967_v47, 0.0  ;;  %v975_v11 = vmul.f32 0.2, %v967_v47  ;;  %v7634_v36 = vld [vmem:[#allocation4 + $0x88] sm:$0xff] }
  0xe7   : > { %v1111_v55 = vadd.f32 %v1107_v37, %v1099_v25  ;;  %v1112_v48 = vadd.f32 %v1108_v53, %v1100_v60  ;;  %v1119_v13 = vmul.f32 %v7382_v23, %v7583_v42  ;;  %v1120_v59 = vmul.f32 %v7386_v41, %v7583_v42 }
  0xe8   : > { %6259 = vmatpush1.bf16.msra.mxu0 %v6258_v63  ;;  %vm972_vm3 = vcmp.ge.f32.partialorder %v968_v14, 0.0  ;;  %v976_v17 = vmul.f32 0.2, %v968_v14  ;;  %v979_v38 = vsel %vm971_vm2, %v967_v47, %v975_v11  ;;  %v1207_v8 = vmul.f32 %v7354_v52, %v7586_v50 }
  0xe9   : > { %v1123_v61 = vadd.f32 %v1119_v13, %v1111_v55  ;;  %v1124_v62 = vadd.f32 %v1120_v59, %v1112_v48  ;;  %v1208_v54 = vmul.f32 %v7358_v7, %v7586_v50  ;;  %v1215_v2 = vmul.f32 %v7374_v22, %v7593_v30 }
  0xea   : > { %v980_v45 = vsel %vm972_vm3, %v968_v14, %v976_v17  ;;  %v1216_v27 = vmul.f32 %v7378_v12, %v7593_v30  ;;  %v7610_v39 = vrot.slane %v5955_v32, %v6737_v5  ;;  %v7613_v19 = vrot.slane %v5952_v21, %v6733_v3 }
  0xeb   : > { %v6266_v28 = vpack.c.bf16 %v980_v45, %v979_v38  ;;  %6016 = vmatmul.mubr.msk.f32.vlgmr.msra.gmra.mrb[48].mxu0 %vm2087_vm12, %v7615_v57  ;;  %v1127_v15 = vadd.f32 %v7418_v58, %v1123_v61  ;;  %v1128_v44 = vadd.f32 %v7421_v6, %v1124_v62  ;;  %v1219_v16 = vadd.f32 %v1215_v2, %v1207_v8  ;;  %v7658_v61 = vld [vmem:[#allocation4 + $0x90] sm:$0xff] }
  0xec   : > { %2860 = vmatprep.mubr.f32.mxu0 %v9932_v1  ;;  %v1220_v31 = vadd.f32 %v1216_v27, %v1208_v54  ;;  %v1227_v49 = vmul.f32 %v7382_v23, %v7610_v39  ;;  %v1228_v32 = vmul.f32 %v7386_v41, %v7610_v39  ;;  %v1045_v9 = vmul.f32 %v7354_v52, %v7613_v19 }
  0xed   : > { %6267 = vmatpush1.bf16.msra.mxu1 %v6266_v28  ;;  %vm1131_vm4 = vcmp.ge.f32.partialorder %v1127_v15, 0.0  ;;  %vm1132_vm5 = vcmp.ge.f32.partialorder %v1128_v44, 0.0  ;;  %v1135_v25 = vmul.f32 0.2, %v1127_v15  ;;  %v1136_v60 = vmul.f32 0.2, %v1128_v44 }
  0xee   : > { %v1231_v34 = vadd.f32 %v1227_v49, %v1219_v16  ;;  %v1232_v56 = vadd.f32 %v1228_v32, %v1220_v31  ;;  %v1046_v29 = vmul.f32 %v7358_v7, %v7613_v19  ;;  %v7632_v47 = vrot.slane %v5952_v21, %v6735_v4 }
  0xef   : > { %6017 = vmatmul.mubr.msk.f32.gmra.mrb[50].mxu0 %vm2087_vm12, %v7634_v36  ;;  %v1139_v37 = vsel %vm1131_vm4, %v1127_v15, %v1135_v25  ;;  %v1140_v53 = vsel %vm1132_vm5, %v1128_v44, %v1136_v60  ;;  %v7639_v63 = vrot.slane %v5952_v21, %v6737_v5  ;;  %v7642_v14 = vrot.slane %v5954_v18, %v6733_v3 }
  0xf0   : > { %6024 = vmatmul.mubr.msk.f32.vlgmr.msra.gmra.mrb[48].mxu1 %vm2087_vm12, %v7615_v57  ;;  %2866 = vmatprep.mubr.f32.mxu0 %v9932_v1  ;;  %v6268_v11 = vpack.c.bf16 %v1140_v53, %v1139_v37  ;;  %v1235_v55 = vadd.f32 %v7418_v58, %v1231_v34  ;;  %v1236_v48 = vadd.f32 %v7421_v6, %v1232_v56  ;;  %v7684_v34 = vld [vmem:[#allocation4 + $0x98] sm:$0xff] }
  0xf1   : > { %2973 = vmatprep.mubr.f32.mxu1 %v9932_v1  ;;  %v1053_v13 = vmul.f32 %v7374_v22, %v7632_v47  ;;  %v1054_v59 = vmul.f32 %v7378_v12, %v7632_v47  ;;  %v1065_v21 = vmul.f32 %v7382_v23, %v7639_v63  ;;  %v1066_v17 = vmul.f32 %v7386_v41, %v7639_v63 }
  0xf2   : > { %6269 = vmatprep.subr.bf16.mxu0 %v6268_v11  ;;  %vm1239_vm6 = vcmp.ge.f32.partialorder %v1235_v55, 0.0  ;;  %vm1240_vm7 = vcmp.ge.f32.partialorder %v1236_v48, 0.0  ;;  %v1243_v38 = vmul.f32 0.2, %v1235_v55  ;;  %v1244_v8 = vmul.f32 0.2, %v1236_v48 }
  0xf3   : > { %6018 = vmatmul.mubr.msk.f32.gmra.mrb[52].mxu0 %vm2087_vm12, %v7658_v61  ;;  %v1057_v62 = vadd.f32 %v1053_v13, %v1045_v9  ;;  %v1058_v54 = vadd.f32 %v1054_v59, %v1046_v29  ;;  %v1153_v2 = vmul.f32 %v7354_v52, %v7642_v14  ;;  %v1154_v45 = vmul.f32 %v7358_v7, %v7642_v14 }
  0xf4   : > { %6025 = vmatmul.mubr.msk.f32.gmra.mrb[50].mxu1 %vm2087_vm12, %v7634_v36  ;;  %2872 = vmatprep.mubr.f32.mxu0 %v9932_v1  ;;  %v1247_v27 = vsel %vm1239_vm6, %v1235_v55, %v1243_v38  ;;  %v1248_v28 = vsel %vm1240_vm7, %v1236_v48, %v1244_v8  ;;  %v7670_v15 = vrot.slane %v5954_v18, %v6735_v4 }
  0xf5   : > { %2979 = vmatprep.mubr.f32.mxu1 %v9932_v1  ;;  %v6276_v44 = vpack.c.bf16 %v1248_v28, %v1247_v27  ;;  %v1069_v16 = vadd.f32 %v1065_v21, %v1057_v62  ;;  %v1070_v31 = vadd.f32 %v1066_v17, %v1058_v54  ;;  %v7674_v49 = vrot.slane %v5954_v18, %v6737_v5  ;;  %v7702_v17 = vld [vmem:[#allocation4 + $0xa0] sm:$0xff] }
  0xf6   : > { %v1161_v32 = vmul.f32 %v7374_v22, %v7670_v15  ;;  %v1162_v9 = vmul.f32 %v7378_v12, %v7670_v15  ;;  %v1101_v25 = vmul.f32 %v7320_v46, %v7567_v10  ;;  %v1102_v60 = vmul.f32 %v7325_v43, %v7567_v10 }
  0xf7   : > { %6019 = vmatmul.mubr.msk.f32.gmra.mrb[54].mxu0 %vm2087_vm12, %v7684_v34  ;;  %6277 = vmatprep.subr.bf16.mxu1 %v6276_v44  ;;  %v1073_v18 = vadd.f32 %v7418_v58, %v1069_v16  ;;  %v1074_v56 = vadd.f32 %v7421_v6, %v1070_v31  ;;  %v1173_v29 = vmul.f32 %v7382_v23, %v7674_v49 }
  0xf8   : > { %6026 = vmatmul.mubr.msk.f32.gmra.mrb[52].mxu1 %vm2087_vm12, %v7658_v61  ;;  %2878 = vmatprep.mubr.f32.mxu0 %v9932_v1  ;;  %v1165_v37 = vadd.f32 %v1161_v32, %v1153_v2  ;;  %v1166_v10 = vadd.f32 %v1162_v9, %v1154_v45  ;;  %v1174_v53 = vmul.f32 %v7386_v41, %v7674_v49  ;;  %v7720_v32 = vld [vmem:[#allocation4 + $0xa8] sm:$0xff] }
  0xf9   : > { %2985 = vmatprep.mubr.f32.mxu1 %v9932_v1  ;;  %vm1077_vm8 = vcmp.ge.f32.partialorder %v1073_v18, 0.0  ;;  %vm1078_vm9 = vcmp.ge.f32.partialorder %v1074_v56, 0.0  ;;  %v1081_v11 = vmul.f32 0.2, %v1073_v18  ;;  %v1082_v55 = vmul.f32 0.2, %v1074_v56 }
  0xfa   : > { %v1177_v48 = vadd.f32 %v1173_v29, %v1165_v37  ;;  %v1178_v13 = vadd.f32 %v1174_v53, %v1166_v10  ;;  %v1109_v59 = vmul.f32 %v7329_v26, %v7579_v35  ;;  %v1110_v21 = vmul.f32 %v7335_v20, %v7579_v35 }
  0xfb   : > { %6020 = vmatmul.mubr.msk.f32.gmra.mrb[56].mxu0 %vm2087_vm12, %v7702_v17  ;;  %v1085_v38 = vsel %vm1077_vm8, %v1073_v18, %v1081_v11  ;;  %v1086_v8 = vsel %vm1078_vm9, %v1074_v56, %v1082_v55  ;;  %v1121_v62 = vmul.f32 %v7341_v24, %v7583_v42  ;;  %v1122_v54 = vmul.f32 %v7345_v51, %v7583_v42 }
  0xfc   : > { %6027 = vmatmul.mubr.msk.f32.gmra.mrb[54].mxu1 %vm2087_vm12, %v7684_v34  ;;  %2884 = vmatprep.mubr.f32.mxu0 %v9932_v1  ;;  %v6270_v2 = vpack.c.bf16 %v1086_v8, %v1085_v38  ;;  %v1181_v35 = vadd.f32 %v7418_v58, %v1177_v48  ;;  %v1182_v45 = vadd.f32 %v7421_v6, %v1178_v13 }
  0xfd   : > { %2991 = vmatprep.mubr.f32.mxu1 %v9932_v1  ;;  %v1113_v27 = vadd.f32 %v1109_v59, %v1101_v25  ;;  %v1114_v28 = vadd.f32 %v1110_v21, %v1102_v60  ;;  %v1209_v44 = vmul.f32 %v7320_v46, %v7586_v50  ;;  %v1210_v42 = vmul.f32 %v7325_v43, %v7586_v50  ;;  %v7742_v59 = vld [vmem:[#allocation4 + $0xb0] sm:$0xff] }
  0xfe   : > { %6271 = vmatpush1.bf16.msra.mxu0 %v6270_v2  ;;  %vm1185_vm10 = vcmp.ge.f32.partialorder %v1181_v35, 0.0  ;;  %vm1186_vm11 = vcmp.ge.f32.partialorder %v1182_v45, 0.0  ;;  %v1189_v16 = vmul.f32 0.2, %v1181_v35  ;;  %v1190_v31 = vmul.f32 0.2, %v1182_v45 }
  0xff   : > { %6021 = vmatmul.mubr.msk.f32.gmra.mrb[58].mxu0 %vm2087_vm12, %v7720_v32  ;;  %v1125_v9 = vadd.f32 %v1121_v62, %v1113_v27  ;;  %v1126_v18 = vadd.f32 %v1122_v54, %v1114_v28  ;;  %v1217_v25 = vmul.f32 %v7329_v26, %v7593_v30  ;;  %v1218_v60 = vmul.f32 %v7335_v20, %v7593_v30 }
 0x100   : > { %6028 = vmatmul.mubr.msk.f32.gmra.mrb[56].mxu1 %vm2087_vm12, %v7702_v17  ;;  %2890 = vmatprep.mubr.f32.mxu0 %v9932_v1  ;;  %v1193_v50 = vsel %vm1185_vm10, %v1181_v35, %v1189_v16  ;;  %v1194_v56 = vsel %vm1186_vm11, %v1182_v45, %v1190_v31  ;;  %v1229_v29 = vmul.f32 %v7341_v24, %v7610_v39 }
 0x101   : > { %2997 = vmatprep.mubr.f32.mxu1 %v9932_v1  ;;  %v6278_v37 = vpack.c.bf16 %v1194_v56, %v1193_v50  ;;  %v1129_v10 = vadd.f32 %v7368_v33, %v1125_v9  ;;  %v1130_v53 = vadd.f32 %v7390_v40, %v1126_v18  ;;  %v1221_v11 = vadd.f32 %v1217_v25, %v1209_v44  ;;  %v5957_v56 = vld [vmem:[%s6731_s22 + $0x54] sm:$0x7] }
 0x102   : > { %v1222_v55 = vadd.f32 %v1218_v60, %v1210_v42  ;;  %v1230_v30 = vmul.f32 %v7345_v51, %v7610_v39  ;;  %v1047_v48 = vmul.f32 %v7320_v46, %v7613_v19  ;;  %v1048_v13 = vmul.f32 %v7325_v43, %v7613_v19  ;;  %v7758_v42 = vld [vmem:[#allocation4 + $0xb8] sm:$0xff] }
 0x103   : > { %6022 = vmatmul.mubr.msk.f32.gmra.mrb[60].mxu0 %vm2087_vm12, %v7742_v59  ;;  %6279 = vmatpush1.bf16.msra.mxu1 %v6278_v37  ;;  %vm1133_vm13 = vcmp.ge.f32.partialorder %v1129_v10, 0.0  ;;  %vm1134_vm14 = vcmp.ge.f32.partialorder %v1130_v53, 0.0  ;;  %v1137_v21 = vmul.f32 0.2, %v1129_v10  ;;  %v1138_v38 = vmul.f32 0.2, %v1130_v53 }
 0x104   : > { %6029 = vmatmul.mubr.msk.f32.gmra.mrb[58].mxu1 %vm2087_vm12, %v7720_v32  ;;  %2896 = vmatprep.mubr.f32.mxu0 %v9932_v1  ;;  %v1233_v39 = vadd.f32 %v1229_v29, %v1221_v11  ;;  %v1234_v8 = vadd.f32 %v1230_v30, %v1222_v55  ;;  %v1055_v19 = vmul.f32 %v7329_v26, %v7632_v47 }
 0x105   : > { %3003 = vmatprep.mubr.f32.mxu1 %v9932_v1  ;;  %v1141_v62 = vsel %vm1133_vm13, %v1129_v10, %v1137_v21  ;;  %v1142_v54 = vsel %vm1134_vm14, %v1130_v53, %v1138_v38  ;;  %v1056_v2 = vmul.f32 %v7335_v20, %v7632_v47  ;;  %v1067_v35 = vmul.f32 %v7341_v24, %v7639_v63  ;;  %v5959_v38 = vld [vmem:[%s6731_s22 + $0x5c] sm:$0x7] }
 0x106   : > { %v6272_v45 = vpack.c.bf16 %v1142_v54, %v1141_v62  ;;  %v1237_v27 = vadd.f32 %v7368_v33, %v1233_v39  ;;  %v1238_v28 = vadd.f32 %v7390_v40, %v1234_v8  ;;  %v1059_v44 = vadd.f32 %v1055_v19, %v1047_v48 }
 0x107   : > { %6023 = vmatmul.mubr.msk.f32.gmra.mrb[62].mxu0 %vm2087_vm12, %v7758_v42  ;;  %v1060_v16 = vadd.f32 %v1056_v2, %v1048_v13  ;;  %v1068_v31 = vmul.f32 %v7345_v51, %v7639_v63  ;;  %v1155_v47 = vmul.f32 %v7320_v46, %v7642_v14  ;;  %v1156_v9 = vmul.f32 %v7325_v43, %v7642_v14 }
 0x108   : > { %6030 = vmatmul.mubr.msk.f32.gmra.mrb[60].mxu1 %vm2087_vm12, %v7742_v59  ;;  %6273 = vmatprep.subr.bf16.mxu0 %v6272_v45  ;;  %vm1241_vm15 = vcmp.ge.f32.partialorder %v1237_v27, 0.0  ;;  %vm1242_vm0 = vcmp.ge.f32.partialorder %v1238_v28, 0.0  ;;  %v1245_v18 = vmul.f32 0.2, %v1237_v27  ;;  %v1246_v25 = vmul.f32 0.2, %v1238_v28 }
 0x109   : > { %3009 = vmatprep.mubr.f32.mxu1 %v9932_v1  ;;  %v1071_v60 = vadd.f32 %v1067_v35, %v1059_v44  ;;  %v1072_v50 = vadd.f32 %v1068_v31, %v1060_v16  ;;  %v1163_v63 = vmul.f32 %v7329_v26, %v7670_v15  ;;  %v1164_v46 = vmul.f32 %v7335_v20, %v7670_v15  ;;  %v5956_v31 = vld [vmem:[%s6731_s22 + $0x50] sm:$0x7] }
 0x10a   : > { %v1249_v43 = vsel %vm1241_vm15, %v1237_v27, %v1245_v18  ;;  %v1250_v14 = vsel %vm1242_vm0, %v1238_v28, %v1246_v25  ;;  %v1175_v29 = vmul.f32 %v7341_v24, %v7674_v49  ;;  %v1176_v37 = vmul.f32 %v7345_v51, %v7674_v49  ;;  %3080 = vmatprep.mubr.f32.mxu0 %v9932_v1 }
 0x10b   : > { %v6280_v10 = vpack.c.bf16 %v1250_v14, %v1249_v43  ;;  %v1075_v53 = vadd.f32 %v7368_v33, %v1071_v60  ;;  %v1076_v11 = vadd.f32 %v7390_v40, %v1072_v50  ;;  %v1167_v26 = vadd.f32 %v1163_v63, %v1155_v47 }
 0x10c   : > { %6031 = vmatmul.mubr.msk.f32.gmra.mrb[62].mxu1 %vm2087_vm12, %v7758_v42  ;;  %v1168_v20 = vadd.f32 %v1164_v46, %v1156_v9  ;;  %v7786_v15 = vrot.slane %v5957_v56, %v6733_v3  ;;  %v7789_v24 = vrot.slane %v5957_v56, %v6735_v4  ;;  %v7792_v51 = vrot.slane %v5957_v56, %v6737_v5 }
 0x10d   : > { %6281 = vmatprep.subr.bf16.mxu1 %v6280_v10  ;;  %vm1079_vm1 = vcmp.ge.f32.partialorder %v1075_v53, 0.0  ;;  %vm1080_vm2 = vcmp.ge.f32.partialorder %v1076_v11, 0.0  ;;  %v1083_v49 = vmul.f32 0.2, %v1075_v53  ;;  %v1084_v55 = vmul.f32 0.2, %v1076_v11  ;;  %3193 = vmatprep.mubr.f32.mxu1 %v9932_v1 }
 0x10e   : > { %v1179_v30 = vadd.f32 %v1175_v29, %v1167_v26  ;;  %v1180_v48 = vadd.f32 %v1176_v37, %v1168_v20  ;;  %v1315_v13 = vmul.f32 %v7354_v52, %v7786_v15  ;;  %v1316_v21 = vmul.f32 %v7358_v7, %v7786_v15 }
 0x10f   : > { %v1087_v39 = vsel %vm1079_vm1, %v1075_v53, %v1083_v49  ;;  %v1088_v8 = vsel %vm1080_vm2, %v1076_v11, %v1084_v55  ;;  %v1323_v19 = vmul.f32 %v7374_v22, %v7789_v24  ;;  %v1324_v62 = vmul.f32 %v7378_v12, %v7789_v24 }
 0x110   : > { %v6274_v54 = vpack.c.bf16 %v1088_v8, %v1087_v39  ;;  %v1183_v2 = vadd.f32 %v7368_v33, %v1179_v30  ;;  %v1184_v35 = vadd.f32 %v7390_v40, %v1180_v48  ;;  %v1335_v45 = vmul.f32 %v7382_v23, %v7792_v51  ;;  %v5958_v8 = vld [vmem:[%s6731_s22 + $0x58] sm:$0x7] }
 0x111   : > { %v1327_v27 = vadd.f32 %v1323_v19, %v1315_v13  ;;  %v1328_v28 = vadd.f32 %v1324_v62, %v1316_v21  ;;  %v1336_v44 = vmul.f32 %v7386_v41, %v7792_v51  ;;  %v7811_v16 = vrot.slane %v5959_v38, %v6733_v3 }
 0x112   : > { %6275 = vmatpush1.bf16.msra.mxu0 %v6274_v54  ;;  %vm1187_vm3 = vcmp.ge.f32.partialorder %v1183_v2, 0.0  ;;  %vm1188_vm4 = vcmp.ge.f32.partialorder %v1184_v35, 0.0  ;;  %v1191_v47 = vmul.f32 0.2, %v1183_v2  ;;  %v1192_v9 = vmul.f32 0.2, %v1184_v35 }
 0x113   : > { %v1339_v33 = vadd.f32 %v1335_v45, %v1327_v27  ;;  %v1340_v18 = vadd.f32 %v1336_v44, %v1328_v28  ;;  %v1423_v40 = vmul.f32 %v7354_v52, %v7811_v16  ;;  %v1424_v25 = vmul.f32 %v7358_v7, %v7811_v16 }
 0x114   : > { %v1195_v60 = vsel %vm1187_vm3, %v1183_v2, %v1191_v47  ;;  %v1196_v50 = vsel %vm1188_vm4, %v1184_v35, %v1192_v9  ;;  %v7819_v63 = vrot.slane %v5959_v38, %v6735_v4  ;;  %v7822_v46 = vrot.slane %v5959_v38, %v6737_v5 }
 0x115   : > { %v6282_v56 = vpack.c.bf16 %v1196_v50, %v1195_v60  ;;  %6032 = vmatmul.mubr.msk.f32.vlgmr.msra.gmra.mrb[64].mxu0 %vm2087_vm12, %v7615_v57  ;;  %v1343_v43 = vadd.f32 %v7418_v58, %v1339_v33  ;;  %v1344_v14 = vadd.f32 %v7421_v6, %v1340_v18  ;;  %v7829_v29 = vrot.slane %v5956_v31, %v6733_v3 }
 0x116   : > { %3086 = vmatprep.mubr.f32.mxu0 %v9932_v1  ;;  %v1431_v37 = vmul.f32 %v7374_v22, %v7819_v63  ;;  %v1432_v10 = vmul.f32 %v7378_v12, %v7819_v63  ;;  %v1443_v53 = vmul.f32 %v7382_v23, %v7822_v46  ;;  %v1444_v11 = vmul.f32 %v7386_v41, %v7822_v46 }
 0x117   : > { %6283 = vmatpush1.bf16.msra.mxu1 %v6282_v56  ;;  %vm1347_vm5 = vcmp.ge.f32.partialorder %v1343_v43, 0.0  ;;  %vm1348_vm6 = vcmp.ge.f32.partialorder %v1344_v14, 0.0  ;;  %v1351_v26 = vmul.f32 0.2, %v1343_v43  ;;  %v1352_v20 = vmul.f32 0.2, %v1344_v14 }
 0x118   : > { %v1435_v49 = vadd.f32 %v1431_v37, %v1423_v40  ;;  %v1436_v55 = vadd.f32 %v1432_v10, %v1424_v25  ;;  %v1261_v30 = vmul.f32 %v7354_v52, %v7829_v29  ;;  %v1262_v48 = vmul.f32 %v7358_v7, %v7829_v29  ;;  %v7878_v40 = vld [vmem:[#allocation4 + $0x10] sm:$0xff] }
 0x119   : > { %6033 = vmatmul.mubr.msk.f32.gmra.mrb[66].mxu0 %vm2087_vm12, %v7634_v36  ;;  %v1355_v13 = vsel %vm1347_vm5, %v1343_v43, %v1351_v26  ;;  %v1356_v21 = vsel %vm1348_vm6, %v1344_v14, %v1352_v20  ;;  %v7847_v38 = vrot.slane %v5956_v31, %v6735_v4  ;;  %v7850_v39 = vrot.slane %v5956_v31, %v6737_v5 }
 0x11a   : > { %6040 = vmatmul.mubr.msk.f32.vlgmr.msra.gmra.mrb[64].mxu1 %vm2087_vm12, %v7615_v57  ;;  %3092 = vmatprep.mubr.f32.mxu0 %v9932_v1  ;;  %v6284_v19 = vpack.c.bf16 %v1356_v21, %v1355_v13  ;;  %v1447_v62 = vadd.f32 %v1443_v53, %v1435_v49  ;;  %v1448_v54 = vadd.f32 %v1444_v11, %v1436_v55 }
 0x11b   : > { %3199 = vmatprep.mubr.f32.mxu1 %v9932_v1  ;;  %v1269_v2 = vmul.f32 %v7374_v22, %v7847_v38  ;;  %v1270_v35 = vmul.f32 %v7378_v12, %v7847_v38  ;;  %v1281_v45 = vmul.f32 %v7382_v23, %v7850_v39  ;;  %v1282_v27 = vmul.f32 %v7386_v41, %v7850_v39 }
 0x11c   : > { %6285 = vmatprep.subr.bf16.mxu0 %v6284_v19  ;;  %v1451_v28 = vadd.f32 %v7418_v58, %v1447_v62  ;;  %v1452_v44 = vadd.f32 %v7421_v6, %v1448_v54  ;;  %v7868_v31 = vrot.slane %v5958_v8, %v6733_v3  ;;  %v7871_v47 = vrot.slane %v5958_v8, %v6735_v4  ;;  %v7910_v19 = vld [vmem:[#allocation4 + $0x30] sm:$0xff] }
 0x11d   : > { %6034 = vmatmul.mubr.msk.f32.gmra.mrb[68].mxu0 %vm2087_vm12, %v7658_v61  ;;  %v1273_v9 = vadd.f32 %v1269_v2, %v1261_v30  ;;  %v1274_v33 = vadd.f32 %v1270_v35, %v1262_v48  ;;  %v7876_v18 = vrot.slane %v5958_v8, %v6737_v5  ;;  %v1317_v25 = vmul.f32 %v7878_v40, %v7786_v15  ;;  %v7916_v2 = vld [vmem:[#allocation4 + $0x38] sm:$0xff] }
 0x11e   : > { %6041 = vmatmul.mubr.msk.f32.gmra.mrb[66].mxu1 %vm2087_vm12, %v7634_v36  ;;  %3098 = vmatprep.mubr.f32.mxu0 %v9932_v1  ;;  %vm1455_vm7 = vcmp.ge.f32.partialorder %v1451_v28, 0.0  ;;  %vm1456_vm8 = vcmp.ge.f32.partialorder %v1452_v44, 0.0  ;;  %v1459_v60 = vmul.f32 0.2, %v1451_v28  ;;  %v1460_v50 = vmul.f32 0.2, %v1452_v44 }
 0x11f   : > { %3205 = vmatprep.mubr.f32.mxu1 %v9932_v1  ;;  %v1285_v56 = vadd.f32 %v1281_v45, %v1273_v9  ;;  %v1286_v43 = vadd.f32 %v1282_v27, %v1274_v33  ;;  %v1369_v14 = vmul.f32 %v7354_v52, %v7868_v31  ;;  %v1370_v37 = vmul.f32 %v7358_v7, %v7868_v31  ;;  %v7920_v45 = vld [vmem:[#allocation4 + $0x50] sm:$0xff] }
 0x120   : > { %v1463_v10 = vsel %vm1455_vm7, %v1451_v28, %v1459_v60  ;;  %v1464_v53 = vsel %vm1456_vm8, %v1452_v44, %v1460_v50  ;;  %v1377_v11 = vmul.f32 %v7374_v22, %v7871_v47  ;;  %v1378_v26 = vmul.f32 %v7378_v12, %v7871_v47 }
 0x121   : > { %6035 = vmatmul.mubr.msk.f32.gmra.mrb[70].mxu0 %vm2087_vm12, %v7684_v34  ;;  %v6292_v20 = vpack.c.bf16 %v1464_v53, %v1463_v10  ;;  %v1289_v49 = vadd.f32 %v7418_v58, %v1285_v56  ;;  %v1290_v55 = vadd.f32 %v7421_v6, %v1286_v43  ;;  %v1389_v52 = vmul.f32 %v7382_v23, %v7876_v18  ;;  %v7906_v23 = vld [vmem:[#allocation4 + $0x18] sm:$0xff] }
 0x122   : > { %6042 = vmatmul.mubr.msk.f32.gmra.mrb[68].mxu1 %vm2087_vm12, %v7658_v61  ;;  %3104 = vmatprep.mubr.f32.mxu0 %v9932_v1  ;;  %v1381_v7 = vadd.f32 %v1377_v11, %v1369_v14  ;;  %v1382_v22 = vadd.f32 %v1378_v26, %v1370_v37  ;;  %v1390_v12 = vmul.f32 %v7386_v41, %v7876_v18  ;;  %v7948_v11 = vld [vmem:[#allocation4 + $0x70] sm:$0xff]  ;;  %v7951_v26 = vld [vmem:[#allocation4 + $0x78] sm:$0xff] }
 0x123   : > { %3211 = vmatprep.mubr.f32.mxu1 %v9932_v1  ;;  %6293 = vmatprep.subr.bf16.mxu1 %v6292_v20  ;;  %vm1293_vm9 = vcmp.ge.f32.partialorder %v1289_v49, 0.0  ;;  %vm1294_vm10 = vcmp.ge.f32.partialorder %v1290_v55, 0.0  ;;  %v1297_v30 = vmul.f32 0.2, %v1289_v49  ;;  %v1298_v48 = vmul.f32 0.2, %v1290_v55 }
 0x124   : > { %v1393_v13 = vadd.f32 %v1389_v52, %v1381_v7  ;;  %v1394_v21 = vadd.f32 %v1390_v12, %v1382_v22  ;;  %v1318_v8 = vmul.f32 %v7906_v23, %v7786_v15  ;;  %v1325_v62 = vmul.f32 %v7910_v19, %v7789_v24 }
 0x125   : > { %6036 = vmatmul.mubr.msk.f32.gmra.mrb[72].mxu0 %vm2087_vm12, %v7702_v17  ;;  %v1301_v41 = vsel %vm1293_vm9, %v1289_v49, %v1297_v30  ;;  %v1302_v54 = vsel %vm1294_vm10, %v1290_v55, %v1298_v48  ;;  %v1326_v35 = vmul.f32 %v7916_v2, %v7789_v24  ;;  %v1337_v15 = vmul.f32 %v7920_v45, %v7792_v51  ;;  %v7930_v24 = vld [vmem:[#allocation4 + $0x58] sm:$0xff] }
 0x126   : > { %6043 = vmatmul.mubr.msk.f32.gmra.mrb[70].mxu1 %vm2087_vm12, %v7684_v34  ;;  %3110 = vmatprep.mubr.f32.mxu0 %v9932_v1  ;;  %v6286_v27 = vpack.c.bf16 %v1302_v54, %v1301_v41  ;;  %v1397_v28 = vadd.f32 %v7418_v58, %v1393_v13  ;;  %v1398_v44 = vadd.f32 %v7421_v6, %v1394_v21 }
 0x127   : > { %3217 = vmatprep.mubr.f32.mxu1 %v9932_v1  ;;  %v1329_v9 = vadd.f32 %v1325_v62, %v1317_v25  ;;  %v1330_v33 = vadd.f32 %v1326_v35, %v1318_v8  ;;  %v1338_v60 = vmul.f32 %v7930_v24, %v7792_v51  ;;  %v1425_v50 = vmul.f32 %v7878_v40, %v7811_v16 }
 0x128   : > { %6287 = vmatpush1.bf16.msra.mxu0 %v6286_v27  ;;  %vm1401_vm11 = vcmp.ge.f32.partialorder %v1397_v28, 0.0  ;;  %vm1402_vm13 = vcmp.ge.f32.partialorder %v1398_v44, 0.0  ;;  %v1405_v56 = vmul.f32 0.2, %v1397_v28  ;;  %v1406_v43 = vmul.f32 0.2, %v1398_v44 }
 0x129   : > { %6037 = vmatmul.mubr.msk.f32.gmra.mrb[74].mxu0 %vm2087_vm12, %v7720_v32  ;;  %v1341_v58 = vadd.f32 %v1337_v15, %v1329_v9  ;;  %v1342_v6 = vadd.f32 %v1338_v60, %v1330_v33  ;;  %v1426_v25 = vmul.f32 %v7906_v23, %v7811_v16  ;;  %v1433_v14 = vmul.f32 %v7910_v19, %v7819_v63 }
 0x12a   : > { %6044 = vmatmul.mubr.msk.f32.gmra.mrb[72].mxu1 %vm2087_vm12, %v7702_v17  ;;  %3116 = vmatprep.mubr.f32.mxu0 %v9932_v1  ;;  %v1409_v51 = vsel %vm1401_vm11, %v1397_v28, %v1405_v56  ;;  %v1410_v37 = vsel %vm1402_vm13, %v1398_v44, %v1406_v43  ;;  %v1434_v10 = vmul.f32 %v7916_v2, %v7819_v63  ;;  %v5961_v56 = vld [vmem:[%s6731_s22 + $0x64] sm:$0x7] }
 0x12b   : > { %3223 = vmatprep.mubr.f32.mxu1 %v9932_v1  ;;  %v6294_v53 = vpack.c.bf16 %v1410_v37, %v1409_v51  ;;  %v1345_v16 = vadd.f32 %v7948_v11, %v1341_v58  ;;  %v1346_v20 = vadd.f32 %v7951_v26, %v1342_v6  ;;  %v1437_v49 = vadd.f32 %v1433_v14, %v1425_v50 }
 0x12c   : > { %v1438_v55 = vadd.f32 %v1434_v10, %v1426_v25  ;;  %v1445_v52 = vmul.f32 %v7920_v45, %v7822_v46  ;;  %v1446_v7 = vmul.f32 %v7930_v24, %v7822_v46  ;;  %v1263_v63 = vmul.f32 %v7878_v40, %v7829_v29 }
 0x12d   : > { %6038 = vmatmul.mubr.msk.f32.gmra.mrb[76].mxu0 %vm2087_vm12, %v7742_v59  ;;  %6295 = vmatpush1.bf16.msra.mxu1 %v6294_v53  ;;  %vm1349_vm14 = vcmp.ge.f32.partialorder %v1345_v16, 0.0  ;;  %vm1350_vm15 = vcmp.ge.f32.partialorder %v1346_v20, 0.0  ;;  %v1353_v22 = vmul.f32 0.2, %v1345_v16  ;;  %v1354_v12 = vmul.f32 0.2, %v1346_v20 }
 0x12e   : > { %6045 = vmatmul.mubr.msk.f32.gmra.mrb[74].mxu1 %vm2087_vm12, %v7720_v32  ;;  %3122 = vmatprep.mubr.f32.mxu0 %v9932_v1  ;;  %v1449_v30 = vadd.f32 %v1445_v52, %v1437_v49  ;;  %v1450_v48 = vadd.f32 %v1446_v7, %v1438_v55  ;;  %v1264_v46 = vmul.f32 %v7906_v23, %v7829_v29  ;;  %v8008_v7 = vld [vmem:[#allocation4] sm:$0xff] }
 0x12f   : > { %3229 = vmatprep.mubr.f32.mxu1 %v9932_v1  ;;  %v1357_v13 = vsel %vm1349_vm14, %v1345_v16, %v1353_v22  ;;  %v1358_v21 = vsel %vm1350_vm15, %v1346_v20, %v1354_v12  ;;  %v1271_v8 = vmul.f32 %v7910_v19, %v7847_v38  ;;  %v1272_v62 = vmul.f32 %v7916_v2, %v7847_v38  ;;  %v5963_v12 = vld [vmem:[%s6731_s22 + $0x6c] sm:$0x7] }
 0x130   : > { %v6288_v41 = vpack.c.bf16 %v1358_v21, %v1357_v13  ;;  %v1453_v54 = vadd.f32 %v7948_v11, %v1449_v30  ;;  %v1454_v35 = vadd.f32 %v7951_v26, %v1450_v48  ;;  %v1283_v15 = vmul.f32 %v7920_v45, %v7850_v39  ;;  %v8021_v21 = vld [vmem:[#allocation4 + $0x28] sm:$0xff] }
 0x131   : > { %6039 = vmatmul.mubr.msk.f32.gmra.mrb[78].mxu0 %vm2087_vm12, %v7758_v42  ;;  %v1275_v29 = vadd.f32 %v1271_v8, %v1263_v63  ;;  %v1276_v27 = vadd.f32 %v1272_v62, %v1264_v46  ;;  %v1284_v28 = vmul.f32 %v7930_v24, %v7850_v39  ;;  %v1371_v38 = vmul.f32 %v7878_v40, %v7868_v31  ;;  %v8012_v63 = vld [vmem:[#allocation4 + $0x8] sm:$0xff]  ;;  %v8017_v46 = vld [vmem:[#allocation4 + $0x20] sm:$0xff] }
 0x132   : > { %6046 = vmatmul.mubr.msk.f32.gmra.mrb[76].mxu1 %vm2087_vm12, %v7742_v59  ;;  %6289 = vmatprep.subr.bf16.mxu0 %v6288_v41  ;;  %vm1457_vm0 = vcmp.ge.f32.partialorder %v1453_v54, 0.0  ;;  %vm1458_vm1 = vcmp.ge.f32.partialorder %v1454_v35, 0.0  ;;  %v1461_v44 = vmul.f32 0.2, %v1453_v54  ;;  %v1462_v9 = vmul.f32 0.2, %v1454_v35 }
 0x133   : > { %3235 = vmatprep.mubr.f32.mxu1 %v9932_v1  ;;  %v1287_v33 = vadd.f32 %v1283_v15, %v1275_v29  ;;  %v1288_v60 = vadd.f32 %v1284_v28, %v1276_v27  ;;  %v1372_v50 = vmul.f32 %v7906_v23, %v7868_v31  ;;  %v1379_v39 = vmul.f32 %v7910_v19, %v7871_v47 }
 0x134   : > { %v1465_v43 = vsel %vm1457_vm0, %v1453_v54, %v1461_v44  ;;  %v1466_v58 = vsel %vm1458_vm1, %v1454_v35, %v1462_v9  ;;  %v1380_v6 = vmul.f32 %v7916_v2, %v7871_v47  ;;  %v1391_v25 = vmul.f32 %v7920_v45, %v7876_v18  ;;  %3306 = vmatprep.mubr.f32.mxu0 %v9932_v1  ;;  %v8036_v9 = vld [vmem:[#allocation4 + $0x40] sm:$0xff] }
 0x135   : > { %v6296_v14 = vpack.c.bf16 %v1466_v58, %v1465_v43  ;;  %v1291_v51 = vadd.f32 %v7948_v11, %v1287_v33  ;;  %v1292_v37 = vadd.f32 %v7951_v26, %v1288_v60  ;;  %v1383_v31 = vadd.f32 %v1379_v39, %v1371_v38  ;;  %v8040_v60 = vld [vmem:[#allocation4 + $0x48] sm:$0xff]  ;;  %v5960_v43 = vld [vmem:[%s6731_s22 + $0x60] sm:$0x7] }
 0x136   : > { %6047 = vmatmul.mubr.msk.f32.gmra.mrb[78].mxu1 %vm2087_vm12, %v7758_v42  ;;  %v1384_v10 = vadd.f32 %v1380_v6, %v1372_v50  ;;  %v1392_v53 = vmul.f32 %v7930_v24, %v7876_v18  ;;  %v8002_v47 = vrot.slane %v5961_v56, %v6733_v3  ;;  %v8005_v16 = vrot.slane %v5961_v56, %v6735_v4 }
 0x137   : > { %6297 = vmatprep.subr.bf16.mxu1 %v6296_v14  ;;  %vm1295_vm2 = vcmp.ge.f32.partialorder %v1291_v51, 0.0  ;;  %vm1296_vm3 = vcmp.ge.f32.partialorder %v1292_v37, 0.0  ;;  %v1299_v20 = vmul.f32 0.2, %v1291_v51  ;;  %v1300_v49 = vmul.f32 0.2, %v1292_v37  ;;  %3419 = vmatprep.mubr.f32.mxu1 %v9932_v1 }
 0x138   : > { %v1395_v55 = vadd.f32 %v1391_v25, %v1383_v31  ;;  %v1396_v52 = vadd.f32 %v1392_v53, %v1384_v10  ;;  %v1531_v18 = vmul.f32 %v8008_v7, %v8002_v47  ;;  %v1532_v22 = vmul.f32 %v8012_v63, %v8002_v47 }
 0x139   : > { %v1303_v30 = vsel %vm1295_vm2, %v1291_v51, %v1299_v20  ;;  %v1304_v48 = vsel %vm1296_vm3, %v1292_v37, %v1300_v49  ;;  %v1539_v13 = vmul.f32 %v8017_v46, %v8005_v16  ;;  %v1540_v8 = vmul.f32 %v8021_v21, %v8005_v16 }
 0x13a   : > { %v6290_v62 = vpack.c.bf16 %v1304_v48, %v1303_v30  ;;  %v1399_v41 = vadd.f32 %v7948_v11, %v1395_v55  ;;  %v1400_v54 = vadd.f32 %v7951_v26, %v1396_v52  ;;  %v8028_v35 = vrot.slane %v5961_v56, %v6737_v5 }
 0x13b   : > { %v1543_v15 = vadd.f32 %v1539_v13, %v1531_v18  ;;  %v1544_v29 = vadd.f32 %v1540_v8, %v1532_v22  ;;  %v8031_v27 = vrot.slane %v5963_v12, %v6733_v3  ;;  %v8034_v28 = vrot.slane %v5963_v12, %v6735_v4  ;;  %v8069_v22 = vld [vmem:[#allocation4 + $0x60] sm:$0xff] }
 0x13c   : > { %6291 = vmatpush1.bf16.msra.mxu0 %v6290_v62  ;;  %vm1403_vm4 = vcmp.ge.f32.partialorder %v1399_v41, 0.0  ;;  %vm1404_vm5 = vcmp.ge.f32.partialorder %v1400_v54, 0.0  ;;  %v1407_v38 = vmul.f32 0.2, %v1399_v41  ;;  %v1408_v44 = vmul.f32 0.2, %v1400_v54 }
 0x13d   : > { %v1551_v33 = vmul.f32 %v8036_v9, %v8028_v35  ;;  %v1552_v50 = vmul.f32 %v8040_v60, %v8028_v35  ;;  %v1639_v39 = vmul.f32 %v8008_v7, %v8031_v27  ;;  %v1640_v56 = vmul.f32 %v8012_v63, %v8031_v27 }
 0x13e   : > { %v1411_v58 = vsel %vm1403_vm4, %v1399_v41, %v1407_v38  ;;  %v1412_v6 = vsel %vm1404_vm5, %v1400_v54, %v1408_v44  ;;  %v1647_v25 = vmul.f32 %v8017_v46, %v8034_v28  ;;  %v1648_v14 = vmul.f32 %v8021_v21, %v8034_v28  ;;  %v8053_v51 = vpop.f32.mrb[0].mxu0 }
 0x13f   : > { %v6298_v37 = vpack.c.bf16 %v1412_v6, %v1411_v58  ;;  %6048 = vmatmul.mubr.msk.f32.vlgmr.msra.gmra.mrb[80].mxu0 %vm2087_vm12, %v7615_v57  ;;  %v1555_v31 = vadd.f32 %v1551_v33, %v1543_v15  ;;  %v1556_v10 = vadd.f32 %v1552_v50, %v1544_v29  ;;  %v8058_v53 = vrot.slane %v5963_v12, %v6737_v5  ;;  %v8060_v20 = vpop.f32.mrb[1].mxu0  ;;  %v8072_v12 = vld [vmem:[#allocation4 + $0x68] sm:$0xff] }
 0x140   : > { %3312 = vmatprep.mubr.f32.mxu0 %v9932_v1  ;;  %v1651_v49 = vadd.f32 %v1647_v25, %v1639_v39  ;;  %v1652_v55 = vadd.f32 %v1648_v14, %v1640_v56  ;;  %v8064_v52 = vrot.slane %v5960_v43, %v6733_v3  ;;  %v8067_v18 = vrot.slane %v5960_v43, %v6735_v4  ;;  %v5962_v29 = vld [vmem:[%s6731_s22 + $0x68] sm:$0x7] }
 0x141   : > { %6299 = vmatpush1.bf16.msra.mxu1 %v6298_v37  ;;  %v1559_v30 = vadd.f32 %v8069_v22, %v1555_v31  ;;  %v1560_v48 = vadd.f32 %v8072_v12, %v1556_v10  ;;  %v1659_v13 = vmul.f32 %v8036_v9, %v8058_v53  ;;  %v1660_v8 = vmul.f32 %v8040_v60, %v8058_v53 }
 0x142   : > { %v1477_v62 = vmul.f32 %v8008_v7, %v8064_v52  ;;  %v1478_v41 = vmul.f32 %v8012_v63, %v8064_v52  ;;  %v1485_v54 = vmul.f32 %v8017_v46, %v8067_v18  ;;  %v1486_v15 = vmul.f32 %v8021_v21, %v8067_v18  ;;  %v8088_v38 = vpop.f32.mrb[2].mxu0 }
 0x143   : > { %6049 = vmatmul.mubr.msk.f32.gmra.mrb[82].mxu0 %vm2087_vm12, %v7634_v36  ;;  %vm1563_vm6 = vcmp.ge.f32.partialorder %v1559_v30, 0.0  ;;  %vm1564_vm7 = vcmp.ge.f32.partialorder %v1560_v48, 0.0  ;;  %v1567_v44 = vmul.f32 0.2, %v1559_v30  ;;  %v1568_v33 = vmul.f32 0.2, %v1560_v48 }
 0x144   : > { %6056 = vmatmul.mubr.msk.f32.vlgmr.msra.gmra.mrb[80].mxu1 %vm2087_vm12, %v7615_v57  ;;  %3318 = vmatprep.mubr.f32.mxu0 %v9932_v1  ;;  %v1663_v50 = vadd.f32 %v1659_v13, %v1651_v49  ;;  %v1664_v39 = vadd.f32 %v1660_v8, %v1652_v55  ;;  %v1489_v56 = vadd.f32 %v1485_v54, %v1477_v62  ;;  %v8095_v58 = vpop.f32.mrb[0].mxu1  ;;  %v8097_v6 = vpop.f32.mrb[3].mxu0 }
 0x145   : > { %3425 = vmatprep.mubr.f32.mxu1 %v9932_v1  ;;  %v1571_v25 = vsel %vm1563_vm6, %v1559_v30, %v1567_v44  ;;  %v1572_v14 = vsel %vm1564_vm7, %v1560_v48, %v1568_v33  ;;  %v1490_v37 = vadd.f32 %v1486_v15, %v1478_v41  ;;  %v8101_v31 = vrot.slane %v5960_v43, %v6737_v5  ;;  %v8103_v10 = vpop.f32.mrb[1].mxu1 }
 0x146   : > { %v6300_v57 = vpack.c.bf16 %v1572_v14, %v1571_v25  ;;  %v1667_v0 = vadd.f32 %v8069_v22, %v1663_v50  ;;  %v1668_v49 = vadd.f32 %v8072_v12, %v1664_v39  ;;  %v8108_v55 = vrot.slane %v5962_v29, %v6733_v3  ;;  %v8110_v13 = vpop.f32.mrb[4].mxu0 }
 0x147   : > { %6050 = vmatmul.mubr.msk.f32.gmra.mrb[84].mxu0 %vm2087_vm12, %v7658_v61  ;;  %v1497_v30 = vmul.f32 %v8036_v9, %v8101_v31  ;;  %v1498_v43 = vmul.f32 %v8040_v60, %v8101_v31  ;;  %v8119_v48 = vrot.slane %v5962_v29, %v6735_v4  ;;  %v8122_v8 = vrot.slane %v5962_v29, %v6737_v5  ;;  %v8124_v62 = vpop.f32.mrb[2].mxu1  ;;  %v8126_v41 = vpop.f32.mrb[5].mxu0 }
 0x148   : > { %9945 = vst [vmem:[#allocation10_spill] sm:$0xff] %v8126_v41  ;;  %6057 = vmatmul.mubr.msk.f32.gmra.mrb[82].mxu1 %vm2087_vm12, %v7634_v36  ;;  %3324 = vmatprep.mubr.f32.mxu0 %v9932_v1  ;;  %vm1671_vm8 = vcmp.ge.f32.partialorder %v1667_v0, 0.0  ;;  %vm1672_vm9 = vcmp.ge.f32.partialorder %v1668_v49, 0.0  ;;  %v1675_v54 = vmul.f32 0.2, %v1667_v0  ;;  %v1585_v29 = vmul.f32 %v8008_v7, %v8108_v55  ;;  %v8134_v50 = vpop.f32.mrb[3].mxu1 }
 0x149   : > { %v1676_v15 = vmul.f32 0.2, %v1668_v49  ;;  %3431 = vmatprep.mubr.f32.mxu1 %v9932_v1  ;;  %6301 = vmatprep.subr.bf16.mxu0 %v6300_v57  ;;  %v1501_v44 = vadd.f32 %v1497_v30, %v1489_v56  ;;  %v1502_v33 = vadd.f32 %v1498_v43, %v1490_v37  ;;  %v1586_v36 = vmul.f32 %v8012_v63, %v8108_v55 }
 0x14a   : > { %v1679_v39 = vsel %vm1671_vm8, %v1667_v0, %v1675_v54  ;;  %v1593_v14 = vmul.f32 %v8017_v46, %v8119_v48  ;;  %v8140_v41 = vpop.f32.mrb[6].mxu0  ;;  %v1594_v0 = vmul.f32 %v8021_v21, %v8119_v48  ;;  %v1605_v54 = vmul.f32 %v8036_v9, %v8122_v8 }
 0x14b   : > { %v1680_v25 = vsel %vm1672_vm9, %v1668_v49, %v1676_v15  ;;  %6051 = vmatmul.mubr.msk.f32.gmra.mrb[86].mxu0 %vm2087_vm12, %v7684_v34  ;;  %v1505_v37 = vadd.f32 %v8069_v22, %v1501_v44  ;;  %v1506_v57 = vadd.f32 %v8072_v12, %v1502_v33  ;;  %v8148_v49 = vpop.f32.mrb[4].mxu1  ;;  %v8150_v30 = vpop.f32.mrb[7].mxu0  ;;  %v1606_v15 = vmul.f32 %v8040_v60, %v8122_v8 }
 0x14c   : > { %v6308_v56 = vpack.c.bf16 %v1680_v25, %v1679_v39  ;;  %9946 = vst [vmem:[#allocation11_spill] sm:$0xff] %v8148_v49  ;;  %9947 = vst [vmem:[#allocation12_spill] sm:$0xff] %v8150_v30  ;;  %6058 = vmatmul.mubr.msk.f32.gmra.mrb[84].mxu1 %vm2087_vm12, %v7658_v61  ;;  %3330 = vmatprep.mubr.f32.mxu0 %v9932_v1  ;;  %v1597_v43 = vadd.f32 %v1593_v14, %v1585_v29  ;;  %v8159_v44 = vpop.f32.mrb[5].mxu1 }
 0x14d   : > { %9948 = vst [vmem:[#allocation13_spill] sm:$0xff] %v8159_v44  ;;  %3437 = vmatprep.mubr.f32.mxu1 %v9932_v1  ;;  %vm1509_vm10 = vcmp.ge.f32.partialorder %v1505_v37, 0.0  ;;  %vm1510_vm11 = vcmp.ge.f32.partialorder %v1506_v57, 0.0  ;;  %v1513_v33 = vmul.f32 0.2, %v1505_v37  ;;  %v1598_v25 = vadd.f32 %v1594_v0, %v1586_v36 }
 0x14e   : > { %6309 = vmatprep.subr.bf16.mxu1 %v6308_v56  ;;  %v1514_v39 = vmul.f32 0.2, %v1506_v57  ;;  %v1609_v61 = vadd.f32 %v1605_v54, %v1597_v43  ;;  %v1533_v29 = vmul.f32 %v7878_v40, %v8002_v47  ;;  %v1534_v14 = vmul.f32 %v7906_v23, %v8002_v47  ;;  %v8166_v30 = vpop.f32.mrb[8].mxu0 }
 0x14f   : > { %9949 = vst [vmem:[#allocation14_spill] sm:$0xff] %v8166_v30  ;;  %6052 = vmatmul.mubr.msk.f32.gmra.mrb[88].mxu0 %vm2087_vm12, %v7702_v17  ;;  %v1517_v44 = vsel %vm1509_vm10, %v1505_v37, %v1513_v33  ;;  %v1541_v56 = vmul.f32 %v7910_v19, %v8005_v16  ;;  %v1542_v36 = vmul.f32 %v7916_v2, %v8005_v16  ;;  %v8174_v0 = vpop.f32.mrb[6].mxu1  ;;  %v8176_v43 = vpop.f32.mrb[9].mxu0  ;;  %v9952_v47 = vmov 0.0  }
 0x150   : > { %v1518_v1 = vsel %vm1510_vm11, %v1506_v57, %v1514_v39  ;;  %9950 = vst [vmem:[#allocation15_spill] sm:$0xff] %v8174_v0  ;;  %9951 = vst [vmem:[#allocation16_spill] sm:$0xff] %v8176_v43  ;;  %6059 = vmatmul.mubr.msk.f32.gmra.mrb[86].mxu1 %vm2087_vm12, %v7684_v34  ;;  %3336 = vmatprep.mubr.f32.mxu0 %v9952_v47  ;;  %v1610_v30 = vadd.f32 %v1606_v15, %v1598_v25  ;;  %v8182_v57 = vpop.f32.mrb[7].mxu1 }
 0x151   : > { %v6302_v54 = vpack.c.bf16 %v1518_v1, %v1517_v44  ;;  %v1613_v37 = vadd.f32 %v8069_v22, %v1609_v61  ;;  %9953 = vst [vmem:[#allocation17_spill] sm:$0xff] %v8182_v57  ;;  %3443 = vmatprep.mubr.f32.mxu1 %v9952_v47  ;;  %v1545_v33 = vadd.f32 %v1541_v56, %v1533_v29 }
 0x152   : > { %v1546_v39 = vadd.f32 %v1542_v36, %v1534_v14  ;;  %v1553_v16 = vmul.f32 %v7920_v45, %v8028_v35  ;;  %v1554_v43 = vmul.f32 %v7930_v24, %v8028_v35  ;;  %v1614_v34 = vadd.f32 %v8072_v12, %v1610_v30  ;;  %v8192_v44 = vpop.f32.mrb[10].mxu0 }
 0x153   : > { %6303 = vmatpush1.bf16.msra.mxu0 %v6302_v54  ;;  %vm1617_vm13 = vcmp.ge.f32.partialorder %v1613_v37, 0.0  ;;  %v1621_v1 = vmul.f32 0.2, %v1613_v37  ;;  %v1641_v15 = vmul.f32 %v7878_v40, %v8031_v27  ;;  %9954 = vst [vmem:[#allocation18_spill] sm:$0xff] %v8192_v44  ;;  %v1642_v29 = vmul.f32 %v7906_v23, %v8031_v27  ;;  %v8200_v14 = vpop.f32.mrb[8].mxu1  ;;  %v8202_v30 = vpop.f32.mrb[11].mxu0 }
 0x154   : > { %6053 = vmatmul.mubr.msk.f32.gmra.mrb[90].mxu0 %vm2087_vm12, %v7720_v32  ;;  %v1557_v25 = vadd.f32 %v1553_v16, %v1545_v33  ;;  %v1558_v61 = vadd.f32 %v1554_v43, %v1546_v39  ;;  %v1649_v35 = vmul.f32 %v7910_v19, %v8034_v28  ;;  %9955 = vst [vmem:[#allocation19_spill] sm:$0xff] %v8200_v14  ;;  %9956 = vst [vmem:[#allocation20_spill] sm:$0xff] %v8202_v30  ;;  %v8209_v54 = vpop.f32.mrb[9].mxu1 }
 0x155   : > { %6060 = vmatmul.mubr.msk.f32.gmra.mrb[88].mxu1 %vm2087_vm12, %v7702_v17  ;;  %3342 = vmatprep.mubr.f32.mxu0 %v9952_v47  ;;  %vm1618_vm14 = vcmp.ge.f32.partialorder %v1614_v34, 0.0  ;;  %v1622_v56 = vmul.f32 0.2, %v1614_v34  ;;  %v1625_v36 = vsel %vm1617_vm13, %v1613_v37, %v1621_v1  ;;  %v1650_v43 = vmul.f32 %v7916_v2, %v8034_v28  ;;  %9957 = vst [vmem:[#allocation21_spill] sm:$0xff] %v8209_v54 }
 0x156   : > { %3449 = vmatprep.mubr.f32.mxu1 %v9952_v47  ;;  %v1561_v27 = vadd.f32 %v7948_v11, %v1557_v25  ;;  %v1562_v33 = vadd.f32 %v7951_v26, %v1558_v61  ;;  %v1653_v39 = vadd.f32 %v1649_v35, %v1641_v15  ;;  %v1661_v17 = vmul.f32 %v7920_v45, %v8058_v53  ;;  %v8220_v1 = vpop.f32.mrb[12].mxu0 }
 0x157   : > { %v1626_v16 = vsel %vm1618_vm14, %v1614_v34, %v1622_v56  ;;  %v1654_v30 = vadd.f32 %v1650_v43, %v1642_v29  ;;  %v1662_v37 = vmul.f32 %v7930_v24, %v8058_v53  ;;  %v1479_v28 = vmul.f32 %v7878_v40, %v8064_v52  ;;  %9958 = vst [vmem:[#allocation22_spill] sm:$0xff] %v8220_v1  ;;  %v8224_v61 = vpop.f32.mrb[10].mxu1  ;;  %v8226_v35 = vpop.f32.mrb[13].mxu0 }
 0x158   : > { %6054 = vmatmul.mubr.msk.f32.gmra.mrb[92].mxu0 %vm2087_vm12, %v7742_v59  ;;  %v6310_v25 = vpack.c.bf16 %v1626_v16, %v1625_v36  ;;  %vm1565_vm15 = vcmp.ge.f32.partialorder %v1561_v27, 0.0  ;;  %vm1566_vm0 = vcmp.ge.f32.partialorder %v1562_v33, 0.0  ;;  %v1569_v15 = vmul.f32 0.2, %v1561_v27  ;;  %9959 = vst [vmem:[#allocation23_spill] sm:$0xff] %v8224_v61  ;;  %9960 = vst [vmem:[#allocation24_spill] sm:$0xff] %v8226_v35 }
 0x159   : > { %6061 = vmatmul.mubr.msk.f32.gmra.mrb[90].mxu1 %vm2087_vm12, %v7720_v32  ;;  %3348 = vmatprep.mubr.f32.mxu0 %v9952_v47  ;;  %v1570_v53 = vmul.f32 0.2, %v1562_v33  ;;  %v1665_v34 = vadd.f32 %v1661_v17, %v1653_v39  ;;  %v1666_v29 = vadd.f32 %v1662_v37, %v1654_v30  ;;  %v1480_v56 = vmul.f32 %v7906_v23, %v8064_v52  ;;  %v8233_v43 = vpop.f32.mrb[11].mxu1 }
 0x15a   : > { %9961 = vst [vmem:[#allocation25_spill] sm:$0xff] %v8233_v43  ;;  %3455 = vmatprep.mubr.f32.mxu1 %v9952_v47  ;;  %6311 = vmatpush1.bf16.msra.mxu1 %v6310_v25  ;;  %v1573_v36 = vsel %vm1565_vm15, %v1561_v27, %v1569_v15  ;;  %v1487_v16 = vmul.f32 %v7910_v19, %v8067_v18  ;;  %v8245_v17 = vpop.f32.mrb[14].mxu0 }
 0x15b   : > { %v1488_v32 = vmul.f32 %v7916_v2, %v8067_v18  ;;  %v1574_v35 = vsel %vm1566_vm0, %v1562_v33, %v1570_v53  ;;  %v1669_v39 = vadd.f32 %v7948_v11, %v1665_v34  ;;  %v1670_v30 = vadd.f32 %v7951_v26, %v1666_v29  ;;  %9962 = vst [vmem:[#allocation26_spill] sm:$0xff] %v8245_v17  ;;  %v8251_v15 = vpop.f32.mrb[12].mxu1  ;;  %v8253_v33 = vpop.f32.mrb[15].mxu0 }
 0x15c   : > { %v1499_v52 = vmul.f32 %v7920_v45, %v8101_v31  ;;  %6055 = vmatmul.mubr.msk.f32.gmra.mrb[94].mxu0 %vm2087_vm12, %v7758_v42  ;;  %v6304_v27 = vpack.c.bf16 %v1574_v35, %v1573_v36  ;;  %v1491_v37 = vadd.f32 %v1487_v16, %v1479_v28  ;;  %v1500_v18 = vmul.f32 %v7930_v24, %v8101_v31  ;;  %v8261_v29 = vpop.f32.mrb[13].mxu1 }
 0x15d   : > { %v1492_v25 = vadd.f32 %v1488_v32, %v1480_v56  ;;  %9963 = vst [vmem:[#allocation27_spill] sm:$0xff] %v8251_v15  ;;  %9964 = vst [vmem:[#allocation28_spill] sm:$0xff] %v8253_v33  ;;  %6062 = vmatmul.mubr.msk.f32.gmra.mrb[92].mxu1 %vm2087_vm12, %v7742_v59  ;;  %vm1673_vm1 = vcmp.ge.f32.partialorder %v1669_v39, 0.0  ;;  %vm1674_vm2 = vcmp.ge.f32.partialorder %v1670_v30, 0.0  ;;  %v1677_v53 = vmul.f32 0.2, %v1669_v39  ;;  %3532 = vmatprep.mubr.f32.mxu0 %v9952_v47  ;;  %v8267_v32 = vpop.permute.xlu0 %2049 }
 0x15e   : > { %v1678_v34 = vmul.f32 0.2, %v1670_v30  ;;  %3461 = vmatprep.mubr.f32.mxu1 %v9952_v47  ;;  %6305 = vmatprep.subr.bf16.mxu0 %v6304_v27  ;;  %v1503_v28 = vadd.f32 %v1499_v52, %v1491_v37  ;;  %v1587_v31 = vmul.f32 %v7878_v40, %v8108_v55  ;;  %9965 = vst [vmem:[#allocation29_spill] sm:$0xff] %v8261_v29  ;;  %9966 = vst [vmem:[#allocation30_spill] sm:$0xff] %v8267_v32 }
 0x15f   : > { %v1504_v35 = vadd.f32 %v1500_v18, %v1492_v25  ;;  %v1681_v56 = vsel %vm1673_vm1, %v1669_v39, %v1677_v53  ;;  %v1588_v59 = vmul.f32 %v7906_v23, %v8108_v55  ;;  %v1595_v16 = vmul.f32 %v7910_v19, %v8119_v48  ;;  %v8273_v25 = vpop.f32.mrb[14].mxu1 }
 0x160   : > { %v1682_v36 = vsel %vm1674_vm2, %v1670_v30, %v1678_v34  ;;  %v1507_v27 = vadd.f32 %v7948_v11, %v1503_v28  ;;  %v1596_v37 = vmul.f32 %v7916_v2, %v8119_v48  ;;  %9967 = vst [vmem:[#allocation31_spill] sm:$0xff] %v8273_v25  ;;  %v1607_v39 = vmul.f32 %v7920_v45, %v8122_v8  ;;  %v8281_v18 = vpop.f32.mrb[15].mxu1 }
 0x161   : > { %v6312_v33 = vpack.c.bf16 %v1682_v36, %v1681_v56  ;;  %v1508_v52 = vadd.f32 %v7951_v26, %v1504_v35  ;;  %6063 = vmatmul.mubr.msk.f32.gmra.mrb[94].mxu1 %vm2087_vm12, %v7758_v42  ;;  %v1599_v55 = vadd.f32 %v1595_v16, %v1587_v31  ;;  %v1608_v30 = vmul.f32 %v7930_v24, %v8122_v8  ;;  %v5965_v35 = vld [vmem:[%s6731_s22 + $0x74] sm:$0x7] }
 0x162   : > { %9968 = vst [vmem:[#allocation32_spill] sm:$0xff] %v8281_v18  ;;  %vm1511_vm3 = vcmp.ge.f32.partialorder %v1507_v27, 0.0  ;;  %v1515_v53 = vmul.f32 0.2, %v1507_v27  ;;  %3645 = vmatprep.mubr.f32.mxu1 %v9952_v47  ;;  %v1600_v48 = vadd.f32 %v1596_v37, %v1588_v59  ;;  %v8287_v56 = vadd.f32 %v8053_v51, %v8267_v32  ;;  %v8294_v18 = vpop.permute.xlu0 %2054 }
 0x163   : > { %6313 = vmatprep.subr.bf16.mxu1 %v6312_v33  ;;  %vm1512_vm4 = vcmp.ge.f32.partialorder %v1508_v52, 0.0  ;;  %v1516_v34 = vmul.f32 0.2, %v1508_v52  ;;  %v1611_v28 = vadd.f32 %v1607_v39, %v1599_v55  ;;  %v8291_v8 = vadd.f32 %v8095_v58, %v8267_v32 }
 0x164   : > { %v1519_v42 = vsel %vm1511_vm3, %v1507_v27, %v1515_v53  ;;  %v1612_v36 = vadd.f32 %v1608_v30, %v1600_v48  ;;  %v8298_v59 = vadd.f32 %v8060_v20, %v8267_v32  ;;  %v8302_v51 = vadd.f32 %v8103_v10, %v8267_v32  ;;  %v5967_v10 = vld [vmem:[%s6731_s22 + $0x7c] sm:$0x7] }
 0x165   : > { %v1520_v31 = vsel %vm1512_vm4, %v1508_v52, %v1516_v34  ;;  %v1615_v16 = vadd.f32 %v7948_v11, %v1611_v28  ;;  %v8306_v27 = vadd.f32 %v8097_v6, %v8294_v18  ;;  %v8309_v58 = vrot.slane %v5965_v35, %v6733_v3  ;;  %v5964_v34 = vld [vmem:[%s6731_s22 + $0x70] sm:$0x7] }
 0x166   : > { %v6306_v33 = vpack.c.bf16 %v1520_v31, %v1519_v42  ;;  %v8312_v52 = vrot.slane %v5965_v35, %v6735_v4  ;;  %v1616_v37 = vadd.f32 %v7951_v26, %v1612_v36  ;;  %v8316_v55 = vrot.slane %v5965_v35, %v6737_v5  ;;  %v8332_v31 = vld [vmem:[#allocation4 + $0x80] sm:$0xff] }
 0x167   : > { %vm1619_vm5 = vcmp.ge.f32.partialorder %v1615_v16, 0.0  ;;  %v1623_v20 = vmul.f32 0.2, %v1615_v16  ;;  %v1747_v39 = vmul.f32 %v8008_v7, %v8309_v58  ;;  %v1748_v6 = vmul.f32 %v8012_v63, %v8309_v58 }
 0x168   : > { %6307 = vmatpush1.bf16.msra.mxu0 %v6306_v33  ;;  %v1755_v30 = vmul.f32 %v8017_v46, %v8312_v52  ;;  %v1756_v53 = vmul.f32 %v8021_v21, %v8312_v52  ;;  %vm1620_vm6 = vcmp.ge.f32.partialorder %v1616_v37, 0.0  ;;  %v1624_v48 = vmul.f32 0.2, %v1616_v37  ;;  %v8330_v42 = vpop.f32.mrb[16].mxu0 }
 0x169   : > { %v1627_v28 = vsel %vm1619_vm5, %v1615_v16, %v1623_v20  ;;  %v1767_v35 = vmul.f32 %v8036_v9, %v8316_v55  ;;  %9969 = vst [vmem:[#allocation33_spill] sm:$0xff] %v8330_v42  ;;  %v1768_v32 = vmul.f32 %v8040_v60, %v8316_v55  ;;  %v8339_v29 = vrot.slane %v5967_v10, %v6733_v3  ;;  %v8341_v25 = vpop.f32.mrb[17].mxu0 }
 0x16a   : > { %v1759_v33 = vadd.f32 %v1755_v30, %v1747_v39  ;;  %v1760_v36 = vadd.f32 %v1756_v53, %v1748_v6  ;;  %9970 = vst [vmem:[#allocation34_spill] sm:$0xff] %v8341_v25  ;;  %v1628_v16 = vsel %vm1620_vm6, %v1616_v37, %v1624_v48  ;;  %v8345_v20 = vrot.slane %v5967_v10, %v6735_v4 }
 0x16b   : > { %6064 = vmatmul.mubr.msk.f32.vlgmr.msra.gmra.mrb[96].mxu0 %vm2087_vm12, %v8332_v31  ;;  %v8348_v42 = vrot.slane %v5967_v10, %v6737_v5  ;;  %v8351_v39 = vrot.slane %v5964_v34, %v6733_v3  ;;  %v6314_v6 = vpack.c.bf16 %v1628_v16, %v1627_v28  ;;  %v1855_v15 = vmul.f32 %v8008_v7, %v8339_v29 }
 0x16c   : > { %3538 = vmatprep.mubr.f32.mxu0 %v9952_v47  ;;  %v1771_v30 = vadd.f32 %v1767_v35, %v1759_v33  ;;  %v1772_v53 = vadd.f32 %v1768_v32, %v1760_v36  ;;  %v1856_v37 = vmul.f32 %v8012_v63, %v8339_v29  ;;  %v1863_v48 = vmul.f32 %v8017_v46, %v8345_v20  ;;  %v8363_v17 = vpop.f32.mrb[18].mxu0  ;;  %v8365_v32 = vld [vmem:[#allocation4 + $0x88] sm:$0xff] }
 0x16d   : > { %v1864_v25 = vmul.f32 %v8021_v21, %v8345_v20  ;;  %v1875_v10 = vmul.f32 %v8036_v9, %v8348_v42  ;;  %9971 = vst [vmem:[#allocation35_spill] sm:$0xff] %v8363_v17  ;;  %6315 = vmatpush1.bf16.msra.mxu1 %v6314_v6  ;;  %9972 = vst [vmem:[#allocation36_spill] sm:$0xff] %v8365_v32  ;;  %v1876_v33 = vmul.f32 %v8040_v60, %v8348_v42  ;;  %v8374_v36 = vpop.f32.mrb[16].mxu1  ;;  %v8376_v16 = vpop.f32.mrb[19].mxu0 }
 0x16e   : > { %v1775_v28 = vadd.f32 %v8069_v22, %v1771_v30  ;;  %v1776_v35 = vadd.f32 %v8072_v12, %v1772_v53  ;;  %vm3920_vm7 = vcmp.ge.f32.partialorder %v8287_v56, 0.0  ;;  %9973 = vst [vmem:[#allocation37_spill] sm:$0xff] %v8374_v36  ;;  %9974 = vst [vmem:[#allocation38_spill] sm:$0xff] %v8376_v16  ;;  %v1867_v6 = vadd.f32 %v1863_v48, %v1855_v15  ;;  %v5966_v53 = vld [vmem:[%s6731_s22 + $0x78] sm:$0x7]  ;;  %v8384_v1 = vpop.f32.mrb[17].mxu1 }
 0x16f   : > { %6065 = vmatmul.mubr.msk.f32.gmra.mrb[98].mxu0 %vm2087_vm12, %v8365_v32  ;;  %v1868_v17 = vadd.f32 %v1864_v25, %v1856_v37  ;;  %v1693_v61 = vmul.f32 %v8008_v7, %v8351_v39  ;;  %v1694_v30 = vmul.f32 %v8012_v63, %v8351_v39  ;;  %9975 = vst [vmem:[#allocation39_spill] sm:$0xff] %v8384_v1  ;;  %v8397_v48 = vld [vmem:[#allocation4 + $0x90] sm:$0xff]  ;;  %vm3921_vm13 = vcmp.ge.f32.partialorder %v8298_v59, 0.0 }
 0x170   : > { %3544 = vmatprep.mubr.f32.mxu0 %v9952_v47  ;;  %vm1779_vm8 = vcmp.ge.f32.partialorder %v1775_v28, 0.0  ;;  %vm1780_vm9 = vcmp.ge.f32.partialorder %v1776_v35, 0.0  ;;  %v1783_v54 = vmul.f32 0.2, %v1775_v28  ;;  %v1784_v43 = vmul.f32 0.2, %v1776_v35  ;;  %6072 = vmatmul.mubr.msk.f32.vlgmr.msra.gmra.mrb[96].mxu1 %vm2087_vm12, %v8332_v31 }
 0x171   : > { %v1879_v16 = vadd.f32 %v1875_v10, %v1867_v6  ;;  %v1880_v36 = vadd.f32 %v1876_v33, %v1868_v17  ;;  %v8389_v15 = vrot.slane %v5964_v34, %v6735_v4  ;;  %v8392_v25 = vrot.slane %v5964_v34, %v6737_v5  ;;  %v8394_v37 = vpop.f32.mrb[20].mxu0  ;;  %3651 = vmatprep.mubr.f32.mxu1 %v9952_v47  ;;  %v8405_v33 = vpop.f32.mrb[18].mxu1 }
 0x172   : > { %9976 = vst [vmem:[#allocation40_spill] sm:$0xff] %v8394_v37  ;;  %v1787_v1 = vsel %vm1779_vm8, %v1775_v28, %v1783_v54  ;;  %v1788_v14 = vsel %vm1780_vm9, %v1776_v35, %v1784_v43  ;;  %v8402_v10 = vrot.slane %v5966_v53, %v6733_v3  ;;  %v4176_v17 = vmul.f32 0.2, %v8287_v56  ;;  %9977 = vst [vmem:[#allocation41_spill] sm:$0xff] %v8405_v33  ;;  %v8407_v34 = vpop.f32.mrb[21].mxu0  ;;  %v8414_v43 = vpop.f32.mrb[19].mxu1 }
 0x173   : > { %6066 = vmatmul.mubr.msk.f32.gmra.mrb[100].mxu0 %vm2087_vm12, %v8397_v48  ;;  %9978 = vst [vmem:[#allocation42_spill] sm:$0xff] %v8407_v34  ;;  %v6316_v6 = vpack.c.bf16 %v1788_v14, %v1787_v1  ;;  %v1883_v37 = vadd.f32 %v8069_v22, %v1879_v16  ;;  %v1884_v44 = vadd.f32 %v8072_v12, %v1880_v36  ;;  %9979 = vst [vmem:[#allocation43_spill] sm:$0xff] %v8414_v43  ;;  %v8427_v16 = vld [vmem:[#allocation4 + $0x98] sm:$0xff] }
 0x174   : > { %3550 = vmatprep.mubr.f32.mxu0 %v9952_v47  ;;  %v1701_v54 = vmul.f32 %v8017_v46, %v8389_v15  ;;  %v1702_v3 = vmul.f32 %v8021_v21, %v8389_v15  ;;  %v1713_v28 = vmul.f32 %v8036_v9, %v8392_v25  ;;  %v1714_v35 = vmul.f32 %v8040_v60, %v8392_v25 }
 0x175   : > { %v1801_v14 = vmul.f32 %v8008_v7, %v8402_v10  ;;  %6073 = vmatmul.mubr.msk.f32.gmra.mrb[98].mxu1 %vm2087_vm12, %v8365_v32  ;;  %6317 = vmatprep.subr.bf16.mxu0 %v6316_v6  ;;  %vm1887_vm10 = vcmp.ge.f32.partialorder %v1883_v37, 0.0  ;;  %vm1888_vm11 = vcmp.ge.f32.partialorder %v1884_v44, 0.0  ;;  %v1891_v1 = vmul.f32 0.2, %v1883_v37  ;;  %v8434_v33 = vpop.f32.mrb[20].mxu1  ;;  %v8436_v6 = vpop.f32.mrb[22].mxu0 }
 0x176   : > { %v1892_v36 = vmul.f32 0.2, %v1884_v44  ;;  %3657 = vmatprep.mubr.f32.mxu1 %v9952_v47  ;;  %v1705_v34 = vadd.f32 %v1701_v54, %v1693_v61  ;;  %v1706_v43 = vadd.f32 %v1702_v3, %v1694_v30  ;;  %v1802_v7 = vmul.f32 %v8012_v63, %v8402_v10  ;;  %9980 = vst [vmem:[#allocation44_spill] sm:$0xff] %v8436_v6  ;;  %v8445_v61 = vpop.f32.mrb[21].mxu1  ;;  %v8447_v30 = vpop.f32.mrb[23].mxu0 }
 0x177   : > { %6067 = vmatmul.mubr.msk.f32.gmra.mrb[102].mxu0 %vm2087_vm12, %v8427_v16  ;;  %v1895_v0 = vsel %vm1887_vm10, %v1883_v37, %v1891_v1  ;;  %v8440_v32 = vrot.slane %v5966_v53, %v6735_v4  ;;  %v8443_v49 = vrot.slane %v5966_v53, %v6737_v5  ;;  %v4432_v6 = vsel %vm3920_vm7, %v8287_v56, %v4176_v17  ;;  %v8465_v56 = vld [vmem:[#allocation4 + $0xa0] sm:$0xff] }
 0x178   : > { %3556 = vmatprep.mubr.f32.mxu0 %v9952_v47  ;;  %v1896_v57 = vsel %vm1888_vm11, %v1884_v44, %v1892_v36  ;;  %v1717_v54 = vadd.f32 %v1713_v28, %v1705_v34  ;;  %v1718_v3 = vadd.f32 %v1714_v35, %v1706_v43  ;;  %v1750_v43 = vmul.f32 %v7906_v23, %v8309_v58 }
 0x179   : > { %v6324_v63 = vpack.c.bf16 %v1896_v57, %v1895_v0  ;;  %6074 = vmatmul.mubr.msk.f32.gmra.mrb[100].mxu1 %vm2087_vm12, %v8397_v48  ;;  %v1809_v4 = vmul.f32 %v8017_v46, %v8440_v32  ;;  %v1810_v5 = vmul.f32 %v8021_v21, %v8440_v32  ;;  %v1821_v44 = vmul.f32 %v8036_v9, %v8443_v49  ;;  %v8462_v57 = vpop.f32.mrb[24].mxu0  ;;  %v8474_v37 = vpop.f32.mrb[22].mxu1 }
 0x17a   : > { %v1822_v0 = vmul.f32 %v8040_v60, %v8443_v49  ;;  %3663 = vmatprep.mubr.f32.mxu1 %v9952_v47  ;;  %v1721_v46 = vadd.f32 %v8069_v22, %v1717_v54  ;;  %v1722_v53 = vadd.f32 %v8072_v12, %v1718_v3  ;;  %v4177_v21 = vmul.f32 0.2, %v8298_v59  ;;  %v8476_v60 = vpop.f32.mrb[25].mxu0  ;;  %v8481_v28 = vpop.f32.mrb[23].mxu1  ;;  %4688 = vmax.xlane.f32.xlu0 %v4432_v6 }
 0x17b   : > { %6068 = vmatmul.mubr.msk.f32.gmra.mrb[104].mxu0 %vm2087_vm12, %v8465_v56  ;;  %v1749_v9 = vmul.f32 %v7878_v40, %v8309_v58  ;;  %6325 = vmatprep.subr.bf16.mxu1 %v6324_v63  ;;  %v1813_v17 = vadd.f32 %v1809_v4, %v1801_v14  ;;  %v1814_v34 = vadd.f32 %v1810_v5, %v1802_v7  ;;  %v8493_v58 = vld [vmem:[#allocation4 + $0xa8] sm:$0xff]  ;;  %vm3922_vm2 = vcmp.ge.f32.partialorder %v8291_v8, 0.0 }
 0x17c   : > { %3562 = vmatprep.mubr.f32.mxu0 %v9952_v47  ;;  %vm1725_vm14 = vcmp.ge.f32.partialorder %v1721_v46, 0.0  ;;  %vm1726_vm15 = vcmp.ge.f32.partialorder %v1722_v53, 0.0  ;;  %v1729_v35 = vmul.f32 0.2, %v1721_v46  ;;  %v1730_v1 = vmul.f32 0.2, %v1722_v53 }
 0x17d   : > { %6075 = vmatmul.mubr.msk.f32.gmra.mrb[102].mxu1 %vm2087_vm12, %v8427_v16  ;;  %v1825_v40 = vadd.f32 %v1821_v44, %v1813_v17  ;;  %v1826_v36 = vadd.f32 %v1822_v0, %v1814_v34  ;;  %v4433_v14 = vsel %vm3921_vm13, %v8298_v59, %v4177_v21  ;;  %v1757_v7 = vmul.f32 %v7910_v19, %v8312_v52  ;;  %v8490_v23 = vpop.f32.mrb[26].mxu0  ;;  %v8499_v3 = vpop.f32.mrb[24].mxu1  ;;  %v8518_v21 = vld [vmem:[#allocation4 + $0xb0] sm:$0xff] }
 0x17e   : > { %3669 = vmatprep.mubr.f32.mxu1 %v9952_v47  ;;  %v1733_v6 = vsel %vm1725_vm14, %v1721_v46, %v1729_v35  ;;  %v1734_v63 = vsel %vm1726_vm15, %v1722_v53, %v1730_v1  ;;  %v1758_v54 = vmul.f32 %v7916_v2, %v8312_v52  ;;  %v8501_v59 = vpop.f32.mrb[27].mxu0  ;;  %4713 = vmax.xlane.f32.xlu1 %v4433_v14  ;;  %v8507_v44 = vmul.f32 0.2, %v8291_v8  ;;  %v8509_v0 = vpop.f32.mrb[25].mxu1  ;;  %v6511_v17 = vld [vmem:[#allocation4 + $0x10] sm:$0xff] }
 0x17f   : > { %6069 = vmatmul.mubr.msk.f32.gmra.mrb[106].mxu0 %vm2087_vm12, %v8493_v58  ;;  %9981 = vst [vmem:[#allocation45_spill] sm:$0xff] %v8501_v59  ;;  %v6318_v19 = vpack.c.bf16 %v1734_v63, %v1733_v6  ;;  %v1829_v4 = vadd.f32 %v8069_v22, %v1825_v40  ;;  %v1830_v5 = vadd.f32 %v8072_v12, %v1826_v36  ;;  %v6512_v40 = vld [vmem:[#allocation4 + $0x18] sm:$0xff]  ;;  %v6513_v14 = vld [vmem:[#allocation4 + $0x30] sm:$0xff]  ;;  %vm3953_vm5 = vcmp.ge.f32.partialorder %v8306_v27, 0.0 }
 0x180   : > { %3568 = vmatprep.mubr.f32.mxu0 %v9952_v47  ;;  %v1761_v46 = vadd.f32 %v1757_v7, %v1749_v9  ;;  %v1762_v53 = vadd.f32 %v1758_v54, %v1750_v43  ;;  %v1769_v2 = vmul.f32 %v7920_v45, %v8316_v55  ;;  %v1770_v52 = vmul.f32 %v7930_v24, %v8316_v55  ;;  %v8528_v43 = vpop.f32.mrb[28].mxu0 }
 0x181   : > { %6076 = vmatmul.mubr.msk.f32.gmra.mrb[104].mxu1 %vm2087_vm12, %v8465_v56  ;;  %6319 = vmatpush1.bf16.msra.mxu0 %v6318_v19  ;;  %vm1833_vm0 = vcmp.ge.f32.partialorder %v1829_v4, 0.0  ;;  %vm1834_vm1 = vcmp.ge.f32.partialorder %v1830_v5, 0.0  ;;  %v1837_v22 = vmul.f32 0.2, %v1829_v4  ;;  %v1838_v12 = vmul.f32 0.2, %v1830_v5 }
 0x182   : > { %3675 = vmatprep.mubr.f32.mxu1 %v9952_v47  ;;  %v1773_v9 = vadd.f32 %v1769_v2, %v1761_v46  ;;  %v1774_v45 = vadd.f32 %v1770_v52, %v1762_v53  ;;  %v1857_v24 = vmul.f32 %v6511_v17, %v8339_v29  ;;  %v8524_v55 = vmul.f32 0.2, %v8306_v27  ;;  %v8526_v34 = vpop.f32.mrb[26].mxu1  ;;  %v8535_v63 = vpop.f32.mrb[29].mxu0  ;;  %v6514_v53 = vld [vmem:[#allocation4 + $0x38] sm:$0xff] }
 0x183   : > { %6070 = vmatmul.mubr.msk.f32.gmra.mrb[108].mxu0 %vm2087_vm12, %v8518_v21  ;;  %v1841_v35 = vsel %vm1833_vm0, %v1829_v4, %v1837_v22  ;;  %v1842_v1 = vsel %vm1834_vm1, %v1830_v5, %v1838_v12  ;;  %v1858_v36 = vmul.f32 %v6512_v40, %v8339_v29  ;;  %v1865_v7 = vmul.f32 %v6513_v14, %v8345_v20  ;;  %v8533_v6 = vpop.f32.mrb[27].mxu1  ;;  %v6515_v5 = vld [vmem:[#allocation4 + $0x50] sm:$0xff]  ;;  %v6516_v52 = vld [vmem:[#allocation4 + $0x58] sm:$0xff] }
 0x184   : > { %3574 = vmatprep.mubr.f32.mxu0 %v9952_v47  ;;  %9982 = vst [vmem:[#allocation46_spill] sm:$0xff] %v8533_v6  ;;  %9983 = vst [vmem:[#allocation47_spill] sm:$0xff] %v8535_v63  ;;  %v6326_v54 = vpack.c.bf16 %v1842_v1, %v1841_v35  ;;  %v1777_v19 = vadd.f32 %v7948_v11, %v1773_v9  ;;  %v1778_v46 = vadd.f32 %v7951_v26, %v1774_v45  ;;  %v8546_v11 = vpop.f32.mrb[30].mxu0  ;;  %v8550_v9 = vld [vmem:[#allocation4 + $0xb8] sm:$0xff] }
 0x185   : > { %v1866_v4 = vmul.f32 %v6514_v53, %v8345_v20  ;;  %6077 = vmatmul.mubr.msk.f32.gmra.mrb[106].mxu1 %vm2087_vm12, %v8493_v58  ;;  %v1869_v29 = vadd.f32 %v1865_v7, %v1857_v24  ;;  %v1877_v2 = vmul.f32 %v6515_v5, %v8348_v42  ;;  %v1878_v22 = vmul.f32 %v6516_v52, %v8348_v42  ;;  %v8556_v1 = vpop.f32.mrb[28].mxu1  ;;  %v8558_v7 = vpop.f32.mrb[31].mxu0 }
 0x186   : > { %v1695_v12 = vmul.f32 %v6511_v17, %v8351_v39  ;;  %9984 = vst [vmem:[#allocation48_spill] sm:$0xff] %v8546_v11  ;;  %3681 = vmatprep.mubr.f32.mxu1 %v9952_v47  ;;  %6327 = vmatpush1.bf16.msra.mxu1 %v6326_v54  ;;  %vm1781_vm3 = vcmp.ge.f32.partialorder %v1777_v19, 0.0  ;;  %vm1782_vm4 = vcmp.ge.f32.partialorder %v1778_v46, 0.0  ;;  %v1785_v26 = vmul.f32 0.2, %v1777_v19  ;;  %9985 = vst [vmem:[#allocation49_spill] sm:$0xff] %v8558_v7 }
 0x187   : > { %v1786_v20 = vmul.f32 0.2, %v1778_v46  ;;  %6071 = vmatmul.mubr.msk.f32.gmra.mrb[110].mxu0 %vm2087_vm12, %v8550_v9  ;;  %v1870_v45 = vadd.f32 %v1866_v4, %v1858_v36  ;;  %v1881_v42 = vadd.f32 %v1877_v2, %v1869_v29  ;;  %v1696_v24 = vmul.f32 %v6512_v40, %v8351_v39  ;;  %v8563_v59 = vpop.f32.mrb[29].mxu1  ;;  %v6518_v4 = vld [vmem:[#allocation4 + $0x70] sm:$0xff]  ;;  %v6519_v7 = vld [vmem:[#allocation4 + $0x78] sm:$0xff] }
 0x188   : > { %v1703_v35 = vmul.f32 %v6513_v14, %v8389_v15  ;;  %v1789_v54 = vsel %vm1781_vm3, %v1777_v19, %v1785_v26  ;;  %v1704_v63 = vmul.f32 %v6514_v53, %v8389_v15  ;;  %v1715_v6 = vmul.f32 %v6515_v5, %v8392_v25  ;;  %3758 = vmatprep.mubr.f32.mxu0 %v9952_v47 }
 0x189   : > { %v1790_v11 = vsel %vm1782_vm4, %v1778_v46, %v1786_v20  ;;  %9986 = vst [vmem:[#allocation50_spill] sm:$0xff] %v8563_v59  ;;  %6078 = vmatmul.mubr.msk.f32.gmra.mrb[108].mxu1 %vm2087_vm12, %v8518_v21  ;;  %v1882_v36 = vadd.f32 %v1878_v22, %v1870_v45  ;;  %v1885_v29 = vadd.f32 %v6518_v4, %v1881_v42  ;;  %v8571_v20 = vpop.f32.mrb[30].mxu1  ;;  %vm3923_vm11 = vcmp.ge.f32.partialorder %v8302_v51, 0.0 }
 0x18a   : > { %v6320_v39 = vpack.c.bf16 %v1790_v11, %v1789_v54  ;;  %v1707_v2 = vadd.f32 %v1703_v35, %v1695_v12  ;;  %3687 = vmatprep.mubr.f32.mxu1 %v9952_v47  ;;  %v1708_v19 = vadd.f32 %v1704_v63, %v1696_v24  ;;  %v1716_v46 = vmul.f32 %v6516_v52, %v8392_v25  ;;  %v8573_v45 = vpop.f32.mrb[31].mxu1 }
 0x18b   : > { %v1803_v15 = vmul.f32 %v6511_v17, %v8402_v10  ;;  %v1804_v26 = vmul.f32 %v6512_v40, %v8402_v10  ;;  %v1886_v59 = vadd.f32 %v6519_v7, %v1882_v36  ;;  %vm1889_vm6 = vcmp.ge.f32.partialorder %v1885_v29, 0.0 }
 0x18c   : > { %6321 = vmatprep.subr.bf16.mxu0 %v6320_v39  ;;  %v1893_v11 = vmul.f32 0.2, %v1885_v29  ;;  %v1719_v22 = vadd.f32 %v1715_v6, %v1707_v2  ;;  %v1720_v12 = vadd.f32 %v1716_v46, %v1708_v19  ;;  %v1811_v42 = vmul.f32 %v6513_v14, %v8440_v32 }
 0x18d   : > { %v1812_v63 = vmul.f32 %v6514_v53, %v8440_v32  ;;  %v1823_v25 = vmul.f32 %v6515_v5, %v8443_v49  ;;  %6079 = vmatmul.mubr.msk.f32.gmra.mrb[110].mxu1 %vm2087_vm12, %v8550_v9  ;;  %vm1890_vm7 = vcmp.ge.f32.partialorder %v1886_v59, 0.0  ;;  %v1894_v10 = vmul.f32 0.2, %v1886_v59 }
 0x18e   : > { %v1897_v17 = vsel %vm1889_vm6, %v1885_v29, %v1893_v11  ;;  %v1723_v40 = vadd.f32 %v6518_v4, %v1719_v22  ;;  %v1724_v24 = vadd.f32 %v6519_v7, %v1720_v12  ;;  %v1815_v35 = vadd.f32 %v1811_v42, %v1803_v15  ;;  %3871 = vmatprep.mubr.f32.mxu1 %v9952_v47  ;;  %v8586_v29 = vpop.permute.xlu1 %2059 }
 0x18f   : > { %v1816_v54 = vadd.f32 %v1812_v63, %v1804_v26  ;;  %v1824_v6 = vmul.f32 %v6516_v52, %v8443_v49  ;;  %v1898_v39 = vsel %vm1890_vm7, %v1886_v59, %v1894_v10  ;;  %v4434_v32 = vsel %vm3922_vm2, %v8291_v8, %v8507_v44 }
 0x190   : > { %vm1727_vm8 = vcmp.ge.f32.partialorder %v1723_v40, 0.0  ;;  %v1731_v14 = vmul.f32 0.2, %v1723_v40  ;;  %v6328_v53 = vpack.c.bf16 %v1898_v39, %v1897_v17  ;;  %vm1728_vm9 = vcmp.ge.f32.partialorder %v1724_v24, 0.0  ;;  %4738 = vmax.xlane.f32.xlu0 %v4434_v32 }
 0x191   : > { %v1732_v5 = vmul.f32 0.2, %v1724_v24  ;;  %v1827_v36 = vadd.f32 %v1823_v25, %v1815_v35  ;;  %v1828_v19 = vadd.f32 %v1824_v6, %v1816_v54  ;;  %v4465_v49 = vsel %vm3953_vm5, %v8306_v27, %v8524_v55  ;;  %v9987_v35 = vld [vmem:[#allocation11_spill] sm:$0xff] }
 0x192   : > { %v1735_v2 = vsel %vm1727_vm8, %v1723_v40, %v1731_v14  ;;  %v2300_v59 = vadd.f32 %v8134_v50, %v8294_v18  ;;  %6329 = vmatprep.subr.bf16.mxu1 %v6328_v53  ;;  %4715 = vmax.xlane.f32.xlu1 %v4465_v49  ;;  %v8594_v15 = vpop.f32.mrb[32].mxu0  ;;  %v2185_v26 = vadd.f32 %v8088_v38, %v8294_v18  ;;  %v4179_v55 = vmul.f32 0.2, %v8302_v51  ;;  %v8606_v42 = vpop.permute.xlu1 %2064  ;;  %v9988_v53 = vld [vmem:[#allocation12_spill] sm:$0xff] }
 0x193   : > { %v1736_v52 = vsel %vm1728_vm9, %v1724_v24, %v1732_v5  ;;  %v1831_v8 = vadd.f32 %v6518_v4, %v1827_v36  ;;  %v1832_v46 = vadd.f32 %v6519_v7, %v1828_v19  ;;  %v8599_v22 = vpop.f32.mrb[33].mxu0  ;;  %v2191_v27 = vadd.f32 %v8110_v13, %v8586_v29  ;;  %v9989_v36 = vld [vmem:[#allocation36_spill] sm:$0xff] }
 0x194   : > { %v6322_v44 = vpack.c.bf16 %v1736_v52, %v1735_v2  ;;  %vm3955_vm14 = vcmp.ge.f32.partialorder %v2300_v59, 0.0  ;;  %v4211_v4 = vmul.f32 0.2, %v2300_v59  ;;  %v2298_v38 = vadd.f32 %v8124_v62, %v8294_v18  ;;  %v9990_v52 = vld [vmem:[#allocation10_spill] sm:$0xff] }
 0x195   : > { %vm1835_vm10 = vcmp.ge.f32.partialorder %v1831_v8, 0.0  ;;  %v1839_v11 = vmul.f32 0.2, %v1831_v8  ;;  %vm1836_vm13 = vcmp.ge.f32.partialorder %v1832_v46, 0.0  ;;  %v1840_v50 = vmul.f32 0.2, %v1832_v46 }
 0x196   : > { %6323 = vmatpush1.bf16.msra.mxu0 %v6322_v44  ;;  %v4435_v63 = vsel %vm3923_vm11, %v8302_v51, %v4179_v55  ;;  %v8609_v25 = vpop.f32.mrb[34].mxu0  ;;  %v2197_v13 = vadd.f32 %v8140_v41, %v8606_v42  ;;  %v4467_v17 = vsel %vm3955_vm14, %v2300_v59, %v4211_v4  ;;  %vm3952_vm15 = vcmp.ge.f32.partialorder %v2185_v26, 0.0  ;;  %v8656_v4 = vpop.permute.xlu0 %2069 }
 0x197   : > { %v1843_v7 = vsel %vm1835_vm10, %v1831_v8, %v1839_v11  ;;  %v1844_v12 = vsel %vm1836_vm13, %v1832_v46, %v1840_v50  ;;  %4763 = vmax.xlane.f32.xlu0 %v4435_v63  ;;  %v8615_v40 = vpop.f32.mrb[35].mxu0  ;;  %4765 = vmax.xlane.f32.xlu1 %v4467_v17  ;;  %v4208_v62 = vmul.f32 0.2, %v2185_v26  ;;  %vm3984_vm0 = vcmp.ge.f32.partialorder %v2191_v27, 0.0  ;;  %v9991_v50 = vld [vmem:[#allocation17_spill] sm:$0xff]  ;;  %v9993_v17 = vld [vmem:[#allocation14_spill] sm:$0xff] }
 0x198   : > { %v6330_v10 = vpack.c.bf16 %v1844_v12, %v1843_v7  ;;  %v4240_v51 = vmul.f32 0.2, %v2191_v27  ;;  %v2304_v54 = vadd.f32 %v9987_v35, %v8586_v29  ;;  %v4210_v41 = vmul.f32 0.2, %v2298_v38 }
 0x199   : > { %6080 = vmatmul.mubr.msk.f32.vlgmr.msra.gmra.mrb[112].mxu0 %vm2087_vm12, %v8332_v31  ;;  %v8618_v24 = vpop.f32.mrb[32].mxu1  ;;  %v4464_v6 = vsel %vm3952_vm15, %v2185_v26, %v4208_v62  ;;  %v2199_v5 = vadd.f32 %v9988_v53, %v8606_v42  ;;  %vm3954_vm1 = vcmp.ge.f32.partialorder %v2298_v38, 0.0  ;;  %vm4016_vm2 = vcmp.ge.f32.partialorder %v2197_v13, 0.0  ;;  %v9994_v53 = vld [vmem:[#allocation15_spill] sm:$0xff] }
 0x19a   : > { %3764 = vmatprep.mubr.f32.mxu0 %v9952_v47  ;;  %6331 = vmatpush1.bf16.msra.mxu1 %v6330_v10  ;;  %v4496_v39 = vsel %vm3984_vm0, %v2191_v27, %v4240_v51  ;;  %v8622_v14 = vpop.f32.mrb[33].mxu1  ;;  %v8624_v32 = vpop.f32.mrb[36].mxu0  ;;  %v4272_v2 = vmul.f32 0.2, %v2197_v13  ;;  %v2193_v8 = vadd.f32 %v9990_v52, %v8586_v29  ;;  %v4466_v44 = vsel %vm3954_vm1, %v2298_v38, %v4210_v41  ;;  %v9992_v38 = vld [vmem:[#allocation13_spill] sm:$0xff]  ;;  %v9995_v52 = vld [vmem:[#allocation18_spill] sm:$0xff] }
 0x19b   : > { %4690 = vmax.xlane.f32.xlu0 %v4464_v6  ;;  %v8630_v19 = vpop.f32.mrb[37].mxu0  ;;  %4692 = vmax.xlane.f32.xlu1 %v4496_v39  ;;  %v4242_v46 = vmul.f32 0.2, %v2304_v54  ;;  %vm3986_vm3 = vcmp.ge.f32.partialorder %v2304_v54, 0.0  ;;  %v4273_v27 = vmul.f32 0.2, %v2199_v5  ;;  %v2306_v12 = vadd.f32 %v9992_v38, %v8586_v29  ;;  %v8672_v39 = vpop.permute.xlu1 %2074 }
 0x19c   : > { %v4528_v49 = vsel %vm4016_vm2, %v2197_v13, %v4272_v2  ;;  %vm4017_vm4 = vcmp.ge.f32.partialorder %v2199_v5, 0.0  ;;  %v4241_v10 = vmul.f32 0.2, %v2193_v8  ;;  %v2203_v62 = vadd.f32 %v9993_v17, %v8656_v4  ;;  %v9997_v38 = vld [vmem:[#allocation19_spill] sm:$0xff] }
 0x19d   : > { %6081 = vmatmul.mubr.msk.f32.gmra.mrb[114].mxu0 %vm2087_vm12, %v9989_v36  ;;  %6088 = vmatmul.mubr.msk.f32.vlgmr.msra.gmra.mrb[112].mxu1 %vm2087_vm12, %v8332_v31  ;;  %v8636_v59 = vpop.f32.mrb[34].mxu1  ;;  %v2312_v31 = vadd.f32 %v9991_v50, %v8606_v42  ;;  %v4498_v63 = vsel %vm3986_vm3, %v2304_v54, %v4242_v46  ;;  %v4529_v51 = vsel %vm4017_vm4, %v2199_v5, %v4273_v27  ;;  %vm3985_vm5 = vcmp.ge.f32.partialorder %v2193_v8, 0.0 }
 0x19e   : > { %3877 = vmatprep.mubr.f32.mxu1 %v9952_v47  ;;  %3770 = vmatprep.mubr.f32.mxu0 %v9952_v47  ;;  %v8640_v26 = vpop.f32.mrb[35].mxu1  ;;  %v8642_v11 = vpop.f32.mrb[38].mxu0  ;;  %v2310_v5 = vadd.f32 %v9994_v53, %v8606_v42  ;;  %v4243_v2 = vmul.f32 0.2, %v2306_v12  ;;  %vm3987_vm7 = vcmp.ge.f32.partialorder %v2306_v12, 0.0  ;;  %vm4048_vm8 = vcmp.ge.f32.partialorder %v2203_v62, 0.0 }
 0x19f   : > { %4740 = vmax.xlane.f32.xlu0 %v4466_v44  ;;  %v8648_v55 = vpop.f32.mrb[39].mxu0  ;;  %4694 = vmax.xlane.f32.xlu1 %v4528_v49  ;;  %v4275_v35 = vmul.f32 0.2, %v2312_v31  ;;  %vm4019_vm6 = vcmp.ge.f32.partialorder %v2312_v31, 0.0  ;;  %v2209_v44 = vadd.f32 %v9995_v52, %v8672_v39  ;;  %v4304_v50 = vmul.f32 0.2, %v2203_v62 }
 0x1a0   : > { %vm4018_vm9 = vcmp.ge.f32.partialorder %v2310_v5, 0.0 }
 0x1a1   : > { %6082 = vmatmul.mubr.msk.f32.gmra.mrb[116].mxu0 %vm2087_vm12, %v8397_v48  ;;  %6089 = vmatmul.mubr.msk.f32.gmra.mrb[114].mxu1 %vm2087_vm12, %v9989_v36  ;;  %v8654_v7 = vpop.f32.mrb[36].mxu1  ;;  %v4497_v36 = vsel %vm3985_vm5, %v2193_v8, %v4241_v10  ;;  %v4531_v46 = vsel %vm4019_vm6, %v2312_v31, %v4275_v35  ;;  %v4499_v10 = vsel %vm3987_vm7, %v2306_v12, %v4243_v2  ;;  %v4274_v31 = vmul.f32 0.2, %v2310_v5  ;;  %v9998_v35 = vld [vmem:[#allocation20_spill] sm:$0xff] }
 0x1a2   : > { %3883 = vmatprep.mubr.f32.mxu1 %v9952_v47  ;;  %3776 = vmatprep.mubr.f32.mxu0 %v9952_v47  ;;  %v8660_v13 = vpop.f32.mrb[37].mxu1  ;;  %v8666_v6 = vpop.f32.mrb[40].mxu0  ;;  %v4560_v53 = vsel %vm4048_vm8, %v2203_v62, %v4304_v50  ;;  %vm4080_vm10 = vcmp.ge.f32.partialorder %v2209_v44, 0.0  ;;  %v10001_v2 = vld [vmem:[#allocation16_spill] sm:$0xff] }
 0x1a3   : > { %4742 = vmax.xlane.f32.xlu0 %v4498_v63  ;;  %4719 = vmax.xlane.f32.xlu1 %v4529_v51  ;;  %v8670_v54 = vpop.f32.mrb[41].mxu0  ;;  %v2316_v63 = vadd.f32 %v9997_v38, %v8656_v4  ;;  %v4530_v38 = vsel %vm4018_vm9, %v2310_v5, %v4274_v31  ;;  %v8732_v31 = vpop.permute.xlu0 %2079 }
 0x1a5   : > { %6083 = vmatmul.mubr.msk.f32.gmra.mrb[118].mxu0 %vm2087_vm12, %v8427_v16  ;;  %6090 = vmatmul.mubr.msk.f32.gmra.mrb[116].mxu1 %vm2087_vm12, %v8397_v48  ;;  %v8676_v41 = vpop.f32.mrb[38].mxu1  ;;  %v4306_v62 = vmul.f32 0.2, %v2316_v63  ;;  %vm4050_vm11 = vcmp.ge.f32.partialorder %v2316_v63, 0.0 }
 0x1a6   : > { %3889 = vmatprep.mubr.f32.mxu1 %v9952_v47  ;;  %3782 = vmatprep.mubr.f32.mxu0 %v9952_v47  ;;  %v8680_v49 = vpop.f32.mrb[39].mxu1  ;;  %v8682_v48 = vpop.f32.mrb[42].mxu0 }
 0x1a7   : > { %4717 = vmax.xlane.f32.xlu0 %v4497_v36  ;;  %v8688_v27 = vpop.f32.mrb[43].mxu0  ;;  %4769 = vmax.xlane.f32.xlu1 %v4531_v46  ;;  %v4336_v36 = vmul.f32 0.2, %v2209_v44  ;;  %v2205_v46 = vadd.f32 %v10001_v2, %v8656_v4  ;;  %v10007_v2 = vld [vmem:[#allocation21_spill] sm:$0xff] }
 0x1a8   : > { %9996 = vst [vmem:[#allocation11_spill] sm:$0xff] %v8688_v27 }
 0x1a9   : > { %6084 = vmatmul.mubr.msk.f32.gmra.mrb[120].mxu0 %vm2087_vm12, %v8465_v56  ;;  %6091 = vmatmul.mubr.msk.f32.gmra.mrb[118].mxu1 %vm2087_vm12, %v8427_v16  ;;  %v8694_v8 = vpop.f32.mrb[40].mxu1  ;;  %v2211_v16 = vadd.f32 %v9998_v35, %v8672_v39  ;;  %v10004_v35 = vld [vmem:[#allocation25_spill] sm:$0xff]  ;;  %vm4049_vm14 = vcmp.ge.f32.partialorder %v2205_v46, 0.0 }
 0x1aa   : > { %3895 = vmatprep.mubr.f32.mxu1 %v9952_v47  ;;  %3788 = vmatprep.mubr.f32.mxu0 %v9952_v47  ;;  %v8698_v17 = vpop.f32.mrb[41].mxu1  ;;  %v8700_v51 = vpop.f32.mrb[44].mxu0 }
 0x1ab   : > { %4767 = vmax.xlane.f32.xlu0 %v4499_v10  ;;  %v8706_v52 = vpop.f32.mrb[45].mxu0  ;;  %4696 = vmax.xlane.f32.xlu1 %v4560_v53  ;;  %v4592_v53 = vsel %vm4080_vm10, %v2209_v44, %v4336_v36  ;;  %v4337_v27 = vmul.f32 0.2, %v2211_v16  ;;  %vm4081_vm13 = vcmp.ge.f32.partialorder %v2211_v16, 0.0  ;;  %v2318_v44 = vadd.f32 %v10007_v2, %v8656_v4 }
 0x1ac   : > { %9999 = vst [vmem:[#allocation12_spill] sm:$0xff] %v8706_v52  ;;  %v4562_v36 = vsel %vm4050_vm11, %v2316_v63, %v4306_v62  ;;  %v8747_v62 = vpop.permute.xlu1 %2084 }
 0x1ad   : > { %6085 = vmatmul.mubr.msk.f32.gmra.mrb[122].mxu0 %vm2087_vm12, %v8493_v58  ;;  %6092 = vmatmul.mubr.msk.f32.gmra.mrb[120].mxu1 %vm2087_vm12, %v8465_v56  ;;  %v8712_v12 = vpop.f32.mrb[42].mxu1  ;;  %v2324_v56 = vadd.f32 %v10004_v35, %v8672_v39  ;;  %vm4051_vm0 = vcmp.ge.f32.partialorder %v2318_v44, 0.0 }
 0x1ae   : > { %3901 = vmatprep.mubr.f32.mxu1 %v9952_v47  ;;  %3794 = vmatprep.mubr.f32.mxu0 %v9952_v47  ;;  %10000 = vst [vmem:[#allocation36_spill] sm:$0xff] %v8712_v12  ;;  %v8716_v50 = vpop.f32.mrb[43].mxu1  ;;  %v8718_v10 = vpop.f32.mrb[46].mxu0 }
 0x1af   : > { %10002 = vst [vmem:[#allocation10_spill] sm:$0xff] %v8716_v50  ;;  %10003 = vst [vmem:[#allocation17_spill] sm:$0xff] %v8718_v10  ;;  %4744 = vmax.xlane.f32.xlu0 %v4530_v38  ;;  %v8724_v52 = vpop.f32.mrb[47].mxu0  ;;  %4698 = vmax.xlane.f32.xlu1 %v4592_v53  ;;  %v4305_v38 = vmul.f32 0.2, %v2205_v46  ;;  %v4593_v53 = vsel %vm4081_vm13, %v2211_v16, %v4337_v27  ;;  %vm4083_vm15 = vcmp.ge.f32.partialorder %v2324_v56, 0.0 }
 0x1b0   : > { %10005 = vst [vmem:[#allocation13_spill] sm:$0xff] %v8724_v52  ;;  %v10009_v52 = vld [vmem:[#allocation22_spill] sm:$0xff]  ;;  %v4339_v10 = vmul.f32 0.2, %v2324_v56 }
 0x1b1   : > { %6086 = vmatmul.mubr.msk.f32.gmra.mrb[124].mxu0 %vm2087_vm12, %v8518_v21  ;;  %6093 = vmatmul.mubr.msk.f32.gmra.mrb[122].mxu1 %vm2087_vm12, %v8493_v58  ;;  %v8730_v5 = vpop.f32.mrb[44].mxu1  ;;  %v2215_v58 = vadd.f32 %v10009_v52, %v8732_v31  ;;  %v10011_v52 = vld [vmem:[#allocation23_spill] sm:$0xff]  ;;  %v4561_v50 = vsel %vm4049_vm14, %v2205_v46, %v4305_v38  ;;  %v10013_v27 = vld [vmem:[#allocation26_spill] sm:$0xff] }
 0x1b2   : > { %3907 = vmatprep.mubr.f32.mxu1 %v9952_v47  ;;  %3800 = vmatprep.mubr.f32.mxu0 %v9952_v47  ;;  %10006 = vst [vmem:[#allocation14_spill] sm:$0xff] %v8730_v5  ;;  %v8736_v35 = vpop.f32.mrb[45].mxu1  ;;  %v2322_v2 = vadd.f32 %v10011_v52, %v8672_v39  ;;  %v2221_v16 = vadd.f32 %v10013_v27, %v8747_v62  ;;  %v10015_v38 = vld [vmem:[#allocation31_spill] sm:$0xff] }
 0x1b3   : > { %10008 = vst [vmem:[#allocation15_spill] sm:$0xff] %v8736_v35  ;;  %4746 = vmax.xlane.f32.xlu0 %v4562_v36  ;;  %4723 = vmax.xlane.f32.xlu1 %v4593_v53  ;;  %v4307_v35 = vmul.f32 0.2, %v2318_v44  ;;  %v4368_v53 = vmul.f32 0.2, %v2215_v58  ;;  %vm4112_vm1 = vcmp.ge.f32.partialorder %v2215_v58, 0.0 }
 0x1b4   : > { %v4338_v46 = vmul.f32 0.2, %v2322_v2  ;;  %vm4082_vm2 = vcmp.ge.f32.partialorder %v2322_v2, 0.0  ;;  %vm4144_vm3 = vcmp.ge.f32.partialorder %v2221_v16, 0.0 }
 0x1b5   : > { %6087 = vmatmul.mubr.msk.f32.gmra.mrb[126].mxu0 %vm2087_vm12, %v8550_v9  ;;  %6094 = vmatmul.mubr.msk.f32.gmra.mrb[124].mxu1 %vm2087_vm12, %v8518_v21  ;;  %v8745_v63 = vpop.f32.mrb[46].mxu1  ;;  %v4595_v21 = vsel %vm4083_vm15, %v2324_v56, %v4339_v10  ;;  %v4563_v52 = vsel %vm4051_vm0, %v2318_v44, %v4307_v35  ;;  %v4624_v12 = vsel %vm4112_vm1, %v2215_v58, %v4368_v53  ;;  %v10016_v10 = vld [vmem:[#allocation24_spill] sm:$0xff] }
 0x1b6   : > { %3913 = vmatprep.mubr.f32.mxu1 %v9952_v47  ;;  %10010 = vst [vmem:[#allocation18_spill] sm:$0xff] %v8745_v63  ;;  %v8751_v36 = vpop.f32.mrb[47].mxu1  ;;  %v10014_v47 = vld [vmem:[#allocation27_spill] sm:$0xff]  ;;  %v2217_v56 = vadd.f32 %v10016_v10, %v8732_v31 }
 0x1b7   : > { %10012 = vst [vmem:[#allocation19_spill] sm:$0xff] %v8751_v36  ;;  %4721 = vmax.xlane.f32.xlu0 %v4561_v50  ;;  %4773 = vmax.xlane.f32.xlu1 %v4595_v21  ;;  %v2328_v63 = vadd.f32 %v10014_v47, %v8732_v31  ;;  %v2334_v36 = vadd.f32 %v10015_v38, %v8747_v62  ;;  %v4400_v50 = vmul.f32 0.2, %v2221_v16  ;;  %v10018_v47 = vld [vmem:[#allocation28_spill] sm:$0xff] }
 0x1b8   : > { %v2223_v44 = vadd.f32 %v10018_v47, %v8747_v62  ;;  %v4369_v10 = vmul.f32 0.2, %v2217_v56  ;;  %vm4113_vm5 = vcmp.ge.f32.partialorder %v2217_v56, 0.0 }
 0x1b9   : > { %6095 = vmatmul.mubr.msk.f32.gmra.mrb[126].mxu1 %vm2087_vm12, %v8550_v9  ;;  %v4594_v9 = vsel %vm4082_vm2, %v2322_v2, %v4338_v46  ;;  %v4370_v27 = vmul.f32 0.2, %v2328_v63  ;;  %v4656_v35 = vsel %vm4144_vm3, %v2221_v16, %v4400_v50  ;;  %vm4114_vm12 = vcmp.ge.f32.partialorder %v2328_v63, 0.0  ;;  %v10022_v46 = vld [vmem:[#allocation32_spill] sm:$0xff] }
 0x1ba   : > { %v4402_v38 = vmul.f32 0.2, %v2334_v36  ;;  %vm4146_vm4 = vcmp.ge.f32.partialorder %v2334_v36, 0.0  ;;  %v4401_v16 = vmul.f32 0.2, %v2223_v44  ;;  %vm4145_vm6 = vcmp.ge.f32.partialorder %v2223_v44, 0.0 }
 0x1bb   : > { %4771 = vmax.xlane.f32.xlu0 %v4563_v52  ;;  %4700 = vmax.xlane.f32.xlu1 %v4624_v12  ;;  %v10020_v12 = vld [vmem:[#allocation29_spill] sm:$0xff]  ;;  %v4626_v53 = vsel %vm4114_vm12, %v2328_v63, %v4370_v27 }
 0x1bc   : > { %v2330_v58 = vadd.f32 %v10020_v12, %v8732_v31  ;;  %v4658_v47 = vsel %vm4146_vm4, %v2334_v36, %v4402_v38  ;;  %v10026_v12 = vld [vmem:[#allocation30_spill] sm:$0xff]  ;;  %v10027_v63 = vld [vmem:[#allocation37_spill] sm:$0xff]  ;;  %v4657_v38 = vsel %vm4145_vm6, %v2223_v44, %v4401_v16 }
 0x1bd   : > { %v2518_v27 = vadd.f32 %v10027_v63, %v10026_v12 }
 0x1be   : > { %v8763_v21 = vpop.f32.mrb[48].mxu0  ;;  %vm4115_vm7 = vcmp.ge.f32.partialorder %v2330_v58, 0.0 }
 0x1bf   : > { %10017 = vst [vmem:[#allocation20_spill] sm:$0xff] %v8763_v21  ;;  %4748 = vmax.xlane.f32.xlu0 %v4594_v9  ;;  %v8767_v52 = vpop.f32.mrb[49].mxu0  ;;  %4702 = vmax.xlane.f32.xlu1 %v4656_v35  ;;  %v2336_v21 = vadd.f32 %v10022_v46, %v8747_v62  ;;  %vm3926_vm9 = vcmp.ge.f32.partialorder %v2518_v27, 0.0 }
 0x1c0   : > { %10019 = vst [vmem:[#allocation16_spill] sm:$0xff] %v8767_v52  ;;  %v4625_v52 = vsel %vm4113_vm5, %v2217_v56, %v4369_v10  ;;  %v10033_v56 = vld [vmem:[#allocation34_spill] sm:$0xff] }
 0x1c1   : > { %v4403_v46 = vmul.f32 0.2, %v2336_v21  ;;  %vm4147_vm8 = vcmp.ge.f32.partialorder %v2336_v21, 0.0  ;;  %v2407_v10 = vadd.f32 %v10033_v56, %v10026_v12 }
 0x1c2   : > { %v8771_v2 = vpop.f32.mrb[50].mxu0 }
 0x1c3   : > { %10021 = vst [vmem:[#allocation25_spill] sm:$0xff] %v8771_v2  ;;  %4750 = vmax.xlane.f32.xlu0 %v4626_v53  ;;  %v8775_v50 = vpop.f32.mrb[48].mxu1  ;;  %4752 = vmax.xlane.f32.xlu1 %v4658_v47  ;;  %v8779_v35 = vpop.f32.mrb[51].mxu0  ;;  %v4371_v2 = vmul.f32 0.2, %v2330_v58  ;;  %v10029_v53 = vld [vmem:[#allocation33_spill] sm:$0xff]  ;;  %v4659_v16 = vsel %vm4147_vm8, %v2336_v21, %v4403_v46 }
 0x1c4   : > { %10023 = vst [vmem:[#allocation21_spill] sm:$0xff] %v8775_v50  ;;  %v8777_v9 = vpop.f32.mrb[49].mxu1  ;;  %10025 = vst [vmem:[#allocation23_spill] sm:$0xff] %v8779_v35  ;;  %v2405_v36 = vadd.f32 %v10029_v53, %v10026_v12  ;;  %vm3925_vm11 = vcmp.ge.f32.partialorder %v2407_v10, 0.0 }
 0x1c5   : > { %10024 = vst [vmem:[#allocation22_spill] sm:$0xff] %v8777_v9  ;;  %v4627_v63 = vsel %vm4115_vm7, %v2330_v58, %v4371_v2  ;;  %v10039_v58 = vld [vmem:[#allocation39_spill] sm:$0xff] }
 0x1c6   : > { %v8783_v5 = vpop.f32.mrb[52].mxu0  ;;  %v4180_v53 = vmul.f32 0.2, %v2405_v36  ;;  %vm3924_vm10 = vcmp.ge.f32.partialorder %v2405_v36, 0.0  ;;  %v2520_v2 = vadd.f32 %v10039_v58, %v10026_v12 }
 0x1c7   : > { %10028 = vst [vmem:[#allocation26_spill] sm:$0xff] %v8783_v5  ;;  %4725 = vmax.xlane.f32.xlu0 %v4625_v52  ;;  %v8787_v47 = vpop.f32.mrb[50].mxu1  ;;  %v8789_v50 = vpop.f32.mrb[53].mxu0  ;;  %4727 = vmax.xlane.f32.xlu1 %v4657_v38  ;;  %v4182_v5 = vmul.f32 0.2, %v2518_v27  ;;  %v10035_v52 = vld [vmem:[#allocation35_spill] sm:$0xff] }
 0x1c8   : > { %10030 = vst [vmem:[#allocation27_spill] sm:$0xff] %v8787_v47  ;;  %10031 = vst [vmem:[#allocation31_spill] sm:$0xff] %v8789_v50  ;;  %v8791_v35 = vpop.f32.mrb[51].mxu1  ;;  %v2411_v44 = vadd.f32 %v10035_v52, %v8294_v18  ;;  %v4436_v46 = vsel %vm3924_vm10, %v2405_v36, %v4180_v53  ;;  %vm3927_vm14 = vcmp.ge.f32.partialorder %v2520_v2, 0.0 }
 0x1c9   : > { %10032 = vst [vmem:[#allocation24_spill] sm:$0xff] %v8791_v35  ;;  %v4438_v56 = vsel %vm3926_vm9, %v2518_v27, %v4182_v5  ;;  %v10045_v5 = vld [vmem:[#allocation41_spill] sm:$0xff] }
 0x1ca   : > { %v8795_v9 = vpop.f32.mrb[54].mxu0  ;;  %v4212_v52 = vmul.f32 0.2, %v2411_v44  ;;  %vm3956_vm13 = vcmp.ge.f32.partialorder %v2411_v44, 0.0  ;;  %v2524_v27 = vadd.f32 %v10045_v5, %v8294_v18 }
 0x1cb   : > { %10034 = vst [vmem:[#allocation28_spill] sm:$0xff] %v8795_v9  ;;  %4775 = vmax.xlane.f32.xlu0 %v4627_v63  ;;  %v8799_v47 = vpop.f32.mrb[52].mxu1  ;;  %4777 = vmax.xlane.f32.xlu1 %v4659_v16  ;;  %v8803_v35 = vpop.f32.mrb[55].mxu0  ;;  %v4181_v9 = vmul.f32 0.2, %v2407_v10  ;;  %v10041_v63 = vld [vmem:[#allocation38_spill] sm:$0xff] }
 0x1cc   : > { %10036 = vst [vmem:[#allocation29_spill] sm:$0xff] %v8799_v47  ;;  %v8801_v38 = vpop.f32.mrb[53].mxu1  ;;  %10038 = vst [vmem:[#allocation30_spill] sm:$0xff] %v8803_v35  ;;  %v2413_v21 = vadd.f32 %v10041_v63, %v8294_v18  ;;  %v4468_v53 = vsel %vm3956_vm13, %v2411_v44, %v4212_v52  ;;  %v4214_v5 = vmul.f32 0.2, %v2524_v27  ;;  %vm3958_vm0 = vcmp.ge.f32.partialorder %v2524_v27, 0.0 }
 0x1cd   : > { %10037 = vst [vmem:[#allocation32_spill] sm:$0xff] %v8801_v38  ;;  %v4437_v58 = vsel %vm3925_vm11, %v2407_v10, %v4181_v9  ;;  %v2530_v9 = vadd.f32 %v8434_v33, %v8586_v29  ;;  %v10054_v33 = vld [vmem:[#allocation42_spill] sm:$0xff] }
 0x1ce   : > { %v8807_v50 = vpop.f32.mrb[56].mxu0  ;;  %v4213_v63 = vmul.f32 0.2, %v2413_v21  ;;  %vm3957_vm15 = vcmp.ge.f32.partialorder %v2413_v21, 0.0 }
 0x1cf   : > { %10040 = vst [vmem:[#allocation37_spill] sm:$0xff] %v8807_v50  ;;  %4838 = vmax.xlane.f32.xlu0 %v4438_v56  ;;  %v8811_v16 = vpop.f32.mrb[54].mxu1  ;;  %4788 = vmax.xlane.f32.xlu1 %v4436_v46  ;;  %v8815_v35 = vpop.f32.mrb[57].mxu0  ;;  %v4183_v50 = vmul.f32 0.2, %v2520_v2  ;;  %v10047_v56 = vld [vmem:[#allocation43_spill] sm:$0xff] }
 0x1d0   : > { %10042 = vst [vmem:[#allocation33_spill] sm:$0xff] %v8811_v16  ;;  %v8813_v38 = vpop.f32.mrb[55].mxu1  ;;  %10044 = vst [vmem:[#allocation35_spill] sm:$0xff] %v8815_v35  ;;  %v2526_v36 = vadd.f32 %v10047_v56, %v8294_v18  ;;  %v4469_v52 = vsel %vm3957_vm15, %v2413_v21, %v4213_v63  ;;  %vm3990_vm2 = vcmp.ge.f32.partialorder %v2530_v9, 0.0 }
 0x1d1   : > { %10043 = vst [vmem:[#allocation34_spill] sm:$0xff] %v8813_v38  ;;  %v4439_v10 = vsel %vm3927_vm14, %v2520_v2, %v4183_v50  ;;  %v2419_v50 = vadd.f32 %v10054_v33, %v8586_v29  ;;  %v4470_v2 = vsel %vm3958_vm0, %v2524_v27, %v4214_v5  ;;  %v2532_v27 = vadd.f32 %v8445_v61, %v8586_v29 }
 0x1d2   : > { %v8819_v47 = vpop.f32.mrb[58].mxu0  ;;  %v4215_v56 = vmul.f32 0.2, %v2526_v36  ;;  %vm3959_vm1 = vcmp.ge.f32.partialorder %v2526_v36, 0.0 }
 0x1d3   : > { %10046 = vst [vmem:[#allocation39_spill] sm:$0xff] %v8819_v47  ;;  %4813 = vmax.xlane.f32.xlu0 %v4437_v58  ;;  %v8823_v46 = vpop.f32.mrb[56].mxu1  ;;  %4790 = vmax.xlane.f32.xlu1 %v4468_v53  ;;  %v8827_v16 = vpop.f32.mrb[59].mxu0  ;;  %v10051_v58 = vld [vmem:[#allocation40_spill] sm:$0xff]  ;;  %v4245_v33 = vmul.f32 0.2, %v2419_v50 }
 0x1d4   : > { %v8825_v38 = vpop.f32.mrb[57].mxu1  ;;  %10049 = vst [vmem:[#allocation41_spill] sm:$0xff] %v8827_v16  ;;  %v2417_v44 = vadd.f32 %v10051_v58, %v8586_v29  ;;  %v4471_v63 = vsel %vm3959_vm1, %v2526_v36, %v4215_v56  ;;  %vm3989_vm12 = vcmp.ge.f32.partialorder %v2419_v50, 0.0  ;;  %v4247_v61 = vmul.f32 0.2, %v2532_v27 }
 0x1d5   : > { %10048 = vst [vmem:[#allocation38_spill] sm:$0xff] %v8825_v38  ;;  %vm3991_vm5 = vcmp.ge.f32.partialorder %v2532_v27, 0.0 }
 0x1d6   : > { %v8831_v47 = vpop.f32.mrb[60].mxu0  ;;  %v4244_v58 = vmul.f32 0.2, %v2417_v44  ;;  %vm3988_vm3 = vcmp.ge.f32.partialorder %v2417_v44, 0.0 }
 0x1d7   : > { %10050 = vst [vmem:[#allocation43_spill] sm:$0xff] %v8831_v47  ;;  %4863 = vmax.xlane.f32.xlu0 %v4439_v10  ;;  %4815 = vmax.xlane.f32.xlu1 %v4469_v52  ;;  %v8835_v53 = vpop.f32.mrb[58].mxu1  ;;  %v8837_v38 = vpop.f32.mrb[61].mxu0  ;;  %v4246_v47 = vmul.f32 0.2, %v2530_v9  ;;  %v10056_v10 = vld [vmem:[#allocation44_spill] sm:$0xff] }
 0x1d8   : > { %10052 = vst [vmem:[#allocation40_spill] sm:$0xff] %v8835_v53  ;;  %v8839_v16 = vpop.f32.mrb[59].mxu1  ;;  %v2423_v21 = vadd.f32 %v10056_v10, %v8606_v42  ;;  %v2425_v10 = vadd.f32 %v8447_v30, %v8606_v42  ;;  %v4500_v36 = vsel %vm3988_vm3, %v2417_v44, %v4244_v58  ;;  %v2542_v44 = vadd.f32 %v8499_v3, %v8656_v4 }
 0x1d9   : > { %10053 = vst [vmem:[#allocation51_spill] sm:$0xff] %v8839_v16  ;;  %v4502_v5 = vsel %vm3990_vm2, %v2530_v9, %v4246_v47  ;;  %v2538_v47 = vadd.f32 %v8481_v28, %v8606_v42  ;;  %v4503_v58 = vsel %vm3991_vm5, %v2532_v27, %v4247_v61  ;;  %v2435_v27 = vadd.f32 %v8490_v23, %v8672_v39 }
 0x1da   : > { %v8843_v35 = vpop.f32.mrb[62].mxu0  ;;  %v4276_v56 = vmul.f32 0.2, %v2423_v21  ;;  %vm4020_vm4 = vcmp.ge.f32.partialorder %v2423_v21, 0.0  ;;  %v4277_v9 = vmul.f32 0.2, %v2425_v10  ;;  %v2548_v23 = vadd.f32 %v8526_v34, %v8672_v39 }
 0x1db   : > { %10055 = vst [vmem:[#allocation42_spill] sm:$0xff] %v8843_v35  ;;  %4840 = vmax.xlane.f32.xlu0 %v4470_v2  ;;  %v8847_v52 = vpop.f32.mrb[60].mxu1  ;;  %v8849_v53 = vpop.f32.mrb[63].mxu0  ;;  %4865 = vmax.xlane.f32.xlu1 %v4471_v63  ;;  %v4501_v35 = vsel %vm3989_vm12, %v2419_v50, %v4245_v33  ;;  %vm4021_vm6 = vcmp.ge.f32.partialorder %v2425_v10, 0.0  ;;  %v4279_v50 = vmul.f32 0.2, %v2538_v47 }
 0x1dc   : > { %10057 = vst [vmem:[#allocation44_spill] sm:$0xff] %v8849_v53  ;;  %v8851_v16 = vpop.f32.mrb[61].mxu1  ;;  %v2536_v53 = vadd.f32 %v8474_v37, %v8606_v42  ;;  %v4532_v30 = vsel %vm4020_vm4, %v2423_v21, %v4276_v56  ;;  %v4533_v37 = vsel %vm4021_vm6, %v2425_v10, %v4277_v9  ;;  %vm4023_vm8 = vcmp.ge.f32.partialorder %v2538_v47, 0.0  ;;  %v10062_v34 = vld [vmem:[#allocation45_spill] sm:$0xff] }
 0x1dd   : > { %v2431_v21 = vadd.f32 %v8476_v60, %v8656_v4  ;;  %v4310_v3 = vmul.f32 0.2, %v2542_v44  ;;  %vm4054_vm9 = vcmp.ge.f32.partialorder %v2542_v44, 0.0  ;;  %v2544_v60 = vadd.f32 %v8509_v0, %v8656_v4 }
 0x1de   : > { %vm4022_vm7 = vcmp.ge.f32.partialorder %v2536_v53, 0.0  ;;  %vm4084_vm13 = vcmp.ge.f32.partialorder %v2435_v27, 0.0  ;;  %v2441_v0 = vadd.f32 %v8528_v43, %v8732_v31  ;;  %vm4086_vm15 = vcmp.ge.f32.partialorder %v2548_v23, 0.0 }
 0x1df   : > { %4842 = vmax.xlane.f32.xlu0 %v4502_v5  ;;  %v8857_v2 = vpop.f32.mrb[62].mxu1  ;;  %4792 = vmax.xlane.f32.xlu1 %v4500_v36  ;;  %v4278_v5 = vmul.f32 0.2, %v2536_v53  ;;  %v2429_v36 = vadd.f32 %v8462_v57, %v8656_v4  ;;  %v4535_v57 = vsel %vm4023_vm8, %v2538_v47, %v4279_v50  ;;  %v4309_v9 = vmul.f32 0.2, %v2431_v21 }
 0x1e0   : > { %v8859_v63 = vpop.f32.mrb[63].mxu1  ;;  %vm4053_vm11 = vcmp.ge.f32.partialorder %v2431_v21, 0.0  ;;  %vm4055_vm14 = vcmp.ge.f32.partialorder %v2544_v60, 0.0  ;;  %v2554_v43 = vadd.f32 %v8556_v1, %v8732_v31  ;;  %vm4116_vm0 = vcmp.ge.f32.partialorder %v2441_v0, 0.0  ;;  %v10070_v1 = vld [vmem:[#allocation47_spill] sm:$0xff] }
 0x1e1   : > { %v4534_v33 = vsel %vm4022_vm7, %v2536_v53, %v4278_v5  ;;  %v4308_v10 = vmul.f32 0.2, %v2429_v36  ;;  %vm4052_vm10 = vcmp.ge.f32.partialorder %v2429_v36, 0.0  ;;  %v4566_v53 = vsel %vm4054_vm9, %v2542_v44, %v4310_v3 }
 0x1e2   : > { %v4340_v5 = vmul.f32 0.2, %v2435_v27  ;;  %v4565_v44 = vsel %vm4053_vm11, %v2431_v21, %v4309_v9  ;;  %v4311_v3 = vmul.f32 0.2, %v2544_v60  ;;  %v4372_v9 = vmul.f32 0.2, %v2441_v0 }
 0x1e3   : > { %4817 = vmax.xlane.f32.xlu0 %v4501_v35  ;;  %4794 = vmax.xlane.f32.xlu1 %v4532_v30  ;;  %v4564_v47 = vsel %vm4052_vm10, %v2429_v36, %v4308_v10  ;;  %v2437_v36 = vadd.f32 %v10062_v34, %v8672_v39  ;;  %vm4118_vm2 = vcmp.ge.f32.partialorder %v2554_v43, 0.0  ;;  %vm4704_vm7 = vcmask 7168  }
 0x1e4   : > { %v4596_v10 = vsel %vm4084_vm13, %v2435_v27, %v4340_v5  ;;  %v4567_v21 = vsel %vm4055_vm14, %v2544_v60, %v4311_v3  ;;  %v2443_v60 = vadd.f32 %v10070_v1, %v8732_v31  ;;  %v4628_v3 = vsel %vm4116_vm0, %v2441_v0, %v4372_v9  ;;  %v10075_v0 = vld [vmem:[#allocation50_spill] sm:$0xff] }
 0x1e5   : > { %v4341_v34 = vmul.f32 0.2, %v2437_v36  ;;  %vm4085_vm1 = vcmp.ge.f32.partialorder %v2437_v36, 0.0  ;;  %v2556_v9 = vadd.f32 %v10075_v0, %v8732_v31  ;;  %vm4729_vm10 = vcmask 15368  }
 0x1e6   : > { %vm4117_vm12 = vcmp.ge.f32.partialorder %v2443_v60, 0.0 }
 0x1e7   : > { %4867 = vmax.xlane.f32.xlu0 %v4503_v58  ;;  %4819 = vmax.xlane.f32.xlu1 %v4533_v37  ;;  %v4375_v0 = vmul.f32 0.2, %v2556_v9  ;;  %vm4119_vm5 = vcmp.ge.f32.partialorder %v2556_v9, 0.0 }
 0x1e8   : > { %v8869_v28 = vpop.f32.mrb[64].mxu0 }
 0x1e9   : > { %v8871_v35 = vpop.f32.mrb[65].mxu0 }
 0x1eb   : > { %4844 = vmax.xlane.f32.xlu0 %v4534_v33  ;;  %4869 = vmax.xlane.f32.xlu1 %v4535_v57 }
 0x1ec   : > { %v8877_v56 = vpop.f32.mrb[66].mxu0 }
 0x1ed   : > { %10058 = vst [vmem:[#allocation52_spill] sm:$0xff] %v8877_v56  ;;  %v8879_v61 = vpop.f32.mrb[64].mxu1  ;;  %v8881_v30 = vpop.f32.mrb[67].mxu0 }
 0x1ee   : > { %10059 = vst [vmem:[#allocation53_spill] sm:$0xff] %v8881_v30  ;;  %v8885_v58 = vpop.f32.mrb[65].mxu1 }
 0x1ef   : > { %4846 = vmax.xlane.f32.xlu0 %v4566_v53  ;;  %4796 = vmax.xlane.f32.xlu1 %v4564_v47  ;;  %v4342_v53 = vmul.f32 0.2, %v2548_v23 }
 0x1f0   : > { %v8889_v37 = vpop.f32.mrb[68].mxu0 }
 0x1f1   : > { %v8891_v50 = vpop.f32.mrb[66].mxu1  ;;  %v8893_v33 = vpop.f32.mrb[69].mxu0  ;;  %v4598_v5 = vsel %vm4086_vm15, %v2548_v23, %v4342_v53  ;;  %v4597_v53 = vsel %vm4085_vm1, %v2437_v36, %v4341_v34  ;;  %v2560_v36 = vadd.f32 %v8571_v20, %v8747_v62  ;;  %v10079_v20 = vld [vmem:[#allocation49_spill] sm:$0xff] }
 0x1f2   : > { %10060 = vst [vmem:[#allocation54_spill] sm:$0xff] %v8891_v50  ;;  %v8897_v57 = vpop.f32.mrb[67].mxu1 }
 0x1f3   : > { %10061 = vst [vmem:[#allocation55_spill] sm:$0xff] %v8897_v57  ;;  %4821 = vmax.xlane.f32.xlu0 %v4565_v44  ;;  %4798 = vmax.xlane.f32.xlu1 %v4596_v10  ;;  %v10066_v44 = vld [vmem:[#allocation46_spill] sm:$0xff]  ;;  %vm4150_vm6 = vcmp.ge.f32.partialorder %v2560_v36, 0.0 }
 0x1f4   : > { %v8901_v47 = vpop.f32.mrb[70].mxu0  ;;  %v2550_v27 = vadd.f32 %v10066_v44, %v8672_v39 }
 0x1f5   : > { %10063 = vst [vmem:[#allocation45_spill] sm:$0xff] %v8901_v47  ;;  %v8903_v30 = vpop.f32.mrb[68].mxu1  ;;  %v8905_v50 = vpop.f32.mrb[71].mxu0 }
 0x1f6   : > { %10064 = vst [vmem:[#allocation56_spill] sm:$0xff] %v8905_v50  ;;  %v8909_v57 = vpop.f32.mrb[69].mxu1  ;;  %v4343_v44 = vmul.f32 0.2, %v2550_v27  ;;  %vm4087_vm3 = vcmp.ge.f32.partialorder %v2550_v27, 0.0 }
 0x1f7   : > { %10065 = vst [vmem:[#allocation57_spill] sm:$0xff] %v8909_v57  ;;  %4871 = vmax.xlane.f32.xlu0 %v4567_v21  ;;  %4848 = vmax.xlane.f32.xlu1 %v4598_v5  ;;  %v4374_v57 = vmul.f32 0.2, %v2554_v43  ;;  %v10072_v21 = vld [vmem:[#allocation48_spill] sm:$0xff] }
 0x1f8   : > { %v8913_v10 = vpop.f32.mrb[72].mxu0  ;;  %v2447_v23 = vadd.f32 %v10072_v21, %v8747_v62  ;;  %v4599_v34 = vsel %vm4087_vm3, %v2550_v27, %v4343_v44  ;;  %v2449_v27 = vadd.f32 %v10079_v20, %v8747_v62 }
 0x1f9   : > { %10067 = vst [vmem:[#allocation46_spill] sm:$0xff] %v8913_v10  ;;  %v8915_v47 = vpop.f32.mrb[70].mxu1  ;;  %v8917_v50 = vpop.f32.mrb[73].mxu0  ;;  %v4630_v1 = vsel %vm4118_vm2, %v2554_v43, %v4374_v57  ;;  %v2744_v57 = vadd.f32 %v8618_v24, %v10026_v12  ;;  %v2633_v24 = vadd.f32 %v8599_v22, %v10026_v12  ;;  %v2746_v22 = vadd.f32 %v8622_v14, %v10026_v12 }
 0x1fa   : > { %10068 = vst [vmem:[#allocation58_spill] sm:$0xff] %v8915_v47  ;;  %10069 = vst [vmem:[#allocation59_spill] sm:$0xff] %v8917_v50  ;;  %v8921_v56 = vpop.f32.mrb[71].mxu1  ;;  %vm4148_vm4 = vcmp.ge.f32.partialorder %v2447_v23, 0.0  ;;  %vm4149_vm9 = vcmp.ge.f32.partialorder %v2449_v27, 0.0 }
 0x1fb   : > { %10071 = vst [vmem:[#allocation47_spill] sm:$0xff] %v8921_v56  ;;  %4800 = vmax.xlane.f32.xlu0 %v4628_v3  ;;  %4823 = vmax.xlane.f32.xlu1 %v4597_v53  ;;  %v4373_v56 = vmul.f32 0.2, %v2443_v60  ;;  %v4404_v3 = vmul.f32 0.2, %v2447_v23  ;;  %vm3930_vm8 = vcmp.ge.f32.partialorder %v2744_v57, 0.0 }
 0x1fc   : > { %v8925_v5 = vpop.f32.mrb[74].mxu0  ;;  %vm3929_vm11 = vcmp.ge.f32.partialorder %v2633_v24, 0.0  ;;  %vm3931_vm14 = vcmp.ge.f32.partialorder %v2746_v22, 0.0 }
 0x1fd   : > { %10073 = vst [vmem:[#allocation48_spill] sm:$0xff] %v8925_v5  ;;  %v8927_v47 = vpop.f32.mrb[72].mxu1  ;;  %v8929_v50 = vpop.f32.mrb[75].mxu0  ;;  %v4629_v43 = vsel %vm4117_vm12, %v2443_v60, %v4373_v56  ;;  %v4660_v44 = vsel %vm4148_vm4, %v2447_v23, %v4404_v3  ;;  %v4631_v56 = vsel %vm4119_vm5, %v2556_v9, %v4375_v0  ;;  %v4186_v60 = vmul.f32 0.2, %v2744_v57 }
 0x1fe   : > { %10074 = vst [vmem:[#allocation60_spill] sm:$0xff] %v8929_v50  ;;  %v8933_v10 = vpop.f32.mrb[73].mxu1  ;;  %v2562_v23 = vadd.f32 %v8573_v45, %v8747_v62  ;;  %v4185_v0 = vmul.f32 0.2, %v2633_v24  ;;  %v2631_v45 = vadd.f32 %v8594_v15, %v10026_v12  ;;  %vm4754_vm12 = vcmask 23568  }
 0x1ff   : > { %4850 = vmax.xlane.f32.xlu0 %v4630_v1  ;;  %4873 = vmax.xlane.f32.xlu1 %v4599_v34  ;;  %v4406_v1 = vmul.f32 0.2, %v2560_v36  ;;  %v4442_v9 = vsel %vm3930_vm8, %v2744_v57, %v4186_v60  ;;  %v4187_v57 = vmul.f32 0.2, %v2746_v22  ;;  %v2637_v60 = vadd.f32 %v8609_v25, %v8294_v18 }
 0x200   : > { %v8937_v21 = vpop.f32.mrb[76].mxu0  ;;  %vm4151_vm13 = vcmp.ge.f32.partialorder %v2562_v23, 0.0  ;;  %v4441_v14 = vsel %vm3929_vm11, %v2633_v24, %v4185_v0  ;;  %v4184_v15 = vmul.f32 0.2, %v2631_v45  ;;  %vm3928_vm15 = vcmp.ge.f32.partialorder %v2631_v45, 0.0 }
 0x201   : > { %v8939_v53 = vpop.f32.mrb[74].mxu1  ;;  %v8941_v50 = vpop.f32.mrb[77].mxu0  ;;  %v4662_v3 = vsel %vm4150_vm6, %v2560_v36, %v4406_v1  ;;  %v4407_v1 = vmul.f32 0.2, %v2562_v23  ;;  %v4216_v25 = vmul.f32 0.2, %v2637_v60 }
 0x202   : > { %10076 = vst [vmem:[#allocation50_spill] sm:$0xff] %v8939_v53  ;;  %10077 = vst [vmem:[#allocation61_spill] sm:$0xff] %v8941_v50  ;;  %v8945_v5 = vpop.f32.mrb[75].mxu1  ;;  %v4440_v24 = vsel %vm3928_vm15, %v2631_v45, %v4184_v15  ;;  %vm3960_vm1 = vcmp.ge.f32.partialorder %v2637_v60, 0.0 }
 0x203   : > { %10078 = vst [vmem:[#allocation62_spill] sm:$0xff] %v8945_v5  ;;  %4825 = vmax.xlane.f32.xlu0 %v4629_v43  ;;  %4802 = vmax.xlane.f32.xlu1 %v4660_v44  ;;  %v4405_v43 = vmul.f32 0.2, %v2449_v27 }
 0x204   : > { %v8949_v34 = vpop.f32.mrb[78].mxu0 }
 0x205   : > { %v8951_v53 = vpop.f32.mrb[76].mxu1  ;;  %v8953_v50 = vpop.f32.mrb[79].mxu0  ;;  %v4661_v36 = vsel %vm4149_vm9, %v2449_v27, %v4405_v43  ;;  %v2756_v27 = vadd.f32 %v8654_v7, %v8586_v29  ;;  %v4443_v43 = vsel %vm3931_vm14, %v2746_v22, %v4187_v57  ;;  %vm4779_vm9 = vcmask 31768  }
 0x206   : > { %10080 = vst [vmem:[#allocation49_spill] sm:$0xff] %v8953_v50  ;;  %v8957_v5 = vpop.f32.mrb[77].mxu1 }
 0x207   : > { %4875 = vmax.xlane.f32.xlu0 %v4631_v56  ;;  %4852 = vmax.xlane.f32.xlu1 %v4662_v3  ;;  %v4689_v20 = vpop.xlane.xlu0 %4688  ;;  %v2750_v3 = vadd.f32 %v8636_v59, %v8294_v18  ;;  %v2639_v59 = vadd.f32 %v8615_v40, %v8294_v18  ;;  %v4250_v7 = vmul.f32 0.2, %v2756_v27  ;;  %v4472_v40 = vsel %vm3960_vm1, %v2637_v60, %v4216_v25 }
 0x208   : > { %4705 = vst.msk [vmem:[#allocation3] sm:$0xff] %vm4704_vm7, %v4689_v20  ;;  %v4663_v20 = vsel %vm4151_vm13, %v2562_v23, %v4407_v1  ;;  %v2645_v23 = vadd.f32 %v8630_v19, %v8586_v29  ;;  %vm3994_vm2 = vcmp.ge.f32.partialorder %v2756_v27, 0.0  ;;  %v2758_v19 = vadd.f32 %v8660_v13, %v8586_v29 }
 0x209   : > { %v8962_v44 = vpop.f32.mrb[78].mxu1  ;;  %vm3962_vm0 = vcmp.ge.f32.partialorder %v2750_v3, 0.0  ;;  %v4217_v45 = vmul.f32 0.2, %v2639_v59  ;;  %vm3961_vm3 = vcmp.ge.f32.partialorder %v2639_v59, 0.0 }
 0x20a   : > { %v8966_v50 = vpop.f32.mrb[79].mxu1  ;;  %v4249_v15 = vmul.f32 0.2, %v2645_v23  ;;  %vm3993_vm4 = vcmp.ge.f32.partialorder %v2645_v23, 0.0  ;;  %vm3995_vm6 = vcmp.ge.f32.partialorder %v2758_v19, 0.0 }
 0x20b   : > { %4938 = vmax.xlane.f32.xlu0 %v4442_v9  ;;  %v4714_v56 = vpop.xlane.xlu1 %4713  ;;  %4827 = vmax.xlane.f32.xlu1 %v4661_v36  ;;  %v4218_v9 = vmul.f32 0.2, %v2750_v3  ;;  %v4473_v60 = vsel %vm3961_vm3, %v2639_v59, %v4217_v45  ;;  %v2649_v45 = vadd.f32 %v8642_v11, %v8606_v42  ;;  %v2762_v11 = vadd.f32 %v8676_v41, %v8606_v42 }
 0x20c   : > { %4730 = vst.msk [vmem:[#allocation3] sm:$0xff] %vm4729_vm10, %v4714_v56  ;;  %v2752_v56 = vadd.f32 %v8640_v26, %v8294_v18  ;;  %v2643_v26 = vadd.f32 %v8624_v32, %v8586_v29 }
 0x20d   : > { %v4474_v1 = vsel %vm3962_vm0, %v2750_v3, %v4218_v9  ;;  %v4506_v3 = vsel %vm3994_vm2, %v2756_v27, %v4250_v7  ;;  %v2655_v27 = vadd.f32 %v8666_v6, %v8656_v4  ;;  %v4505_v7 = vsel %vm3993_vm4, %v2645_v23, %v4249_v15 }
 0x20e   : > { %v4219_v9 = vmul.f32 0.2, %v2752_v56  ;;  %vm3963_vm5 = vcmp.ge.f32.partialorder %v2752_v56, 0.0  ;;  %vm3992_vm8 = vcmp.ge.f32.partialorder %v2643_v26, 0.0  ;;  %v2768_v6 = vadd.f32 %v8694_v8, %v8656_v4 }
 0x20f   : > { %4913 = vmax.xlane.f32.xlu0 %v4441_v14  ;;  %4877 = vmax.xlane.f32.xlu1 %v4663_v20  ;;  %v4312_v15 = vmul.f32 0.2, %v2655_v27  ;;  %vm4056_vm11 = vcmp.ge.f32.partialorder %v2655_v27, 0.0  ;;  %vm4024_vm13 = vcmp.ge.f32.partialorder %v2649_v45, 0.0  ;;  %vm4026_vm15 = vcmp.ge.f32.partialorder %v2762_v11, 0.0 }
 0x210   : > { %vm4058_vm14 = vcmp.ge.f32.partialorder %v2768_v6, 0.0 }
 0x211   : > { %v4568_v41 = vsel %vm4056_vm11, %v2655_v27, %v4312_v15  ;;  %v2770_v27 = vadd.f32 %v8698_v17, %v8656_v4 }
 0x212   : > { %v8977_v36 = vpop.f32.mrb[80].mxu0 }
 0x213   : > { %4963 = vmax.xlane.f32.xlu0 %v4443_v43  ;;  %v8981_v0 = vpop.f32.mrb[81].mxu0  ;;  %4888 = vmax.xlane.f32.xlu1 %v4440_v24  ;;  %vm4059_vm2 = vcmp.ge.f32.partialorder %v2770_v27, 0.0 }
 0x216   : > { %v8985_v22 = vpop.f32.mrb[82].mxu0 }
 0x217   : > { %4940 = vmax.xlane.f32.xlu0 %v4474_v1  ;;  %v8989_v14 = vpop.f32.mrb[80].mxu1  ;;  %v8991_v57 = vpop.f32.mrb[83].mxu0  ;;  %4890 = vmax.xlane.f32.xlu1 %v4472_v40  ;;  %v4251_v40 = vmul.f32 0.2, %v2758_v19 }
 0x218   : > { %10081 = vst [vmem:[#allocation63_spill] sm:$0xff] %v8991_v57  ;;  %v8993_v20 = vpop.f32.mrb[81].mxu1 }
 0x219   : > { %v4507_v23 = vsel %vm3995_vm6, %v2758_v19, %v4251_v40  ;;  %v2657_v40 = vadd.f32 %v8670_v54, %v8656_v4 }
 0x21a   : > { %v8997_v43 = vpop.f32.mrb[84].mxu0 }
 0x21b   : > { %4942 = vmax.xlane.f32.xlu0 %v4506_v3  ;;  %v9001_v24 = vpop.f32.mrb[82].mxu1  ;;  %v9003_v25 = vpop.f32.mrb[85].mxu0  ;;  %4915 = vmax.xlane.f32.xlu1 %v4473_v60  ;;  %v4475_v3 = vsel %vm3963_vm5, %v2752_v56, %v4219_v9  ;;  %v4248_v60 = vmul.f32 0.2, %v2643_v26  ;;  %v4280_v9 = vmul.f32 0.2, %v2649_v45 }
 0x21c   : > { %v9005_v13 = vpop.f32.mrb[83].mxu1  ;;  %vm4057_vm0 = vcmp.ge.f32.partialorder %v2657_v40, 0.0 }
 0x21d   : > { %v4739_v1 = vpop.xlane.xlu0 %4738  ;;  %10082 = vst [vmem:[#allocation64_spill] sm:$0xff] %v9005_v13  ;;  %v4504_v56 = vsel %vm3992_vm8, %v2643_v26, %v4248_v60  ;;  %v2651_v60 = vadd.f32 %v8648_v55, %v8606_v42 }
 0x21e   : > { %4755 = vst.msk [vmem:[#allocation3] sm:$0xff] %vm4754_vm12, %v4739_v1  ;;  %v9010_v59 = vpop.f32.mrb[86].mxu0 }
 0x21f   : > { %v4716_v32 = vpop.xlane.xlu1 %4715  ;;  %10083 = vst [vmem:[#allocation65_spill] sm:$0xff] %v9010_v59  ;;  %4917 = vmax.xlane.f32.xlu0 %v4505_v7  ;;  %v9014_v57 = vpop.f32.mrb[84].mxu1  ;;  %4965 = vmax.xlane.f32.xlu1 %v4475_v3  ;;  %vm4025_vm1 = vcmp.ge.f32.partialorder %v2651_v60, 0.0 }
 0x220   : > { %v9016_v13 = vpop.f32.mrb[87].mxu0  ;;  %v9018_v1 = vpop.f32.mrb[85].mxu1 }
 0x221   : > { %10084 = vst [vmem:[#allocation66_spill] sm:$0xff] %v9016_v13 }
 0x222   : > { %v9022_v59 = vpop.f32.mrb[88].mxu0 }
 0x223   : > { %10085 = vst [vmem:[#allocation67_spill] sm:$0xff] %v9022_v59  ;;  %4967 = vmax.xlane.f32.xlu0 %v4507_v23  ;;  %v9026_v7 = vpop.f32.mrb[86].mxu1  ;;  %v9028_v3 = vpop.f32.mrb[89].mxu0  ;;  %4892 = vmax.xlane.f32.xlu1 %v4504_v56  ;;  %v4314_v23 = vmul.f32 0.2, %v2768_v6 }
 0x224   : > { %10086 = vst [vmem:[#allocation68_spill] sm:$0xff] %v9026_v7  ;;  %10087 = vst [vmem:[#allocation69_spill] sm:$0xff] %v9028_v3  ;;  %v4764_v13 = vpop.xlane.xlu0 %4763  ;;  %v9030_v8 = vpop.f32.mrb[87].mxu1  ;;  %v4536_v3 = vsel %vm4024_vm13, %v2649_v45, %v4280_v9  ;;  %v4282_v56 = vmul.f32 0.2, %v2762_v11  ;;  %v2764_v9 = vadd.f32 %v8680_v49, %v8606_v42 }
 0x225   : > { %10088 = vst [vmem:[#allocation70_spill] sm:$0xff] %v9030_v8  ;;  %4780 = vst.msk [vmem:[#allocation3] sm:$0xff] %vm4779_vm9, %v4764_v13  ;;  %v4766_v19 = vpop.xlane.xlu1 %4765  ;;  %v4570_v55 = vsel %vm4058_vm14, %v2768_v6, %v4314_v23  ;;  %v4313_v45 = vmul.f32 0.2, %v2657_v40  ;;  %v2667_v23 = vadd.f32 %v8700_v51, %v8732_v31 }
 0x226   : > { %vm4027_vm3 = vcmp.ge.f32.partialorder %v2764_v9, 0.0 }
 0x227   : > { %v9035_v26 = vpop.f32.mrb[90].mxu0  ;;  %4896 = vmax.xlane.f32.xlu0 %v4568_v41  ;;  %4894 = vmax.xlane.f32.xlu1 %v4536_v3  ;;  %v4538_v3 = vsel %vm4026_vm15, %v2762_v11, %v4282_v56  ;;  %v4281_v41 = vmul.f32 0.2, %v2651_v60  ;;  %v4569_v49 = vsel %vm4057_vm0, %v2657_v40, %v4313_v45  ;;  %v4315_v11 = vmul.f32 0.2, %v2770_v27  ;;  %v10097_v45 = vld [vmem:[#allocation14_spill] sm:$0xff] }
 0x228   : > { %v9039_v7 = vpop.f32.mrb[88].mxu1  ;;  %v9041_v8 = vpop.f32.mrb[91].mxu0  ;;  %vm4120_vm4 = vcmp.ge.f32.partialorder %v2667_v23, 0.0 }
 0x229   : > { %10089 = vst [vmem:[#allocation71_spill] sm:$0xff] %v9041_v8  ;;  %v4691_v13 = vpop.xlane.xlu0 %4690  ;;  %v9043_v59 = vpop.f32.mrb[89].mxu1 }
 0x22a   : > { %4706 = vst.msk [vmem:[#allocation3 + $0x8] sm:$0xff] %vm4704_vm7, %v4691_v13  ;;  %v4693_v54 = vpop.xlane.xlu1 %4692 }
 0x22b   : > { %4731 = vst.msk [vmem:[#allocation3 + $0x8] sm:$0xff] %vm4729_vm10, %v4716_v32  ;;  %v9050_v15 = vpop.f32.mrb[92].mxu0  ;;  %4946 = vmax.xlane.f32.xlu0 %v4570_v55  ;;  %4944 = vmax.xlane.f32.xlu1 %v4538_v3  ;;  %v4537_v55 = vsel %vm4025_vm1, %v2651_v60, %v4281_v41  ;;  %v4283_v3 = vmul.f32 0.2, %v2764_v9  ;;  %v10098_v60 = vld [vmem:[#allocation36_spill] sm:$0xff] }
 0x22c   : > { %4707 = vst.msk [vmem:[#allocation3 + $0x10] sm:$0xff] %vm4704_vm7, %v4693_v54  ;;  %10090 = vst [vmem:[#allocation72_spill] sm:$0xff] %v9050_v15  ;;  %v9054_v13 = vpop.f32.mrb[90].mxu1  ;;  %v9056_v8 = vpop.f32.mrb[93].mxu0  ;;  %v2661_v54 = vadd.f32 %v8682_v48, %v8672_v39  ;;  %v4571_v48 = vsel %vm4059_vm2, %v2770_v27, %v4315_v11  ;;  %v2774_v41 = vadd.f32 %v10098_v60, %v8672_v39  ;;  %v10101_v27 = vld [vmem:[#allocation12_spill] sm:$0xff] }
 0x22d   : > { %10091 = vst [vmem:[#allocation73_spill] sm:$0xff] %v9054_v13  ;;  %10092 = vst [vmem:[#allocation74_spill] sm:$0xff] %v9056_v8  ;;  %v4741_v17 = vpop.xlane.xlu0 %4740  ;;  %v9058_v32 = vpop.f32.mrb[91].mxu1  ;;  %v2669_v11 = vadd.f32 %v10101_v27, %v8732_v31 }
 0x22e   : > { %4756 = vst.msk [vmem:[#allocation3 + $0x8] sm:$0xff] %vm4754_vm12, %v4741_v17  ;;  %v4695_v6 = vpop.xlane.xlu1 %4694  ;;  %vm4088_vm5 = vcmp.ge.f32.partialorder %v2661_v54, 0.0  ;;  %vm4090_vm8 = vcmp.ge.f32.partialorder %v2774_v41, 0.0 }
 0x22f   : > { %4781 = vst.msk [vmem:[#allocation3 + $0x8] sm:$0xff] %vm4779_vm9, %v4766_v19  ;;  %v9065_v56 = vpop.f32.mrb[94].mxu0  ;;  %4921 = vmax.xlane.f32.xlu0 %v4569_v49  ;;  %4919 = vmax.xlane.f32.xlu1 %v4537_v55  ;;  %v4376_v49 = vmul.f32 0.2, %v2667_v23  ;;  %vm4121_vm11 = vcmp.ge.f32.partialorder %v2669_v11, 0.0 }
 0x230   : > { %4708 = vst.msk [vmem:[#allocation3 + $0x18] sm:$0xff] %vm4704_vm7, %v4695_v6  ;;  %10093 = vst [vmem:[#allocation75_spill] sm:$0xff] %v9065_v56  ;;  %v9069_v17 = vpop.f32.mrb[92].mxu1  ;;  %v9071_v8 = vpop.f32.mrb[95].mxu0  ;;  %v2780_v6 = vadd.f32 %v10097_v45, %v8732_v31  ;;  %v4539_v56 = vsel %vm4027_vm3, %v2764_v9, %v4283_v3  ;;  %v10102_v9 = vld [vmem:[#allocation11_spill] sm:$0xff] }
 0x231   : > { %10094 = vst [vmem:[#allocation76_spill] sm:$0xff] %v9069_v17  ;;  %10095 = vst [vmem:[#allocation77_spill] sm:$0xff] %v9071_v8  ;;  %v4743_v51 = vpop.xlane.xlu0 %4742  ;;  %v9073_v19 = vpop.f32.mrb[93].mxu1  ;;  %v4344_v8 = vmul.f32 0.2, %v2661_v54  ;;  %v2663_v3 = vadd.f32 %v10102_v9, %v8672_v39 }
 0x232   : > { %10096 = vst [vmem:[#allocation78_spill] sm:$0xff] %v9073_v19  ;;  %v4720_v40 = vpop.xlane.xlu1 %4719  ;;  %vm4122_vm6 = vcmp.ge.f32.partialorder %v2780_v6, 0.0 }
 0x233   : > { %4733 = vst.msk [vmem:[#allocation3 + $0x18] sm:$0xff] %vm4729_vm10, %v4720_v40  ;;  %4971 = vmax.xlane.f32.xlu0 %v4571_v48  ;;  %4969 = vmax.xlane.f32.xlu1 %v4539_v56  ;;  %v4632_v40 = vsel %vm4120_vm4, %v2667_v23, %v4376_v49  ;;  %v4378_v48 = vmul.f32 0.2, %v2780_v6  ;;  %v4600_v60 = vsel %vm4088_vm5, %v2661_v54, %v4344_v8  ;;  %v4346_v56 = vmul.f32 0.2, %v2774_v41  ;;  %v10104_v49 = vld [vmem:[#allocation10_spill] sm:$0xff] }
 0x234   : > { %v9080_v55 = vpop.f32.mrb[94].mxu1  ;;  %v2776_v9 = vadd.f32 %v10104_v49, %v8672_v39  ;;  %v4345_v54 = vmul.f32 0.2, %v2663_v3  ;;  %vm4089_vm13 = vcmp.ge.f32.partialorder %v2663_v3, 0.0 }
 0x235   : > { %10099 = vst [vmem:[#allocation14_spill] sm:$0xff] %v9080_v55  ;;  %v4718_v17 = vpop.xlane.xlu0 %4717  ;;  %v9082_v19 = vpop.f32.mrb[95].mxu1  ;;  %v4634_v23 = vsel %vm4122_vm6, %v2780_v6, %v4378_v48  ;;  %v4602_v8 = vsel %vm4090_vm8, %v2774_v41, %v4346_v56  ;;  %v10107_v6 = vld [vmem:[#allocation21_spill] sm:$0xff] }
 0x236   : > { %10100 = vst [vmem:[#allocation36_spill] sm:$0xff] %v9082_v19  ;;  %4732 = vst.msk [vmem:[#allocation3 + $0x10] sm:$0xff] %vm4729_vm10, %v4718_v17  ;;  %v4770_v45 = vpop.xlane.xlu1 %4769  ;;  %v10103_v19 = vld [vmem:[#allocation15_spill] sm:$0xff]  ;;  %v2970_v48 = vadd.f32 %v10107_v6, %v10026_v12  ;;  %v4347_v56 = vmul.f32 0.2, %v2776_v9  ;;  %vm4091_vm15 = vcmp.ge.f32.partialorder %v2776_v9, 0.0 }
 0x237   : > { %4757 = vst.msk [vmem:[#allocation3 + $0x10] sm:$0xff] %vm4754_vm12, %v4743_v51  ;;  %4900 = vmax.xlane.f32.xlu0 %v4632_v40  ;;  %4898 = vmax.xlane.f32.xlu1 %v4600_v60  ;;  %v2782_v27 = vadd.f32 %v10103_v19, %v8732_v31  ;;  %v4377_v51 = vmul.f32 0.2, %v2669_v11 }
 0x238   : > { %v4190_v6 = vmul.f32 0.2, %v2970_v48  ;;  %vm3934_vm0 = vcmp.ge.f32.partialorder %v2970_v48, 0.0 }
 0x239   : > { %v4768_v55 = vpop.xlane.xlu0 %4767  ;;  %v4633_v41 = vsel %vm4121_vm11, %v2669_v11, %v4377_v51  ;;  %vm4123_vm14 = vcmp.ge.f32.partialorder %v2782_v27, 0.0 }
 0x23a   : > { %4782 = vst.msk [vmem:[#allocation3 + $0x10] sm:$0xff] %vm4779_vm9, %v4768_v55  ;;  %v4697_v17 = vpop.xlane.xlu1 %4696 }
 0x23b   : > { %4709 = vst.msk [vmem:[#allocation3 + $0x20] sm:$0xff] %vm4704_vm7, %v4697_v17  ;;  %4950 = vmax.xlane.f32.xlu0 %v4634_v23  ;;  %4948 = vmax.xlane.f32.xlu1 %v4602_v8  ;;  %v4379_v17 = vmul.f32 0.2, %v2782_v27  ;;  %v10108_v23 = vld [vmem:[#allocation17_spill] sm:$0xff]  ;;  %v4601_v8 = vsel %vm4089_vm13, %v2663_v3, %v4345_v54  ;;  %v4603_v54 = vsel %vm4091_vm15, %v2776_v9, %v4347_v56 }
 0x23c   : > { %v2673_v49 = vadd.f32 %v10108_v23, %v8747_v62  ;;  %v4446_v9 = vsel %vm3934_vm0, %v2970_v48, %v4190_v6 }
 0x23d   : > { %v4745_v40 = vpop.xlane.xlu0 %4744  ;;  %v4635_v11 = vsel %vm4123_vm14, %v2782_v27, %v4379_v17 }
 0x23e   : > { %v9096_v60 = vpop.f32.mrb[96].mxu0  ;;  %4758 = vst.msk [vmem:[#allocation3 + $0x18] sm:$0xff] %vm4754_vm12, %v4745_v40  ;;  %v4699_v55 = vpop.xlane.xlu1 %4698  ;;  %v4408_v51 = vmul.f32 0.2, %v2673_v49  ;;  %vm4152_vm1 = vcmp.ge.f32.partialorder %v2673_v49, 0.0 }
 0x23f   : > { %10105 = vst [vmem:[#allocation12_spill] sm:$0xff] %v9096_v60  ;;  %v9099_v19 = vpop.f32.mrb[97].mxu0  ;;  %4783 = vst.msk [vmem:[#allocation3 + $0x18] sm:$0xff] %vm4779_vm9, %v4770_v45  ;;  %4925 = vmax.xlane.f32.xlu0 %v4633_v41  ;;  %4923 = vmax.xlane.f32.xlu1 %v4601_v8  ;;  %v10111_v45 = vld [vmem:[#allocation16_spill] sm:$0xff]  ;;  %v10112_v41 = vld [vmem:[#allocation18_spill] sm:$0xff] }
 0x240   : > { %10106 = vst [vmem:[#allocation11_spill] sm:$0xff] %v9099_v19  ;;  %4710 = vst.msk [vmem:[#allocation3 + $0x28] sm:$0xff] %vm4704_vm7, %v4699_v55  ;;  %v2859_v55 = vadd.f32 %v10111_v45, %v10026_v12  ;;  %v2786_v3 = vadd.f32 %v10112_v41, %v8747_v62  ;;  %v10118_v41 = vld [vmem:[#allocation13_spill] sm:$0xff] }
 0x241   : > { %v4747_v40 = vpop.xlane.xlu0 %4746 }
 0x242   : > { %v9107_v19 = vpop.f32.mrb[98].mxu0  ;;  %v4724_v60 = vpop.xlane.xlu1 %4723  ;;  %v4189_v27 = vmul.f32 0.2, %v2859_v55  ;;  %vm3933_vm2 = vcmp.ge.f32.partialorder %v2859_v55, 0.0  ;;  %vm4154_vm3 = vcmp.ge.f32.partialorder %v2786_v3, 0.0 }
 0x243   : > { %10109 = vst [vmem:[#allocation15_spill] sm:$0xff] %v9107_v19  ;;  %v9109_v13 = vpop.f32.mrb[99].mxu0  ;;  %4735 = vst.msk [vmem:[#allocation3 + $0x28] sm:$0xff] %vm4729_vm10, %v4724_v60  ;;  %4975 = vmax.xlane.f32.xlu0 %v4635_v11  ;;  %v9116_v23 = vpop.f32.mrb[96].mxu1  ;;  %4973 = vmax.xlane.f32.xlu1 %v4603_v54  ;;  %v10116_v60 = vld [vmem:[#allocation22_spill] sm:$0xff]  ;;  %v2675_v54 = vadd.f32 %v10118_v41, %v8747_v62 }
 0x244   : > { %10110 = vst [vmem:[#allocation10_spill] sm:$0xff] %v9109_v13  ;;  %10113 = vst [vmem:[#allocation21_spill] sm:$0xff] %v9116_v23  ;;  %v9118_v13 = vpop.f32.mrb[97].mxu1  ;;  %v2972_v17 = vadd.f32 %v10116_v60, %v10026_v12  ;;  %v4410_v11 = vmul.f32 0.2, %v2786_v3  ;;  %v10122_v60 = vld [vmem:[#allocation26_spill] sm:$0xff] }
 0x245   : > { %v4722_v8 = vpop.xlane.xlu0 %4721  ;;  %10114 = vst [vmem:[#allocation17_spill] sm:$0xff] %v9118_v13  ;;  %v4664_v13 = vsel %vm4152_vm1, %v2673_v49, %v4408_v51  ;;  %v4445_v49 = vsel %vm3933_vm2, %v2859_v55, %v4189_v27  ;;  %vm4153_vm5 = vcmp.ge.f32.partialorder %v2675_v54, 0.0  ;;  %vm4854_vm1 = vcmask 56368  }
 0x246   : > { %4734 = vst.msk [vmem:[#allocation3 + $0x20] sm:$0xff] %vm4729_vm10, %v4722_v8  ;;  %v4774_v45 = vpop.xlane.xlu1 %4773  ;;  %v9121_v19 = vpop.f32.mrb[100].mxu0  ;;  %v4191_v6 = vmul.f32 0.2, %v2972_v17  ;;  %vm3935_vm4 = vcmp.ge.f32.partialorder %v2972_v17, 0.0 }
 0x247   : > { %10115 = vst [vmem:[#allocation16_spill] sm:$0xff] %v9121_v19  ;;  %4759 = vst.msk [vmem:[#allocation3 + $0x20] sm:$0xff] %vm4754_vm12, %v4747_v40  ;;  %v9126_v56 = vpop.f32.mrb[101].mxu0  ;;  %5038 = vmax.xlane.f32.xlu0 %v4446_v9  ;;  %4902 = vmax.xlane.f32.xlu1 %v4664_v13  ;;  %v4409_v9 = vmul.f32 0.2, %v2675_v54  ;;  %v10124_v13 = vld [vmem:[#allocation19_spill] sm:$0xff] }
 0x248   : > { %10117 = vst [vmem:[#allocation18_spill] sm:$0xff] %v9126_v56  ;;  %v9130_v8 = vpop.f32.mrb[98].mxu1  ;;  %v2869_v56 = vadd.f32 %v10122_v60, %v8586_v29  ;;  %v2788_v41 = vadd.f32 %v10124_v13, %v8747_v62  ;;  %v10128_v60 = vld [vmem:[#allocation29_spill] sm:$0xff] }
 0x249   : > { %10119 = vst [vmem:[#allocation22_spill] sm:$0xff] %v9130_v8  ;;  %v4772_v19 = vpop.xlane.xlu0 %4771  ;;  %v9132_v23 = vpop.f32.mrb[99].mxu1 }
 0x24a   : > { %10120 = vst [vmem:[#allocation13_spill] sm:$0xff] %v9132_v23  ;;  %4784 = vst.msk [vmem:[#allocation3 + $0x20] sm:$0xff] %vm4779_vm9, %v4772_v19  ;;  %v4701_v40 = vpop.xlane.xlu1 %4700  ;;  %v9135_v48 = vpop.f32.mrb[102].mxu0  ;;  %v4666_v23 = vsel %vm4154_vm3, %v2786_v3, %v4410_v11  ;;  %v4252_v27 = vmul.f32 0.2, %v2869_v56  ;;  %v4447_v3 = vsel %vm3935_vm4, %v2972_v17, %v4191_v6  ;;  %vm3996_vm6 = vcmp.ge.f32.partialorder %v2869_v56, 0.0 }
 0x24b   : > { %10121 = vst [vmem:[#allocation79_spill] sm:$0xff] %v9135_v48  ;;  %4711 = vst.msk [vmem:[#allocation3 + $0x30] sm:$0xff] %vm4704_vm7, %v4701_v40  ;;  %v9140_v51 = vpop.f32.mrb[103].mxu0  ;;  %5013 = vmax.xlane.f32.xlu0 %v4445_v49  ;;  %4952 = vmax.xlane.f32.xlu1 %v4666_v23  ;;  %v4411_v23 = vmul.f32 0.2, %v2788_v41  ;;  %v10130_v49 = vld [vmem:[#allocation20_spill] sm:$0xff] }
 0x24c   : > { %10123 = vst [vmem:[#allocation26_spill] sm:$0xff] %v9140_v51  ;;  %v9144_v19 = vpop.f32.mrb[100].mxu1  ;;  %v2982_v51 = vadd.f32 %v10128_v60, %v8586_v29  ;;  %v2857_v13 = vadd.f32 %v10130_v49, %v10026_v12  ;;  %vm4155_vm8 = vcmp.ge.f32.partialorder %v2788_v41, 0.0  ;;  %v10134_v6 = vld [vmem:[#allocation31_spill] sm:$0xff]  ;;  %vm4879_vm3 = vcmask 64568  }
 0x24d   : > { %10125 = vst [vmem:[#allocation19_spill] sm:$0xff] %v9144_v19  ;;  %v4749_v48 = vpop.xlane.xlu0 %4748  ;;  %v9146_v8 = vpop.f32.mrb[101].mxu1  ;;  %v4667_v49 = vsel %vm4155_vm8, %v2788_v41, %v4411_v23 }
 0x24e   : > { %10126 = vst [vmem:[#allocation80_spill] sm:$0xff] %v9146_v8  ;;  %4760 = vst.msk [vmem:[#allocation3 + $0x28] sm:$0xff] %vm4754_vm12, %v4749_v48  ;;  %v4703_v40 = vpop.xlane.xlu1 %4702  ;;  %v9149_v55 = vpop.f32.mrb[104].mxu0  ;;  %v4665_v48 = vsel %vm4153_vm5, %v2675_v54, %v4409_v9  ;;  %v4254_v17 = vmul.f32 0.2, %v2982_v51  ;;  %v10136_v54 = vld [vmem:[#allocation25_spill] sm:$0xff] }
 0x24f   : > { %10127 = vst [vmem:[#allocation81_spill] sm:$0xff] %v9149_v55  ;;  %4785 = vst.msk [vmem:[#allocation3 + $0x28] sm:$0xff] %vm4779_vm9, %v4774_v45  ;;  %v9155_v11 = vpop.f32.mrb[105].mxu0  ;;  %5063 = vmax.xlane.f32.xlu0 %v4447_v3  ;;  %4927 = vmax.xlane.f32.xlu1 %v4665_v48  ;;  %v4188_v3 = vmul.f32 0.2, %v2857_v13  ;;  %v2863_v9 = vadd.f32 %v10136_v54, %v8294_v18  ;;  %vm3932_vm11 = vcmp.ge.f32.partialorder %v2857_v13, 0.0 }
 0x250   : > { %4712 = vst.msk [vmem:[#allocation3 + $0x38] sm:$0xff] %vm4704_vm7, %v4703_v40  ;;  %10129 = vst [vmem:[#allocation29_spill] sm:$0xff] %v9155_v11  ;;  %v9159_v8 = vpop.f32.mrb[102].mxu1  ;;  %v2871_v40 = vadd.f32 %v10134_v6, %v8586_v29  ;;  %v4508_v11 = vsel %vm3996_vm6, %v2869_v56, %v4252_v27  ;;  %vm3998_vm7 = vcmp.ge.f32.partialorder %v2982_v51, 0.0  ;;  %v10141_v54 = vld [vmem:[#allocation27_spill] sm:$0xff] }
 0x251   : > { %10131 = vst [vmem:[#allocation20_spill] sm:$0xff] %v9159_v8  ;;  %v4751_v55 = vpop.xlane.xlu0 %4750  ;;  %v9161_v60 = vpop.f32.mrb[103].mxu1  ;;  %v4510_v41 = vsel %vm3998_vm7, %v2982_v51, %v4254_v17  ;;  %v4220_v23 = vmul.f32 0.2, %v2863_v9  ;;  %vm3964_vm14 = vcmp.ge.f32.partialorder %v2863_v9, 0.0 }
 0x252   : > { %10132 = vst [vmem:[#allocation82_spill] sm:$0xff] %v9161_v60  ;;  %v4753_v45 = vpop.xlane.xlu1 %4752  ;;  %v9163_v19 = vpop.f32.mrb[106].mxu0  ;;  %v4253_v27 = vmul.f32 0.2, %v2871_v40  ;;  %vm3997_vm13 = vcmp.ge.f32.partialorder %v2871_v40, 0.0 }
 0x253   : > { %10133 = vst [vmem:[#allocation83_spill] sm:$0xff] %v9163_v19  ;;  %v9167_v15 = vpop.f32.mrb[107].mxu0  ;;  %4992 = vmax.xlane.f32.xlu0 %v4508_v11  ;;  %4977 = vmax.xlane.f32.xlu1 %v4667_v49  ;;  %v2976_v49 = vadd.f32 %v10141_v54, %v8294_v18 }
 0x254   : > { %10135 = vst [vmem:[#allocation31_spill] sm:$0xff] %v9167_v15  ;;  %v9171_v48 = vpop.f32.mrb[104].mxu1  ;;  %v10139_v15 = vld [vmem:[#allocation32_spill] sm:$0xff] }
 0x255   : > { %v4726_v60 = vpop.xlane.xlu0 %4725  ;;  %v9173_v19 = vpop.f32.mrb[105].mxu1  ;;  %v2984_v8 = vadd.f32 %v10139_v15, %v8586_v29  ;;  %vm3966_vm15 = vcmp.ge.f32.partialorder %v2976_v49, 0.0 }
 0x256   : > { %10137 = vst [vmem:[#allocation25_spill] sm:$0xff] %v9173_v19  ;;  %4736 = vst.msk [vmem:[#allocation3 + $0x30] sm:$0xff] %vm4729_vm10, %v4726_v60  ;;  %v4728_v6 = vpop.xlane.xlu1 %4727  ;;  %v9176_v56 = vpop.f32.mrb[108].mxu0  ;;  %v4444_v60 = vsel %vm3932_vm11, %v2857_v13, %v4188_v3  ;;  %v4509_v3 = vsel %vm3997_vm13, %v2871_v40, %v4253_v27  ;;  %v2994_v40 = vadd.f32 %v8823_v46, %v8656_v4 }
 0x257   : > { %10138 = vst [vmem:[#allocation84_spill] sm:$0xff] %v9176_v56  ;;  %4761 = vst.msk [vmem:[#allocation3 + $0x30] sm:$0xff] %vm4754_vm12, %v4751_v55  ;;  %v9182_v11 = vpop.f32.mrb[109].mxu0  ;;  %5042 = vmax.xlane.f32.xlu0 %v4510_v41  ;;  %4988 = vmax.xlane.f32.xlu1 %v4444_v60  ;;  %v4222_v60 = vmul.f32 0.2, %v2976_v49 }
 0x258   : > { %4737 = vst.msk [vmem:[#allocation3 + $0x38] sm:$0xff] %vm4729_vm10, %v4728_v6  ;;  %10140 = vst [vmem:[#allocation32_spill] sm:$0xff] %v9182_v11  ;;  %v9187_v56 = vpop.f32.mrb[106].mxu1  ;;  %v10145_v6 = vld [vmem:[#allocation23_spill] sm:$0xff]  ;;  %v4255_v11 = vmul.f32 0.2, %v2984_v8 }
 0x259   : > { %4762 = vst.msk [vmem:[#allocation3 + $0x38] sm:$0xff] %vm4754_vm12, %v4753_v45  ;;  %10142 = vst [vmem:[#allocation27_spill] sm:$0xff] %v9187_v56  ;;  %v4776_v15 = vpop.xlane.xlu0 %4775  ;;  %v9189_v55 = vpop.f32.mrb[107].mxu1  ;;  %v2865_v54 = vadd.f32 %v10145_v6, %v8294_v18  ;;  %v10146_v45 = vld [vmem:[#allocation37_spill] sm:$0xff]  ;;  %vm4804_vm10 = vcmask 39968   ;;  %vm3999_vm12 = vcmp.ge.f32.partialorder %v2984_v8, 0.0 }
 0x25a   : > { %10143 = vst [vmem:[#allocation85_spill] sm:$0xff] %v9189_v55  ;;  %4786 = vst.msk [vmem:[#allocation3 + $0x30] sm:$0xff] %vm4779_vm9, %v4776_v15  ;;  %v4778_v51 = vpop.xlane.xlu1 %4777  ;;  %v9192_v17 = vpop.f32.mrb[110].mxu0  ;;  %v2881_v13 = vadd.f32 %v10146_v45, %v8656_v4  ;;  %v4476_v55 = vsel %vm3964_vm14, %v2863_v9, %v4220_v23  ;;  %v10150_v56 = vld [vmem:[#allocation24_spill] sm:$0xff]  ;;  %v4511_v9 = vsel %vm3999_vm12, %v2984_v8, %v4255_v11  ;;  %v4318_v46 = vmul.f32 0.2, %v2994_v40 }
 0x25b   : > { %10144 = vst [vmem:[#allocation86_spill] sm:$0xff] %v9192_v17  ;;  %4787 = vst.msk [vmem:[#allocation3 + $0x38] sm:$0xff] %vm4779_vm9, %v4778_v51  ;;  %v9199_v41 = vpop.f32.mrb[111].mxu0  ;;  %5017 = vmax.xlane.f32.xlu0 %v4509_v3  ;;  %4990 = vmax.xlane.f32.xlu1 %v4476_v55  ;;  %v2978_v45 = vadd.f32 %v10150_v56, %v8294_v18  ;;  %vm4829_vm9 = vcmask 48168   ;;  %v4221_v27 = vmul.f32 0.2, %v2865_v54  ;;  %v4478_v23 = vsel %vm3966_vm15, %v2976_v49, %v4222_v60 }
 0x25c   : > { %10147 = vst [vmem:[#allocation23_spill] sm:$0xff] %v9199_v41  ;;  %v9201_v15 = vpop.f32.mrb[108].mxu1  ;;  %v4316_v51 = vmul.f32 0.2, %v2881_v13  ;;  %vm4060_vm0 = vcmp.ge.f32.partialorder %v2881_v13, 0.0  ;;  %vm3965_vm2 = vcmp.ge.f32.partialorder %v2865_v54, 0.0 }
 0x25d   : > { %10148 = vst [vmem:[#allocation37_spill] sm:$0xff] %v9201_v15  ;;  %v4839_v17 = vpop.xlane.xlu0 %4838  ;;  %v9203_v6 = vpop.f32.mrb[109].mxu1  ;;  %v4223_v49 = vmul.f32 0.2, %v2978_v45  ;;  %v10154_v60 = vld [vmem:[#allocation28_spill] sm:$0xff]  ;;  %vm4062_vm4 = vcmp.ge.f32.partialorder %v2994_v40, 0.0 }
 0x25e   : > { %10149 = vst [vmem:[#allocation87_spill] sm:$0xff] %v9203_v6  ;;  %v4789_v19 = vpop.xlane.xlu1 %4788  ;;  %v4572_v11 = vsel %vm4060_vm0, %v2881_v13, %v4316_v51  ;;  %vm3967_vm5 = vcmp.ge.f32.partialorder %v2978_v45, 0.0 }
 0x25f   : > { %4805 = vst.msk [vmem:[#allocation3] sm:$0xff] %vm4804_vm10, %v4789_v19  ;;  %5067 = vmax.xlane.f32.xlu0 %v4511_v9  ;;  %5040 = vmax.xlane.f32.xlu1 %v4478_v23  ;;  %v10153_v19 = vld [vmem:[#allocation35_spill] sm:$0xff]  ;;  %v2875_v9 = vadd.f32 %v10154_v60, %v8606_v42  ;;  %v4477_v23 = vsel %vm3965_vm2, %v2865_v54, %v4221_v27 }
 0x260   : > { %v9210_v55 = vpop.f32.mrb[110].mxu1  ;;  %v2883_v8 = vadd.f32 %v10153_v19, %v8656_v4  ;;  %v4479_v54 = vsel %vm3967_vm5, %v2978_v45, %v4223_v49 }
 0x261   : > { %10151 = vst [vmem:[#allocation24_spill] sm:$0xff] %v9210_v55  ;;  %v4814_v3 = vpop.xlane.xlu0 %4813  ;;  %v9212_v56 = vpop.f32.mrb[111].mxu1  ;;  %v4284_v51 = vmul.f32 0.2, %v2875_v9  ;;  %v10156_v55 = vld [vmem:[#allocation33_spill] sm:$0xff]  ;;  %vm4028_vm8 = vcmp.ge.f32.partialorder %v2875_v9, 0.0 }
 0x262   : > { %10152 = vst [vmem:[#allocation88_spill] sm:$0xff] %v9212_v56  ;;  %4830 = vst.msk [vmem:[#allocation3] sm:$0xff] %vm4829_vm9, %v4814_v3  ;;  %v4791_v6 = vpop.xlane.xlu1 %4790  ;;  %v4317_v19 = vmul.f32 0.2, %v2883_v8  ;;  %v2988_v60 = vadd.f32 %v10156_v55, %v8606_v42  ;;  %vm4061_vm6 = vcmp.ge.f32.partialorder %v2883_v8, 0.0  ;;  %v10158_v55 = vld [vmem:[#allocation30_spill] sm:$0xff] }
 0x263   : > { %4806 = vst.msk [vmem:[#allocation3 + $0x8] sm:$0xff] %vm4804_vm10, %v4791_v6  ;;  %4996 = vmax.xlane.f32.xlu0 %v4572_v11  ;;  %5015 = vmax.xlane.f32.xlu1 %v4477_v23  ;;  %v10155_v6 = vld [vmem:[#allocation38_spill] sm:$0xff]  ;;  %v2877_v45 = vadd.f32 %v10158_v55, %v8606_v42  ;;  %v4540_v49 = vsel %vm4028_vm8, %v2875_v9, %v4284_v51 }
 0x264   : > { %4855 = vst.msk [vmem:[#allocation3] sm:$0xff] %vm4854_vm1, %v4839_v17  ;;  %v2996_v13 = vadd.f32 %v10155_v6, %v8656_v4  ;;  %v4574_v17 = vsel %vm4062_vm4, %v2994_v40, %v4318_v46  ;;  %v4573_v40 = vsel %vm4061_vm6, %v2883_v8, %v4317_v19  ;;  %vm4030_vm11 = vcmp.ge.f32.partialorder %v2988_v60, 0.0 }
 0x265   : > { %v4864_v3 = vpop.xlane.xlu0 %4863  ;;  %v4285_v19 = vmul.f32 0.2, %v2877_v45  ;;  %vm4029_vm14 = vcmp.ge.f32.partialorder %v2877_v45, 0.0 }
 0x266   : > { %4880 = vst.msk [vmem:[#allocation3] sm:$0xff] %vm4879_vm3, %v4864_v3  ;;  %v4816_v56 = vpop.xlane.xlu1 %4815  ;;  %v4319_v23 = vmul.f32 0.2, %v2996_v13  ;;  %v10157_v3 = vld [vmem:[#allocation43_spill] sm:$0xff]  ;;  %vm4063_vm7 = vcmp.ge.f32.partialorder %v2996_v13, 0.0 }
 0x267   : > { %4831 = vst.msk [vmem:[#allocation3 + $0x8] sm:$0xff] %vm4829_vm9, %v4816_v56  ;;  %5046 = vmax.xlane.f32.xlu0 %v4574_v17  ;;  %5065 = vmax.xlane.f32.xlu1 %v4479_v54  ;;  %v2893_v6 = vadd.f32 %v10157_v3, %v8732_v31  ;;  %v4286_v56 = vmul.f32 0.2, %v2988_v60  ;;  %v3006_v3 = vadd.f32 %v8847_v52, %v8732_v31 }
 0x268   : > { %v4575_v8 = vsel %vm4063_vm7, %v2996_v13, %v4319_v23  ;;  %v2895_v23 = vadd.f32 %v8837_v38, %v8732_v31 }
 0x269   : > { %v4841_v27 = vpop.xlane.xlu0 %4840  ;;  %v4542_v51 = vsel %vm4030_vm11, %v2988_v60, %v4286_v56  ;;  %vm4124_vm13 = vcmp.ge.f32.partialorder %v2893_v6, 0.0  ;;  %v4382_v13 = vmul.f32 0.2, %v3006_v3  ;;  %vm4126_vm12 = vcmp.ge.f32.partialorder %v3006_v3, 0.0 }
 0x26a   : > { %4856 = vst.msk [vmem:[#allocation3 + $0x8] sm:$0xff] %vm4854_vm1, %v4841_v27  ;;  %v4866_v11 = vpop.xlane.xlu1 %4865  ;;  %v4380_v27 = vmul.f32 0.2, %v2893_v6  ;;  %vm4125_vm0 = vcmp.ge.f32.partialorder %v2895_v23, 0.0 }
 0x26b   : > { %4881 = vst.msk [vmem:[#allocation3 + $0x8] sm:$0xff] %vm4879_vm3, %v4866_v11  ;;  %5021 = vmax.xlane.f32.xlu0 %v4573_v40  ;;  %4994 = vmax.xlane.f32.xlu1 %v4540_v49  ;;  %v10160_v11 = vld [vmem:[#allocation34_spill] sm:$0xff] }
 0x26c   : > { %v9230_v41 = vpop.f32.mrb[112].mxu0  ;;  %v2990_v55 = vadd.f32 %v10160_v11, %v8606_v42  ;;  %v4636_v60 = vsel %vm4124_vm13, %v2893_v6, %v4380_v27  ;;  %v4381_v6 = vmul.f32 0.2, %v2895_v23  ;;  %v3008_v27 = vadd.f32 %v8851_v16, %v8732_v31 }
 0x26d   : > { %v9235_v46 = vpop.f32.mrb[113].mxu0  ;;  %v4843_v17 = vpop.xlane.xlu0 %4842 }
 0x26e   : > { %10159 = vst [vmem:[#allocation35_spill] sm:$0xff] %v9235_v46  ;;  %v4793_v54 = vpop.xlane.xlu1 %4792  ;;  %v4287_v56 = vmul.f32 0.2, %v2990_v55  ;;  %vm4031_vm15 = vcmp.ge.f32.partialorder %v2990_v55, 0.0  ;;  %vm4127_vm4 = vcmp.ge.f32.partialorder %v3008_v27, 0.0 }
 0x26f   : > { %4807 = vst.msk [vmem:[#allocation3 + $0x10] sm:$0xff] %vm4804_vm10, %v4793_v54  ;;  %5071 = vmax.xlane.f32.xlu0 %v4575_v8  ;;  %5044 = vmax.xlane.f32.xlu1 %v4542_v51  ;;  %v10164_v8 = vld [vmem:[#allocation39_spill] sm:$0xff] }
 0x270   : > { %v9239_v15 = vpop.f32.mrb[114].mxu0  ;;  %v9244_v40 = vpop.f32.mrb[112].mxu1  ;;  %v2887_v51 = vadd.f32 %v10164_v8, %v8672_v39  ;;  %v4638_v8 = vsel %vm4126_vm12, %v3006_v3, %v4382_v13  ;;  %v4383_v3 = vmul.f32 0.2, %v3008_v27  ;;  %v3083_v13 = vadd.f32 %v8869_v28, %v10026_v12 }
 0x271   : > { %v9246_v9 = vpop.f32.mrb[115].mxu0  ;;  %v9248_v49 = vpop.f32.mrb[113].mxu1 }
 0x272   : > { %10161 = vst [vmem:[#allocation28_spill] sm:$0xff] %v9246_v9  ;;  %10162 = vst [vmem:[#allocation38_spill] sm:$0xff] %v9248_v49  ;;  %v4818_v52 = vpop.xlane.xlu0 %4817  ;;  %v4795_v54 = vpop.xlane.xlu1 %4794  ;;  %vm4092_vm2 = vcmp.ge.f32.partialorder %v2887_v51, 0.0  ;;  %vm3936_vm6 = vcmp.ge.f32.partialorder %v3083_v13, 0.0 }
 0x273   : > { %4832 = vst.msk [vmem:[#allocation3 + $0x10] sm:$0xff] %vm4829_vm9, %v4818_v52  ;;  %5000 = vmax.xlane.f32.xlu0 %v4636_v60  ;;  %v4541_v52 = vsel %vm4029_vm14, %v2877_v45, %v4285_v19  ;;  %v4348_v60 = vmul.f32 0.2, %v2887_v51  ;;  %v10167_v45 = vld [vmem:[#allocation40_spill] sm:$0xff] }
 0x274   : > { %4857 = vst.msk [vmem:[#allocation3 + $0x10] sm:$0xff] %vm4854_vm1, %v4843_v17  ;;  %v9254_v11 = vpop.f32.mrb[116].mxu0  ;;  %v9259_v49 = vpop.f32.mrb[114].mxu1  ;;  %5019 = vmax.xlane.f32.xlu1 %v4541_v52  ;;  %v3000_v19 = vadd.f32 %v10167_v45, %v8672_v39 }
 0x275   : > { %10163 = vst [vmem:[#allocation33_spill] sm:$0xff] %v9254_v11  ;;  %4808 = vst.msk [vmem:[#allocation3 + $0x18] sm:$0xff] %vm4804_vm10, %v4795_v54  ;;  %v9261_v9 = vpop.f32.mrb[117].mxu0  ;;  %v9263_v46 = vpop.f32.mrb[115].mxu1 }
 0x276   : > { %10165 = vst [vmem:[#allocation43_spill] sm:$0xff] %v9261_v9  ;;  %v4868_v38 = vpop.xlane.xlu0 %4867  ;;  %v4820_v17 = vpop.xlane.xlu1 %4819  ;;  %vm4094_vm5 = vcmp.ge.f32.partialorder %v3000_v19, 0.0 }
 0x277   : > { %4882 = vst.msk [vmem:[#allocation3 + $0x10] sm:$0xff] %vm4879_vm3, %v4868_v38  ;;  %5050 = vmax.xlane.f32.xlu0 %v4638_v8  ;;  %v4543_v38 = vsel %vm4031_vm15, %v2990_v55, %v4287_v56  ;;  %v4350_v8 = vmul.f32 0.2, %v3000_v19  ;;  %v10172_v55 = vld [vmem:[#allocation41_spill] sm:$0xff] }
 0x278   : > { %v9268_v54 = vpop.f32.mrb[118].mxu0  ;;  %4833 = vst.msk [vmem:[#allocation3 + $0x18] sm:$0xff] %vm4829_vm9, %v4820_v17  ;;  %v9273_v11 = vpop.f32.mrb[116].mxu1  ;;  %5069 = vmax.xlane.f32.xlu1 %v4543_v38  ;;  %v2889_v56 = vadd.f32 %v10172_v55, %v8672_v39 }
 0x279   : > { %10166 = vst [vmem:[#allocation30_spill] sm:$0xff] %v9268_v54  ;;  %10168 = vst [vmem:[#allocation34_spill] sm:$0xff] %v9273_v11  ;;  %v9275_v52 = vpop.f32.mrb[119].mxu0  ;;  %v9277_v9 = vpop.f32.mrb[117].mxu1  ;;  %v4192_v54 = vmul.f32 0.2, %v3083_v13 }
 0x27a   : > { %10169 = vst [vmem:[#allocation39_spill] sm:$0xff] %v9275_v52  ;;  %10170 = vst [vmem:[#allocation40_spill] sm:$0xff] %v9277_v9  ;;  %v4845_v16 = vpop.xlane.xlu0 %4844  ;;  %v4870_v17 = vpop.xlane.xlu1 %4869  ;;  %v4637_v52 = vsel %vm4125_vm0, %v2895_v23, %v4381_v6  ;;  %v3196_v23 = vadd.f32 %v8879_v61, %v10026_v12  ;;  %v4349_v55 = vmul.f32 0.2, %v2889_v56  ;;  %vm4093_vm8 = vcmp.ge.f32.partialorder %v2889_v56, 0.0 }
 0x27b   : > { %4858 = vst.msk [vmem:[#allocation3 + $0x18] sm:$0xff] %vm4854_vm1, %v4845_v16  ;;  %5025 = vmax.xlane.f32.xlu0 %v4637_v52  ;;  %v4604_v16 = vsel %vm4092_vm2, %v2887_v51, %v4348_v60  ;;  %v10175_v52 = vld [vmem:[#allocation51_spill] sm:$0xff] }
 0x27c   : > { %v9282_v45 = vpop.f32.mrb[120].mxu0  ;;  %4883 = vst.msk [vmem:[#allocation3 + $0x18] sm:$0xff] %vm4879_vm3, %v4870_v17  ;;  %v9287_v9 = vpop.f32.mrb[118].mxu1  ;;  %4998 = vmax.xlane.f32.xlu1 %v4604_v16  ;;  %v4639_v17 = vsel %vm4127_vm4, %v3008_v27, %v4383_v3  ;;  %v3002_v51 = vadd.f32 %v10175_v52, %v8672_v39  ;;  %v4606_v16 = vsel %vm4094_vm5, %v3000_v19, %v4350_v8  ;;  %v4194_v27 = vmul.f32 0.2, %v3196_v23 }
 0x27d   : > { %10171 = vst [vmem:[#allocation89_spill] sm:$0xff] %v9282_v45  ;;  %v9289_v38 = vpop.f32.mrb[121].mxu0  ;;  %v9291_v11 = vpop.f32.mrb[119].mxu1  ;;  %v3085_v3 = vadd.f32 %v8871_v35, %v10026_v12  ;;  %v4448_v19 = vsel %vm3936_vm6, %v3083_v13, %v4192_v54  ;;  %vm3938_vm7 = vcmp.ge.f32.partialorder %v3196_v23, 0.0  ;;  %v3198_v13 = vadd.f32 %v8885_v58, %v10026_v12 }
 0x27e   : > { %10173 = vst [vmem:[#allocation41_spill] sm:$0xff] %v9289_v38  ;;  %10174 = vst [vmem:[#allocation90_spill] sm:$0xff] %v9291_v11  ;;  %v4847_v28 = vpop.xlane.xlu0 %4846  ;;  %v4797_v45 = vpop.xlane.xlu1 %4796  ;;  %v4351_v8 = vmul.f32 0.2, %v3002_v51  ;;  %vm4095_vm11 = vcmp.ge.f32.partialorder %v3002_v51, 0.0 }
 0x27f   : > { %4809 = vst.msk [vmem:[#allocation3 + $0x20] sm:$0xff] %vm4804_vm10, %v4797_v45  ;;  %5075 = vmax.xlane.f32.xlu0 %v4639_v17  ;;  %v10180_v17 = vld [vmem:[#allocation42_spill] sm:$0xff]  ;;  %v4193_v54 = vmul.f32 0.2, %v3085_v3  ;;  %vm3937_vm13 = vcmp.ge.f32.partialorder %v3085_v3, 0.0  ;;  %vm3939_vm12 = vcmp.ge.f32.partialorder %v3198_v13, 0.0 }
 0x280   : > { %v9295_v6 = vpop.f32.mrb[122].mxu0  ;;  %v9300_v60 = vpop.f32.mrb[120].mxu1  ;;  %5048 = vmax.xlane.f32.xlu1 %v4606_v16  ;;  %v2899_v16 = vadd.f32 %v10180_v17, %v8747_v62  ;;  %v4450_v17 = vsel %vm3938_vm7, %v3196_v23, %v4194_v27  ;;  %v4195_v23 = vmul.f32 0.2, %v3198_v13  ;;  %v3095_v27 = vadd.f32 %v8889_v37, %v8586_v29 }
 0x281   : > { %10176 = vst [vmem:[#allocation51_spill] sm:$0xff] %v9300_v60  ;;  %v9302_v11 = vpop.f32.mrb[123].mxu0  ;;  %v9304_v38 = vpop.f32.mrb[121].mxu1 }
 0x282   : > { %10177 = vst [vmem:[#allocation91_spill] sm:$0xff] %v9302_v11  ;;  %10178 = vst [vmem:[#allocation92_spill] sm:$0xff] %v9304_v38  ;;  %v4822_v61 = vpop.xlane.xlu0 %4821  ;;  %v4799_v45 = vpop.xlane.xlu1 %4798  ;;  %vm4156_vm14 = vcmp.ge.f32.partialorder %v2899_v16, 0.0  ;;  %vm4000_vm0 = vcmp.ge.f32.partialorder %v3095_v27, 0.0 }
 0x283   : > { %4834 = vst.msk [vmem:[#allocation3 + $0x20] sm:$0xff] %vm4829_vm9, %v4822_v61  ;;  %5088 = vmax.xlane.f32.xlu0 %v4448_v19  ;;  %v4605_v61 = vsel %vm4093_vm8, %v2889_v56, %v4349_v55  ;;  %v3012_v56 = vadd.f32 %v8857_v2, %v8747_v62  ;;  %v4449_v2 = vsel %vm3937_vm13, %v3085_v3, %v4193_v54 }
 0x284   : > { %4859 = vst.msk [vmem:[#allocation3 + $0x20] sm:$0xff] %vm4854_vm1, %v4847_v28  ;;  %v9310_v52 = vpop.f32.mrb[124].mxu0  ;;  %v9315_v38 = vpop.f32.mrb[122].mxu1  ;;  %5023 = vmax.xlane.f32.xlu1 %v4605_v61  ;;  %v4607_v61 = vsel %vm4095_vm11, %v3002_v51, %v4351_v8  ;;  %v3208_v3 = vadd.f32 %v8903_v30, %v8586_v29  ;;  %v4451_v54 = vsel %vm3939_vm12, %v3198_v13, %v4195_v23  ;;  %vm4929_vm11 = vcmask 80968  }
 0x285   : > { %10179 = vst [vmem:[#allocation93_spill] sm:$0xff] %v9310_v52  ;;  %4810 = vst.msk [vmem:[#allocation3 + $0x28] sm:$0xff] %vm4804_vm10, %v4799_v45  ;;  %v9317_v11 = vpop.f32.mrb[125].mxu0  ;;  %v9319_v60 = vpop.f32.mrb[123].mxu1  ;;  %v4412_v52 = vmul.f32 0.2, %v2899_v16  ;;  %v3097_v30 = vadd.f32 %v8893_v33, %v8586_v29 }
 0x286   : > { %10181 = vst [vmem:[#allocation42_spill] sm:$0xff] %v9319_v60  ;;  %v4872_v35 = vpop.xlane.xlu0 %4871  ;;  %v4849_v28 = vpop.xlane.xlu1 %4848  ;;  %vm4158_vm15 = vcmp.ge.f32.partialorder %v3012_v56, 0.0  ;;  %vm4002_vm4 = vcmp.ge.f32.partialorder %v3208_v3, 0.0  ;;  %v10188_v33 = vld [vmem:[#allocation57_spill] sm:$0xff] }
 0x287   : > { %4884 = vst.msk [vmem:[#allocation3 + $0x20] sm:$0xff] %vm4879_vm3, %v4872_v35  ;;  %5138 = vmax.xlane.f32.xlu0 %v4450_v17  ;;  %v10185_v17 = vld [vmem:[#allocation44_spill] sm:$0xff] }
 0x288   : > { %v9324_v45 = vpop.f32.mrb[126].mxu0  ;;  %v9328_v55 = vpop.f32.mrb[124].mxu1  ;;  %5073 = vmax.xlane.f32.xlu1 %v4607_v61  ;;  %v2901_v51 = vadd.f32 %v10185_v17, %v8747_v62  ;;  %v4668_v61 = vsel %vm4156_vm14, %v2899_v16, %v4412_v52  ;;  %v4258_v17 = vmul.f32 0.2, %v3208_v3  ;;  %vm4954_vm14 = vcmask 89168  }
 0x289   : > { %10182 = vst [vmem:[#allocation94_spill] sm:$0xff] %v9328_v55  ;;  %v9330_v19 = vpop.f32.mrb[127].mxu0  ;;  %v9332_v35 = vpop.f32.mrb[125].mxu1  ;;  %v4414_v55 = vmul.f32 0.2, %v3012_v56 }
 0x28a   : > { %10183 = vst [vmem:[#allocation95_spill] sm:$0xff] %v9330_v19  ;;  %10184 = vst [vmem:[#allocation96_spill] sm:$0xff] %v9332_v35  ;;  %v4801_v60 = vpop.xlane.xlu0 %4800  ;;  %v4824_v58 = vpop.xlane.xlu1 %4823  ;;  %v4256_v19 = vmul.f32 0.2, %v3095_v27  ;;  %vm4157_vm2 = vcmp.ge.f32.partialorder %v2901_v51, 0.0 }
 0x28b   : > { %4811 = vst.msk [vmem:[#allocation3 + $0x30] sm:$0xff] %vm4804_vm10, %v4801_v60  ;;  %5113 = vmax.xlane.f32.xlu0 %v4449_v2  ;;  %v4670_v52 = vsel %vm4158_vm15, %v3012_v56, %v4414_v55 }
 0x28c   : > { %4835 = vst.msk [vmem:[#allocation3 + $0x28] sm:$0xff] %vm4829_vm9, %v4824_v58  ;;  %v9340_v8 = vpop.f32.mrb[126].mxu1  ;;  %5002 = vmax.xlane.f32.xlu1 %v4668_v61  ;;  %v4413_v58 = vmul.f32 0.2, %v2901_v51  ;;  %v4512_v13 = vsel %vm4000_vm0, %v3095_v27, %v4256_v19  ;;  %v10189_v19 = vld [vmem:[#allocation54_spill] sm:$0xff] }
 0x28d   : > { %4860 = vst.msk [vmem:[#allocation3 + $0x28] sm:$0xff] %vm4854_vm1, %v4849_v28  ;;  %v9343_v60 = vpop.f32.mrb[127].mxu1  ;;  %v3014_v28 = vadd.f32 %v8859_v63, %v8747_v62  ;;  %v10187_v63 = vld [vmem:[#allocation52_spill] sm:$0xff]  ;;  %v3202_v27 = vadd.f32 %v10189_v19, %v8294_v18 }
 0x28e   : > { %10186 = vst [vmem:[#allocation44_spill] sm:$0xff] %v9343_v60  ;;  %v4851_v35 = vpop.xlane.xlu0 %4850  ;;  %v4874_v37 = vpop.xlane.xlu1 %4873  ;;  %v3089_v56 = vadd.f32 %v10187_v63, %v8294_v18  ;;  %v4669_v55 = vsel %vm4157_vm2, %v2901_v51, %v4413_v58 }
 0x28f   : > { %4885 = vst.msk [vmem:[#allocation3 + $0x28] sm:$0xff] %vm4879_vm3, %v4874_v37  ;;  %5163 = vmax.xlane.f32.xlu0 %v4451_v54  ;;  %v4415_v23 = vmul.f32 0.2, %v3014_v28  ;;  %vm4159_vm5 = vcmp.ge.f32.partialorder %v3014_v28, 0.0  ;;  %v4257_v54 = vmul.f32 0.2, %v3097_v30 }
 0x290   : > { %5052 = vmax.xlane.f32.xlu1 %v4670_v52  ;;  %v4514_v52 = vsel %vm4002_vm4, %v3208_v3, %v4258_v17  ;;  %vm3968_vm6 = vcmp.ge.f32.partialorder %v3089_v56, 0.0  ;;  %v4226_v17 = vmul.f32 0.2, %v3202_v27  ;;  %vm3970_vm7 = vcmp.ge.f32.partialorder %v3202_v27, 0.0 }
 0x292   : > { %v4826_v16 = vpop.xlane.xlu0 %4825  ;;  %v4803_v2 = vpop.xlane.xlu1 %4802 }
 0x293   : > { %4836 = vst.msk [vmem:[#allocation3 + $0x30] sm:$0xff] %vm4829_vm9, %v4826_v16  ;;  %5092 = vmax.xlane.f32.xlu0 %v4512_v13  ;;  %v4224_v16 = vmul.f32 0.2, %v3089_v56  ;;  %v10190_v13 = vld [vmem:[#allocation53_spill] sm:$0xff] }
 0x294   : > { %4861 = vst.msk [vmem:[#allocation3 + $0x30] sm:$0xff] %vm4854_vm1, %v4851_v35  ;;  %5027 = vmax.xlane.f32.xlu1 %v4669_v55  ;;  %v3210_v35 = vadd.f32 %v10188_v33, %v8586_v29  ;;  %v3091_v63 = vadd.f32 %v10190_v13, %v8294_v18 }
 0x295   : > { %4812 = vst.msk [vmem:[#allocation3 + $0x38] sm:$0xff] %vm4804_vm10, %v4803_v2  ;;  %v4671_v2 = vsel %vm4159_vm5, %v3014_v28, %v4415_v23  ;;  %vm4001_vm10 = vcmp.ge.f32.partialorder %v3097_v30, 0.0  ;;  %v4480_v28 = vsel %vm3968_vm6, %v3089_v56, %v4224_v16 }
 0x296   : > { %v4876_v61 = vpop.xlane.xlu0 %4875  ;;  %v4853_v37 = vpop.xlane.xlu1 %4852  ;;  %v4259_v55 = vmul.f32 0.2, %v3210_v35  ;;  %v4513_v3 = vsel %vm4001_vm10, %v3097_v30, %v4257_v54  ;;  %vm4003_vm8 = vcmp.ge.f32.partialorder %v3210_v35, 0.0  ;;  %v10192_v30 = vld [vmem:[#allocation55_spill] sm:$0xff]  ;;  %vm3969_vm13 = vcmp.ge.f32.partialorder %v3091_v63, 0.0 }
 0x297   : > { %4886 = vst.msk [vmem:[#allocation3 + $0x30] sm:$0xff] %vm4879_vm3, %v4876_v61  ;;  %5142 = vmax.xlane.f32.xlu0 %v4514_v52  ;;  %v10191_v61 = vld [vmem:[#allocation46_spill] sm:$0xff]  ;;  %v4225_v52 = vmul.f32 0.2, %v3091_v63  ;;  %v3204_v54 = vadd.f32 %v10192_v30, %v8294_v18 }
 0x298   : > { %5077 = vmax.xlane.f32.xlu1 %v4671_v2  ;;  %v3107_v60 = vadd.f32 %v10191_v61, %v8656_v4  ;;  %v3220_v2 = vadd.f32 %v8927_v47, %v8656_v4  ;;  %v4515_v13 = vsel %vm4003_vm8, %v3210_v35, %v4259_v55  ;;  %v10193_v61 = vld [vmem:[#allocation59_spill] sm:$0xff] }
 0x299   : > { %v3109_v47 = vadd.f32 %v10193_v61, %v8656_v4  ;;  %v4227_v55 = vmul.f32 0.2, %v3204_v54  ;;  %vm3971_vm15 = vcmp.ge.f32.partialorder %v3204_v54, 0.0 }
 0x29a   : > { %v4939_v51 = vpop.xlane.xlu0 %4938  ;;  %v4828_v58 = vpop.xlane.xlu1 %4827  ;;  %v4320_v19 = vmul.f32 0.2, %v3107_v60  ;;  %vm4066_vm12 = vcmp.ge.f32.partialorder %v3220_v2, 0.0 }
 0x29b   : > { %4837 = vst.msk [vmem:[#allocation3 + $0x38] sm:$0xff] %vm4829_vm9, %v4828_v58  ;;  %5117 = vmax.xlane.f32.xlu0 %v4513_v3  ;;  %vm4904_vm9 = vcmask 72768   ;;  %v4322_v58 = vmul.f32 0.2, %v3220_v2  ;;  %v10194_v3 = vld [vmem:[#allocation45_spill] sm:$0xff]  ;;  %vm4065_vm0 = vcmp.ge.f32.partialorder %v3109_v47, 0.0 }
 0x29c   : > { %4862 = vst.msk [vmem:[#allocation3 + $0x38] sm:$0xff] %vm4854_vm1, %v4853_v37  ;;  %5090 = vmax.xlane.f32.xlu1 %v4480_v28  ;;  %v4482_v37 = vsel %vm3970_vm7, %v3202_v27, %v4226_v17  ;;  %vm4064_vm1 = vcmp.ge.f32.partialorder %v3107_v60, 0.0  ;;  %v3101_v27 = vadd.f32 %v10194_v3, %v8606_v42  ;;  %v4481_v17 = vsel %vm3969_vm13, %v3091_v63, %v4225_v52 }
 0x29d   : > { %v4576_v35 = vsel %vm4064_vm1, %v3107_v60, %v4320_v19  ;;  %v3222_v60 = vadd.f32 %v8933_v10, %v8656_v4  ;;  %v4578_v19 = vsel %vm4066_vm12, %v3220_v2, %v4322_v58  ;;  %v4483_v52 = vsel %vm3971_vm15, %v3204_v54, %v4227_v55  ;;  %v10196_v2 = vld [vmem:[#allocation56_spill] sm:$0xff] }
 0x29e   : > { %v4914_v23 = vpop.xlane.xlu0 %4913  ;;  %v4878_v33 = vpop.xlane.xlu1 %4877  ;;  %v4288_v30 = vmul.f32 0.2, %v3101_v27  ;;  %vm4032_vm2 = vcmp.ge.f32.partialorder %v3101_v27, 0.0  ;;  %v3103_v58 = vadd.f32 %v10196_v2, %v8606_v42  ;;  %v3234_v2 = vadd.f32 %v8957_v5, %v8732_v31 }
 0x29f   : > { %4887 = vst.msk [vmem:[#allocation3 + $0x38] sm:$0xff] %vm4879_vm3, %v4878_v33  ;;  %5167 = vmax.xlane.f32.xlu0 %v4515_v13  ;;  %vm4979_vm3 = vcmask 97368   ;;  %v4321_v13 = vmul.f32 0.2, %v3109_v47  ;;  %vm4067_vm4 = vcmp.ge.f32.partialorder %v3222_v60, 0.0 }
 0x2a0   : > { %5140 = vmax.xlane.f32.xlu1 %v4482_v37  ;;  %vm4033_vm6 = vcmp.ge.f32.partialorder %v3103_v58, 0.0  ;;  %vm4131_vm12 = vcmp.ge.f32.partialorder %v3234_v2, 0.0 }
 0x2a1   : > { %v4577_v10 = vsel %vm4065_vm0, %v3109_v47, %v4321_v13 }
 0x2a2   : > { %v4964_v56 = vpop.xlane.xlu0 %4963  ;;  %v4889_v16 = vpop.xlane.xlu1 %4888 }
 0x2a3   : > { %4905 = vst.msk [vmem:[#allocation3] sm:$0xff] %vm4904_vm9, %v4889_v16  ;;  %5096 = vmax.xlane.f32.xlu0 %v4576_v35  ;;  %v4323_v16 = vmul.f32 0.2, %v3222_v60  ;;  %v4544_v35 = vsel %vm4032_vm2, %v3101_v27, %v4288_v30 }
 0x2a4   : > { %4930 = vst.msk [vmem:[#allocation3] sm:$0xff] %vm4929_vm11, %v4914_v23  ;;  %5115 = vmax.xlane.f32.xlu1 %v4481_v17  ;;  %v10195_v23 = vld [vmem:[#allocation58_spill] sm:$0xff]  ;;  %v4289_v17 = vmul.f32 0.2, %v3103_v58 }
 0x2a5   : > { %4955 = vst.msk [vmem:[#allocation3] sm:$0xff] %vm4954_vm14, %v4939_v51  ;;  %v3214_v63 = vadd.f32 %v10195_v23, %v8606_v42  ;;  %v4579_v47 = vsel %vm4067_vm4, %v3222_v60, %v4323_v16  ;;  %v10198_v23 = vld [vmem:[#allocation61_spill] sm:$0xff]  ;;  %v10199_v60 = vld [vmem:[#allocation48_spill] sm:$0xff] }
 0x2a6   : > { %v4941_v28 = vpop.xlane.xlu0 %4940  ;;  %v4891_v33 = vpop.xlane.xlu1 %4890  ;;  %4980 = vst.msk [vmem:[#allocation3] sm:$0xff] %vm4979_vm3, %v4964_v56  ;;  %v3119_v56 = vadd.f32 %v8937_v21, %v8732_v31  ;;  %v3232_v21 = vadd.f32 %v8951_v53, %v8732_v31  ;;  %v3113_v16 = vadd.f32 %v10199_v60, %v8672_v39 }
 0x2a7   : > { %4906 = vst.msk [vmem:[#allocation3 + $0x8] sm:$0xff] %vm4904_vm9, %v4891_v33  ;;  %5146 = vmax.xlane.f32.xlu0 %v4578_v19  ;;  %v4290_v61 = vmul.f32 0.2, %v3214_v63  ;;  %vm4034_vm5 = vcmp.ge.f32.partialorder %v3214_v63, 0.0  ;;  %v10197_v33 = vld [vmem:[#allocation47_spill] sm:$0xff] }
 0x2a8   : > { %5165 = vmax.xlane.f32.xlu1 %v4483_v52  ;;  %v4384_v3 = vmul.f32 0.2, %v3119_v56  ;;  %v3216_v13 = vadd.f32 %v10197_v33, %v8606_v42  ;;  %vm4128_vm10 = vcmp.ge.f32.partialorder %v3119_v56, 0.0  ;;  %v4386_v30 = vmul.f32 0.2, %v3232_v21 }
 0x2a9   : > { %v4546_v27 = vsel %vm4034_vm5, %v3214_v63, %v4290_v61  ;;  %v3121_v52 = vadd.f32 %v10198_v23, %v8732_v31  ;;  %v4545_v63 = vsel %vm4033_vm6, %v3103_v58, %v4289_v17  ;;  %vm4130_vm8 = vcmp.ge.f32.partialorder %v3232_v21, 0.0  ;;  %v10200_v58 = vld [vmem:[#allocation50_spill] sm:$0xff] }
 0x2aa   : > { %v4943_v37 = vpop.xlane.xlu0 %4942  ;;  %v4916_v51 = vpop.xlane.xlu1 %4915  ;;  %v4640_v53 = vsel %vm4128_vm10, %v3119_v56, %v4384_v3  ;;  %vm4035_vm7 = vcmp.ge.f32.partialorder %v3216_v13, 0.0  ;;  %vm4096_vm13 = vcmp.ge.f32.partialorder %v3113_v16, 0.0  ;;  %v4387_v17 = vmul.f32 0.2, %v3234_v2 }
 0x2ab   : > { %4931 = vst.msk [vmem:[#allocation3 + $0x8] sm:$0xff] %vm4929_vm11, %v4916_v51  ;;  %5121 = vmax.xlane.f32.xlu0 %v4577_v10  ;;  %v4291_v51 = vmul.f32 0.2, %v3216_v13  ;;  %v4385_v56 = vmul.f32 0.2, %v3121_v52  ;;  %vm4129_vm1 = vcmp.ge.f32.partialorder %v3121_v52, 0.0  ;;  %v3240_v33 = vadd.f32 %v8966_v50, %v8747_v62 }
 0x2ac   : > { %4956 = vst.msk [vmem:[#allocation3 + $0x8] sm:$0xff] %vm4954_vm14, %v4941_v28  ;;  %5094 = vmax.xlane.f32.xlu1 %v4544_v35  ;;  %v4642_v35 = vsel %vm4130_vm8, %v3232_v21, %v4386_v30  ;;  %v4643_v50 = vsel %vm4131_vm12, %v3234_v2, %v4387_v17 }
 0x2ad   : > { %v4419_v23 = vmul.f32 0.2, %v3240_v33  ;;  %vm4163_vm0 = vcmp.ge.f32.partialorder %v3240_v33, 0.0 }
 0x2ae   : > { %v4918_v54 = vpop.xlane.xlu0 %4917  ;;  %v4966_v55 = vpop.xlane.xlu1 %4965 }
 0x2af   : > { %4981 = vst.msk [vmem:[#allocation3 + $0x8] sm:$0xff] %vm4979_vm3, %v4966_v55  ;;  %5171 = vmax.xlane.f32.xlu0 %v4579_v47  ;;  %v3226_v55 = vadd.f32 %v10200_v58, %v8672_v39 }
 0x2b0   : > { %5144 = vmax.xlane.f32.xlu1 %v4546_v27  ;;  %v4641_v27 = vsel %vm4129_vm1, %v3121_v52, %v4385_v56  ;;  %v4675_v56 = vsel %vm4163_vm0, %v3240_v33, %v4419_v23 }
 0x2b1   : > { %v4354_v5 = vmul.f32 0.2, %v3226_v55  ;;  %vm4098_vm15 = vcmp.ge.f32.partialorder %v3226_v55, 0.0 }
 0x2b2   : > { %v4968_v28 = vpop.xlane.xlu0 %4967  ;;  %v4893_v19 = vpop.xlane.xlu1 %4892 }
 0x2b3   : > { %4907 = vst.msk [vmem:[#allocation3 + $0x10] sm:$0xff] %vm4904_vm9, %v4893_v19  ;;  %5100 = vmax.xlane.f32.xlu0 %v4640_v53  ;;  %v3309_v53 = vadd.f32 %v8977_v36, %v10026_v12 }
 0x2b4   : > { %4932 = vst.msk [vmem:[#allocation3 + $0x10] sm:$0xff] %vm4929_vm11, %v4918_v54  ;;  %5119 = vmax.xlane.f32.xlu1 %v4545_v63  ;;  %v4352_v54 = vmul.f32 0.2, %v3113_v16 }
 0x2b5   : > { %4957 = vst.msk [vmem:[#allocation3 + $0x10] sm:$0xff] %vm4954_vm14, %v4943_v37  ;;  %v4547_v37 = vsel %vm4035_vm7, %v3216_v13, %v4291_v51  ;;  %v10202_v51 = vld [vmem:[#allocation62_spill] sm:$0xff]  ;;  %vm3940_vm4 = vcmp.ge.f32.partialorder %v3309_v53, 0.0 }
 0x2b6   : > { %v4897_v10 = vpop.xlane.xlu0 %4896  ;;  %4982 = vst.msk [vmem:[#allocation3 + $0x10] sm:$0xff] %vm4979_vm3, %v4968_v28  ;;  %v4895_v61 = vpop.xlane.xlu1 %4894  ;;  %v10201_v28 = vld [vmem:[#allocation60_spill] sm:$0xff]  ;;  %v4608_v19 = vsel %vm4096_vm13, %v3113_v16, %v4352_v54  ;;  %v3228_v60 = vadd.f32 %v10202_v51, %v8672_v39  ;;  %v4610_v16 = vsel %vm4098_vm15, %v3226_v55, %v4354_v5  ;;  %v3315_v51 = vadd.f32 %v8985_v22, %v8294_v18 }
 0x2b7   : > { %4909 = vst.msk [vmem:[#allocation3 + $0x20] sm:$0xff] %vm4904_vm9, %v4897_v10  ;;  %4908 = vst.msk [vmem:[#allocation3 + $0x18] sm:$0xff] %vm4904_vm9, %v4895_v61  ;;  %5150 = vmax.xlane.f32.xlu0 %v4642_v35  ;;  %v3115_v21 = vadd.f32 %v10201_v28, %v8672_v39  ;;  %v4196_v10 = vmul.f32 0.2, %v3309_v53  ;;  %v3422_v61 = vadd.f32 %v8989_v14, %v10026_v12 }
 0x2b8   : > { %5169 = vmax.xlane.f32.xlu1 %v4547_v37  ;;  %v4355_v2 = vmul.f32 0.2, %v3228_v60  ;;  %v3125_v35 = vadd.f32 %v8949_v34, %v8747_v62  ;;  %vm4099_vm5 = vcmp.ge.f32.partialorder %v3228_v60, 0.0  ;;  %v3311_v14 = vadd.f32 %v8981_v0, %v10026_v12 }
 0x2b9   : > { %v4353_v52 = vmul.f32 0.2, %v3115_v21  ;;  %vm4097_vm2 = vcmp.ge.f32.partialorder %v3115_v21, 0.0  ;;  %v4198_v37 = vmul.f32 0.2, %v3422_v61  ;;  %v3238_v34 = vadd.f32 %v8962_v44, %v8747_v62 }
 0x2ba   : > { %v4947_v3 = vpop.xlane.xlu0 %4946  ;;  %v4945_v47 = vpop.xlane.xlu1 %4944  ;;  %v4611_v17 = vsel %vm4099_vm5, %v3228_v60, %v4355_v2  ;;  %vm3942_vm10 = vcmp.ge.f32.partialorder %v3422_v61, 0.0  ;;  %vm4160_vm6 = vcmp.ge.f32.partialorder %v3125_v35, 0.0  ;;  %v4197_v5 = vmul.f32 0.2, %v3311_v14 }
 0x2bb   : > { %5125 = vmax.xlane.f32.xlu0 %v4641_v27  ;;  %v4609_v54 = vsel %vm4097_vm2, %v3115_v21, %v4353_v52  ;;  %v3424_v28 = vadd.f32 %v8993_v20, %v10026_v12  ;;  %v4454_v21 = vsel %vm3942_vm10, %v3422_v61, %v4198_v37  ;;  %v4418_v0 = vmul.f32 0.2, %v3238_v34  ;;  %v10204_v37 = vld [vmem:[#allocation63_spill] sm:$0xff] }
 0x2bc   : > { %5098 = vmax.xlane.f32.xlu1 %v4608_v19  ;;  %v10203_v19 = vld [vmem:[#allocation49_spill] sm:$0xff]  ;;  %vm3941_vm8 = vcmp.ge.f32.partialorder %v3311_v14, 0.0  ;;  %vm4162_vm7 = vcmp.ge.f32.partialorder %v3238_v34, 0.0  ;;  %v4228_v61 = vmul.f32 0.2, %v3315_v51  ;;  %v3428_v22 = vadd.f32 %v9001_v24, %v8294_v18 }
 0x2bd   : > { %v4453_v20 = vsel %vm3941_vm8, %v3311_v14, %v4197_v5  ;;  %v4674_v60 = vsel %vm4162_vm7, %v3238_v34, %v4418_v0  ;;  %vm3943_vm1 = vcmp.ge.f32.partialorder %v3424_v28, 0.0  ;;  %vm3972_vm15 = vcmp.ge.f32.partialorder %v3315_v51, 0.0 }
 0x2be   : > { %v4922_v30 = vpop.xlane.xlu0 %4921  ;;  %v4920_v13 = vpop.xlane.xlu1 %4919  ;;  %v3317_v14 = vadd.f32 %v10204_v37, %v8294_v18  ;;  %v4484_v24 = vsel %vm3972_vm15, %v3315_v51, %v4228_v61  ;;  %vm3974_vm2 = vcmp.ge.f32.partialorder %v3428_v22, 0.0  ;;  %vm5004_vm5 = vcmask 105568  }
 0x2bf   : > { %4934 = vst.msk [vmem:[#allocation3 + $0x20] sm:$0xff] %vm4929_vm11, %v4922_v30  ;;  %4933 = vst.msk [vmem:[#allocation3 + $0x18] sm:$0xff] %vm4929_vm11, %v4920_v13  ;;  %5175 = vmax.xlane.f32.xlu0 %v4643_v50  ;;  %v3127_v30 = vadd.f32 %v10203_v19, %v8747_v62  ;;  %v3321_v50 = vadd.f32 %v8997_v43, %v8586_v29  ;;  %vm5054_vm7 = vcmask 121968  }
 0x2c0   : > { %4959 = vst.msk [vmem:[#allocation3 + $0x20] sm:$0xff] %vm4954_vm14, %v4947_v3  ;;  %4958 = vst.msk [vmem:[#allocation3 + $0x18] sm:$0xff] %vm4954_vm14, %v4945_v47  ;;  %5148 = vmax.xlane.f32.xlu1 %v4610_v16  ;;  %v4452_v3 = vsel %vm3940_vm4, %v3309_v53, %v4196_v10  ;;  %v4416_v47 = vmul.f32 0.2, %v3125_v35  ;;  %v4199_v53 = vmul.f32 0.2, %v3424_v28 }
 0x2c1   : > { %v4417_v52 = vmul.f32 0.2, %v3127_v30  ;;  %vm4161_vm13 = vcmp.ge.f32.partialorder %v3127_v30, 0.0  ;;  %vm4004_vm12 = vcmp.ge.f32.partialorder %v3321_v50, 0.0  ;;  %vm3973_vm4 = vcmp.ge.f32.partialorder %v3317_v14, 0.0 }
 0x2c2   : > { %v4972_v63 = vpop.xlane.xlu0 %4971  ;;  %v4970_v36 = vpop.xlane.xlu1 %4969  ;;  %v4672_v13 = vsel %vm4160_vm6, %v3125_v35, %v4416_v47  ;;  %v4455_v10 = vsel %vm3943_vm1, %v3424_v28, %v4199_v53 }
 0x2c3   : > { %4984 = vst.msk [vmem:[#allocation3 + $0x20] sm:$0xff] %vm4979_vm3, %v4972_v63  ;;  %4983 = vst.msk [vmem:[#allocation3 + $0x18] sm:$0xff] %vm4979_vm3, %v4970_v36  ;;  %5177 = vmax.xlane.f32.xlu0 %v4675_v56  ;;  %v4260_v63 = vmul.f32 0.2, %v3321_v50  ;;  %v3434_v36 = vadd.f32 %v9014_v57, %v8586_v29  ;;  %v4673_v56 = vsel %vm4161_vm13, %v3127_v30, %v4417_v52  ;;  %v10206_v30 = vld [vmem:[#allocation67_spill] sm:$0xff] }
 0x2c4   : > { %5123 = vmax.xlane.f32.xlu1 %v4609_v54 }
 0x2c5   : > { %v4262_v54 = vmul.f32 0.2, %v3434_v36  ;;  %v4516_v57 = vsel %vm4004_vm12, %v3321_v50, %v4260_v63  ;;  %vm4006_vm0 = vcmp.ge.f32.partialorder %v3434_v36, 0.0  ;;  %v10208_v63 = vld [vmem:[#allocation68_spill] sm:$0xff] }
 0x2c6   : > { %v4901_v58 = vpop.xlane.xlu0 %4900  ;;  %v4899_v55 = vpop.xlane.xlu1 %4898 }
 0x2c7   : > { %4911 = vst.msk [vmem:[#allocation3 + $0x30] sm:$0xff] %vm4904_vm9, %v4901_v58  ;;  %4910 = vst.msk [vmem:[#allocation3 + $0x28] sm:$0xff] %vm4904_vm9, %v4899_v55  ;;  %5188 = vmax.xlane.f32.xlu0 %v4452_v3  ;;  %v3323_v58 = vadd.f32 %v9003_v25, %v8586_v29  ;;  %v4230_v55 = vmul.f32 0.2, %v3428_v22  ;;  %v4229_v25 = vmul.f32 0.2, %v3317_v14 }
 0x2c8   : > { %5173 = vmax.xlane.f32.xlu1 %v4611_v17  ;;  %v3436_v17 = vadd.f32 %v9018_v1, %v8586_v29 }
 0x2c9   : > { %v4261_v34 = vmul.f32 0.2, %v3323_v58  ;;  %v4486_v28 = vsel %vm3974_vm2, %v3428_v22, %v4230_v55  ;;  %v4485_v50 = vsel %vm3973_vm4, %v3317_v14, %v4229_v25 }
 0x2ca   : > { %v4951_v33 = vpop.xlane.xlu0 %4950  ;;  %v4949_v27 = vpop.xlane.xlu1 %4948  ;;  %v4263_v19 = vmul.f32 0.2, %v3436_v17  ;;  %vm4007_vm10 = vcmp.ge.f32.partialorder %v3436_v17, 0.0 }
 0x2cb   : > { %5238 = vmax.xlane.f32.xlu0 %v4454_v21 }
 0x2cc   : > { %5102 = vmax.xlane.f32.xlu1 %v4672_v13  ;;  %v3333_v13 = vadd.f32 %v10206_v30, %v8656_v4 }
 0x2ce   : > { %v4926_v44 = vpop.xlane.xlu0 %4925  ;;  %v4924_v23 = vpop.xlane.xlu1 %4923  ;;  %v4324_v51 = vmul.f32 0.2, %v3333_v13 }
 0x2cf   : > { %4936 = vst.msk [vmem:[#allocation3 + $0x30] sm:$0xff] %vm4929_vm11, %v4926_v44  ;;  %4935 = vst.msk [vmem:[#allocation3 + $0x28] sm:$0xff] %vm4929_vm11, %v4924_v23  ;;  %5213 = vmax.xlane.f32.xlu0 %v4453_v20  ;;  %v10207_v23 = vld [vmem:[#allocation65_spill] sm:$0xff] }
 0x2d0   : > { %4961 = vst.msk [vmem:[#allocation3 + $0x30] sm:$0xff] %vm4954_vm14, %v4951_v33  ;;  %4960 = vst.msk [vmem:[#allocation3 + $0x28] sm:$0xff] %vm4954_vm14, %v4949_v27  ;;  %5152 = vmax.xlane.f32.xlu1 %v4674_v60  ;;  %v4518_v33 = vsel %vm4006_vm0, %v3434_v36, %v4262_v54  ;;  %v10205_v27 = vld [vmem:[#allocation64_spill] sm:$0xff]  ;;  %v3327_v53 = vadd.f32 %v10207_v23, %v8606_v42  ;;  %v3446_v60 = vadd.f32 %v9039_v7, %v8656_v4 }
 0x2d1   : > { %v3430_v5 = vadd.f32 %v10205_v27, %v8294_v18  ;;  %v3440_v36 = vadd.f32 %v10208_v63, %v8606_v42  ;;  %v10212_v23 = vld [vmem:[#allocation72_spill] sm:$0xff] }
 0x2d2   : > { %v4976_v16 = vpop.xlane.xlu0 %4975  ;;  %v4974_v43 = vpop.xlane.xlu1 %4973  ;;  %vm4036_vm8 = vcmp.ge.f32.partialorder %v3327_v53, 0.0  ;;  %vm4070_vm1 = vcmp.ge.f32.partialorder %v3446_v60, 0.0 }
 0x2d3   : > { %4986 = vst.msk [vmem:[#allocation3 + $0x30] sm:$0xff] %vm4979_vm3, %v4976_v16  ;;  %4985 = vst.msk [vmem:[#allocation3 + $0x28] sm:$0xff] %vm4979_vm3, %v4974_v43  ;;  %5263 = vmax.xlane.f32.xlu0 %v4455_v10  ;;  %v4231_v1 = vmul.f32 0.2, %v3430_v5  ;;  %vm3975_vm6 = vcmp.ge.f32.partialorder %v3430_v5, 0.0  ;;  %v4519_v16 = vsel %vm4007_vm10, %v3436_v17, %v4263_v19  ;;  %vm4038_vm13 = vcmp.ge.f32.partialorder %v3440_v36, 0.0 }
 0x2d4   : > { %5127 = vmax.xlane.f32.xlu1 %v4673_v56  ;;  %v4292_v43 = vmul.f32 0.2, %v3327_v53  ;;  %v4326_v56 = vmul.f32 0.2, %v3446_v60  ;;  %v3339_v19 = vadd.f32 %v9035_v26, %v8672_v39 }
 0x2d5   : > { %v4487_v10 = vsel %vm3975_vm6, %v3430_v5, %v4231_v1 }
 0x2d6   : > { %v9453_v2 = vpop.xlane.xlu0 %5038  ;;  %v4903_v35 = vpop.xlane.xlu1 %4902  ;;  %v4548_v37 = vsel %vm4036_vm8, %v3327_v53, %v4292_v43  ;;  %v3345_v53 = vadd.f32 %v10212_v23, %v8732_v31  ;;  %vm4100_vm4 = vcmp.ge.f32.partialorder %v3339_v19, 0.0  ;;  %v10214_v43 = vld [vmem:[#allocation76_spill] sm:$0xff]  ;;  %v10221_v23 = vld [vmem:[#allocation15_spill] sm:$0xff] }
 0x2d7   : > { %4912 = vst.msk [vmem:[#allocation3 + $0x38] sm:$0xff] %vm4904_vm9, %v4903_v35  ;;  %5192 = vmax.xlane.f32.xlu0 %v4516_v57  ;;  %vm4005_vm9 = vcmp.ge.f32.partialorder %v3323_v58, 0.0  ;;  %v10209_v35 = vld [vmem:[#allocation69_spill] sm:$0xff]  ;;  %v10210_v57 = vld [vmem:[#allocation66_spill] sm:$0xff]  ;;  %v3458_v63 = vadd.f32 %v10214_v43, %v8732_v31 }
 0x2d8   : > { %5190 = vmax.xlane.f32.xlu1 %v4484_v24  ;;  %v4517_v44 = vsel %vm4005_vm9, %v3323_v58, %v4261_v34  ;;  %v3335_v7 = vadd.f32 %v10209_v35, %v8656_v4  ;;  %v4294_v58 = vmul.f32 0.2, %v3440_v36  ;;  %v3329_v55 = vadd.f32 %v10210_v57, %v8606_v42  ;;  %v10223_v43 = vld [vmem:[#allocation22_spill] sm:$0xff] }
 0x2d9   : > { %v3448_v34 = vadd.f32 %v9043_v59, %v8656_v4  ;;  %v3454_v59 = vadd.f32 %v9058_v32, %v8672_v39  ;;  %vm4132_vm10 = vcmp.ge.f32.partialorder %v3345_v53, 0.0 }
 0x2da   : > { %v5014_v3 = vpop.xlane.xlu0 %5013  ;;  %v4953_v47 = vpop.xlane.xlu1 %4952  ;;  %v4293_v17 = vmul.f32 0.2, %v3329_v55  ;;  %vm4069_vm12 = vcmp.ge.f32.partialorder %v3335_v7, 0.0  ;;  %vm4037_vm15 = vcmp.ge.f32.partialorder %v3329_v55, 0.0 }
 0x2db   : > { %5242 = vmax.xlane.f32.xlu0 %v4518_v33  ;;  %v10211_v33 = vld [vmem:[#allocation70_spill] sm:$0xff]  ;;  %vm4071_vm0 = vcmp.ge.f32.partialorder %v3448_v34, 0.0  ;;  %v4359_v1 = vmul.f32 0.2, %v3454_v59  ;;  %vm4103_vm9 = vcmp.ge.f32.partialorder %v3454_v59, 0.0 }
 0x2dc   : > { %5240 = vmax.xlane.f32.xlu1 %v4486_v28  ;;  %v3442_v25 = vadd.f32 %v10211_v33, %v8606_v42  ;;  %v4327_v28 = vmul.f32 0.2, %v3448_v34  ;;  %v4549_v30 = vsel %vm4037_vm15, %v3329_v55, %v4293_v17  ;;  %v10218_v33 = vld [vmem:[#allocation21_spill] sm:$0xff] }
 0x2de   : > { %v5064_v21 = vpop.xlane.xlu0 %5063  ;;  %v4928_v0 = vpop.xlane.xlu1 %4927  ;;  %vm4039_vm2 = vcmp.ge.f32.partialorder %v3442_v25, 0.0  ;;  %v4583_v32 = vsel %vm4071_vm0, %v3448_v34, %v4327_v28 }
 0x2df   : > { %4937 = vst.msk [vmem:[#allocation3 + $0x38] sm:$0xff] %vm4929_vm11, %v4928_v0  ;;  %5217 = vmax.xlane.f32.xlu0 %v4517_v44  ;;  %vm4068_vm11 = vcmp.ge.f32.partialorder %v3333_v13, 0.0  ;;  %v4295_v0 = vmul.f32 0.2, %v3442_v25 }
 0x2e0   : > { %4962 = vst.msk [vmem:[#allocation3 + $0x38] sm:$0xff] %vm4954_vm14, %v4953_v47  ;;  %5215 = vmax.xlane.f32.xlu1 %v4485_v50  ;;  %vm5029_vm14 = vcmask 113768   ;;  %v4580_v54 = vsel %vm4068_vm11, %v3333_v13, %v4324_v51  ;;  %v4325_v47 = vmul.f32 0.2, %v3335_v7  ;;  %v4356_v50 = vmul.f32 0.2, %v3339_v19 }
 0x2e1   : > { %vm4134_vm11 = vcmp.ge.f32.partialorder %v3458_v63, 0.0 }
 0x2e2   : > { %v4993_v20 = vpop.xlane.xlu0 %4992  ;;  %v4978_v52 = vpop.xlane.xlu1 %4977 }
 0x2e3   : > { %5007 = vst.msk [vmem:[#allocation3 + $0x10] sm:$0xff] %vm5004_vm5, %v4993_v20  ;;  %5267 = vmax.xlane.f32.xlu0 %v4519_v16  ;;  %v10213_v20 = vld [vmem:[#allocation73_spill] sm:$0xff]  ;;  %v4388_v16 = vmul.f32 0.2, %v3345_v53 }
 0x2e4   : > { %4987 = vst.msk [vmem:[#allocation3 + $0x38] sm:$0xff] %vm4979_vm3, %v4978_v52  ;;  %5265 = vmax.xlane.f32.xlu1 %v4487_v10  ;;  %vm5079_vm3 = vcmask 130168   ;;  %v3452_v26 = vadd.f32 %v10213_v20, %v8672_v39  ;;  %v4551_v52 = vsel %vm4039_vm2, %v3442_v25, %v4295_v0  ;;  %v3648_v25 = vadd.f32 %v10218_v33, %v10026_v12  ;;  %v10227_v33 = vld [vmem:[#allocation13_spill] sm:$0xff] }
 0x2e5   : > { %v4644_v55 = vsel %vm4132_vm10, %v3345_v53, %v4388_v16  ;;  %v3541_v53 = vadd.f32 %v10221_v23, %v8294_v18  ;;  %vm5104_vm10 = vcmask 138368  }
 0x2e6   : > { %v5043_v61 = vpop.xlane.xlu0 %5042  ;;  %v4989_v22 = vpop.xlane.xlu1 %4988  ;;  %v4358_v10 = vmul.f32 0.2, %v3452_v26  ;;  %vm4102_vm6 = vcmp.ge.f32.partialorder %v3452_v26, 0.0 }
 0x2e7   : > { %5005 = vst.msk [vmem:[#allocation3] sm:$0xff] %vm5004_vm5, %v4989_v22  ;;  %5196 = vmax.xlane.f32.xlu0 %v4580_v54  ;;  %v4390_v54 = vmul.f32 0.2, %v3458_v63  ;;  %v4232_v16 = vmul.f32 0.2, %v3541_v53  ;;  %vm3976_vm2 = vcmp.ge.f32.partialorder %v3541_v53, 0.0 }
 0x2e8   : > { %5030 = vst.msk [vmem:[#allocation3] sm:$0xff] %vm5029_vm14, %v5014_v3  ;;  %5194 = vmax.xlane.f32.xlu1 %v4548_v37  ;;  %v4582_v3 = vsel %vm4070_vm1, %v3446_v60, %v4326_v56  ;;  %v4612_v56 = vsel %vm4100_vm4, %v3339_v19, %v4356_v50  ;;  %v4202_v19 = vmul.f32 0.2, %v3648_v25 }
 0x2e9   : > { %5055 = vst.msk [vmem:[#allocation3] sm:$0xff] %vm5054_vm7, %v9453_v2  ;;  %v4550_v2 = vsel %vm4038_vm13, %v3440_v36, %v4294_v58  ;;  %v4615_v36 = vsel %vm4103_vm9, %v3454_v59, %v4359_v1  ;;  %v10216_v58 = vld [vmem:[#allocation12_spill] sm:$0xff] }
 0x2ea   : > { %v5018_v14 = vpop.xlane.xlu0 %5017  ;;  %v4991_v24 = vpop.xlane.xlu1 %4990  ;;  %5080 = vst.msk [vmem:[#allocation3] sm:$0xff] %vm5079_vm3, %v5064_v21  ;;  %v4581_v21 = vsel %vm4069_vm12, %v3335_v7, %v4325_v47  ;;  %v3535_v57 = vadd.f32 %v10216_v58, %v10026_v12  ;;  %v4614_v47 = vsel %vm4102_vm6, %v3452_v26, %v4358_v10  ;;  %vm3946_vm12 = vcmp.ge.f32.partialorder %v3648_v25, 0.0  ;;  %v10225_v58 = vld [vmem:[#allocation10_spill] sm:$0xff] }
 0x2eb   : > { %5032 = vst.msk [vmem:[#allocation3 + $0x10] sm:$0xff] %vm5029_vm14, %v5018_v14  ;;  %5246 = vmax.xlane.f32.xlu0 %v4582_v3  ;;  %v10217_v14 = vld [vmem:[#allocation74_spill] sm:$0xff] }
 0x2ec   : > { %5006 = vst.msk [vmem:[#allocation3 + $0x8] sm:$0xff] %vm5004_vm5, %v4991_v24  ;;  %5244 = vmax.xlane.f32.xlu1 %v4550_v2  ;;  %v3347_v24 = vadd.f32 %v10217_v14, %v8732_v31  ;;  %v4200_v17 = vmul.f32 0.2, %v3535_v57  ;;  %v4646_v2 = vsel %vm4134_vm11, %v3458_v63, %v4390_v54  ;;  %vm3944_vm1 = vcmp.ge.f32.partialorder %v3535_v57, 0.0 }
 0x2ed   : > { %5057 = vst.msk [vmem:[#allocation3 + $0x10] sm:$0xff] %vm5054_vm7, %v5043_v61  ;;  %v10215_v61 = vld [vmem:[#allocation71_spill] sm:$0xff]  ;;  %v3654_v63 = vadd.f32 %v10223_v43, %v8294_v18 }
 0x2ee   : > { %v5068_v27 = vpop.xlane.xlu0 %5067  ;;  %v5041_v5 = vpop.xlane.xlu1 %5040  ;;  %v3341_v22 = vadd.f32 %v10215_v61, %v8672_v39  ;;  %vm4133_vm13 = vcmp.ge.f32.partialorder %v3347_v24, 0.0 }
 0x2ef   : > { %5082 = vst.msk [vmem:[#allocation3 + $0x10] sm:$0xff] %vm5079_vm3, %v5068_v27  ;;  %5221 = vmax.xlane.f32.xlu0 %v4581_v21  ;;  %v4389_v27 = vmul.f32 0.2, %v3347_v24  ;;  %v4234_v54 = vmul.f32 0.2, %v3654_v63  ;;  %vm3978_vm4 = vcmp.ge.f32.partialorder %v3654_v63, 0.0 }
 0x2f0   : > { %5219 = vmax.xlane.f32.xlu1 %v4549_v30  ;;  %v4357_v37 = vmul.f32 0.2, %v3341_v22  ;;  %vm4101_vm8 = vcmp.ge.f32.partialorder %v3341_v22, 0.0  ;;  %v10220_v30 = vld [vmem:[#allocation11_spill] sm:$0xff] }
 0x2f2   : > { %v4997_v13 = vpop.xlane.xlu0 %4996  ;;  %v5016_v44 = vpop.xlane.xlu1 %5015  ;;  %v4613_v59 = vsel %vm4101_vm8, %v3341_v22, %v4357_v37 }
 0x2f3   : > { %5009 = vst.msk [vmem:[#allocation3 + $0x20] sm:$0xff] %vm5004_vm5, %v4997_v13  ;;  %5271 = vmax.xlane.f32.xlu0 %v4583_v32  ;;  %v3537_v13 = vadd.f32 %v10220_v30, %v10026_v12  ;;  %v4645_v32 = vsel %vm4133_vm13, %v3347_v24, %v4389_v27  ;;  %vm5129_vm13 = vcmask 146568  }
 0x2f4   : > { %5031 = vst.msk [vmem:[#allocation3 + $0x8] sm:$0xff] %vm5029_vm14, %v5016_v44  ;;  %5269 = vmax.xlane.f32.xlu1 %v4551_v52  ;;  %v4456_v44 = vsel %vm3944_vm1, %v3535_v57, %v4200_v17  ;;  %v10222_v52 = vld [vmem:[#allocation17_spill] sm:$0xff]  ;;  %v3543_v57 = vadd.f32 %v10225_v58, %v8294_v18 }
 0x2f5   : > { %5056 = vst.msk [vmem:[#allocation3 + $0x8] sm:$0xff] %vm5054_vm7, %v5041_v5  ;;  %v10219_v5 = vld [vmem:[#allocation75_spill] sm:$0xff]  ;;  %v4201_v26 = vmul.f32 0.2, %v3537_v13  ;;  %vm3945_vm0 = vcmp.ge.f32.partialorder %v3537_v13, 0.0 }
 0x2f6   : > { %v5047_v51 = vpop.xlane.xlu0 %5046  ;;  %v5066_v60 = vpop.xlane.xlu1 %5065  ;;  %v3351_v28 = vadd.f32 %v10219_v5, %v8747_v62  ;;  %v4233_v17 = vmul.f32 0.2, %v3543_v57  ;;  %vm3977_vm11 = vcmp.ge.f32.partialorder %v3543_v57, 0.0  ;;  %v10228_v5 = vld [vmem:[#allocation18_spill] sm:$0xff] }
 0x2f7   : > { %5081 = vst.msk [vmem:[#allocation3 + $0x8] sm:$0xff] %vm5079_vm3, %v5066_v60  ;;  %5273 = vmax.xlane.f32.xlu0 %v4615_v36  ;;  %v4458_v60 = vsel %vm3946_vm12, %v3648_v25, %v4202_v19  ;;  %v3656_v25 = vadd.f32 %v10227_v33, %v8294_v18 }
 0x2f8   : > { %5198 = vmax.xlane.f32.xlu1 %v4612_v56  ;;  %v4420_v1 = vmul.f32 0.2, %v3351_v28  ;;  %vm4164_vm15 = vcmp.ge.f32.partialorder %v3351_v28, 0.0  ;;  %v10224_v56 = vld [vmem:[#allocation16_spill] sm:$0xff] }
 0x2f9   : > { %vm3979_vm1 = vcmp.ge.f32.partialorder %v3656_v25, 0.0 }
 0x2fa   : > { %v5022_v35 = vpop.xlane.xlu0 %5021  ;;  %v4995_v7 = vpop.xlane.xlu1 %4994  ;;  %v4676_v36 = vsel %vm4164_vm15, %v3351_v28, %v4420_v1  ;;  %v3549_v28 = vadd.f32 %v10228_v5, %v8586_v29  ;;  %vm5154_vm15 = vcmask 154768  }
 0x2fb   : > { %5034 = vst.msk [vmem:[#allocation3 + $0x20] sm:$0xff] %vm5029_vm14, %v5022_v35  ;;  %5200 = vmax.xlane.f32.xlu0 %v4644_v55  ;;  %v3547_v35 = vadd.f32 %v10224_v56, %v8586_v29  ;;  %v4488_v55 = vsel %vm3976_vm2, %v3541_v53, %v4232_v16  ;;  %vm5179_vm2 = vcmask 162968   ;;  %v10233_v56 = vld [vmem:[#allocation26_spill] sm:$0xff] }
 0x2fc   : > { %5059 = vst.msk [vmem:[#allocation3 + $0x20] sm:$0xff] %vm5054_vm7, %v5047_v51  ;;  %5248 = vmax.xlane.f32.xlu1 %v4614_v47  ;;  %v3650_v51 = vadd.f32 %v10222_v52, %v10026_v12  ;;  %v10226_v47 = vld [vmem:[#allocation19_spill] sm:$0xff]  ;;  %v4265_v23 = vmul.f32 0.2, %v3549_v28  ;;  %v10231_v52 = vld [vmem:[#allocation20_spill] sm:$0xff]  ;;  %vm4009_vm12 = vcmp.ge.f32.partialorder %v3549_v28, 0.0 }
 0x2fd   : > { %5008 = vst.msk [vmem:[#allocation3 + $0x18] sm:$0xff] %vm5004_vm5, %v4995_v7  ;;  %v4457_v7 = vsel %vm3945_vm0, %v3537_v13, %v4201_v26  ;;  %v4264_v24 = vmul.f32 0.2, %v3547_v35  ;;  %vm4008_vm6 = vcmp.ge.f32.partialorder %v3547_v35, 0.0  ;;  %v4235_v13 = vmul.f32 0.2, %v3656_v25 }
 0x2fe   : > { %v5072_v34 = vpop.xlane.xlu0 %5071  ;;  %v5045_v3 = vpop.xlane.xlu1 %5044  ;;  %v4203_v22 = vmul.f32 0.2, %v3650_v51  ;;  %vm3947_vm9 = vcmp.ge.f32.partialorder %v3650_v51, 0.0 }
 0x2ff   : > { %5084 = vst.msk [vmem:[#allocation3 + $0x20] sm:$0xff] %vm5079_vm3, %v5072_v34  ;;  %5250 = vmax.xlane.f32.xlu0 %v4646_v2  ;;  %v3660_v34 = vadd.f32 %v10226_v47, %v8586_v29  ;;  %v4490_v2 = vsel %vm3978_vm4, %v3654_v63, %v4234_v54  ;;  %v4520_v30 = vsel %vm4008_vm6, %v3547_v35, %v4264_v24  ;;  %v10235_v47 = vld [vmem:[#allocation29_spill] sm:$0xff] }
 0x300   : > { %5223 = vmax.xlane.f32.xlu1 %v4613_v59  ;;  %v3555_v35 = vadd.f32 %v10233_v56, %v8606_v42 }
 0x301   : > { %vm4010_vm8 = vcmp.ge.f32.partialorder %v3660_v34, 0.0 }
 0x302   : > { %v5001_v21 = vpop.xlane.xlu0 %5000  ;;  %v5020_v0 = vpop.xlane.xlu1 %5019  ;;  %v4297_v24 = vmul.f32 0.2, %v3555_v35  ;;  %vm4041_vm6 = vcmp.ge.f32.partialorder %v3555_v35, 0.0 }
 0x303   : > { %5011 = vst.msk [vmem:[#allocation3 + $0x30] sm:$0xff] %vm5004_vm5, %v5001_v21  ;;  %5288 = vmax.xlane.f32.xlu0 %v4456_v44  ;;  %v4266_v21 = vmul.f32 0.2, %v3660_v34  ;;  %v4489_v44 = vsel %vm3977_vm11, %v3543_v57, %v4233_v17 }
 0x304   : > { %5033 = vst.msk [vmem:[#allocation3 + $0x18] sm:$0xff] %vm5029_vm14, %v5020_v0  ;;  %5225 = vmax.xlane.f32.xlu1 %v4645_v32  ;;  %v10229_v0 = vld [vmem:[#allocation79_spill] sm:$0xff]  ;;  %v10230_v32 = vld [vmem:[#allocation80_spill] sm:$0xff] }
 0x305   : > { %5058 = vst.msk [vmem:[#allocation3 + $0x18] sm:$0xff] %vm5054_vm7, %v5045_v3  ;;  %v4459_v3 = vsel %vm3947_vm9, %v3650_v51, %v4203_v22  ;;  %v3553_v19 = vadd.f32 %v10229_v0, %v8606_v42  ;;  %v4522_v26 = vsel %vm4010_vm8, %v3660_v34, %v4266_v21  ;;  %v3666_v51 = vadd.f32 %v10231_v52, %v8606_v42 }
 0x306   : > { %v5051_v50 = vpop.xlane.xlu0 %5050  ;;  %v5070_v20 = vpop.xlane.xlu1 %5069  ;;  %v3561_v34 = vadd.f32 %v10235_v47, %v8656_v4  ;;  %v4553_v21 = vsel %vm4041_vm6, %v3555_v35, %v4297_v24 }
 0x307   : > { %5083 = vst.msk [vmem:[#allocation3 + $0x18] sm:$0xff] %vm5079_vm3, %v5070_v20  ;;  %5338 = vmax.xlane.f32.xlu0 %v4458_v60  ;;  %v4296_v20 = vmul.f32 0.2, %v3553_v19  ;;  %v4491_v60 = vsel %vm3979_vm1, %v3656_v25, %v4235_v13  ;;  %vm4040_vm0 = vcmp.ge.f32.partialorder %v3553_v19, 0.0  ;;  %v4298_v22 = vmul.f32 0.2, %v3666_v51 }
 0x308   : > { %5202 = vmax.xlane.f32.xlu1 %v4676_v36  ;;  %v10232_v36 = vld [vmem:[#allocation82_spill] sm:$0xff]  ;;  %vm4042_vm4 = vcmp.ge.f32.partialorder %v3666_v51, 0.0  ;;  %v4329_v5 = vmul.f32 0.2, %v3561_v34  ;;  %vm4073_vm8 = vcmp.ge.f32.partialorder %v3561_v34, 0.0 }
 0x30a   : > { %v5026_v10 = vpop.xlane.xlu0 %5025  ;;  %v4999_v61 = vpop.xlane.xlu1 %4998 }
 0x30b   : > { %5036 = vst.msk [vmem:[#allocation3 + $0x30] sm:$0xff] %vm5029_vm14, %v5026_v10  ;;  %5313 = vmax.xlane.f32.xlu0 %v4457_v7  ;;  %v3668_v10 = vadd.f32 %v10232_v36, %v8606_v42  ;;  %v4552_v7 = vsel %vm4040_vm0, %v3553_v19, %v4296_v20 }
 0x30c   : > { %5061 = vst.msk [vmem:[#allocation3 + $0x30] sm:$0xff] %vm5054_vm7, %v5051_v50  ;;  %5290 = vmax.xlane.f32.xlu1 %v4488_v55  ;;  %v3662_v50 = vadd.f32 %v10230_v32, %v8586_v29  ;;  %v10234_v55 = vld [vmem:[#allocation81_spill] sm:$0xff] }
 0x30d   : > { %5010 = vst.msk [vmem:[#allocation3 + $0x28] sm:$0xff] %vm5004_vm5, %v4999_v61  ;;  %v4521_v61 = vsel %vm4009_vm12, %v3549_v28, %v4265_v23  ;;  %v4299_v57 = vmul.f32 0.2, %v3668_v10  ;;  %v10236_v28 = vld [vmem:[#allocation83_spill] sm:$0xff]  ;;  %v4585_v23 = vsel %vm4073_vm8, %v3561_v34, %v4329_v5 }
 0x30e   : > { %v5076_v37 = vpop.xlane.xlu0 %5075  ;;  %v5049_v14 = vpop.xlane.xlu1 %5048  ;;  %v4267_v63 = vmul.f32 0.2, %v3662_v50  ;;  %vm4011_vm9 = vcmp.ge.f32.partialorder %v3662_v50, 0.0 }
 0x30f   : > { %5086 = vst.msk [vmem:[#allocation3 + $0x30] sm:$0xff] %vm5079_vm3, %v5076_v37  ;;  %5363 = vmax.xlane.f32.xlu0 %v4459_v3  ;;  %v3559_v37 = vadd.f32 %v10234_v55, %v8656_v4  ;;  %v4554_v3 = vsel %vm4042_vm4, %v3666_v51, %v4298_v22 }
 0x310   : > { %5340 = vmax.xlane.f32.xlu1 %v4490_v2  ;;  %v3672_v2 = vadd.f32 %v9171_v48, %v8656_v4  ;;  %v3761_v48 = vadd.f32 %v9230_v41, %v10026_v12  ;;  %v3874_v41 = vadd.f32 %v9244_v40, %v10026_v12  ;;  %v10237_v40 = vld [vmem:[#allocation35_spill] sm:$0xff] }
 0x311   : > { %v4328_v25 = vmul.f32 0.2, %v3559_v37  ;;  %vm4072_vm11 = vcmp.ge.f32.partialorder %v3559_v37, 0.0 }
 0x312   : > { %v5089_v27 = vpop.xlane.xlu0 %5088  ;;  %v5024_v59 = vpop.xlane.xlu1 %5023  ;;  %vm3950_vm12 = vcmp.ge.f32.partialorder %v3874_v41, 0.0 }
 0x313   : > { %5105 = vst.msk [vmem:[#allocation3] sm:$0xff] %vm5104_vm10, %v5089_v27  ;;  %5292 = vmax.xlane.f32.xlu0 %v4520_v30  ;;  %v4330_v30 = vmul.f32 0.2, %v3672_v2  ;;  %v4584_v13 = vsel %vm4072_vm11, %v3559_v37, %v4328_v25 }
 0x314   : > { %5035 = vst.msk [vmem:[#allocation3 + $0x28] sm:$0xff] %vm5029_vm14, %v5024_v59  ;;  %5315 = vmax.xlane.f32.xlu1 %v4489_v44  ;;  %v3565_v59 = vadd.f32 %v10236_v28, %v8672_v39 }
 0x315   : > { %5060 = vst.msk [vmem:[#allocation3 + $0x28] sm:$0xff] %vm5054_vm7, %v5049_v14  ;;  %v4523_v14 = vsel %vm4011_vm9, %v3662_v50, %v4267_v63  ;;  %v4204_v50 = vmul.f32 0.2, %v3761_v48 }
 0x316   : > { %v5139_v1 = vpop.xlane.xlu0 %5138  ;;  %v5074_v53 = vpop.xlane.xlu1 %5073  ;;  %v4360_v44 = vmul.f32 0.2, %v3565_v59 }
 0x317   : > { %5085 = vst.msk [vmem:[#allocation3 + $0x28] sm:$0xff] %vm5079_vm3, %v5074_v53  ;;  %5342 = vmax.xlane.f32.xlu0 %v4522_v26 }
 0x318   : > { %5365 = vmax.xlane.f32.xlu1 %v4491_v60 }
 0x31a   : > { %v5114_v16 = vpop.xlane.xlu0 %5113  ;;  %v5003_v43 = vpop.xlane.xlu1 %5002 }
 0x31b   : > { %5130 = vst.msk [vmem:[#allocation3] sm:$0xff] %vm5129_vm13, %v5114_v16  ;;  %5317 = vmax.xlane.f32.xlu0 %v4521_v61  ;;  %v4206_v16 = vmul.f32 0.2, %v3874_v41 }
 0x31c   : > { %5012 = vst.msk [vmem:[#allocation3 + $0x38] sm:$0xff] %vm5004_vm5, %v5003_v43  ;;  %5294 = vmax.xlane.f32.xlu1 %v4552_v7  ;;  %vm4043_vm5 = vcmp.ge.f32.partialorder %v3668_v10, 0.0  ;;  %v3763_v43 = vadd.f32 %v10237_v40, %v10026_v12  ;;  %v10239_v7 = vld [vmem:[#allocation38_spill] sm:$0xff] }
 0x31d   : > { %5155 = vst.msk [vmem:[#allocation3] sm:$0xff] %vm5154_vm15, %v5139_v1  ;;  %v4555_v27 = vsel %vm4043_vm5, %v3668_v10, %v4299_v57  ;;  %v3767_v1 = vadd.f32 %v9239_v15, %v8294_v18  ;;  %v3880_v15 = vadd.f32 %v9259_v49, %v8294_v18  ;;  %v10238_v10 = vld [vmem:[#allocation28_spill] sm:$0xff]  ;;  %v10240_v57 = vld [vmem:[#allocation77_spill] sm:$0xff] }
 0x31e   : > { %v5164_v54 = vpop.xlane.xlu0 %5163  ;;  %v5053_v58 = vpop.xlane.xlu1 %5052  ;;  %v3769_v61 = vadd.f32 %v10238_v10, %v8294_v18  ;;  %v4205_v35 = vmul.f32 0.2, %v3763_v43  ;;  %v3353_v55 = vadd.f32 %v10240_v57, %v8747_v62  ;;  %vm3949_vm9 = vcmp.ge.f32.partialorder %v3763_v43, 0.0 }
 0x31f   : > { %5180 = vst.msk [vmem:[#allocation3] sm:$0xff] %vm5179_vm2, %v5164_v54  ;;  %5367 = vmax.xlane.f32.xlu0 %v4523_v14  ;;  %v4236_v26 = vmul.f32 0.2, %v3767_v1  ;;  %vm3980_vm1 = vcmp.ge.f32.partialorder %v3767_v1, 0.0  ;;  %v4238_v36 = vmul.f32 0.2, %v3880_v15  ;;  %v3876_v54 = vadd.f32 %v10239_v7, %v10026_v12 }
 0x320   : > { %5344 = vmax.xlane.f32.xlu1 %v4554_v3  ;;  %vm3982_vm0 = vcmp.ge.f32.partialorder %v3880_v15, 0.0  ;;  %v4237_v37 = vmul.f32 0.2, %v3769_v61  ;;  %vm3981_vm4 = vcmp.ge.f32.partialorder %v3769_v61, 0.0  ;;  %v3882_v12 = vadd.f32 %v9263_v46, %v8294_v18  ;;  %v10249_v7 = vld [vmem:[#allocation14_spill] sm:$0xff] }
 0x321   : > { %v4492_v49 = vsel %vm3980_vm1, %v3767_v1, %v4236_v26  ;;  %v4494_v14 = vsel %vm3982_vm0, %v3880_v15, %v4238_v36  ;;  %v4207_v34 = vmul.f32 0.2, %v3876_v54  ;;  %v4461_v3 = vsel %vm3949_vm9, %v3763_v43, %v4205_v35  ;;  %v10244_v1 = vld [vmem:[#allocation34_spill] sm:$0xff]  ;;  %v10247_v43 = vld [vmem:[#allocation39_spill] sm:$0xff] }
 0x322   : > { %v5093_v17 = vpop.xlane.xlu0 %5092  ;;  %v5028_v33 = vpop.xlane.xlu1 %5027  ;;  %vm3951_vm5 = vcmp.ge.f32.partialorder %v3876_v54, 0.0  ;;  %vm4165_vm6 = vcmp.ge.f32.partialorder %v3353_v55, 0.0  ;;  %v4239_v28 = vmul.f32 0.2, %v3882_v12  ;;  %vm3983_vm11 = vcmp.ge.f32.partialorder %v3882_v12, 0.0 }
 0x323   : > { %5107 = vst.msk [vmem:[#allocation3 + $0x10] sm:$0xff] %vm5104_vm10, %v5093_v17  ;;  %5369 = vmax.xlane.f32.xlu0 %v4555_v27  ;;  %v4421_v17 = vmul.f32 0.2, %v3353_v55  ;;  %v4463_v46 = vsel %vm3951_vm5, %v3876_v54, %v4207_v34  ;;  %v3464_v54 = vadd.f32 %v10249_v7, %v8747_v62 }
 0x324   : > { %5037 = vst.msk [vmem:[#allocation3 + $0x38] sm:$0xff] %vm5029_vm14, %v5028_v33  ;;  %5319 = vmax.xlane.f32.xlu1 %v4553_v21  ;;  %vm4074_vm14 = vcmp.ge.f32.partialorder %v3672_v2, 0.0  ;;  %v10241_v33 = vld [vmem:[#allocation43_spill] sm:$0xff] }
 0x325   : > { %5062 = vst.msk [vmem:[#allocation3 + $0x38] sm:$0xff] %vm5054_vm7, %v5053_v58  ;;  %vm4104_vm7 = vcmp.ge.f32.partialorder %v3565_v59, 0.0  ;;  %v4586_v20 = vsel %vm4074_vm14, %v3672_v2, %v4330_v30  ;;  %v4462_v58 = vsel %vm3950_vm12, %v3874_v41, %v4206_v16  ;;  %v3775_v25 = vadd.f32 %v10241_v33, %v8586_v29 }
 0x326   : > { %v5143_v0 = vpop.xlane.xlu0 %5142  ;;  %v5078_v19 = vpop.xlane.xlu1 %5077  ;;  %v4616_v52 = vsel %vm4104_vm7, %v3565_v59, %v4360_v44  ;;  %v4493_v2 = vsel %vm3981_vm4, %v3769_v61, %v4237_v37  ;;  %v10242_v59 = vld [vmem:[#allocation33_spill] sm:$0xff]  ;;  %v4677_v30 = vsel %vm4165_vm6, %v3353_v55, %v4421_v17  ;;  %vm4166_vm4 = vcmp.ge.f32.partialorder %v3464_v54, 0.0 }
 0x327   : > { %5087 = vst.msk [vmem:[#allocation3 + $0x38] sm:$0xff] %vm5079_vm3, %v5078_v19  ;;  %5296 = vmax.xlane.f32.xlu0 %v4584_v13  ;;  %vm3948_vm3 = vcmp.ge.f32.partialorder %v3761_v48, 0.0  ;;  %v3773_v18 = vadd.f32 %v10242_v59, %v8586_v29  ;;  %v4269_v21 = vmul.f32 0.2, %v3775_v25  ;;  %vm4013_vm8 = vcmp.ge.f32.partialorder %v3775_v25, 0.0 }
 0x328   : > { %5321 = vmax.xlane.f32.xlu1 %v4585_v23  ;;  %v4460_v63 = vsel %vm3948_vm3, %v3761_v48, %v4204_v50  ;;  %v3886_v23 = vadd.f32 %v10244_v1, %v8586_v29 }
 0x329   : > { %v4268_v44 = vmul.f32 0.2, %v3773_v18  ;;  %vm4012_vm14 = vcmp.ge.f32.partialorder %v3773_v18, 0.0 }
 0x32a   : > { %v5118_v53 = vpop.xlane.xlu0 %5117  ;;  %v5091_v32 = vpop.xlane.xlu1 %5090  ;;  %vm4014_vm3 = vcmp.ge.f32.partialorder %v3886_v23, 0.0 }
 0x32b   : > { %5132 = vst.msk [vmem:[#allocation3 + $0x10] sm:$0xff] %vm5129_vm13, %v5118_v53  ;;  %5346 = vmax.xlane.f32.xlu0 %v4586_v20  ;;  %v4495_v53 = vsel %vm3983_vm11, %v3882_v12, %v4239_v28  ;;  %v4525_v20 = vsel %vm4013_vm8, %v3775_v25, %v4269_v21  ;;  %v4524_v16 = vsel %vm4012_vm14, %v3773_v18, %v4268_v44  ;;  %v4422_v12 = vmul.f32 0.2, %v3464_v54  ;;  %v10254_v44 = vld [vmem:[#allocation32_spill] sm:$0xff] }
 0x32c   : > { %5157 = vst.msk [vmem:[#allocation3 + $0x10] sm:$0xff] %vm5154_vm15, %v5143_v0  ;;  %5298 = vmax.xlane.f32.xlu1 %v4616_v52  ;;  %v10243_v0 = vld [vmem:[#allocation30_spill] sm:$0xff]  ;;  %v3892_v18 = vadd.f32 %v9287_v9, %v8606_v42  ;;  %vm5204_vm11 = vcmask 171168   ;;  %v3573_v1 = vadd.f32 %v10254_v44, %v8732_v31 }
 0x32d   : > { %5106 = vst.msk [vmem:[#allocation3 + $0x8] sm:$0xff] %vm5104_vm10, %v5091_v32  ;;  %v3779_v19 = vadd.f32 %v10243_v0, %v8606_v42  ;;  %v10245_v32 = vld [vmem:[#allocation31_spill] sm:$0xff]  ;;  %v10246_v52 = vld [vmem:[#allocation78_spill] sm:$0xff] }
 0x32e   : > { %v5168_v51 = vpop.xlane.xlu0 %5167  ;;  %v5141_v60 = vpop.xlane.xlu1 %5140  ;;  %v3567_v50 = vadd.f32 %v10245_v32, %v8672_v39  ;;  %v4302_v9 = vmul.f32 0.2, %v3892_v18  ;;  %vm4046_vm14 = vcmp.ge.f32.partialorder %v3892_v18, 0.0  ;;  %v10255_v32 = vld [vmem:[#allocation36_spill] sm:$0xff] }
 0x32f   : > { %5182 = vst.msk [vmem:[#allocation3 + $0x10] sm:$0xff] %vm5179_vm2, %v5168_v51  ;;  %5388 = vmax.xlane.f32.xlu0 %v4460_v63  ;;  %v4300_v41 = vmul.f32 0.2, %v3779_v19  ;;  %vm4044_vm7 = vcmp.ge.f32.partialorder %v3779_v19, 0.0  ;;  %v3460_v51 = vadd.f32 %v10246_v52, %v8732_v31  ;;  %v3781_v63 = vadd.f32 %v10247_v43, %v8606_v42  ;;  %v10256_v52 = vld [vmem:[#allocation41_spill] sm:$0xff] }
 0x330   : > { %5390 = vmax.xlane.f32.xlu1 %v4492_v49  ;;  %v4361_v40 = vmul.f32 0.2, %v3567_v50  ;;  %vm4105_vm1 = vcmp.ge.f32.partialorder %v3567_v50, 0.0 }
 0x331   : > { %v4556_v36 = vsel %vm4044_vm7, %v3779_v19, %v4300_v41  ;;  %v4391_v49 = vmul.f32 0.2, %v3460_v51  ;;  %vm4135_vm12 = vcmp.ge.f32.partialorder %v3460_v51, 0.0  ;;  %vm4045_vm0 = vcmp.ge.f32.partialorder %v3781_v63, 0.0 }
 0x332   : > { %v5097_v22 = vpop.xlane.xlu0 %5096  ;;  %v5116_v56 = vpop.xlane.xlu1 %5115  ;;  %v4617_v57 = vsel %vm4105_vm1, %v3567_v50, %v4361_v40  ;;  %v3466_v50 = vadd.f32 %v10255_v32, %v8747_v62  ;;  %vm5229_vm1 = vcmask 179368  }
 0x333   : > { %5109 = vst.msk [vmem:[#allocation3 + $0x20] sm:$0xff] %vm5104_vm10, %v5097_v22  ;;  %5438 = vmax.xlane.f32.xlu0 %v4462_v58  ;;  %v10248_v22 = vld [vmem:[#allocation25_spill] sm:$0xff]  ;;  %v4301_v58 = vmul.f32 0.2, %v3781_v63  ;;  %v4647_v34 = vsel %vm4135_vm12, %v3460_v51, %v4391_v49  ;;  %v3787_v51 = vadd.f32 %v10256_v52, %v8656_v4 }
 0x334   : > { %5131 = vst.msk [vmem:[#allocation3 + $0x8] sm:$0xff] %vm5129_vm13, %v5116_v56  ;;  %5440 = vmax.xlane.f32.xlu1 %v4494_v14  ;;  %v3674_v56 = vadd.f32 %v10248_v22, %v8656_v4  ;;  %v4423_v40 = vmul.f32 0.2, %v3466_v50  ;;  %vm4167_vm12 = vcmp.ge.f32.partialorder %v3466_v50, 0.0 }
 0x335   : > { %5156 = vst.msk [vmem:[#allocation3 + $0x8] sm:$0xff] %vm5154_vm15, %v5141_v60  ;;  %v4270_v60 = vmul.f32 0.2, %v3886_v23  ;;  %v4557_v33 = vsel %vm4045_vm0, %v3781_v63, %v4301_v58  ;;  %v10257_v63 = vld [vmem:[#allocation85_spill] sm:$0xff]  ;;  %v4333_v22 = vmul.f32 0.2, %v3787_v51 }
 0x336   : > { %v5147_v24 = vpop.xlane.xlu0 %5146  ;;  %v5166_v47 = vpop.xlane.xlu1 %5165  ;;  %v4331_v14 = vmul.f32 0.2, %v3674_v56  ;;  %vm4075_vm9 = vcmp.ge.f32.partialorder %v3674_v56, 0.0  ;;  %vm5254_vm0 = vcmask 187568   ;;  %v10259_v58 = vld [vmem:[#allocation90_spill] sm:$0xff] }
 0x337   : > { %5181 = vst.msk [vmem:[#allocation3 + $0x8] sm:$0xff] %vm5179_vm2, %v5166_v47  ;;  %5413 = vmax.xlane.f32.xlu0 %v4461_v3  ;;  %v4526_v35 = vsel %vm4014_vm3, %v3886_v23, %v4270_v60  ;;  %v10251_v3 = vld [vmem:[#allocation27_spill] sm:$0xff]  ;;  %v4558_v60 = vsel %vm4046_vm14, %v3892_v18, %v4302_v9  ;;  %vm4137_vm3 = vcmp.ge.f32.partialorder %v3573_v1, 0.0 }
 0x338   : > { %5415 = vmax.xlane.f32.xlu1 %v4493_v2  ;;  %v3678_v17 = vadd.f32 %v10251_v3, %v8672_v39  ;;  %v4587_v28 = vsel %vm4075_vm9, %v3674_v56, %v4331_v14  ;;  %vm4077_vm9 = vcmp.ge.f32.partialorder %v3787_v51, 0.0  ;;  %v3791_v14 = vadd.f32 %v9295_v6, %v8672_v39 }
 0x33a   : > { %v5122_v27 = vpop.xlane.xlu0 %5121  ;;  %v5095_v5 = vpop.xlane.xlu1 %5094  ;;  %v4362_v59 = vmul.f32 0.2, %v3678_v17  ;;  %vm4106_vm6 = vcmp.ge.f32.partialorder %v3678_v17, 0.0  ;;  %v4364_v6 = vmul.f32 0.2, %v3791_v14 }
 0x33b   : > { %5134 = vst.msk [vmem:[#allocation3 + $0x20] sm:$0xff] %vm5129_vm13, %v5122_v27  ;;  %5463 = vmax.xlane.f32.xlu0 %v4463_v46  ;;  %v4678_v46 = vsel %vm4166_vm4, %v3464_v54, %v4422_v12  ;;  %v10260_v12 = vld [vmem:[#allocation37_spill] sm:$0xff] }
 0x33c   : > { %5159 = vst.msk [vmem:[#allocation3 + $0x20] sm:$0xff] %vm5154_vm15, %v5147_v24  ;;  %5227 = vmax.xlane.f32.xlu1 %v4677_v30  ;;  %v10250_v24 = vld [vmem:[#allocation40_spill] sm:$0xff]  ;;  %v10253_v30 = vld [vmem:[#allocation89_spill] sm:$0xff]  ;;  %v4618_v23 = vsel %vm4106_vm6, %v3678_v17, %v4362_v59 }
 0x33d   : > { %5108 = vst.msk [vmem:[#allocation3 + $0x18] sm:$0xff] %vm5104_vm10, %v5095_v5  ;;  %v3888_v47 = vadd.f32 %v10250_v24, %v8586_v29  ;;  %v10252_v29 = vld [vmem:[#allocation84_spill] sm:$0xff]  ;;  %v4589_v24 = vsel %vm4077_vm9, %v3787_v51, %v4333_v22 }
 0x33e   : > { %v5172_v48 = vpop.xlane.xlu0 %5171  ;;  %v5145_v13 = vpop.xlane.xlu1 %5144  ;;  %v3571_v27 = vadd.f32 %v10252_v29, %v8732_v31 }
 0x33f   : > { %5184 = vst.msk [vmem:[#allocation3 + $0x20] sm:$0xff] %vm5179_vm2, %v5172_v48  ;;  %5465 = vmax.xlane.f32.xlu0 %v4495_v53  ;;  %v4271_v5 = vmul.f32 0.2, %v3888_v47  ;;  %vm4015_vm5 = vcmp.ge.f32.partialorder %v3888_v47, 0.0  ;;  %v3785_v48 = vadd.f32 %v10253_v30, %v8656_v4 }
 0x340   : > { %5417 = vmax.xlane.f32.xlu1 %v4525_v20  ;;  %v4392_v19 = vmul.f32 0.2, %v3571_v27  ;;  %vm4136_vm8 = vcmp.ge.f32.partialorder %v3571_v27, 0.0 }
 0x341   : > { %v4332_v20 = vmul.f32 0.2, %v3785_v48  ;;  %vm4076_vm7 = vcmp.ge.f32.partialorder %v3785_v48, 0.0 }
 0x342   : > { %v5101_v26 = vpop.xlane.xlu0 %5100  ;;  %v5120_v15 = vpop.xlane.xlu1 %5119 }
 0x343   : > { %5111 = vst.msk [vmem:[#allocation3 + $0x30] sm:$0xff] %vm5104_vm10, %v5101_v26  ;;  %5392 = vmax.xlane.f32.xlu0 %v4524_v16  ;;  %v4648_v26 = vsel %vm4136_vm8, %v3571_v27, %v4392_v19  ;;  %v4588_v49 = vsel %vm4076_vm7, %v3785_v48, %v4332_v20  ;;  %vm4108_vm8 = vcmp.ge.f32.partialorder %v3791_v14, 0.0 }
 0x344   : > { %5133 = vst.msk [vmem:[#allocation3 + $0x18] sm:$0xff] %vm5129_vm13, %v5120_v15  ;;  %5394 = vmax.xlane.f32.xlu1 %v4556_v36  ;;  %v4393_v15 = vmul.f32 0.2, %v3573_v1  ;;  %v3680_v36 = vadd.f32 %v10257_v63, %v8672_v39  ;;  %v4620_v30 = vsel %vm4108_vm8, %v3791_v14, %v4364_v6 }
 0x345   : > { %5158 = vst.msk [vmem:[#allocation3 + $0x18] sm:$0xff] %vm5154_vm15, %v5145_v13  ;;  %v4527_v13 = vsel %vm4015_vm5, %v3888_v47, %v4271_v5 }
 0x346   : > { %v5151_v10 = vpop.xlane.xlu0 %5150  ;;  %v5170_v61 = vpop.xlane.xlu1 %5169  ;;  %v4649_v56 = vsel %vm4137_vm3, %v3573_v1, %v4393_v15  ;;  %v4363_v54 = vmul.f32 0.2, %v3680_v36  ;;  %vm4107_vm4 = vcmp.ge.f32.partialorder %v3680_v36, 0.0  ;;  %v10266_v15 = vld [vmem:[#allocation92_spill] sm:$0xff] }
 0x347   : > { %5183 = vst.msk [vmem:[#allocation3 + $0x18] sm:$0xff] %vm5179_vm2, %v5170_v61  ;;  %5442 = vmax.xlane.f32.xlu0 %v4526_v35  ;;  %v3900_v52 = vadd.f32 %v10266_v15, %v8656_v4 }
 0x348   : > { %5323 = vmax.xlane.f32.xlu1 %v4617_v57  ;;  %v3894_v57 = vadd.f32 %v10259_v58, %v8606_v42  ;;  %v3684_v42 = vadd.f32 %v10260_v12, %v8732_v31  ;;  %v4619_v17 = vsel %vm4107_vm4, %v3680_v36, %v4363_v54  ;;  %v10267_v36 = vld [vmem:[#allocation93_spill] sm:$0xff] }
 0x349   : > { %v4335_v63 = vmul.f32 0.2, %v3900_v52 }
 0x34a   : > { %v5126_v55 = vpop.xlane.xlu0 %5125  ;;  %v5099_v37 = vpop.xlane.xlu1 %5098  ;;  %v4303_v3 = vmul.f32 0.2, %v3894_v57  ;;  %vm4047_vm6 = vcmp.ge.f32.partialorder %v3894_v57, 0.0  ;;  %v4394_v5 = vmul.f32 0.2, %v3684_v42 }
 0x34b   : > { %5136 = vst.msk [vmem:[#allocation3 + $0x30] sm:$0xff] %vm5129_vm13, %v5126_v55  ;;  %5275 = vmax.xlane.f32.xlu0 %v4647_v34  ;;  %v4679_v55 = vsel %vm4167_vm12, %v3466_v50, %v4423_v40  ;;  %vm4079_vm12 = vcmp.ge.f32.partialorder %v3900_v52, 0.0 }
 0x34c   : > { %5161 = vst.msk [vmem:[#allocation3 + $0x30] sm:$0xff] %vm5154_vm15, %v5151_v10  ;;  %5419 = vmax.xlane.f32.xlu1 %v4557_v33  ;;  %v10258_v10 = vld [vmem:[#allocation86_spill] sm:$0xff]  ;;  %v10261_v33 = vld [vmem:[#allocation23_spill] sm:$0xff]  ;;  %v4559_v18 = vsel %vm4047_vm6, %v3894_v57, %v4303_v3  ;;  %v4591_v57 = vsel %vm4079_vm12, %v3900_v52, %v4335_v63  ;;  %vm5304_vm12 = vcmask 203968  }
 0x34d   : > { %5110 = vst.msk [vmem:[#allocation3 + $0x28] sm:$0xff] %vm5104_vm10, %v5099_v37  ;;  %v3577_v61 = vadd.f32 %v10258_v10, %v8747_v62  ;;  %v3797_v10 = vadd.f32 %v10267_v36, %v8732_v31 }
 0x34e   : > { %v5176_v25 = vpop.xlane.xlu0 %5175  ;;  %v5149_v2 = vpop.xlane.xlu1 %5148 }
 0x34f   : > { %5186 = vst.msk [vmem:[#allocation3 + $0x30] sm:$0xff] %vm5179_vm2, %v5176_v25  ;;  %5371 = vmax.xlane.f32.xlu0 %v4587_v28  ;;  %v4424_v37 = vmul.f32 0.2, %v3577_v61  ;;  %vm4168_vm5 = vcmp.ge.f32.partialorder %v3577_v61, 0.0  ;;  %v3579_v25 = vadd.f32 %v10261_v33, %v8747_v62  ;;  %v10262_v28 = vld [vmem:[#allocation51_spill] sm:$0xff]  ;;  %vm4140_vm4 = vcmp.ge.f32.partialorder %v3797_v10, 0.0 }
 0x350   : > { %5252 = vmax.xlane.f32.xlu1 %v4678_v46  ;;  %v3898_v59 = vadd.f32 %v10262_v28, %v8656_v4  ;;  %v4396_v58 = vmul.f32 0.2, %v3797_v10 }
 0x351   : > { %v4425_v46 = vmul.f32 0.2, %v3579_v25 }
 0x352   : > { %v9641_v21 = vpop.xlane.xlu0 %5177  ;;  %v5124_v0 = vpop.xlane.xlu1 %5123  ;;  %v4334_v1 = vmul.f32 0.2, %v3898_v59 }
 0x353   : > { %5135 = vst.msk [vmem:[#allocation3 + $0x28] sm:$0xff] %vm5129_vm13, %v5124_v0  ;;  %5467 = vmax.xlane.f32.xlu0 %v4527_v13  ;;  %v10263_v0 = vld [vmem:[#allocation91_spill] sm:$0xff] }
 0x354   : > { %5160 = vst.msk [vmem:[#allocation3 + $0x28] sm:$0xff] %vm5154_vm15, %v5149_v2  ;;  %5348 = vmax.xlane.f32.xlu1 %v4618_v23  ;;  %v4680_v2 = vsel %vm4168_vm5, %v3577_v61, %v4424_v37  ;;  %v3793_v19 = vadd.f32 %v10263_v0, %v8672_v39  ;;  %v10264_v13 = vld [vmem:[#allocation87_spill] sm:$0xff]  ;;  %v10265_v23 = vld [vmem:[#allocation24_spill] sm:$0xff] }
 0x355   : > { %v3686_v44 = vadd.f32 %v10264_v13, %v8732_v31 }
 0x356   : > { %v5189_v53 = vpop.xlane.xlu0 %5188  ;;  %v5174_v41 = vpop.xlane.xlu1 %5173  ;;  %v4365_v32 = vmul.f32 0.2, %v3793_v19  ;;  %vm4109_vm14 = vcmp.ge.f32.partialorder %v3793_v19, 0.0 }
 0x357   : > { %5205 = vst.msk [vmem:[#allocation3] sm:$0xff] %vm5204_vm11, %v5189_v53  ;;  %5300 = vmax.xlane.f32.xlu0 %v4648_v26  ;;  %v3690_v53 = vadd.f32 %v10265_v23, %v8747_v62  ;;  %v4395_v26 = vmul.f32 0.2, %v3686_v44  ;;  %vm4139_vm7 = vcmp.ge.f32.partialorder %v3686_v44, 0.0 }
 0x358   : > { %5185 = vst.msk [vmem:[#allocation3 + $0x28] sm:$0xff] %vm5179_vm2, %v5174_v41  ;;  %5444 = vmax.xlane.f32.xlu1 %v4558_v60  ;;  %v4621_v40 = vsel %vm4109_vm14, %v3793_v19, %v4365_v32  ;;  %v10272_v19 = vld [vmem:[#allocation96_spill] sm:$0xff] }
 0x359   : > { %v4426_v60 = vmul.f32 0.2, %v3690_v53  ;;  %vm4170_vm3 = vcmp.ge.f32.partialorder %v3690_v53, 0.0  ;;  %v4651_v61 = vsel %vm4139_vm7, %v3686_v44, %v4395_v26 }
 0x35a   : > { %v5239_v16 = vpop.xlane.xlu0 %5238  ;;  %v5103_v43 = vpop.xlane.xlu1 %5102 }
 0x35b   : > { %5112 = vst.msk [vmem:[#allocation3 + $0x38] sm:$0xff] %vm5104_vm10, %v5103_v43  ;;  %5396 = vmax.xlane.f32.xlu0 %v4588_v49  ;;  %vm5279_vm10 = vcmask 195768   ;;  %v4682_v22 = vsel %vm4170_vm3, %v3690_v53, %v4426_v60 }
 0x35c   : > { %5325 = vmax.xlane.f32.xlu1 %v4649_v56 }
 0x35e   : > { %v5214_v35 = vpop.xlane.xlu0 %5213  ;;  %v5153_v7 = vpop.xlane.xlu1 %5152 }
 0x35f   : > { %5230 = vst.msk [vmem:[#allocation3] sm:$0xff] %vm5229_vm1, %v5214_v35  ;;  %5277 = vmax.xlane.f32.xlu0 %v4679_v55 }
 0x360   : > { %5255 = vst.msk [vmem:[#allocation3] sm:$0xff] %vm5254_vm0, %v5239_v16  ;;  %5421 = vmax.xlane.f32.xlu1 %v4589_v24  ;;  %v3904_v16 = vadd.f32 %v9315_v38, %v8672_v39  ;;  %v3799_v38 = vadd.f32 %v9317_v11, %v8732_v31  ;;  %v3803_v11 = vadd.f32 %v9324_v45, %v8747_v62 }
 0x362   : > { %v5264_v47 = vpop.xlane.xlu0 %5263  ;;  %v5128_v34 = vpop.xlane.xlu1 %5127  ;;  %v4366_v49 = vmul.f32 0.2, %v3904_v16  ;;  %vm4110_vm9 = vcmp.ge.f32.partialorder %v3904_v16, 0.0  ;;  %v4397_v55 = vmul.f32 0.2, %v3799_v38  ;;  %vm4141_vm5 = vcmp.ge.f32.partialorder %v3799_v38, 0.0 }
 0x363   : > { %5280 = vst.msk [vmem:[#allocation3] sm:$0xff] %vm5279_vm10, %v5264_v47  ;;  %5373 = vmax.xlane.f32.xlu0 %v4619_v17  ;;  %v4428_v3 = vmul.f32 0.2, %v3803_v11  ;;  %v10270_v17 = vld [vmem:[#allocation95_spill] sm:$0xff]  ;;  %vm4172_vm8 = vcmp.ge.f32.partialorder %v3803_v11, 0.0 }
 0x364   : > { %5137 = vst.msk [vmem:[#allocation3 + $0x38] sm:$0xff] %vm5129_vm13, %v5128_v34  ;;  %5302 = vmax.xlane.f32.xlu1 %v4680_v2  ;;  %vm4138_vm13 = vcmp.ge.f32.partialorder %v3684_v42, 0.0  ;;  %v4622_v37 = vsel %vm4110_vm9, %v3904_v16, %v4366_v49  ;;  %v10269_v34 = vld [vmem:[#allocation42_spill] sm:$0xff]  ;;  %v3805_v33 = vadd.f32 %v10270_v17, %v8747_v62  ;;  %vm5329_vm9 = vcmask 212168  }
 0x365   : > { %5162 = vst.msk [vmem:[#allocation3 + $0x38] sm:$0xff] %vm5154_vm15, %v5153_v7  ;;  %vm4169_vm15 = vcmp.ge.f32.partialorder %v3579_v25, 0.0  ;;  %v4650_v9 = vsel %vm4138_vm13, %v3684_v42, %v4394_v5  ;;  %v10268_v7 = vld [vmem:[#allocation88_spill] sm:$0xff]  ;;  %v3906_v12 = vadd.f32 %v10269_v34, %v8672_v39  ;;  %v4652_v42 = vsel %vm4140_vm4, %v3797_v10, %v4396_v58 }
 0x366   : > { %5187 = vst.msk [vmem:[#allocation3 + $0x38] sm:$0xff] %vm5179_vm2, %v9641_v21  ;;  %v5193_v29 = vpop.xlane.xlu0 %5192  ;;  %v5191_v27 = vpop.xlane.xlu1 %5190  ;;  %v4681_v50 = vsel %vm4169_vm15, %v3579_v25, %v4425_v46  ;;  %vm4078_vm2 = vcmp.ge.f32.partialorder %v3898_v59, 0.0  ;;  %v3692_v54 = vadd.f32 %v10268_v7, %v8747_v62  ;;  %v4653_v25 = vsel %vm4141_vm5, %v3799_v38, %v4397_v55  ;;  %v5528_v38 = vld [vmem:[#allocation4 + $0x100] sm:$0xff]  ;;  %v5531_v7 = vld [vmem:[#allocation4 + $0x118] sm:$0xff] }
 0x367   : > { %5207 = vst.msk [vmem:[#allocation3 + $0x10] sm:$0xff] %vm5204_vm11, %v5193_v29  ;;  %5206 = vst.msk [vmem:[#allocation3 + $0x8] sm:$0xff] %vm5204_vm11, %v5191_v27  ;;  %5469 = vmax.xlane.f32.xlu0 %v4559_v18  ;;  %v4590_v51 = vsel %vm4078_vm2, %v3898_v59, %v4334_v1  ;;  %v4367_v2 = vmul.f32 0.2, %v3906_v12  ;;  %v10271_v29 = vld [vmem:[#allocation94_spill] sm:$0xff]  ;;  %v3916_v5 = vadd.f32 %v9340_v8, %v8747_v62  ;;  %vm4111_vm13 = vcmp.ge.f32.partialorder %v3906_v12, 0.0 }
 0x368   : > { %5398 = vmax.xlane.f32.xlu1 %v4620_v30  ;;  %v4427_v47 = vmul.f32 0.2, %v3692_v54  ;;  %vm4171_vm6 = vcmp.ge.f32.partialorder %v3692_v54, 0.0  ;;  %v3910_v27 = vadd.f32 %v10271_v29, %v8732_v31  ;;  %v4429_v28 = vmul.f32 0.2, %v3805_v33  ;;  %v5532_v58 = vld [vmem:[#allocation4 + $0x120] sm:$0xff] }
 0x369   : > { %v4684_v59 = vsel %vm4172_vm8, %v3803_v11, %v4428_v3  ;;  %vm4173_vm15 = vcmp.ge.f32.partialorder %v3805_v33, 0.0  ;;  %v3912_v30 = vadd.f32 %v10272_v19, %v8732_v31  ;;  %v4430_v8 = vmul.f32 0.2, %v3916_v5 }
 0x36a   : > { %v5243_v21 = vpop.xlane.xlu0 %5242  ;;  %v5241_v48 = vpop.xlane.xlu1 %5240  ;;  %v4683_v39 = vsel %vm4171_vm6, %v3692_v54, %v4427_v47  ;;  %v4398_v0 = vmul.f32 0.2, %v3910_v27  ;;  %vm4142_vm2 = vcmp.ge.f32.partialorder %v3910_v27, 0.0  ;;  %vm4174_vm14 = vcmp.ge.f32.partialorder %v3916_v5, 0.0 }
 0x36b   : > { %5350 = vmax.xlane.f32.xlu0 %v4650_v9  ;;  %v4399_v1 = vmul.f32 0.2, %v3912_v30  ;;  %v10273_v9 = vld [vmem:[#allocation44_spill] sm:$0xff]  ;;  %v4686_v31 = vsel %vm4174_vm14, %v3916_v5, %v4430_v8  ;;  %vm4143_vm7 = vcmp.ge.f32.partialorder %v3912_v30, 0.0  ;;  %vm5354_vm4 = vcmask 220368  }
 0x36c   : > { %5327 = vmax.xlane.f32.xlu1 %v4681_v50  ;;  %v3918_v23 = vadd.f32 %v10273_v9, %v8747_v62  ;;  %v4654_v53 = vsel %vm4142_vm2, %v3910_v27, %v4398_v0  ;;  %vm5379_vm5 = vcmask 228568   ;;  %vm5429_vm6 = vcmask 244968  }
 0x36d   : > { %vm5454_vm8 = vcmask 253168  }
 0x36e   : > { %v5218_v41 = vpop.xlane.xlu0 %5217  ;;  %v5216_v20 = vpop.xlane.xlu1 %5215  ;;  %vm4175_vm3 = vcmp.ge.f32.partialorder %v3918_v23, 0.0 }
 0x36f   : > { %5232 = vst.msk [vmem:[#allocation3 + $0x10] sm:$0xff] %vm5229_vm1, %v5218_v41  ;;  %5231 = vst.msk [vmem:[#allocation3 + $0x8] sm:$0xff] %vm5229_vm1, %v5216_v20  ;;  %5446 = vmax.xlane.f32.xlu0 %v4590_v51  ;;  %v4431_v41 = vmul.f32 0.2, %v3918_v23  ;;  %v4655_v20 = vsel %vm4143_vm7, %v3912_v30, %v4399_v1 }
 0x370   : > { %5257 = vst.msk [vmem:[#allocation3 + $0x10] sm:$0xff] %vm5254_vm0, %v5243_v21  ;;  %5256 = vst.msk [vmem:[#allocation3 + $0x8] sm:$0xff] %vm5254_vm0, %v5241_v48  ;;  %5423 = vmax.xlane.f32.xlu1 %v4621_v40  ;;  %v4623_v21 = vsel %vm4111_vm13, %v3906_v12, %v4367_v2  ;;  %v4685_v48 = vsel %vm4173_vm15, %v3805_v33, %v4429_v28  ;;  %vm5479_vm13 = vcmask 261368  }
 0x371   : > { %v4687_v62 = vsel %vm4175_vm3, %v3918_v23, %v4431_v41 }
 0x372   : > { %v5268_v43 = vpop.xlane.xlu0 %5267  ;;  %v5266_v4 = vpop.xlane.xlu1 %5265 }
 0x373   : > { %5282 = vst.msk [vmem:[#allocation3 + $0x10] sm:$0xff] %vm5279_vm10, %v5268_v43  ;;  %5281 = vst.msk [vmem:[#allocation3 + $0x8] sm:$0xff] %vm5279_vm10, %v5266_v4  ;;  %5375 = vmax.xlane.f32.xlu0 %v4651_v61 }
 0x374   : > { %5352 = vmax.xlane.f32.xlu1 %v4682_v22  ;;  %v5529_v22 = vld [vmem:[#allocation4 + $0x108] sm:$0xff] }
 0x376   : > { %v5197_v56 = vpop.xlane.xlu0 %5196  ;;  %v5195_v35 = vpop.xlane.xlu1 %5194 }
 0x377   : > { %5209 = vst.msk [vmem:[#allocation3 + $0x20] sm:$0xff] %vm5204_vm11, %v5197_v56  ;;  %5208 = vst.msk [vmem:[#allocation3 + $0x18] sm:$0xff] %vm5204_vm11, %v5195_v35  ;;  %5471 = vmax.xlane.f32.xlu0 %v4591_v57  ;;  %v5530_v56 = vld [vmem:[#allocation4 + $0x110] sm:$0xff]  ;;  %v6332_v35 = vpack.c.bf16 %v5529_v22, %v5528_v38  ;;  %v5533_v57 = vld [vmem:[#allocation4 + $0x128] sm:$0xff] }
 0x378   : > { %5448 = vmax.xlane.f32.xlu1 %v4622_v37  ;;  %v6336_v54 = vpack.c.bf16 %v5531_v7, %v5530_v56  ;;  %v6340_v37 = vpack.c.bf16 %v5533_v57, %v5532_v58 }
 0x379   : > { %6333 = vmatprep.subr.bf16.mxu0 %v6332_v35 }
 0x37a   : > { %v5247_v14 = vpop.xlane.xlu0 %5246  ;;  %v5245_v24 = vpop.xlane.xlu1 %5244  ;;  %6335 = vmatpush3.bf16.msra.mxu0 %v6332_v35 }
 0x37b   : > { %5400 = vmax.xlane.f32.xlu0 %v4652_v42  ;;  %6337 = vmatprep.subr.bf16.mxu0 %v6336_v54 }
 0x37c   : > { %5425 = vmax.xlane.f32.xlu1 %v4653_v25 }
 0x37e   : > { %v5222_v45 = vpop.xlane.xlu0 %5221  ;;  %v5220_v6 = vpop.xlane.xlu1 %5219  ;;  %6339 = vmatpush3.bf16.msra.mxu0 %v6336_v54 }
 0x37f   : > { %5234 = vst.msk [vmem:[#allocation3 + $0x20] sm:$0xff] %vm5229_vm1, %v5222_v45  ;;  %5233 = vst.msk [vmem:[#allocation3 + $0x18] sm:$0xff] %vm5229_vm1, %v5220_v6  ;;  %5377 = vmax.xlane.f32.xlu0 %v4683_v39  ;;  %6341 = vmatprep.subr.bf16.mxu0 %v6340_v37 }
 0x380   : > { %5259 = vst.msk [vmem:[#allocation3 + $0x20] sm:$0xff] %vm5254_vm0, %v5247_v14  ;;  %5258 = vst.msk [vmem:[#allocation3 + $0x18] sm:$0xff] %vm5254_vm0, %v5245_v24  ;;  %5402 = vmax.xlane.f32.xlu1 %v4684_v59  ;;  %v5534_v14 = vld [vmem:[#allocation4 + $0x130] sm:$0xff]  ;;  %v5535_v24 = vld [vmem:[#allocation4 + $0x138] sm:$0xff] }
 0x381   : > { %v6344_v12 = vpack.c.bf16 %v5535_v24, %v5534_v14  ;;  %v5539_v14 = vld [vmem:[#allocation4 + $0x158] sm:$0xff] }
 0x382   : > { %v5272_v18 = vpop.xlane.xlu0 %5271  ;;  %v5270_v46 = vpop.xlane.xlu1 %5269  ;;  %6343 = vmatpush3.bf16.msra.mxu0 %v6340_v37  ;;  %v5538_v37 = vld [vmem:[#allocation4 + $0x150] sm:$0xff] }
 0x383   : > { %5284 = vst.msk [vmem:[#allocation3 + $0x20] sm:$0xff] %vm5279_vm10, %v5272_v18  ;;  %5283 = vst.msk [vmem:[#allocation3 + $0x18] sm:$0xff] %vm5279_vm10, %v5270_v46  ;;  %5473 = vmax.xlane.f32.xlu0 %v4623_v21  ;;  %6345 = vmatprep.subr.bf16.mxu0 %v6344_v12 }
 0x384   : > { %5427 = vmax.xlane.f32.xlu1 %v4685_v48 }
 0x386   : > { %v5274_v13 = vpop.xlane.xlu0 %5273  ;;  %v5199_v44 = vpop.xlane.xlu1 %5198  ;;  %6347 = vmatpush3.bf16.msra.mxu0 %v6344_v12 }
 0x387   : > { %5210 = vst.msk [vmem:[#allocation3 + $0x28] sm:$0xff] %vm5204_vm11, %v5199_v44  ;;  %5450 = vmax.xlane.f32.xlu0 %v4654_v53 }
 0x388   : > { %5452 = vmax.xlane.f32.xlu1 %v4686_v31 }
 0x38a   : > { %v5201_v32 = vpop.xlane.xlu0 %5200  ;;  %v5249_v50 = vpop.xlane.xlu1 %5248 }
 0x38b   : > { %5211 = vst.msk [vmem:[#allocation3 + $0x30] sm:$0xff] %vm5204_vm11, %v5201_v32  ;;  %5475 = vmax.xlane.f32.xlu0 %v4655_v20 }
 0x38e   : > { %v5251_v26 = vpop.xlane.xlu0 %5250  ;;  %v5224_v15 = vpop.xlane.xlu1 %5223 }
 0x38f   : > { %5235 = vst.msk [vmem:[#allocation3 + $0x28] sm:$0xff] %vm5229_vm1, %v5224_v15  ;;  %5477 = vmax.xlane.f32.xlu0 %v4687_v62 }
 0x390   : > { %5260 = vst.msk [vmem:[#allocation3 + $0x28] sm:$0xff] %vm5254_vm0, %v5249_v50 }
 0x391   : > { %5285 = vst.msk [vmem:[#allocation3 + $0x28] sm:$0xff] %vm5279_vm10, %v5274_v13 }
 0x392   : > { %v5289_v52 = vpop.xlane.xlu0 %5288  ;;  %v5226_v51 = vpop.xlane.xlu1 %5225 }
 0x393   : > { %5305 = vst.msk [vmem:[#allocation3] sm:$0xff] %vm5304_vm12, %v5289_v52 }
 0x394   : > { %5236 = vst.msk [vmem:[#allocation3 + $0x30] sm:$0xff] %vm5229_vm1, %v5226_v51 }
 0x395   : > { %5261 = vst.msk [vmem:[#allocation3 + $0x30] sm:$0xff] %vm5254_vm0, %v5251_v26 }
 0x396   : > { %v5339_v60 = vpop.xlane.xlu0 %5338  ;;  %v5203_v16 = vpop.xlane.xlu1 %5202 }
 0x397   : > { %5212 = vst.msk [vmem:[#allocation3 + $0x38] sm:$0xff] %vm5204_vm11, %v5203_v16  ;;  %vm5404_vm11 = vcmask 236768  }
 0x39a   : > { %v5314_v40 = vpop.xlane.xlu0 %5313  ;;  %v5291_v43 = vpop.xlane.xlu1 %5290 }
 0x39b   : > { %5330 = vst.msk [vmem:[#allocation3] sm:$0xff] %vm5329_vm9, %v5314_v40 }
 0x39c   : > { %5306 = vst.msk [vmem:[#allocation3 + $0x8] sm:$0xff] %vm5304_vm12, %v5291_v43 }
 0x39d   : > { %5355 = vst.msk [vmem:[#allocation3] sm:$0xff] %vm5354_vm4, %v5339_v60 }
 0x39e   : > { %v5364_v4 = vpop.xlane.xlu0 %5363  ;;  %v5341_v63 = vpop.xlane.xlu1 %5340 }
 0x39f   : > { %5380 = vst.msk [vmem:[#allocation3] sm:$0xff] %vm5379_vm5, %v5364_v4 }
 0x3a2   : > { %v5293_v36 = vpop.xlane.xlu0 %5292  ;;  %v5316_v10 = vpop.xlane.xlu1 %5315 }
 0x3a3   : > { %5307 = vst.msk [vmem:[#allocation3 + $0x10] sm:$0xff] %vm5304_vm12, %v5293_v36 }
 0x3a4   : > { %5331 = vst.msk [vmem:[#allocation3 + $0x8] sm:$0xff] %vm5329_vm9, %v5316_v10 }
 0x3a5   : > { %5356 = vst.msk [vmem:[#allocation3 + $0x8] sm:$0xff] %vm5354_vm4, %v5341_v63 }
 0x3a6   : > { %v5343_v61 = vpop.xlane.xlu0 %5342  ;;  %v5366_v49 = vpop.xlane.xlu1 %5365 }
 0x3a7   : > { %5381 = vst.msk [vmem:[#allocation3 + $0x8] sm:$0xff] %vm5379_vm5, %v5366_v49 }
 0x3aa   : > { %v5318_v55 = vpop.xlane.xlu0 %5317  ;;  %v5295_v11 = vpop.xlane.xlu1 %5294 }
 0x3ab   : > { %5332 = vst.msk [vmem:[#allocation3 + $0x10] sm:$0xff] %vm5329_vm9, %v5318_v55 }
 0x3ac   : > { %5357 = vst.msk [vmem:[#allocation3 + $0x10] sm:$0xff] %vm5354_vm4, %v5343_v61 }
 0x3ad   : > { %5308 = vst.msk [vmem:[#allocation3 + $0x18] sm:$0xff] %vm5304_vm12, %v5295_v11  ;;  %v5537_v11 = vld [vmem:[#allocation4 + $0x148] sm:$0xff] }
 0x3ae   : > { %v5368_v47 = vpop.xlane.xlu0 %5367  ;;  %v5345_v34 = vpop.xlane.xlu1 %5344  ;;  %v6348_v24 = vpack.c.bf16 %v5538_v37, %v5537_v11 }
 0x3af   : > { %5382 = vst.msk [vmem:[#allocation3 + $0x10] sm:$0xff] %vm5379_vm5, %v5368_v47  ;;  %v5540_v47 = vld [vmem:[#allocation4 + $0x160] sm:$0xff] }
 0x3b0   : > { %6349 = vmatprep.subr.bf16.mxu1 %v6348_v24 }
 0x3b1   : > { %6351 = vmatpush3.bf16.msra.mxu1 %v6348_v24 }
 0x3b2   : > { %v5370_v42 = vpop.xlane.xlu0 %5369  ;;  %v5320_v3 = vpop.xlane.xlu1 %5319 }
 0x3b3   : > { %5333 = vst.msk [vmem:[#allocation3 + $0x18] sm:$0xff] %vm5329_vm9, %v5320_v3  ;;  %v5541_v3 = vld [vmem:[#allocation4 + $0x168] sm:$0xff] }
 0x3b4   : > { %5358 = vst.msk [vmem:[#allocation3 + $0x18] sm:$0xff] %vm5354_vm4, %v5345_v34 }
 0x3b5   : > { %5383 = vst.msk [vmem:[#allocation3 + $0x18] sm:$0xff] %vm5379_vm5, %v5370_v42  ;;  %v6352_v42 = vpack.c.bf16 %v5540_v47, %v5539_v14 }
 0x3b6   : > { %v5297_v17 = vpop.xlane.xlu0 %5296  ;;  %v5322_v33 = vpop.xlane.xlu1 %5321 }
 0x3b7   : > { %5309 = vst.msk [vmem:[#allocation3 + $0x20] sm:$0xff] %vm5304_vm12, %v5297_v17  ;;  %v5542_v17 = vld [vmem:[#allocation4 + $0x170] sm:$0xff]  ;;  %6353 = vmatprep.subr.bf16.mxu1 %v6352_v42 }
 0x3b8   : > { %5334 = vst.msk [vmem:[#allocation3 + $0x20] sm:$0xff] %vm5329_vm9, %v5322_v33  ;;  %v6356_v33 = vpack.c.bf16 %v5542_v17, %v5541_v3  ;;  %6355 = vmatpush3.bf16.msra.mxu1 %v6352_v42 }
 0x3ba   : > { %v5347_v25 = vpop.xlane.xlu0 %5346  ;;  %v5299_v45 = vpop.xlane.xlu1 %5298  ;;  %6357 = vmatprep.subr.bf16.mxu1 %v6356_v33 }
 0x3bb   : > { %5359 = vst.msk [vmem:[#allocation3 + $0x20] sm:$0xff] %vm5354_vm4, %v5347_v25 }
 0x3bc   : > { %5310 = vst.msk [vmem:[#allocation3 + $0x28] sm:$0xff] %vm5304_vm12, %v5299_v45  ;;  %v5543_v45 = vld [vmem:[#allocation4 + $0x178] sm:$0xff]  ;;  %6359 = vmatpush3.bf16.msra.mxu1 %v6356_v33 }
 0x3be   : > { %v5389_v6 = vpop.xlane.xlu0 %5388  ;;  %v5391_v2 = vpop.xlane.xlu1 %5390 }
 0x3bf   : > { %5405 = vst.msk [vmem:[#allocation3] sm:$0xff] %vm5404_vm11, %v5389_v6  ;;  %5406 = vst.msk [vmem:[#allocation3 + $0x8] sm:$0xff] %vm5404_vm11, %v5391_v2  ;;  %v5544_v6 = vld [vmem:[#allocation4 + $0x180] sm:$0xff] }
 0x3c0   : > { %v6360_v2 = vpack.c.bf16 %v5544_v6, %v5543_v45 }
 0x3c2   : > { %v5439_v29 = vpop.xlane.xlu0 %5438  ;;  %v5441_v27 = vpop.xlane.xlu1 %5440  ;;  %6361 = vmatprep.subr.bf16.mxu1 %v6360_v2 }
 0x3c3   : > { %6363 = vmatpush3.bf16.msra.mxu1 %v6360_v2 }
 0x3c6   : > { %v5414_v39 = vpop.xlane.xlu0 %5413  ;;  %v5416_v5 = vpop.xlane.xlu1 %5415 }
 0x3c7   : > { %5430 = vst.msk [vmem:[#allocation3] sm:$0xff] %vm5429_vm6, %v5414_v39  ;;  %5431 = vst.msk [vmem:[#allocation3 + $0x8] sm:$0xff] %vm5429_vm6, %v5416_v5  ;;  %v5546_v39 = vld [vmem:[#allocation4 + $0x190] sm:$0xff] }
 0x3c8   : > { %5455 = vst.msk [vmem:[#allocation3] sm:$0xff] %vm5454_vm8, %v5439_v29  ;;  %5456 = vst.msk [vmem:[#allocation3 + $0x8] sm:$0xff] %vm5454_vm8, %v5441_v27  ;;  %v5545_v27 = vld [vmem:[#allocation4 + $0x188] sm:$0xff] }
 0x3c9   : > { %v6364_v5 = vpack.c.bf16 %v5546_v39, %v5545_v27 }
 0x3ca   : > { %v5464_v28 = vpop.xlane.xlu0 %5463  ;;  %v5228_v59 = vpop.xlane.xlu1 %5227 }
 0x3cb   : > { %5480 = vst.msk [vmem:[#allocation3] sm:$0xff] %vm5479_vm13, %v5464_v28  ;;  %6365 = vmatprep.subr.bf16.mxu1 %v6364_v5 }
 0x3cc   : > { %5237 = vst.msk [vmem:[#allocation3 + $0x38] sm:$0xff] %vm5229_vm1, %v5228_v59  ;;  %v5547_v59 = vld [vmem:[#allocation4 + $0x198] sm:$0xff]  ;;  %6367 = vmatpush3.bf16.msra.mxu1 %v6364_v5  ;;  %vm5558_vm1 = vcmask 523264  }
 0x3ce   : > { %v5466_v18 = vpop.xlane.xlu0 %5465  ;;  %v5418_v46 = vpop.xlane.xlu1 %5417 }
 0x3cf   : > { %5481 = vst.msk [vmem:[#allocation3 + $0x8] sm:$0xff] %vm5479_vm13, %v5466_v18  ;;  %v5548_v18 = vld [vmem:[#allocation4 + $0x1a0] sm:$0xff] }
 0x3d2   : > { %v5393_v0 = vpop.xlane.xlu0 %5392  ;;  %v5488_v19 = vld [vmem:[#allocation3] sm:$0xff]  ;;  %v5395_v30 = vpop.xlane.xlu1 %5394 }
 0x3d3   : > { %5407 = vst.msk [vmem:[#allocation3 + $0x10] sm:$0xff] %vm5404_vm11, %v5393_v0  ;;  %5496 = vxpose.xlu1.b32.start [1/8] (short) (narrow) %v5488_v19, 32  ;;  %5408 = vst.msk [vmem:[#allocation3 + $0x18] sm:$0xff] %vm5404_vm11, %v5395_v30 }
 0x3d4   : > { %5432 = vst.msk [vmem:[#allocation3 + $0x10] sm:$0xff] %vm5429_vm6, %v5418_v46  ;;  %v6368_v46 = vpack.c.bf16 %v5548_v18, %v5547_v59 }
 0x3d6   : > { %v5443_v21 = vpop.xlane.xlu0 %5442  ;;  %v5489_v8 = vld [vmem:[#allocation3 + $0x8] sm:$0xff]  ;;  %v5324_v48 = vpop.xlane.xlu1 %5323  ;;  %6369 = vmatprep.subr.bf16.mxu1 %v6368_v46 }
 0x3d7   : > { %5457 = vst.msk [vmem:[#allocation3 + $0x10] sm:$0xff] %vm5454_vm8, %v5443_v21  ;;  %5497 = vxpose.xlu1.b32.cont [2/8] (short) (narrow) %v5489_v8, 32  ;;  %6371 = vmatpush3.bf16.msra.mxu1 %v6368_v46  ;;  %v5549_v8 = vld [vmem:[#allocation4 + $0x1a8] sm:$0xff] }
 0x3d8   : > { %5335 = vst.msk [vmem:[#allocation3 + $0x28] sm:$0xff] %vm5329_vm9, %v5324_v48  ;;  %v5550_v48 = vld [vmem:[#allocation4 + $0x1b0] sm:$0xff] }
 0x3da   : > { %v5276_v13 = vpop.xlane.xlu0 %5275  ;;  %v5420_v44 = vpop.xlane.xlu1 %5419 }
 0x3db   : > { %5286 = vst.msk [vmem:[#allocation3 + $0x30] sm:$0xff] %vm5279_vm10, %v5276_v13  ;;  %v5551_v13 = vld [vmem:[#allocation4 + $0x1b8] sm:$0xff] }
 0x3dc   : > { %5433 = vst.msk [vmem:[#allocation3 + $0x18] sm:$0xff] %vm5429_vm6, %v5420_v44  ;;  %v6372_v44 = vpack.c.bf16 %v5550_v48, %v5549_v8 }
 0x3de   : > { %v5372_v1 = vpop.xlane.xlu0 %5371  ;;  %v5253_v9 = vpop.xlane.xlu1 %5252  ;;  %6373 = vmatprep.subr.bf16.mxu1 %v6372_v44 }
 0x3df   : > { %5384 = vst.msk [vmem:[#allocation3 + $0x20] sm:$0xff] %vm5379_vm5, %v5372_v1  ;;  %v5552_v1 = vld [vmem:[#allocation4 + $0x1c0] sm:$0xff]  ;;  %6375 = vmatpush3.bf16.msra.mxu1 %v6372_v44 }
 0x3e0   : > { %5262 = vst.msk [vmem:[#allocation3 + $0x38] sm:$0xff] %vm5254_vm0, %v5253_v9  ;;  %v6376_v9 = vpack.c.bf16 %v5552_v1, %v5551_v13  ;;  %v6622_v13 = vmov 0.03  }
 0x3e2   : > { %v5468_v23 = vpop.xlane.xlu0 %5467  ;;  %v5349_v53 = vpop.xlane.xlu1 %5348  ;;  %6377 = vmatprep.subr.bf16.mxu1 %v6376_v9 }
 0x3e3   : > { %5482 = vst.msk [vmem:[#allocation3 + $0x10] sm:$0xff] %vm5479_vm13, %v5468_v23  ;;  %6379 = vmatpush3.bf16.msra.mxu1 %v6376_v9  ;;  %v6096_v23 = vld [vmem:[#allocation4 + $0x140] ss:$0 sm:$0xff] }
 0x3e4   : > { %5360 = vst.msk [vmem:[#allocation3 + $0x28] sm:$0xff] %vm5354_vm4, %v5349_v53 }
 0x3e6   : > { %v5301_v31 = vpop.xlane.xlu0 %5300  ;;  %v5445_v32 = vpop.xlane.xlu1 %5444 }
 0x3e7   : > { %5311 = vst.msk [vmem:[#allocation3 + $0x30] sm:$0xff] %vm5304_vm12, %v5301_v31 }
 0x3e8   : > { %5458 = vst.msk [vmem:[#allocation3 + $0x18] sm:$0xff] %vm5454_vm8, %v5445_v32 }
 0x3ea   : > { %v5397_v50 = vpop.xlane.xlu0 %5396  ;;  %v5490_v41 = vld [vmem:[#allocation3 + $0x10] sm:$0xff]  ;;  %v5326_v20 = vpop.xlane.xlu1 %5325 }
 0x3eb   : > { %5409 = vst.msk [vmem:[#allocation3 + $0x20] sm:$0xff] %vm5404_vm11, %v5397_v50  ;;  %5498 = vxpose.xlu1.b32.cont [3/8] (short) (narrow) %v5490_v41, 32 }
 0x3ec   : > { %5336 = vst.msk [vmem:[#allocation3 + $0x30] sm:$0xff] %vm5329_vm9, %v5326_v20 }
 0x3ee   : > { %v5278_v26 = vpop.xlane.xlu0 %5277  ;;  %v5422_v15 = vpop.xlane.xlu1 %5421 }
 0x3ef   : > { %5287 = vst.msk [vmem:[#allocation3 + $0x38] sm:$0xff] %vm5279_vm10, %v5278_v26 }
 0x3f0   : > { %5434 = vst.msk [vmem:[#allocation3 + $0x20] sm:$0xff] %vm5429_vm6, %v5422_v15 }
 0x3f2   : > { %v5374_v62 = vpop.xlane.xlu0 %5373  ;;  %v5303_v52 = vpop.xlane.xlu1 %5302 }
 0x3f3   : > { %5385 = vst.msk [vmem:[#allocation3 + $0x28] sm:$0xff] %vm5379_vm5, %v5374_v62 }
 0x3f4   : > { %5312 = vst.msk [vmem:[#allocation3 + $0x38] sm:$0xff] %vm5304_vm12, %v5303_v52 }
 0x3f6   : > { %v5470_v51 = vpop.xlane.xlu0 %5469  ;;  %v5399_v60 = vpop.xlane.xlu1 %5398 }
 0x3f7   : > { %5483 = vst.msk [vmem:[#allocation3 + $0x18] sm:$0xff] %vm5479_vm13, %v5470_v51 }
 0x3f8   : > { %5410 = vst.msk [vmem:[#allocation3 + $0x28] sm:$0xff] %vm5404_vm11, %v5399_v60 }
 0x3fa   : > { %v5351_v16 = vpop.xlane.xlu0 %5350  ;;  %v5328_v40 = vpop.xlane.xlu1 %5327 }
 0x3fb   : > { %5361 = vst.msk [vmem:[#allocation3 + $0x30] sm:$0xff] %vm5354_vm4, %v5351_v16 }
 0x3fc   : > { %5337 = vst.msk [vmem:[#allocation3 + $0x38] sm:$0xff] %vm5329_vm9, %v5328_v40 }
 0x3fe   : > { %v5447_v43 = vpop.xlane.xlu0 %5446  ;;  %v5491_v4 = vld [vmem:[#allocation3 + $0x18] sm:$0xff]  ;;  %v5424_v63 = vpop.xlane.xlu1 %5423 }
 0x3ff   : > { %5459 = vst.msk [vmem:[#allocation3 + $0x20] sm:$0xff] %vm5454_vm8, %v5447_v43  ;;  %5499 = vxpose.xlu1.b32.cont [4/8] (short) (narrow) %v5491_v4, 32 }
 0x400   : > { %5435 = vst.msk [vmem:[#allocation3 + $0x28] sm:$0xff] %vm5429_vm6, %v5424_v63  ;;  %v10274_v63 = vlaneseq }
 0x402   : > { %v5376_v36 = vpop.xlane.xlu0 %5375  ;;  %v5353_v10 = vpop.xlane.xlu1 %5352 }
 0x403   : > { %5386 = vst.msk [vmem:[#allocation3 + $0x30] sm:$0xff] %vm5379_vm5, %v5376_v36  ;;  %v9800_v36 = vand.u32 127, %v10274_v63 }
 0x404   : > { %5362 = vst.msk [vmem:[#allocation3 + $0x38] sm:$0xff] %vm5354_vm4, %v5353_v10  ;;  %v6101_v10 = vld [vmem:[#allocation4 + $0x1c8] ss:$0 sm:$0xff] }
 0x405   : > { %vm5759_vm14 = vcmp.ge.s32.totalorder %v9800_v36, 3  ;;  %vm5760_vm7 = vcmp.lt.s32.totalorder %v9800_v36, 7  ;;  %vm5818_vm12 = vcmp.ge.s32.totalorder %v9800_v36, 10  ;;  %vm5821_vm9 = vcmp.ge.s32.totalorder %v9800_v36, 7 }
 0x406   : > { %v5472_v61 = vpop.xlane.xlu0 %5471  ;;  %v5449_v49 = vpop.xlane.xlu1 %5448  ;;  %vm9808_vm3 = vmand %vm5759_vm14, %vm5760_vm7  ;;  %vm5822_vm4 = vcmp.lt.s32.totalorder %v9800_v36, 12  ;;  %v5820_v44 = vsel %vm5818_vm12, 0.2, %v6622_v13 }
 0x407   : > { %5484 = vst.msk [vmem:[#allocation3 + $0x20] sm:$0xff] %vm5479_vm13, %v5472_v61 }
 0x408   : > { %5460 = vst.msk [vmem:[#allocation3 + $0x28] sm:$0xff] %vm5454_vm8, %v5449_v49 }
 0x40a   : > { %v5401_v38 = vpop.xlane.xlu0 %5400  ;;  %v5426_v22 = vpop.xlane.xlu1 %5425 }
 0x40b   : > { %5411 = vst.msk [vmem:[#allocation3 + $0x30] sm:$0xff] %vm5404_vm11, %v5401_v38 }
 0x40c   : > { %5436 = vst.msk [vmem:[#allocation3 + $0x30] sm:$0xff] %vm5429_vm6, %v5426_v22 }
 0x40e   : > { %v5378_v56 = vpop.xlane.xlu0 %5377  ;;  %v5492_v35 = vld [vmem:[#allocation3 + $0x20] sm:$0xff]  ;;  %v5403_v7 = vpop.xlane.xlu1 %5402 }
 0x40f   : > { %5387 = vst.msk [vmem:[#allocation3 + $0x38] sm:$0xff] %vm5379_vm5, %v5378_v56  ;;  %5500 = vxpose.xlu1.b32.cont [5/8] (short) (narrow) %v5492_v35, 32  ;;  %vm9846_vm5 = vmand %vm5821_vm9, %vm5822_vm4 }
 0x410   : > { %5412 = vst.msk [vmem:[#allocation3 + $0x38] sm:$0xff] %vm5404_vm11, %v5403_v7 }
 0x412   : > { %v5474_v54 = vpop.xlane.xlu0 %5473  ;;  %v5428_v58 = vpop.xlane.xlu1 %5427 }
 0x413   : > { %5485 = vst.msk [vmem:[#allocation3 + $0x28] sm:$0xff] %vm5479_vm13, %v5474_v54 }
 0x414   : > { %5437 = vst.msk [vmem:[#allocation3 + $0x38] sm:$0xff] %vm5429_vm6, %v5428_v58 }
 0x416   : > { %v5451_v57 = vpop.xlane.xlu0 %5450  ;;  %v5453_v55 = vpop.xlane.xlu1 %5452 }
 0x417   : > { %5461 = vst.msk [vmem:[#allocation3 + $0x30] sm:$0xff] %vm5454_vm8, %v5451_v57  ;;  %5462 = vst.msk [vmem:[#allocation3 + $0x38] sm:$0xff] %vm5454_vm8, %v5453_v55 }
 0x41a   : > { %v5476_v34 = vpop.xlane.xlu0 %5475  ;;  %v5493_v12 = vld [vmem:[#allocation3 + $0x28] sm:$0xff] }
 0x41b   : > { %5486 = vst.msk [vmem:[#allocation3 + $0x30] sm:$0xff] %vm5479_vm13, %v5476_v34  ;;  %5501 = vxpose.xlu1.b32.cont [6/8] (short) (narrow) %v5493_v12, 32 }
 0x41e   : > { %v5478_v25 = vpop.xlane.xlu0 %5477 }
 0x41f   : > { %5487 = vst.msk [vmem:[#allocation3 + $0x38] sm:$0xff] %vm5479_vm13, %v5478_v25 }
 0x422   : > { %v5494_v29 = vld [vmem:[#allocation3 + $0x30] sm:$0xff] }
 0x423   : > { %5502 = vxpose.xlu1.b32.cont [7/8] (short) (narrow) %v5494_v29, 32 }
 0x426   : > { %v5495_v28 = vld [vmem:[#allocation3 + $0x38] sm:$0xff] }
 0x427   : > { %5503 = vxpose.xlu1.b32.end [8/8] (short) (narrow) %v5495_v28, 32 }
 0x48b   : > { %v5512_v0 = vpop.trf.xlu1 }
 0x48c   : > { %6160 = vmatprep.mubr.msk.f32.mxu0 %vm5558_vm1, %v5512_v0  ;;  %v6621_v0 = vmov 0.5  }
 0x48f   : > { %v5513_v19 = vpop.trf.xlu1 }
 0x490   : > { %6161 = vmatmul.mubr.msk.f32.vlgmr.msra.gmra.mrb[128].mxu0 %vm5558_vm1, %v5513_v19  ;;  %v5819_v19 = vsel %vm5818_vm12, 1.5, %v6621_v0 }
 0x493   : > { %v5514_v30 = vpop.trf.xlu1 }
 0x494   : > { %6163 = vmatprep.mubr.msk.f32.mxu0 %vm5558_vm1, %v5514_v30 }
 0x497   : > { %v5515_v21 = vpop.trf.xlu1 }
 0x498   : > { %6164 = vmatmul.mubr.msk.f32.gmra.mrb[130].mxu0 %vm5558_vm1, %v5515_v21 }
 0x563   : > { %v6162_v53 = vpop.f32.mrb[128].mxu0 }
 0x564   : > { %v5643_v31 = vadd.f32 %v6162_v53, %v6096_v23  ;;  %v5637_v32 = vpop.f32.mrb[129].mxu0 }
 0x565   : > { %v5638_v50 = vadd.f32 %v6096_v23, %v5637_v32 }
 0x566   : > { %v5661_v41 = vmul.f32 0.2, %v5643_v31  ;;  %vm5657_vm0 = vcmp.ge.f32.partialorder %v5643_v31, 0.0 }
 0x567   : > { %v5660_v20 = vmul.f32 0.2, %v5638_v50  ;;  %vm5656_vm10 = vcmp.ge.f32.partialorder %v5638_v50, 0.0 }
 0x568   : > { %v5665_v15 = vsel %vm5657_vm0, %v5643_v31, %v5661_v41 }
 0x569   : > { %v5664_v26 = vsel %vm5656_vm10, %v5638_v50, %v5660_v20 }
 0x56a   : > { %6198 = vmatprep.mubr.f32.mxu1 %v5664_v26 }
 0x56b   : > { %v6165_v62 = vpop.f32.mrb[130].mxu0  ;;  %6199 = vmatmul.mubr.f32.vlgmr.msra.gmra.mrb[128].mxu1 %v5665_v15 }
 0x56c   : > { %v5653_v52 = vadd.f32 %v6165_v62, %v6096_v23  ;;  %v5647_v51 = vpop.f32.mrb[131].mxu0 }
 0x56d   : > { %v5648_v60 = vadd.f32 %v6096_v23, %v5647_v51 }
 0x56e   : > { %v5663_v16 = vmul.f32 0.2, %v5653_v52  ;;  %vm5659_vm2 = vcmp.ge.f32.partialorder %v5653_v52, 0.0 }
 0x56f   : > { %v5662_v40 = vmul.f32 0.2, %v5648_v60  ;;  %vm5658_vm15 = vcmp.ge.f32.partialorder %v5648_v60, 0.0 }
 0x570   : > { %v5667_v4 = vsel %vm5659_vm2, %v5653_v52, %v5663_v16 }
 0x571   : > { %v5666_v43 = vsel %vm5658_vm15, %v5648_v60, %v5662_v40 }
 0x572   : > { %6201 = vmatprep.mubr.f32.mxu1 %v5666_v43 }
 0x573   : > { %6202 = vmatmul.mubr.f32.gmra.mrb[130].mxu1 %v5667_v4 }
 0x63e   : > { %v6200_v61 = vpop.f32.mrb[128].mxu1 }
 0x63f   : > { %v9804_v49 = vadd.f32 %v6200_v61, %v6101_v10  ;;  %v5738_v38 = vpop.f32.mrb[129].mxu1 }
 0x640   : > { %v9806_v22 = vadd.f32 %v6101_v10, %v5738_v38 }
 0x641   : > { %v5763_v35 = vmul.f32 %v9804_v49, %v9804_v49  ;;  %v6103_v12 = vmul.f32 -1.442695, %v9804_v49 }
 0x642   : > { %v5762_v54 = vmul.f32 %v9806_v22, %v9806_v22  ;;  %v6102_v42 = vmul.f32 -1.442695, %v9806_v22 }
 0x643   : > { %v5767_v7 = vsel %vm9808_vm3, %v5763_v35, 0.0  ;;  %6440 = vpow2.f32 %v6103_v12 }
 0x644   : > { %5772 = vadd.xlane.f32.xlu0 %v5767_v7  ;;  %v5766_v55 = vsel %vm9808_vm3, %v5762_v54, 0.0  ;;  %6442 = vpow2.f32 %v6102_v42 }
 0x646   : > { %v6203_v58 = vpop.f32.mrb[130].mxu1 }
 0x647   : > { %v5748_v57 = vpop.f32.mrb[131].mxu1  ;;  %v9820_v11 = vadd.f32 %v6203_v58, %v6101_v10 }
 0x648   : > { %v9822_v37 = vadd.f32 %v6101_v10, %v5748_v57  ;;  %5770 = vadd.xlane.f32.xlu0 %v5766_v55 }
 0x649   : > { %v5765_v47 = vmul.f32 %v9820_v11, %v9820_v11  ;;  %v6105_v17 = vmul.f32 -1.442695, %v9820_v11 }
 0x64a   : > { %v5764_v14 = vmul.f32 %v9822_v37, %v9822_v37  ;;  %v6104_v3 = vmul.f32 -1.442695, %v9822_v37 }
 0x64b   : > { %v5769_v34 = vsel %vm9808_vm3, %v5765_v47, 0.0 }
 0x64c   : > { %v5768_v24 = vsel %vm9808_vm3, %v5764_v14, 0.0  ;;  %6444 = vpow2.f32 %v6104_v3 }
 0x64d   : > { %5774 = vadd.xlane.f32.xlu0 %v5768_v24  ;;  %v6441_v33 = vpop.eup %6440  ;;  %6446 = vpow2.f32 %v6105_v17 }
 0x64e   : > { %v5807_v25 = vadd.f32 1.0, %v6441_v33  ;;  %v6443_v45 = vpop.eup %6442 }
 0x64f   : > { %v5806_v6 = vadd.f32 1.0, %v6443_v45 }
 0x650   : > { %6448 = vrcp.f32 %v5807_v25 }
 0x651   : > { %5776 = vadd.xlane.f32.xlu0 %v5769_v34  ;;  %6450 = vrcp.f32 %v5806_v6 }
 0x656   : > { %v6445_v2 = vpop.eup %6444 }
 0x657   : > { %v5808_v39 = vadd.f32 1.0, %v6445_v2  ;;  %v6447_v5 = vpop.eup %6446 }
 0x658   : > { %v5809_v18 = vadd.f32 1.0, %v6447_v5 }
 0x65a   : > { %v6449_v46 = vpop.eup %6448 }
 0x65b   : > { %v5825_v8 = vmul.f32 %v6449_v46, %v5819_v19  ;;  %v6451_v48 = vpop.eup %6450 }
 0x65c   : > { %v5824_v32 = vmul.f32 %v6451_v48, %v5819_v19 }
 0x65d   : > { %v5829_v50 = vadd.f32 %v5825_v8, %v5820_v44 }
 0x65e   : > { %v5828_v52 = vadd.f32 %v5824_v32, %v5820_v44 }
 0x6d1   : > { %v5773_v29 = vpop.xlane.xlu0 %5772 }
 0x6d2   : > { %v5779_v27 = vmax.f32 %v5773_v29, 1e-24 }
 0x6d4   : > { %6452 = vrsqrt.f32 %v5779_v27 }
 0x6d5   : > { %v5771_v28 = vpop.xlane.xlu0 %5770  ;;  %6454 = vrcp.f32 %v5808_v39 }
 0x6d6   : > { %v5778_v59 = vmax.f32 %v5771_v28, 1e-24 }
 0x6d8   : > { %6456 = vrsqrt.f32 %v5778_v59 }
 0x6d9   : > { %6458 = vrcp.f32 %v5809_v18 }
 0x6da   : > { %v5775_v30 = vpop.xlane.xlu0 %5774 }
 0x6db   : > { %v5780_v21 = vmax.f32 %v5775_v30, 1e-24 }
 0x6dd   : > { %6460 = vrsqrt.f32 %v5780_v21 }
 0x6de   : > { %v6453_v1 = vpop.eup %6452  ;;  %v5777_v9 = vpop.xlane.xlu0 %5776 }
 0x6df   : > { %v5787_v53 = vmul.f32 %v6453_v1, %v9804_v49  ;;  %v5781_v31 = vmax.f32 %v5777_v9, 1e-24  ;;  %v6455_v41 = vpop.eup %6454 }
 0x6e0   : > { %v5826_v51 = vmul.f32 %v6455_v41, %v5819_v19 }
 0x6e1   : > { %v5791_v20 = vsel %vm9808_vm3, %v5787_v53, %v9804_v49  ;;  %6462 = vrsqrt.f32 %v5781_v31 }
 0x6e2   : > { %v6457_v26 = vpop.eup %6456  ;;  %v5833_v15 = vsel %vm9846_vm5, %v5829_v50, %v5791_v20  ;;  %v5830_v36 = vadd.f32 %v5826_v51, %v5820_v44 }
 0x6e3   : > { %5837 = vst [vmem:[%s152_s25 + $0x8] sm:$0xff] %v5833_v15  ;;  %v5786_v62 = vmul.f32 %v6457_v26, %v9806_v22  ;;  %v6459_v16 = vpop.eup %6458 }
 0x6e4   : > { %v5827_v63 = vmul.f32 %v6459_v16, %v5819_v19 }
 0x6e5   : > { %v5790_v60 = vsel %vm9808_vm3, %v5786_v62, %v9806_v22 }
 0x6e6   : > { %v5832_v40 = vsel %vm9846_vm5, %v5828_v52, %v5790_v60  ;;  %v5831_v22 = vadd.f32 %v5827_v63, %v5820_v44 }
 0x6e7   : > { %v6461_v43 = vpop.eup %6460  ;;  %5836 = vst [vmem:[%s152_s25] sm:$0xff] %v5832_v40 }
 0x6e8   : > { %v5788_v4 = vmul.f32 %v6461_v43, %v9822_v37 }
 0x6ea   : > { %v5792_v10 = vsel %vm9808_vm3, %v5788_v4, %v9822_v37 }
 0x6eb   : > { %v6463_v61 = vpop.eup %6462  ;;  %v5834_v49 = vsel %vm9846_vm5, %v5830_v36, %v5792_v10 }
 0x6ec   : > { %5838 = vst [vmem:[%s152_s25 + $0x10] sm:$0xff] %v5834_v49  ;;  %v5789_v38 = vmul.f32 %v6463_v61, %v9820_v11 }
 0x6ee   : > { %v5793_v35 = vsel %vm9808_vm3, %v5789_v38, %v9820_v11 }
 0x6ef   : > { %v5835_v7 = vsel %vm9846_vm5, %v5831_v22, %v5793_v35 }
 0x6f0   : > { %5839 = vst [vmem:[%s152_s25 + $0x18] sm:$0xff] %v5835_v7 }
 0x6f1   : > { %6561 = shalt.err (!%p6558_p7)
}
 0x6f2   : > { %s6562_s7 = scalar_lea.hbm %s9873_s30, 512  ;;  %s6566_s16 = scalar_lea.hbm %s9927_s2, 1024 }
 0x6f3   : > { %p6563_p8 = scmp.ne.s32.totalorder %s9873_s30, %s6562_s7  ;;  %p6567_p1 = scmp.lt.u32.totalorder %s9873_s30, %s9927_s2 }
 0x6f4   : > { %p6568_p0 = scmp.lt.u32.totalorder %s6566_s16, %s6562_s7  ;;  %p6570_p6 = scmp.lt.u32.totalorder %s6562_s7, %s9873_s30 }
 0x6f5   : > { %p6564_p11 = pnand %p6563_p8, %p10279_p9 }
 0x6f6   : > { %p6569_p5 = por %p6568_p0, %p6567_p1 }
 0x6f7   : > { %p6565_p13 = pneg %p6564_p11 }
 0x6f8   : > { %p6571_p10 = por %p6570_p6, %p6569_p5 }
 0x6fa   : > { %p6572_p12 = pnand %p6571_p10, %p6565_p13 }
 0x6fc   : > { %6575 = shalt.err (!%p6572_p12)
}
 0x6fd   : > { %s6624_s22 = smov 128   ;;  %s6625_s23 = smov 8  }
 0x6fe   : > { %6384 = dma.vmem_to_hbm [thread:$0]  (%p10279_p9), %s9875_s27, 512, %s9873_s30, %s9884_s13, %s6624_s22, %s6624_s22, %s6625_s23  }
 0x6ff PF: > { %p6396_p2 = scmp.ge.s32.totalorder %s6614_s12, 2  ;;  %s5869_s24 = sand.u32 1, %s6602_s9  }
 0x700   : > { %p10280_p3 = scmp.ne.s32.totalorder %s9939_s20, 0  ;;  %s5870_s25 = scalar_lea.sflag [#allocation6], %s5869_s24 }
 0x702   : > { %p6391_p4 = pnand %p6396_p2, %p10280_p3 }
 0x704   : > { %6597 = dma.done.wait (!%p6391_p4), %s5870_s25, 512  }
 0x705   : > { %6599 = vsyncadd (!%p6391_p4), %s5870_s25, 4294966784  ;;  %p13_p7 = scmp.ge.s32.totalorder %s6666_s15, 4   ;;  %s10281_s9 = smov %s6606_s10 }
 0x706   : > { %s10282_s10 = smov %s6610_s11  ;;  %s10283_s11 = smov %s6677_s18 }
 0x707   : > { %s10284_s12 = smov %s6666_s15  ;;  %15 = sbr.rel (!%p13_p7) target bundleno = 4 (0x4), region = 99 }
 0x70e   :  { %5875 = vsyncpa [#allocation5], 1 }
 0x70f   :  { %5877 = vsyncpa [#allocation5 + $0x1], 1 }
 0x710   :  { %5878 = vsyncpa [#allocation6], 1 }
 0x711   :  { %5880 = vsyncpa [#allocation6 + $0x1], 1 }

</bundles_post_ra>
